<compile_context>
chip_gen: v7x
topology: tpu7x:2x2x1
jax: 0.10.0
libtpu: 0.0.40
codegen_flags: <defaults>
</compile_context>

<pallas_src>
import jax
import jax.numpy as jnp
from jax import lax
from jax.experimental import pallas as pl
from jax.experimental.pallas import tpu as pltpu


_NEG_BIG = -1e30  # bias for padded classifier columns -> softmax prob == 0


def _round_up(x, m):
    return ((x + m - 1) // m) * m


# ---------------------------------------------------------------------------
# Shared helpers (traced inside the kernels)
# ---------------------------------------------------------------------------
def _lstm_recurrence(seq_ref, gx, whh, Nt, H, L):
    """Serial recurrence over L timesteps; overwrites seq_ref[t] with h_t.

    gx : (L*Nt, 4H) hoisted input projection + fused bias, gate order (i,f,o,g).
         The i/f/o columns of gx and whh were pre-scaled by 0.5 at pack time,
         so sigmoid(z) == 0.5*tanh(scaled_z) + 0.5 (single EUP push per gate).
    whh: (H, 4H) recurrent weights (same pre-scaling).
    Returns the final (h, c).
    """

    def one_step(h, c, gx_t):
        g = gx_t + jnp.dot(h, whh, preferred_element_type=jnp.float32)  # (Nt,4H)
        t = jnp.tanh(g)
        sig = 0.5 * t[:, :3 * H] + 0.5          # i, f, o in one contiguous slab
        i_g = sig[:, :H]
        f_g = sig[:, H:2 * H]
        o_g = sig[:, 2 * H:3 * H]
        g_g = t[:, 3 * H:]                      # candidate (plain tanh)
        c = f_g * c + i_g * g_g
        h = o_g * jnp.tanh(c)
        return h, c

    h0 = jnp.zeros((Nt, H), jnp.float32)
    c0 = jnp.zeros((Nt, H), jnp.float32)

    if L <= 16:
        # Small static L: full unroll for LLO scheduling visibility.
        h, c = h0, c0
        for t in range(L):
            h, c = one_step(h, c, gx[t * Nt:(t + 1) * Nt, :])
            # Dp == H, so h_t is exactly the next layer's input at time t.
            seq_ref[t] = h
        return h, c

    # Large L: partial unroll keeps live ranges bounded (no spill-bound blowup).
    gx3 = gx.reshape(L, Nt, 4 * H)

    def body(t, carry):
        h, c = carry
        gx_t = lax.dynamic_index_in_dim(gx3, t, axis=0, keepdims=False)
        h, c = one_step(h, c, gx_t)
        seq_ref[t] = h
        return (h, c)

    return lax.fori_loop(0, L, body, (h0, c0), unroll=2)


def _classifier(h, wc, bc):
    """Linear + numerically-stable softmax (padded columns carry -1e30 bias)."""
    logits = jnp.dot(h, wc, preferred_element_type=jnp.float32) + bc
    m = jnp.max(logits, axis=-1, keepdims=True)
    e = jnp.exp(logits - m)
    return e / jnp.sum(e, axis=-1, keepdims=True)


# ---------------------------------------------------------------------------
# Kernel A (primary): all layers' weights VMEM-resident, grid = (batch_tiles,)
# ---------------------------------------------------------------------------
def _lstm_resident_kernel(x_ref, wih_ref, whh_ref, b_ref, wc_ref, bc_ref,
                          out_ref, seq_ref):
    # x_ref   : (L, Nt, H)     time-major, zero-padded layer-0 input (Dp == H)
    # wih_ref : (NL, H, 4H)    fused input->gate weights, all layers resident
    # whh_ref : (NL, H, 4H)    fused hidden->gate weights
    # b_ref   : (NL, 1, 4H)    fused biases (b_ih + b_hh)
    # wc_ref  : (H, Op)        classifier weight (pre-transposed, lane-padded)
    # bc_ref  : (1, Op)        classifier bias (padded cols = -1e30)
    # out_ref : (Nt, Op)       softmax probabilities
    # seq_ref : (L, Nt, H)     scratch: layer input, overwritten with its output
    L, Nt, H = seq_ref.shape
    NL = wih_ref.shape[0]

    seq_ref[...] = x_ref[...]

    def layer_body(k, h_prev):
        del h_prev
        wih = wih_ref[k]                       # (H, 4H)
        whh = whh_ref[k]                       # (H, 4H)
        b = b_ref[k]                           # (1, 4H)
        # Hoisted input projection: one big MXU matmul for all L timesteps.
        seq2d = seq_ref[...].reshape(L * Nt, H)
        gx = jnp.dot(seq2d, wih, preferred_element_type=jnp.float32) + b
        h, _ = _lstm_recurrence(seq_ref, gx, whh, Nt, H, L)
        return h

    if NL <= 8:
        h_last = jnp.zeros((Nt, H), jnp.float32)
        for k in range(NL):                    # small static layer count: unroll
            h_last = layer_body(k, h_last)
    else:
        h_last = lax.fori_loop(0, NL, layer_body,
                               jnp.zeros((Nt, H), jnp.float32))

    out_ref[...] = _classifier(h_last, wc_ref[...], bc_ref[...]).astype(out_ref.dtype)


# ---------------------------------------------------------------------------
# Kernel B (fallback for large H): per-layer weight streaming on a grid axis
# ---------------------------------------------------------------------------
def _lstm_streaming_kernel(x_ref, wih_ref, whh_ref, b_ref, wc_ref, bc_ref,
                           out_ref, seq_ref):
    # Grid: (batch_tiles, NL); layer axis is sequential ("arbitrary").
    layer = pl.program_id(1)
    num_layers = pl.num_programs(1)
    L, Nt, H = seq_ref.shape

    @pl.when(layer == 0)
    def _():
        seq_ref[...] = x_ref[...]

    wih = wih_ref[0]                           # (H, 4H)
    whh = whh_ref[0]                           # (H, 4H)
    b = b_ref[0]                               # (1, 4H)

    seq2d = seq_ref[...].reshape(L * Nt, H)
    gx = jnp.dot(seq2d, wih, preferred_element_type=jnp.float32) + b
    h, _ = _lstm_recurrence(seq_ref, gx, whh, Nt, H, L)

    @pl.when(layer == num_layers - 1)
    def _():
        out_ref[...] = _classifier(h, wc_ref[...], bc_ref[...]).astype(out_ref.dtype)


# ---------------------------------------------------------------------------
# Wrapper: parameter packing (glue) + pallas_call
# ---------------------------------------------------------------------------
def _pick_batch_tile(N, L, H, weight_bytes, budget_bytes):
    """Largest MXU-friendly batch tile whose fp32 working set fits the budget."""
    n_aligned = _round_up(max(N, 1), 8)
    for cand in (256, 128, 64, 32, 16, 8):
        if cand > n_aligned:
            continue
        # x (double-buffered) + seq scratch + hoisted gate projection + temps.
        act_bytes = 4 * cand * (3 * L * H + 4 * L * H + 32 * H)
        if weight_bytes + act_bytes <= budget_bytes:
            return cand
    return 8


def baseline_lstm_pallas(x, params, hidden_size, output_size, *,
                         force_streaming=False):
    """x: (N, L, D) batch-first, like the PyTorch module."""
    N, L, D = x.shape
    H = hidden_size
    NL = H  # num_layers = hidden_size (reproducing the module's constructor)
    O = output_size
    assert D <= H, "this packing assumes input_size <= hidden_size (Dp == H)"
    # TODO(synk): support D > H by widening the layer-0 sequence buffer only.
    Dp = H

    # --- fused per-layer weights, gate order (i, f, o, g) -----------------
    # The 0.5 pre-scale of the sigmoid gates (i, f, o) is folded in here so the
    # kernel can use sigmoid(z) = 0.5*tanh(0.5*z) + 0.5 with a single tanh.
    perm = jnp.array([0, 1, 3, 2])  # PyTorch order is (i, f, g, o)
    col_scale = jnp.concatenate(
        [jnp.full((3 * H,), 0.5, jnp.float32), jnp.ones((H,), jnp.float32)])
    wih_stack, whh_stack, b_stack = [], [], []
    for k in range(NL):
        w_ih, w_hh, b_ih, b_hh = params["layers"][k]  # PyTorch shapes
        in_k = w_ih.shape[1]
        wih_k = w_ih.reshape(4, H, in_k)[perm].transpose(2, 0, 1).reshape(in_k, 4 * H)
        wih_k = jnp.pad(wih_k, ((0, Dp - in_k), (0, 0)))                  # (Dp, 4H)
        whh_k = w_hh.reshape(4, H, H)[perm].transpose(2, 0, 1).reshape(H, 4 * H)
        b_k = (b_ih + b_hh).reshape(4, H)[perm].reshape(1, 4 * H)
        wih_stack.append(wih_k)
        whh_stack.append(whh_k)
        b_stack.append(b_k)
    wih = jnp.stack(wih_stack).astype(jnp.float32) * col_scale   # (NL, Dp, 4H)
    whh = jnp.stack(whh_stack).astype(jnp.float32) * col_scale   # (NL, H, 4H)
    bias = jnp.stack(b_stack).astype(jnp.float32) * col_scale    # (NL, 1, 4H)

    # --- classifier, lane-padded to a multiple of 128 ---------------------
    Op = _round_up(max(O, 1), 128)
    wc = jnp.pad(params["w_cls"].T.astype(jnp.float32), ((0, 0), (0, Op - O)))
    bc = jnp.pad(params["b_cls"].astype(jnp.float32).reshape(1, O),
                 ((0, 0), (0, Op - O)), constant_values=_NEG_BIG)

    # --- residency decision & batch tile ----------------------------------
    weight_bytes_total = 4 * (wih.size + whh.size + bias.size + wc.size + bc.size)
    resident = (weight_bytes_total <= 24 * 1024 * 1024) and not force_streaming
    per_layer_bytes = 4 * (Dp * 4 * H + H * 4 * H + 4 * H)
    vmem_budget = 40 * 1024 * 1024
    wbytes_for_tile = (weight_bytes_total if resident
                       else 2 * per_layer_bytes + 4 * (wc.size + bc.size))
    Nt = _pick_batch_tile(N, L, H, wbytes_for_tile, vmem_budget)
    Np = _round_up(N, Nt)
    n_btiles = Np // Nt

    # --- input: batch-first (N, L, D) -> time-major padded (L, Np, Dp) ----
    x_tm = jnp.transpose(x.astype(jnp.float32), (1, 0, 2))        # (L, N, D)
    x_tm = jnp.pad(x_tm, ((0, 0), (0, Np - N), (0, Dp - D)))      # (L, Np, Dp)

    compiler_params = pltpu.CompilerParams(
        dimension_semantics=("parallel",) if resident else ("parallel", "arbitrary"),
        vmem_limit_bytes=48 * 1024 * 1024,   # leaves headroom on v7x (64 MiB)
    )

    if resident:
        out = pl.pallas_call(
            _lstm_resident_kernel,
            out_shape=jax.ShapeDtypeStruct((Np, Op), jnp.float32),
            grid_spec=pltpu.PrefetchScalarGridSpec(
                num_scalar_prefetch=0,
                grid=(n_btiles,),
                in_specs=[
                    pl.BlockSpec((L, Nt, Dp), lambda b: (0, b, 0)),       # x
                    pl.BlockSpec((NL, Dp, 4 * H), lambda b: (0, 0, 0)),   # Wih (resident)
                    pl.BlockSpec((NL, H, 4 * H), lambda b: (0, 0, 0)),    # Whh (resident)
                    pl.BlockSpec((NL, 1, 4 * H), lambda b: (0, 0, 0)),    # bias (resident)
                    pl.BlockSpec((H, Op), lambda b: (0, 0)),              # classifier W
                    pl.BlockSpec((1, Op), lambda b: (0, 0)),              # classifier b
                ],
                out_specs=pl.BlockSpec((Nt, Op), lambda b: (b, 0)),
                scratch_shapes=[pltpu.VMEM((L, Nt, Dp), jnp.float32)],
            ),
            compiler_params=compiler_params,
        )(x_tm, wih, whh, bias, wc, bc)
    else:
        out = pl.pallas_call(
            _lstm_streaming_kernel,
            out_shape=jax.ShapeDtypeStruct((Np, Op), jnp.float32),
            grid_spec=pltpu.PrefetchScalarGridSpec(
                num_scalar_prefetch=0,
                grid=(n_btiles, NL),
                in_specs=[
                    pl.BlockSpec((L, Nt, Dp), lambda b, l: (0, b, 0)),     # x (const over l)
                    pl.BlockSpec((1, Dp, 4 * H), lambda b, l: (l, 0, 0)),  # per-layer Wih
                    pl.BlockSpec((1, H, 4 * H), lambda b, l: (l, 0, 0)),   # per-layer Whh
                    pl.BlockSpec((1, 1, 4 * H), lambda b, l: (l, 0, 0)),   # per-layer bias
                    pl.BlockSpec((H, Op), lambda b, l: (0, 0)),            # classifier W
                    pl.BlockSpec((1, Op), lambda b, l: (0, 0)),            # classifier b
                ],
                out_specs=pl.BlockSpec((Nt, Op), lambda b, l: (b, 0)),
                scratch_shapes=[pltpu.VMEM((L, Nt, Dp), jnp.float32)],
            ),
            compiler_params=compiler_params,
        )(x_tm, wih, whh, bias, wc, bc)

    return out[:N, :O]


# ---------------------------------------------------------------------------
# Pure-JAX reference (PyTorch LSTM semantics) for verification
# ---------------------------------------------------------------------------
def baseline_lstm_ref(x, params, hidden_size, output_size):
    N, L, D = x.shape
    H = hidden_size
    NL = H
    seq = x.astype(jnp.float32)
    h = jnp.zeros((N, H), jnp.float32)
    for k in range(NL):
        w_ih, w_hh, b_ih, b_hh = params["layers"][k]
        h = jnp.zeros((N, H), jnp.float32)
        c = jnp.zeros((N, H), jnp.float32)
        outs = []
        for t in range(L):
            gates = seq[:, t, :] @ w_ih.T + h @ w_hh.T + b_ih + b_hh
            i_g = jax.nn.sigmoid(gates[:, 0:H])
            f_g = jax.nn.sigmoid(gates[:, H:2 * H])
            g_g = jnp.tanh(gates[:, 2 * H:3 * H])
            o_g = jax.nn.sigmoid(gates[:, 3 * H:4 * H])
            c = f_g * c + i_g * g_g
            h = o_g * jnp.tanh(c)
            outs.append(h)
        seq = jnp.stack(outs, axis=1)
    logits = h @ params["w_cls"].T + params["b_cls"]
    return jax.nn.softmax(logits, axis=-1)


# ---------------------------------------------------------------------------
# Deterministic parameter construction (PyTorch-style uniform init)
# ---------------------------------------------------------------------------
def make_params(key, input_size, hidden_size, output_size):
    H = hidden_size
    NL = H
    scale = 1.0 / jnp.sqrt(jnp.float32(H))
    layers = []
    for k in range(NL):
        in_k = input_size if k == 0 else H
        key, k1, k2, k3, k4 = jax.random.split(key, 5)
        w_ih = jax.random.uniform(k1, (4 * H, in_k), jnp.float32, -scale, scale)
        w_hh = jax.random.uniform(k2, (4 * H, H), jnp.float32, -scale, scale)
        b_ih = jax.random.uniform(k3, (4 * H,), jnp.float32, -scale, scale)
        b_hh = jax.random.uniform(k4, (4 * H,), jnp.float32, -scale, scale)
        layers.append((w_ih, w_hh, b_ih, b_hh))
    key, k1, k2 = jax.random.split(key, 3)
    w_cls = jax.random.uniform(k1, (output_size, H), jnp.float32, -scale, scale)
    b_cls = jax.random.uniform(k2, (output_size,), jnp.float32, -scale, scale)
    return {"layers": layers, "w_cls": w_cls, "b_cls": b_cls}


if __name__ == "__main__":
    # Small shapes consistent with the module's forward: x is (N, L, D).
    N, L, D = 2, 8, 4
    hidden_size = 8          # -> num_layers = 8 (module passes hidden_size as num_layers)
    output_size = 5

    key = jax.random.PRNGKey(0)
    key, kx = jax.random.split(key)
    x = jax.random.normal(kx, (N, L, D), jnp.float32)
    params = make_params(key, D, hidden_size, output_size)

    ref = jax.block_until_ready(baseline_lstm_ref(x, params, hidden_size, output_size))

    # Primary path: resident weights, grid = (batch_tiles,).
    out = jax.block_until_ready(
        baseline_lstm_pallas(x, params, hidden_size, output_size))
    assert out.shape == (N, output_size)
    assert jnp.allclose(out, ref, atol=1e-3, rtol=1e-3), (out, ref)

    # Fallback path (large-H weight streaming), exercised here for coverage.
    out_s = jax.block_until_ready(
        baseline_lstm_pallas(x, params, hidden_size, output_size,
                             force_streaming=True))
    assert out_s.shape == (N, output_size)
    assert jnp.allclose(out_s, ref, atol=1e-3, rtol=1e-3), (out_s, ref)

    print("KERNEL_OK")
</pallas_src>

<mosaic_0001>
module attributes {stable_mosaic.version = 11 : i64} {
  func.func @_lstm_resident_kernel(%arg0: i32, %arg1: memref<8x8x8xf32, #tpu.memory_space<vmem>>, %arg2: memref<8x8x32xf32, #tpu.memory_space<vmem>>, %arg3: memref<8x8x32xf32, #tpu.memory_space<vmem>>, %arg4: memref<8x1x32xf32, #tpu.memory_space<vmem>>, %arg5: memref<8x128xf32, #tpu.memory_space<vmem>>, %arg6: memref<1x128xf32, #tpu.memory_space<vmem>>, %arg7: memref<8x128xf32, #tpu.memory_space<vmem>>, %arg8: memref<8x8x8xf32, #tpu.memory_space<vmem>>) attributes {dimension_semantics = [#tpu.dimension_semantics<parallel>], iteration_bounds = array<i64: 1>, scalar_prefetch = 0 : i64, scratch_operands = 1 : i64, tpu.core_type = #tpu.core_type<tc>, window_params = [{transform_indices = @transform_0, window_bounds = array<i64: 8, 8, 8>}, {pipeline_mode = #tpu.pipeline_mode<synchronous>, transform_indices = @transform_1, window_bounds = array<i64: 8, 8, 32>}, {pipeline_mode = #tpu.pipeline_mode<synchronous>, transform_indices = @transform_2, window_bounds = array<i64: 8, 8, 32>}, {pipeline_mode = #tpu.pipeline_mode<synchronous>, transform_indices = @transform_3, window_bounds = array<i64: 8, 1, 32>}, {pipeline_mode = #tpu.pipeline_mode<synchronous>, transform_indices = @transform_4, window_bounds = array<i64: 8, 128>}, {pipeline_mode = #tpu.pipeline_mode<synchronous>, transform_indices = @transform_5, window_bounds = array<i64: 1, 128>}, {transform_indices = @transform_6, window_bounds = array<i64: 8, 128>}]} {
    %c0 = arith.constant 0 : index
    %c0_0 = arith.constant 0 : index
    %c0_1 = arith.constant 0 : index
    %0 = vector.load %arg1[%c0, %c0_0, %c0_1] : memref<8x8x8xf32, #tpu.memory_space<vmem>>, vector<8x8x8xf32>
    %c0_2 = arith.constant 0 : index
    %c0_3 = arith.constant 0 : index
    %c0_4 = arith.constant 0 : index
    %1 = vector.load %arg8[%c0_2, %c0_3, %c0_4] : memref<8x8x8xf32, #tpu.memory_space<vmem>>, vector<8x8x8xf32>
    tpu.vector_store %arg8[%c0_2, %c0_3, %c0_4], %0 {strides = array<i32>} : memref<8x8x8xf32, #tpu.memory_space<vmem>>, vector<8x8x8xf32>,
    %c0_5 = arith.constant 0 : index
    %c0_6 = arith.constant 0 : index
    %c0_7 = arith.constant 0 : index
    %2 = vector.load %arg2[%c0_5, %c0_6, %c0_7] : memref<8x8x32xf32, #tpu.memory_space<vmem>>, vector<1x8x32xf32>
    %3 = vector.shape_cast %2 : vector<1x8x32xf32> to vector<8x32xf32>
    %c0_8 = arith.constant 0 : index
    %c0_9 = arith.constant 0 : index
    %c0_10 = arith.constant 0 : index
    %4 = vector.load %arg3[%c0_8, %c0_9, %c0_10] : memref<8x8x32xf32, #tpu.memory_space<vmem>>, vector<1x8x32xf32>
    %5 = vector.shape_cast %4 : vector<1x8x32xf32> to vector<8x32xf32>
    %c0_11 = arith.constant 0 : index
    %c0_12 = arith.constant 0 : index
    %c0_13 = arith.constant 0 : index
    %6 = vector.load %arg4[%c0_11, %c0_12, %c0_13] : memref<8x1x32xf32, #tpu.memory_space<vmem>>, vector<1x1x32xf32>
    %7 = vector.shape_cast %6 : vector<1x1x32xf32> to vector<1x32xf32>
    %c0_14 = arith.constant 0 : index
    %c0_15 = arith.constant 0 : index
    %c0_16 = arith.constant 0 : index
    %8 = vector.load %arg8[%c0_14, %c0_15, %c0_16] : memref<8x8x8xf32, #tpu.memory_space<vmem>>, vector<8x8x8xf32>
    %9 = vector.shape_cast %8 : vector<8x8x8xf32> to vector<64x8xf32>
    %cst = arith.constant dense<0.000000e+00> : vector<64x32xf32>
    %10 = tpu.matmul %9, %3, %cst {dimension_numbers = #tpu.dot_dimension_numbers<[1], [0], [0], [1], [0, 0, 1, 1], [], []>} : vector<64x8xf32>, vector<8x32xf32>, vector<64x32xf32> -> vector<64x32xf32>
    %11 = vector.broadcast %7 : vector<1x32xf32> to vector<64x32xf32>
    %12 = arith.addf %10, %11 : vector<64x32xf32>
    %cst_17 = arith.constant 0.000000e+00 : f32
    %13 = vector.broadcast %cst_17 : f32 to vector<8x8xf32>
    %cst_18 = arith.constant 0.000000e+00 : f32
    %14 = vector.broadcast %cst_18 : f32 to vector<8x8xf32>
    %15 = vector.extract_strided_slice %12 {offsets = [0, 0], sizes = [8, 32], strides = [1, 1]} : vector<64x32xf32> to vector<8x32xf32>
    %cst_19 = arith.constant dense<0.000000e+00> : vector<8x32xf32>
    %16 = tpu.matmul %13, %5, %cst_19 {dimension_numbers = #tpu.dot_dimension_numbers<[1], [0], [0], [1], [0, 0, 1, 1], [], []>} : vector<8x8xf32>, vector<8x32xf32>, vector<8x32xf32> -> vector<8x32xf32>
    %17 = arith.addf %15, %16 : vector<8x32xf32>
    %18 = math.tanh %17 : vector<8x32xf32>
    %19 = vector.extract_strided_slice %18 {offsets = [0, 0], sizes = [8, 24], strides = [1, 1]} : vector<8x32xf32> to vector<8x24xf32>
    %cst_20 = arith.constant 5.000000e-01 : f32
    %20 = vector.broadcast %cst_20 : f32 to vector<8x24xf32>
    %21 = arith.mulf %20, %19 : vector<8x24xf32>
    %cst_21 = arith.constant 5.000000e-01 : f32
    %22 = vector.broadcast %cst_21 : f32 to vector<8x24xf32>
    %23 = arith.addf %21, %22 : vector<8x24xf32>
    %24 = vector.extract_strided_slice %23 {offsets = [0, 0], sizes = [8, 8], strides = [1, 1]} : vector<8x24xf32> to vector<8x8xf32>
    %25 = vector.extract_strided_slice %23 {offsets = [0, 8], sizes = [8, 8], strides = [1, 1]} : vector<8x24xf32> to vector<8x8xf32>
    %26 = vector.extract_strided_slice %23 {offsets = [0, 16], sizes = [8, 8], strides = [1, 1]} : vector<8x24xf32> to vector<8x8xf32>
    %27 = vector.extract_strided_slice %18 {offsets = [0, 24], sizes = [8, 8], strides = [1, 1]} : vector<8x32xf32> to vector<8x8xf32>
    %28 = arith.mulf %25, %14 : vector<8x8xf32>
    %29 = arith.mulf %24, %27 : vector<8x8xf32>
    %30 = arith.addf %28, %29 : vector<8x8xf32>
    %31 = math.tanh %30 : vector<8x8xf32>
    %32 = arith.mulf %26, %31 : vector<8x8xf32>
    %c0_22 = arith.constant 0 : index
    %c0_23 = arith.constant 0 : index
    %c0_24 = arith.constant 0 : index
    %33 = vector.load %arg8[%c0_22, %c0_23, %c0_24] : memref<8x8x8xf32, #tpu.memory_space<vmem>>, vector<1x8x8xf32>
    %34 = vector.shape_cast %33 : vector<1x8x8xf32> to vector<8x8xf32>
    %35 = vector.shape_cast %32 : vector<8x8xf32> to vector<1x8x8xf32>
    tpu.vector_store %arg8[%c0_22, %c0_23, %c0_24], %35 {strides = array<i32>} : memref<8x8x8xf32, #tpu.memory_space<vmem>>, vector<1x8x8xf32>,
    %36 = vector.extract_strided_slice %12 {offsets = [8, 0], sizes = [8, 32], strides = [1, 1]} : vector<64x32xf32> to vector<8x32xf32>
    %cst_25 = arith.constant dense<0.000000e+00> : vector<8x32xf32>
    %37 = tpu.matmul %32, %5, %cst_25 {dimension_numbers = #tpu.dot_dimension_numbers<[1], [0], [0], [1], [0, 0, 1, 1], [], []>} : vector<8x8xf32>, vector<8x32xf32>, vector<8x32xf32> -> vector<8x32xf32>
    %38 = arith.addf %36, %37 : vector<8x32xf32>
    %39 = math.tanh %38 : vector<8x32xf32>
    %40 = vector.extract_strided_slice %39 {offsets = [0, 0], sizes = [8, 24], strides = [1, 1]} : vector<8x32xf32> to vector<8x24xf32>
    %cst_26 = arith.constant 5.000000e-01 : f32
    %41 = vector.broadcast %cst_26 : f32 to vector<8x24xf32>
    %42 = arith.mulf %41, %40 : vector<8x24xf32>
    %cst_27 = arith.constant 5.000000e-01 : f32
    %43 = vector.broadcast %cst_27 : f32 to vector<8x24xf32>
    %44 = arith.addf %42, %43 : vector<8x24xf32>
    %45 = vector.extract_strided_slice %44 {offsets = [0, 0], sizes = [8, 8], strides = [1, 1]} : vector<8x24xf32> to vector<8x8xf32>
    %46 = vector.extract_strided_slice %44 {offsets = [0, 8], sizes = [8, 8], strides = [1, 1]} : vector<8x24xf32> to vector<8x8xf32>
    %47 = vector.extract_strided_slice %44 {offsets = [0, 16], sizes = [8, 8], strides = [1, 1]} : vector<8x24xf32> to vector<8x8xf32>
    %48 = vector.extract_strided_slice %39 {offsets = [0, 24], sizes = [8, 8], strides = [1, 1]} : vector<8x32xf32> to vector<8x8xf32>
    %49 = arith.mulf %46, %30 : vector<8x8xf32>
    %50 = arith.mulf %45, %48 : vector<8x8xf32>
    %51 = arith.addf %49, %50 : vector<8x8xf32>
    %52 = math.tanh %51 : vector<8x8xf32>
    %53 = arith.mulf %47, %52 : vector<8x8xf32>
    %c1 = arith.constant 1 : index
    %c0_28 = arith.constant 0 : index
    %c0_29 = arith.constant 0 : index
    %54 = vector.load %arg8[%c1, %c0_28, %c0_29] : memref<8x8x8xf32, #tpu.memory_space<vmem>>, vector<1x8x8xf32>
    %55 = vector.shape_cast %54 : vector<1x8x8xf32> to vector<8x8xf32>
    %56 = vector.shape_cast %53 : vector<8x8xf32> to vector<1x8x8xf32>
    tpu.vector_store %arg8[%c1, %c0_28, %c0_29], %56 {strides = array<i32>} : memref<8x8x8xf32, #tpu.memory_space<vmem>>, vector<1x8x8xf32>,
    %57 = vector.extract_strided_slice %12 {offsets = [16, 0], sizes = [8, 32], strides = [1, 1]} : vector<64x32xf32> to vector<8x32xf32>
    %cst_30 = arith.constant dense<0.000000e+00> : vector<8x32xf32>
    %58 = tpu.matmul %53, %5, %cst_30 {dimension_numbers = #tpu.dot_dimension_numbers<[1], [0], [0], [1], [0, 0, 1, 1], [], []>} : vector<8x8xf32>, vector<8x32xf32>, vector<8x32xf32> -> vector<8x32xf32>
    %59 = arith.addf %57, %58 : vector<8x32xf32>
    %60 = math.tanh %59 : vector<8x32xf32>
    %61 = vector.extract_strided_slice %60 {offsets = [0, 0], sizes = [8, 24], strides = [1, 1]} : vector<8x32xf32> to vector<8x24xf32>
    %cst_31 = arith.constant 5.000000e-01 : f32
    %62 = vector.broadcast %cst_31 : f32 to vector<8x24xf32>
    %63 = arith.mulf %62, %61 : vector<8x24xf32>
    %cst_32 = arith.constant 5.000000e-01 : f32
    %64 = vector.broadcast %cst_32 : f32 to vector<8x24xf32>
    %65 = arith.addf %63, %64 : vector<8x24xf32>
    %66 = vector.extract_strided_slice %65 {offsets = [0, 0], sizes = [8, 8], strides = [1, 1]} : vector<8x24xf32> to vector<8x8xf32>
    %67 = vector.extract_strided_slice %65 {offsets = [0, 8], sizes = [8, 8], strides = [1, 1]} : vector<8x24xf32> to vector<8x8xf32>
    %68 = vector.extract_strided_slice %65 {offsets = [0, 16], sizes = [8, 8], strides = [1, 1]} : vector<8x24xf32> to vector<8x8xf32>
    %69 = vector.extract_strided_slice %60 {offsets = [0, 24], sizes = [8, 8], strides = [1, 1]} : vector<8x32xf32> to vector<8x8xf32>
    %70 = arith.mulf %67, %51 : vector<8x8xf32>
    %71 = arith.mulf %66, %69 : vector<8x8xf32>
    %72 = arith.addf %70, %71 : vector<8x8xf32>
    %73 = math.tanh %72 : vector<8x8xf32>
    %74 = arith.mulf %68, %73 : vector<8x8xf32>
    %c2 = arith.constant 2 : index
    %c0_33 = arith.constant 0 : index
    %c0_34 = arith.constant 0 : index
    %75 = vector.load %arg8[%c2, %c0_33, %c0_34] : memref<8x8x8xf32, #tpu.memory_space<vmem>>, vector<1x8x8xf32>
    %76 = vector.shape_cast %75 : vector<1x8x8xf32> to vector<8x8xf32>
    %77 = vector.shape_cast %74 : vector<8x8xf32> to vector<1x8x8xf32>
    tpu.vector_store %arg8[%c2, %c0_33, %c0_34], %77 {strides = array<i32>} : memref<8x8x8xf32, #tpu.memory_space<vmem>>, vector<1x8x8xf32>,
    %78 = vector.extract_strided_slice %12 {offsets = [24, 0], sizes = [8, 32], strides = [1, 1]} : vector<64x32xf32> to vector<8x32xf32>
    %cst_35 = arith.constant dense<0.000000e+00> : vector<8x32xf32>
    %79 = tpu.matmul %74, %5, %cst_35 {dimension_numbers = #tpu.dot_dimension_numbers<[1], [0], [0], [1], [0, 0, 1, 1], [], []>} : vector<8x8xf32>, vector<8x32xf32>, vector<8x32xf32> -> vector<8x32xf32>
    %80 = arith.addf %78, %79 : vector<8x32xf32>
    %81 = math.tanh %80 : vector<8x32xf32>
    %82 = vector.extract_strided_slice %81 {offsets = [0, 0], sizes = [8, 24], strides = [1, 1]} : vector<8x32xf32> to vector<8x24xf32>
    %cst_36 = arith.constant 5.000000e-01 : f32
    %83 = vector.broadcast %cst_36 : f32 to vector<8x24xf32>
    %84 = arith.mulf %83, %82 : vector<8x24xf32>
    %cst_37 = arith.constant 5.000000e-01 : f32
    %85 = vector.broadcast %cst_37 : f32 to vector<8x24xf32>
    %86 = arith.addf %84, %85 : vector<8x24xf32>
    %87 = vector.extract_strided_slice %86 {offsets = [0, 0], sizes = [8, 8], strides = [1, 1]} : vector<8x24xf32> to vector<8x8xf32>
    %88 = vector.extract_strided_slice %86 {offsets = [0, 8], sizes = [8, 8], strides = [1, 1]} : vector<8x24xf32> to vector<8x8xf32>
    %89 = vector.extract_strided_slice %86 {offsets = [0, 16], sizes = [8, 8], strides = [1, 1]} : vector<8x24xf32> to vector<8x8xf32>
    %90 = vector.extract_strided_slice %81 {offsets = [0, 24], sizes = [8, 8], strides = [1, 1]} : vector<8x32xf32> to vector<8x8xf32>
    %91 = arith.mulf %88, %72 : vector<8x8xf32>
    %92 = arith.mulf %87, %90 : vector<8x8xf32>
    %93 = arith.addf %91, %92 : vector<8x8xf32>
    %94 = math.tanh %93 : vector<8x8xf32>
    %95 = arith.mulf %89, %94 : vector<8x8xf32>
    %c3 = arith.constant 3 : index
    %c0_38 = arith.constant 0 : index
    %c0_39 = arith.constant 0 : index
    %96 = vector.load %arg8[%c3, %c0_38, %c0_39] : memref<8x8x8xf32, #tpu.memory_space<vmem>>, vector<1x8x8xf32>
    %97 = vector.shape_cast %96 : vector<1x8x8xf32> to vector<8x8xf32>
    %98 = vector.shape_cast %95 : vector<8x8xf32> to vector<1x8x8xf32>
    tpu.vector_store %arg8[%c3, %c0_38, %c0_39], %98 {strides = array<i32>} : memref<8x8x8xf32, #tpu.memory_space<vmem>>, vector<1x8x8xf32>,
    %99 = vector.extract_strided_slice %12 {offsets = [32, 0], sizes = [8, 32], strides = [1, 1]} : vector<64x32xf32> to vector<8x32xf32>
    %cst_40 = arith.constant dense<0.000000e+00> : vector<8x32xf32>
    %100 = tpu.matmul %95, %5, %cst_40 {dimension_numbers = #tpu.dot_dimension_numbers<[1], [0], [0], [1], [0, 0, 1, 1], [], []>} : vector<8x8xf32>, vector<8x32xf32>, vector<8x32xf32> -> vector<8x32xf32>
    %101 = arith.addf %99, %100 : vector<8x32xf32>
    %102 = math.tanh %101 : vector<8x32xf32>
    %103 = vector.extract_strided_slice %102 {offsets = [0, 0], sizes = [8, 24], strides = [1, 1]} : vector<8x32xf32> to vector<8x24xf32>
    %cst_41 = arith.constant 5.000000e-01 : f32
    %104 = vector.broadcast %cst_41 : f32 to vector<8x24xf32>
    %105 = arith.mulf %104, %103 : vector<8x24xf32>
    %cst_42 = arith.constant 5.000000e-01 : f32
    %106 = vector.broadcast %cst_42 : f32 to vector<8x24xf32>
    %107 = arith.addf %105, %106 : vector<8x24xf32>
    %108 = vector.extract_strided_slice %107 {offsets = [0, 0], sizes = [8, 8], strides = [1, 1]} : vector<8x24xf32> to vector<8x8xf32>
    %109 = vector.extract_strided_slice %107 {offsets = [0, 8], sizes = [8, 8], strides = [1, 1]} : vector<8x24xf32> to vector<8x8xf32>
    %110 = vector.extract_strided_slice %107 {offsets = [0, 16], sizes = [8, 8], strides = [1, 1]} : vector<8x24xf32> to vector<8x8xf32>
    %111 = vector.extract_strided_slice %102 {offsets = [0, 24], sizes = [8, 8], strides = [1, 1]} : vector<8x32xf32> to vector<8x8xf32>
    %112 = arith.mulf %109, %93 : vector<8x8xf32>
    %113 = arith.mulf %108, %111 : vector<8x8xf32>
    %114 = arith.addf %112, %113 : vector<8x8xf32>
    %115 = math.tanh %114 : vector<8x8xf32>
    %116 = arith.mulf %110, %115 : vector<8x8xf32>
    %c4 = arith.constant 4 : index
    %c0_43 = arith.constant 0 : index
    %c0_44 = arith.constant 0 : index
    %117 = vector.load %arg8[%c4, %c0_43, %c0_44] : memref<8x8x8xf32, #tpu.memory_space<vmem>>, vector<1x8x8xf32>
    %118 = vector.shape_cast %117 : vector<1x8x8xf32> to vector<8x8xf32>
    %119 = vector.shape_cast %116 : vector<8x8xf32> to vector<1x8x8xf32>
    tpu.vector_store %arg8[%c4, %c0_43, %c0_44], %119 {strides = array<i32>} : memref<8x8x8xf32, #tpu.memory_space<vmem>>, vector<1x8x8xf32>,
    %120 = vector.extract_strided_slice %12 {offsets = [40, 0], sizes = [8, 32], strides = [1, 1]} : vector<64x32xf32> to vector<8x32xf32>
    %cst_45 = arith.constant dense<0.000000e+00> : vector<8x32xf32>
    %121 = tpu.matmul %116, %5, %cst_45 {dimension_numbers = #tpu.dot_dimension_numbers<[1], [0], [0], [1], [0, 0, 1, 1], [], []>} : vector<8x8xf32>, vector<8x32xf32>, vector<8x32xf32> -> vector<8x32xf32>
    %122 = arith.addf %120, %121 : vector<8x32xf32>
    %123 = math.tanh %122 : vector<8x32xf32>
    %124 = vector.extract_strided_slice %123 {offsets = [0, 0], sizes = [8, 24], strides = [1, 1]} : vector<8x32xf32> to vector<8x24xf32>
    %cst_46 = arith.constant 5.000000e-01 : f32
    %125 = vector.broadcast %cst_46 : f32 to vector<8x24xf32>
    %126 = arith.mulf %125, %124 : vector<8x24xf32>
    %cst_47 = arith.constant 5.000000e-01 : f32
    %127 = vector.broadcast %cst_47 : f32 to vector<8x24xf32>
    %128 = arith.addf %126, %127 : vector<8x24xf32>
    %129 = vector.extract_strided_slice %128 {offsets = [0, 0], sizes = [8, 8], strides = [1, 1]} : vector<8x24xf32> to vector<8x8xf32>
    %130 = vector.extract_strided_slice %128 {offsets = [0, 8], sizes = [8, 8], strides = [1, 1]} : vector<8x24xf32> to vector<8x8xf32>
    %131 = vector.extract_strided_slice %128 {offsets = [0, 16], sizes = [8, 8], strides = [1, 1]} : vector<8x24xf32> to vector<8x8xf32>
    %132 = vector.extract_strided_slice %123 {offsets = [0, 24], sizes = [8, 8], strides = [1, 1]} : vector<8x32xf32> to vector<8x8xf32>
    %133 = arith.mulf %130, %114 : vector<8x8xf32>
    %134 = arith.mulf %129, %132 : vector<8x8xf32>
    %135 = arith.addf %133, %134 : vector<8x8xf32>
    %136 = math.tanh %135 : vector<8x8xf32>
    %137 = arith.mulf %131, %136 : vector<8x8xf32>
    %c5 = arith.constant 5 : index
    %c0_48 = arith.constant 0 : index
    %c0_49 = arith.constant 0 : index
    %138 = vector.load %arg8[%c5, %c0_48, %c0_49] : memref<8x8x8xf32, #tpu.memory_space<vmem>>, vector<1x8x8xf32>
    %139 = vector.shape_cast %138 : vector<1x8x8xf32> to vector<8x8xf32>
    %140 = vector.shape_cast %137 : vector<8x8xf32> to vector<1x8x8xf32>
    tpu.vector_store %arg8[%c5, %c0_48, %c0_49], %140 {strides = array<i32>} : memref<8x8x8xf32, #tpu.memory_space<vmem>>, vector<1x8x8xf32>,
    %141 = vector.extract_strided_slice %12 {offsets = [48, 0], sizes = [8, 32], strides = [1, 1]} : vector<64x32xf32> to vector<8x32xf32>
    %cst_50 = arith.constant dense<0.000000e+00> : vector<8x32xf32>
    %142 = tpu.matmul %137, %5, %cst_50 {dimension_numbers = #tpu.dot_dimension_numbers<[1], [0], [0], [1], [0, 0, 1, 1], [], []>} : vector<8x8xf32>, vector<8x32xf32>, vector<8x32xf32> -> vector<8x32xf32>
    %143 = arith.addf %141, %142 : vector<8x32xf32>
    %144 = math.tanh %143 : vector<8x32xf32>
    %145 = vector.extract_strided_slice %144 {offsets = [0, 0], sizes = [8, 24], strides = [1, 1]} : vector<8x32xf32> to vector<8x24xf32>
    %cst_51 = arith.constant 5.000000e-01 : f32
    %146 = vector.broadcast %cst_51 : f32 to vector<8x24xf32>
    %147 = arith.mulf %146, %145 : vector<8x24xf32>
    %cst_52 = arith.constant 5.000000e-01 : f32
    %148 = vector.broadcast %cst_52 : f32 to vector<8x24xf32>
    %149 = arith.addf %147, %148 : vector<8x24xf32>
    %150 = vector.extract_strided_slice %149 {offsets = [0, 0], sizes = [8, 8], strides = [1, 1]} : vector<8x24xf32> to vector<8x8xf32>
    %151 = vector.extract_strided_slice %149 {offsets = [0, 8], sizes = [8, 8], strides = [1, 1]} : vector<8x24xf32> to vector<8x8xf32>
    %152 = vector.extract_strided_slice %149 {offsets = [0, 16], sizes = [8, 8], strides = [1, 1]} : vector<8x24xf32> to vector<8x8xf32>
    %153 = vector.extract_strided_slice %144 {offsets = [0, 24], sizes = [8, 8], strides = [1, 1]} : vector<8x32xf32> to vector<8x8xf32>
    %154 = arith.mulf %151, %135 : vector<8x8xf32>
    %155 = arith.mulf %150, %153 : vector<8x8xf32>
    %156 = arith.addf %154, %155 : vector<8x8xf32>
    %157 = math.tanh %156 : vector<8x8xf32>
    %158 = arith.mulf %152, %157 : vector<8x8xf32>
    %c6 = arith.constant 6 : index
    %c0_53 = arith.constant 0 : index
    %c0_54 = arith.constant 0 : index
    %159 = vector.load %arg8[%c6, %c0_53, %c0_54] : memref<8x8x8xf32, #tpu.memory_space<vmem>>, vector<1x8x8xf32>
    %160 = vector.shape_cast %159 : vector<1x8x8xf32> to vector<8x8xf32>
    %161 = vector.shape_cast %158 : vector<8x8xf32> to vector<1x8x8xf32>
    tpu.vector_store %arg8[%c6, %c0_53, %c0_54], %161 {strides = array<i32>} : memref<8x8x8xf32, #tpu.memory_space<vmem>>, vector<1x8x8xf32>,
    %162 = vector.extract_strided_slice %12 {offsets = [56, 0], sizes = [8, 32], strides = [1, 1]} : vector<64x32xf32> to vector<8x32xf32>
    %cst_55 = arith.constant dense<0.000000e+00> : vector<8x32xf32>
    %163 = tpu.matmul %158, %5, %cst_55 {dimension_numbers = #tpu.dot_dimension_numbers<[1], [0], [0], [1], [0, 0, 1, 1], [], []>} : vector<8x8xf32>, vector<8x32xf32>, vector<8x32xf32> -> vector<8x32xf32>
    %164 = arith.addf %162, %163 : vector<8x32xf32>
    %165 = math.tanh %164 : vector<8x32xf32>
    %166 = vector.extract_strided_slice %165 {offsets = [0, 0], sizes = [8, 24], strides = [1, 1]} : vector<8x32xf32> to vector<8x24xf32>
    %cst_56 = arith.constant 5.000000e-01 : f32
    %167 = vector.broadcast %cst_56 : f32 to vector<8x24xf32>
    %168 = arith.mulf %167, %166 : vector<8x24xf32>
    %cst_57 = arith.constant 5.000000e-01 : f32
    %169 = vector.broadcast %cst_57 : f32 to vector<8x24xf32>
    %170 = arith.addf %168, %169 : vector<8x24xf32>
    %171 = vector.extract_strided_slice %170 {offsets = [0, 0], sizes = [8, 8], strides = [1, 1]} : vector<8x24xf32> to vector<8x8xf32>
    %172 = vector.extract_strided_slice %170 {offsets = [0, 8], sizes = [8, 8], strides = [1, 1]} : vector<8x24xf32> to vector<8x8xf32>
    %173 = vector.extract_strided_slice %170 {offsets = [0, 16], sizes = [8, 8], strides = [1, 1]} : vector<8x24xf32> to vector<8x8xf32>
    %174 = vector.extract_strided_slice %165 {offsets = [0, 24], sizes = [8, 8], strides = [1, 1]} : vector<8x32xf32> to vector<8x8xf32>
    %175 = arith.mulf %172, %156 : vector<8x8xf32>
    %176 = arith.mulf %171, %174 : vector<8x8xf32>
    %177 = arith.addf %175, %176 : vector<8x8xf32>
    %178 = math.tanh %177 : vector<8x8xf32>
    %179 = arith.mulf %173, %178 : vector<8x8xf32>
    %c7 = arith.constant 7 : index
    %c0_58 = arith.constant 0 : index
    %c0_59 = arith.constant 0 : index
    %180 = vector.load %arg8[%c7, %c0_58, %c0_59] : memref<8x8x8xf32, #tpu.memory_space<vmem>>, vector<1x8x8xf32>
    %181 = vector.shape_cast %180 : vector<1x8x8xf32> to vector<8x8xf32>
    %182 = vector.shape_cast %179 : vector<8x8xf32> to vector<1x8x8xf32>
    tpu.vector_store %arg8[%c7, %c0_58, %c0_59], %182 {strides = array<i32>} : memref<8x8x8xf32, #tpu.memory_space<vmem>>, vector<1x8x8xf32>,
    %c1_60 = arith.constant 1 : index
    %c0_61 = arith.constant 0 : index
    %c0_62 = arith.constant 0 : index
    %183 = vector.load %arg2[%c1_60, %c0_61, %c0_62] : memref<8x8x32xf32, #tpu.memory_space<vmem>>, vector<1x8x32xf32>
    %184 = vector.shape_cast %183 : vector<1x8x32xf32> to vector<8x32xf32>
    %c1_63 = arith.constant 1 : index
    %c0_64 = arith.constant 0 : index
    %c0_65 = arith.constant 0 : index
    %185 = vector.load %arg3[%c1_63, %c0_64, %c0_65] : memref<8x8x32xf32, #tpu.memory_space<vmem>>, vector<1x8x32xf32>
    %186 = vector.shape_cast %185 : vector<1x8x32xf32> to vector<8x32xf32>
    %c1_66 = arith.constant 1 : index
    %c0_67 = arith.constant 0 : index
    %c0_68 = arith.constant 0 : index
    %187 = vector.load %arg4[%c1_66, %c0_67, %c0_68] : memref<8x1x32xf32, #tpu.memory_space<vmem>>, vector<1x1x32xf32>
    %188 = vector.shape_cast %187 : vector<1x1x32xf32> to vector<1x32xf32>
    %c0_69 = arith.constant 0 : index
    %c0_70 = arith.constant 0 : index
    %c0_71 = arith.constant 0 : index
    %189 = vector.load %arg8[%c0_69, %c0_70, %c0_71] : memref<8x8x8xf32, #tpu.memory_space<vmem>>, vector<8x8x8xf32>
    %190 = vector.shape_cast %189 : vector<8x8x8xf32> to vector<64x8xf32>
    %cst_72 = arith.constant dense<0.000000e+00> : vector<64x32xf32>
    %191 = tpu.matmul %190, %184, %cst_72 {dimension_numbers = #tpu.dot_dimension_numbers<[1], [0], [0], [1], [0, 0, 1, 1], [], []>} : vector<64x8xf32>, vector<8x32xf32>, vector<64x32xf32> -> vector<64x32xf32>
    %192 = vector.broadcast %188 : vector<1x32xf32> to vector<64x32xf32>
    %193 = arith.addf %191, %192 : vector<64x32xf32>
    %cst_73 = arith.constant 0.000000e+00 : f32
    %194 = vector.broadcast %cst_73 : f32 to vector<8x8xf32>
    %cst_74 = arith.constant 0.000000e+00 : f32
    %195 = vector.broadcast %cst_74 : f32 to vector<8x8xf32>
    %196 = vector.extract_strided_slice %193 {offsets = [0, 0], sizes = [8, 32], strides = [1, 1]} : vector<64x32xf32> to vector<8x32xf32>
    %cst_75 = arith.constant dense<0.000000e+00> : vector<8x32xf32>
    %197 = tpu.matmul %194, %186, %cst_75 {dimension_numbers = #tpu.dot_dimension_numbers<[1], [0], [0], [1], [0, 0, 1, 1], [], []>} : vector<8x8xf32>, vector<8x32xf32>, vector<8x32xf32> -> vector<8x32xf32>
    %198 = arith.addf %196, %197 : vector<8x32xf32>
    %199 = math.tanh %198 : vector<8x32xf32>
    %200 = vector.extract_strided_slice %199 {offsets = [0, 0], sizes = [8, 24], strides = [1, 1]} : vector<8x32xf32> to vector<8x24xf32>
    %cst_76 = arith.constant 5.000000e-01 : f32
    %201 = vector.broadcast %cst_76 : f32 to vector<8x24xf32>
    %202 = arith.mulf %201, %200 : vector<8x24xf32>
    %cst_77 = arith.constant 5.000000e-01 : f32
    %203 = vector.broadcast %cst_77 : f32 to vector<8x24xf32>
    %204 = arith.addf %202, %203 : vector<8x24xf32>
    %205 = vector.extract_strided_slice %204 {offsets = [0, 0], sizes = [8, 8], strides = [1, 1]} : vector<8x24xf32> to vector<8x8xf32>
    %206 = vector.extract_strided_slice %204 {offsets = [0, 8], sizes = [8, 8], strides = [1, 1]} : vector<8x24xf32> to vector<8x8xf32>
    %207 = vector.extract_strided_slice %204 {offsets = [0, 16], sizes = [8, 8], strides = [1, 1]} : vector<8x24xf32> to vector<8x8xf32>
    %208 = vector.extract_strided_slice %199 {offsets = [0, 24], sizes = [8, 8], strides = [1, 1]} : vector<8x32xf32> to vector<8x8xf32>
    %209 = arith.mulf %206, %195 : vector<8x8xf32>
    %210 = arith.mulf %205, %208 : vector<8x8xf32>
    %211 = arith.addf %209, %210 : vector<8x8xf32>
    %212 = math.tanh %211 : vector<8x8xf32>
    %213 = arith.mulf %207, %212 : vector<8x8xf32>
    %c0_78 = arith.constant 0 : index
    %c0_79 = arith.constant 0 : index
    %c0_80 = arith.constant 0 : index
    %214 = vector.load %arg8[%c0_78, %c0_79, %c0_80] : memref<8x8x8xf32, #tpu.memory_space<vmem>>, vector<1x8x8xf32>
    %215 = vector.shape_cast %214 : vector<1x8x8xf32> to vector<8x8xf32>
    %216 = vector.shape_cast %213 : vector<8x8xf32> to vector<1x8x8xf32>
    tpu.vector_store %arg8[%c0_78, %c0_79, %c0_80], %216 {strides = array<i32>} : memref<8x8x8xf32, #tpu.memory_space<vmem>>, vector<1x8x8xf32>,
    %217 = vector.extract_strided_slice %193 {offsets = [8, 0], sizes = [8, 32], strides = [1, 1]} : vector<64x32xf32> to vector<8x32xf32>
    %cst_81 = arith.constant dense<0.000000e+00> : vector<8x32xf32>
    %218 = tpu.matmul %213, %186, %cst_81 {dimension_numbers = #tpu.dot_dimension_numbers<[1], [0], [0], [1], [0, 0, 1, 1], [], []>} : vector<8x8xf32>, vector<8x32xf32>, vector<8x32xf32> -> vector<8x32xf32>
    %219 = arith.addf %217, %218 : vector<8x32xf32>
    %220 = math.tanh %219 : vector<8x32xf32>
    %221 = vector.extract_strided_slice %220 {offsets = [0, 0], sizes = [8, 24], strides = [1, 1]} : vector<8x32xf32> to vector<8x24xf32>
    %cst_82 = arith.constant 5.000000e-01 : f32
    %222 = vector.broadcast %cst_82 : f32 to vector<8x24xf32>
    %223 = arith.mulf %222, %221 : vector<8x24xf32>
    %cst_83 = arith.constant 5.000000e-01 : f32
    %224 = vector.broadcast %cst_83 : f32 to vector<8x24xf32>
    %225 = arith.addf %223, %224 : vector<8x24xf32>
    %226 = vector.extract_strided_slice %225 {offsets = [0, 0], sizes = [8, 8], strides = [1, 1]} : vector<8x24xf32> to vector<8x8xf32>
    %227 = vector.extract_strided_slice %225 {offsets = [0, 8], sizes = [8, 8], strides = [1, 1]} : vector<8x24xf32> to vector<8x8xf32>
    %228 = vector.extract_strided_slice %225 {offsets = [0, 16], sizes = [8, 8], strides = [1, 1]} : vector<8x24xf32> to vector<8x8xf32>
    %229 = vector.extract_strided_slice %220 {offsets = [0, 24], sizes = [8, 8], strides = [1, 1]} : vector<8x32xf32> to vector<8x8xf32>
    %230 = arith.mulf %227, %211 : vector<8x8xf32>
    %231 = arith.mulf %226, %229 : vector<8x8xf32>
    %232 = arith.addf %230, %231 : vector<8x8xf32>
    %233 = math.tanh %232 : vector<8x8xf32>
    %234 = arith.mulf %228, %233 : vector<8x8xf32>
    %c1_84 = arith.constant 1 : index
    %c0_85 = arith.constant 0 : index
    %c0_86 = arith.constant 0 : index
    %235 = vector.load %arg8[%c1_84, %c0_85, %c0_86] : memref<8x8x8xf32, #tpu.memory_space<vmem>>, vector<1x8x8xf32>
    %236 = vector.shape_cast %235 : vector<1x8x8xf32> to vector<8x8xf32>
    %237 = vector.shape_cast %234 : vector<8x8xf32> to vector<1x8x8xf32>
    tpu.vector_store %arg8[%c1_84, %c0_85, %c0_86], %237 {strides = array<i32>} : memref<8x8x8xf32, #tpu.memory_space<vmem>>, vector<1x8x8xf32>,
    %238 = vector.extract_strided_slice %193 {offsets = [16, 0], sizes = [8, 32], strides = [1, 1]} : vector<64x32xf32> to vector<8x32xf32>
    %cst_87 = arith.constant dense<0.000000e+00> : vector<8x32xf32>
    %239 = tpu.matmul %234, %186, %cst_87 {dimension_numbers = #tpu.dot_dimension_numbers<[1], [0], [0], [1], [0, 0, 1, 1], [], []>} : vector<8x8xf32>, vector<8x32xf32>, vector<8x32xf32> -> vector<8x32xf32>
    %240 = arith.addf %238, %239 : vector<8x32xf32>
    %241 = math.tanh %240 : vector<8x32xf32>
    %242 = vector.extract_strided_slice %241 {offsets = [0, 0], sizes = [8, 24], strides = [1, 1]} : vector<8x32xf32> to vector<8x24xf32>
    %cst_88 = arith.constant 5.000000e-01 : f32
    %243 = vector.broadcast %cst_88 : f32 to vector<8x24xf32>
    %244 = arith.mulf %243, %242 : vector<8x24xf32>
    %cst_89 = arith.constant 5.000000e-01 : f32
    %245 = vector.broadcast %cst_89 : f32 to vector<8x24xf32>
    %246 = arith.addf %244, %245 : vector<8x24xf32>
    %247 = vector.extract_strided_slice %246 {offsets = [0, 0], sizes = [8, 8], strides = [1, 1]} : vector<8x24xf32> to vector<8x8xf32>
    %248 = vector.extract_strided_slice %246 {offsets = [0, 8], sizes = [8, 8], strides = [1, 1]} : vector<8x24xf32> to vector<8x8xf32>
    %249 = vector.extract_strided_slice %246 {offsets = [0, 16], sizes = [8, 8], strides = [1, 1]} : vector<8x24xf32> to vector<8x8xf32>
    %250 = vector.extract_strided_slice %241 {offsets = [0, 24], sizes = [8, 8], strides = [1, 1]} : vector<8x32xf32> to vector<8x8xf32>
    %251 = arith.mulf %248, %232 : vector<8x8xf32>
    %252 = arith.mulf %247, %250 : vector<8x8xf32>
    %253 = arith.addf %251, %252 : vector<8x8xf32>
    %254 = math.tanh %253 : vector<8x8xf32>
    %255 = arith.mulf %249, %254 : vector<8x8xf32>
    %c2_90 = arith.constant 2 : index
    %c0_91 = arith.constant 0 : index
    %c0_92 = arith.constant 0 : index
    %256 = vector.load %arg8[%c2_90, %c0_91, %c0_92] : memref<8x8x8xf32, #tpu.memory_space<vmem>>, vector<1x8x8xf32>
    %257 = vector.shape_cast %256 : vector<1x8x8xf32> to vector<8x8xf32>
    %258 = vector.shape_cast %255 : vector<8x8xf32> to vector<1x8x8xf32>
    tpu.vector_store %arg8[%c2_90, %c0_91, %c0_92], %258 {strides = array<i32>} : memref<8x8x8xf32, #tpu.memory_space<vmem>>, vector<1x8x8xf32>,
    %259 = vector.extract_strided_slice %193 {offsets = [24, 0], sizes = [8, 32], strides = [1, 1]} : vector<64x32xf32> to vector<8x32xf32>
    %cst_93 = arith.constant dense<0.000000e+00> : vector<8x32xf32>
    %260 = tpu.matmul %255, %186, %cst_93 {dimension_numbers = #tpu.dot_dimension_numbers<[1], [0], [0], [1], [0, 0, 1, 1], [], []>} : vector<8x8xf32>, vector<8x32xf32>, vector<8x32xf32> -> vector<8x32xf32>
    %261 = arith.addf %259, %260 : vector<8x32xf32>
    %262 = math.tanh %261 : vector<8x32xf32>
    %263 = vector.extract_strided_slice %262 {offsets = [0, 0], sizes = [8, 24], strides = [1, 1]} : vector<8x32xf32> to vector<8x24xf32>
    %cst_94 = arith.constant 5.000000e-01 : f32
    %264 = vector.broadcast %cst_94 : f32 to vector<8x24xf32>
    %265 = arith.mulf %264, %263 : vector<8x24xf32>
    %cst_95 = arith.constant 5.000000e-01 : f32
    %266 = vector.broadcast %cst_95 : f32 to vector<8x24xf32>
    %267 = arith.addf %265, %266 : vector<8x24xf32>
    %268 = vector.extract_strided_slice %267 {offsets = [0, 0], sizes = [8, 8], strides = [1, 1]} : vector<8x24xf32> to vector<8x8xf32>
    %269 = vector.extract_strided_slice %267 {offsets = [0, 8], sizes = [8, 8], strides = [1, 1]} : vector<8x24xf32> to vector<8x8xf32>
    %270 = vector.extract_strided_slice %267 {offsets = [0, 16], sizes = [8, 8], strides = [1, 1]} : vector<8x24xf32> to vector<8x8xf32>
    %271 = vector.extract_strided_slice %262 {offsets = [0, 24], sizes = [8, 8], strides = [1, 1]} : vector<8x32xf32> to vector<8x8xf32>
    %272 = arith.mulf %269, %253 : vector<8x8xf32>
    %273 = arith.mulf %268, %271 : vector<8x8xf32>
    %274 = arith.addf %272, %273 : vector<8x8xf32>
    %275 = math.tanh %274 : vector<8x8xf32>
    %276 = arith.mulf %270, %275 : vector<8x8xf32>
    %c3_96 = arith.constant 3 : index
    %c0_97 = arith.constant 0 : index
    %c0_98 = arith.constant 0 : index
    %277 = vector.load %arg8[%c3_96, %c0_97, %c0_98] : memref<8x8x8xf32, #tpu.memory_space<vmem>>, vector<1x8x8xf32>
    %278 = vector.shape_cast %277 : vector<1x8x8xf32> to vector<8x8xf32>
    %279 = vector.shape_cast %276 : vector<8x8xf32> to vector<1x8x8xf32>
    tpu.vector_store %arg8[%c3_96, %c0_97, %c0_98], %279 {strides = array<i32>} : memref<8x8x8xf32, #tpu.memory_space<vmem>>, vector<1x8x8xf32>,
    %280 = vector.extract_strided_slice %193 {offsets = [32, 0], sizes = [8, 32], strides = [1, 1]} : vector<64x32xf32> to vector<8x32xf32>
    %cst_99 = arith.constant dense<0.000000e+00> : vector<8x32xf32>
    %281 = tpu.matmul %276, %186, %cst_99 {dimension_numbers = #tpu.dot_dimension_numbers<[1], [0], [0], [1], [0, 0, 1, 1], [], []>} : vector<8x8xf32>, vector<8x32xf32>, vector<8x32xf32> -> vector<8x32xf32>
    %282 = arith.addf %280, %281 : vector<8x32xf32>
    %283 = math.tanh %282 : vector<8x32xf32>
    %284 = vector.extract_strided_slice %283 {offsets = [0, 0], sizes = [8, 24], strides = [1, 1]} : vector<8x32xf32> to vector<8x24xf32>
    %cst_100 = arith.constant 5.000000e-01 : f32
    %285 = vector.broadcast %cst_100 : f32 to vector<8x24xf32>
    %286 = arith.mulf %285, %284 : vector<8x24xf32>
    %cst_101 = arith.constant 5.000000e-01 : f32
    %287 = vector.broadcast %cst_101 : f32 to vector<8x24xf32>
    %288 = arith.addf %286, %287 : vector<8x24xf32>
    %289 = vector.extract_strided_slice %288 {offsets = [0, 0], sizes = [8, 8], strides = [1, 1]} : vector<8x24xf32> to vector<8x8xf32>
    %290 = vector.extract_strided_slice %288 {offsets = [0, 8], sizes = [8, 8], strides = [1, 1]} : vector<8x24xf32> to vector<8x8xf32>
    %291 = vector.extract_strided_slice %288 {offsets = [0, 16], sizes = [8, 8], strides = [1, 1]} : vector<8x24xf32> to vector<8x8xf32>
    %292 = vector.extract_strided_slice %283 {offsets = [0, 24], sizes = [8, 8], strides = [1, 1]} : vector<8x32xf32> to vector<8x8xf32>
    %293 = arith.mulf %290, %274 : vector<8x8xf32>
    %294 = arith.mulf %289, %292 : vector<8x8xf32>
    %295 = arith.addf %293, %294 : vector<8x8xf32>
    %296 = math.tanh %295 : vector<8x8xf32>
    %297 = arith.mulf %291, %296 : vector<8x8xf32>
    %c4_102 = arith.constant 4 : index
    %c0_103 = arith.constant 0 : index
    %c0_104 = arith.constant 0 : index
    %298 = vector.load %arg8[%c4_102, %c0_103, %c0_104] : memref<8x8x8xf32, #tpu.memory_space<vmem>>, vector<1x8x8xf32>
    %299 = vector.shape_cast %298 : vector<1x8x8xf32> to vector<8x8xf32>
    %300 = vector.shape_cast %297 : vector<8x8xf32> to vector<1x8x8xf32>
    tpu.vector_store %arg8[%c4_102, %c0_103, %c0_104], %300 {strides = array<i32>} : memref<8x8x8xf32, #tpu.memory_space<vmem>>, vector<1x8x8xf32>,
    %301 = vector.extract_strided_slice %193 {offsets = [40, 0], sizes = [8, 32], strides = [1, 1]} : vector<64x32xf32> to vector<8x32xf32>
    %cst_105 = arith.constant dense<0.000000e+00> : vector<8x32xf32>
    %302 = tpu.matmul %297, %186, %cst_105 {dimension_numbers = #tpu.dot_dimension_numbers<[1], [0], [0], [1], [0, 0, 1, 1], [], []>} : vector<8x8xf32>, vector<8x32xf32>, vector<8x32xf32> -> vector<8x32xf32>
    %303 = arith.addf %301, %302 : vector<8x32xf32>
    %304 = math.tanh %303 : vector<8x32xf32>
    %305 = vector.extract_strided_slice %304 {offsets = [0, 0], sizes = [8, 24], strides = [1, 1]} : vector<8x32xf32> to vector<8x24xf32>
    %cst_106 = arith.constant 5.000000e-01 : f32
    %306 = vector.broadcast %cst_106 : f32 to vector<8x24xf32>
    %307 = arith.mulf %306, %305 : vector<8x24xf32>
    %cst_107 = arith.constant 5.000000e-01 : f32
    %308 = vector.broadcast %cst_107 : f32 to vector<8x24xf32>
    %309 = arith.addf %307, %308 : vector<8x24xf32>
    %310 = vector.extract_strided_slice %309 {offsets = [0, 0], sizes = [8, 8], strides = [1, 1]} : vector<8x24xf32> to vector<8x8xf32>
    %311 = vector.extract_strided_slice %309 {offsets = [0, 8], sizes = [8, 8], strides = [1, 1]} : vector<8x24xf32> to vector<8x8xf32>
    %312 = vector.extract_strided_slice %309 {offsets = [0, 16], sizes = [8, 8], strides = [1, 1]} : vector<8x24xf32> to vector<8x8xf32>
    %313 = vector.extract_strided_slice %304 {offsets = [0, 24], sizes = [8, 8], strides = [1, 1]} : vector<8x32xf32> to vector<8x8xf32>
    %314 = arith.mulf %311, %295 : vector<8x8xf32>
    %315 = arith.mulf %310, %313 : vector<8x8xf32>
    %316 = arith.addf %314, %315 : vector<8x8xf32>
    %317 = math.tanh %316 : vector<8x8xf32>
    %318 = arith.mulf %312, %317 : vector<8x8xf32>
    %c5_108 = arith.constant 5 : index
    %c0_109 = arith.constant 0 : index
    %c0_110 = arith.constant 0 : index
    %319 = vector.load %arg8[%c5_108, %c0_109, %c0_110] : memref<8x8x8xf32, #tpu.memory_space<vmem>>, vector<1x8x8xf32>
    %320 = vector.shape_cast %319 : vector<1x8x8xf32> to vector<8x8xf32>
    %321 = vector.shape_cast %318 : vector<8x8xf32> to vector<1x8x8xf32>
    tpu.vector_store %arg8[%c5_108, %c0_109, %c0_110], %321 {strides = array<i32>} : memref<8x8x8xf32, #tpu.memory_space<vmem>>, vector<1x8x8xf32>,
    %322 = vector.extract_strided_slice %193 {offsets = [48, 0], sizes = [8, 32], strides = [1, 1]} : vector<64x32xf32> to vector<8x32xf32>
    %cst_111 = arith.constant dense<0.000000e+00> : vector<8x32xf32>
    %323 = tpu.matmul %318, %186, %cst_111 {dimension_numbers = #tpu.dot_dimension_numbers<[1], [0], [0], [1], [0, 0, 1, 1], [], []>} : vector<8x8xf32>, vector<8x32xf32>, vector<8x32xf32> -> vector<8x32xf32>
    %324 = arith.addf %322, %323 : vector<8x32xf32>
    %325 = math.tanh %324 : vector<8x32xf32>
    %326 = vector.extract_strided_slice %325 {offsets = [0, 0], sizes = [8, 24], strides = [1, 1]} : vector<8x32xf32> to vector<8x24xf32>
    %cst_112 = arith.constant 5.000000e-01 : f32
    %327 = vector.broadcast %cst_112 : f32 to vector<8x24xf32>
    %328 = arith.mulf %327, %326 : vector<8x24xf32>
    %cst_113 = arith.constant 5.000000e-01 : f32
    %329 = vector.broadcast %cst_113 : f32 to vector<8x24xf32>
    %330 = arith.addf %328, %329 : vector<8x24xf32>
    %331 = vector.extract_strided_slice %330 {offsets = [0, 0], sizes = [8, 8], strides = [1, 1]} : vector<8x24xf32> to vector<8x8xf32>
    %332 = vector.extract_strided_slice %330 {offsets = [0, 8], sizes = [8, 8], strides = [1, 1]} : vector<8x24xf32> to vector<8x8xf32>
    %333 = vector.extract_strided_slice %330 {offsets = [0, 16], sizes = [8, 8], strides = [1, 1]} : vector<8x24xf32> to vector<8x8xf32>
    %334 = vector.extract_strided_slice %325 {offsets = [0, 24], sizes = [8, 8], strides = [1, 1]} : vector<8x32xf32> to vector<8x8xf32>
    %335 = arith.mulf %332, %316 : vector<8x8xf32>
    %336 = arith.mulf %331, %334 : vector<8x8xf32>
    %337 = arith.addf %335, %336 : vector<8x8xf32>
    %338 = math.tanh %337 : vector<8x8xf32>
    %339 = arith.mulf %333, %338 : vector<8x8xf32>
    %c6_114 = arith.constant 6 : index
    %c0_115 = arith.constant 0 : index
    %c0_116 = arith.constant 0 : index
    %340 = vector.load %arg8[%c6_114, %c0_115, %c0_116] : memref<8x8x8xf32, #tpu.memory_space<vmem>>, vector<1x8x8xf32>
    %341 = vector.shape_cast %340 : vector<1x8x8xf32> to vector<8x8xf32>
    %342 = vector.shape_cast %339 : vector<8x8xf32> to vector<1x8x8xf32>
    tpu.vector_store %arg8[%c6_114, %c0_115, %c0_116], %342 {strides = array<i32>} : memref<8x8x8xf32, #tpu.memory_space<vmem>>, vector<1x8x8xf32>,
    %343 = vector.extract_strided_slice %193 {offsets = [56, 0], sizes = [8, 32], strides = [1, 1]} : vector<64x32xf32> to vector<8x32xf32>
    %cst_117 = arith.constant dense<0.000000e+00> : vector<8x32xf32>
    %344 = tpu.matmul %339, %186, %cst_117 {dimension_numbers = #tpu.dot_dimension_numbers<[1], [0], [0], [1], [0, 0, 1, 1], [], []>} : vector<8x8xf32>, vector<8x32xf32>, vector<8x32xf32> -> vector<8x32xf32>
    %345 = arith.addf %343, %344 : vector<8x32xf32>
    %346 = math.tanh %345 : vector<8x32xf32>
    %347 = vector.extract_strided_slice %346 {offsets = [0, 0], sizes = [8, 24], strides = [1, 1]} : vector<8x32xf32> to vector<8x24xf32>
    %cst_118 = arith.constant 5.000000e-01 : f32
    %348 = vector.broadcast %cst_118 : f32 to vector<8x24xf32>
    %349 = arith.mulf %348, %347 : vector<8x24xf32>
    %cst_119 = arith.constant 5.000000e-01 : f32
    %350 = vector.broadcast %cst_119 : f32 to vector<8x24xf32>
    %351 = arith.addf %349, %350 : vector<8x24xf32>
    %352 = vector.extract_strided_slice %351 {offsets = [0, 0], sizes = [8, 8], strides = [1, 1]} : vector<8x24xf32> to vector<8x8xf32>
    %353 = vector.extract_strided_slice %351 {offsets = [0, 8], sizes = [8, 8], strides = [1, 1]} : vector<8x24xf32> to vector<8x8xf32>
    %354 = vector.extract_strided_slice %351 {offsets = [0, 16], sizes = [8, 8], strides = [1, 1]} : vector<8x24xf32> to vector<8x8xf32>
    %355 = vector.extract_strided_slice %346 {offsets = [0, 24], sizes = [8, 8], strides = [1, 1]} : vector<8x32xf32> to vector<8x8xf32>
    %356 = arith.mulf %353, %337 : vector<8x8xf32>
    %357 = arith.mulf %352, %355 : vector<8x8xf32>
    %358 = arith.addf %356, %357 : vector<8x8xf32>
    %359 = math.tanh %358 : vector<8x8xf32>
    %360 = arith.mulf %354, %359 : vector<8x8xf32>
    %c7_120 = arith.constant 7 : index
    %c0_121 = arith.constant 0 : index
    %c0_122 = arith.constant 0 : index
    %361 = vector.load %arg8[%c7_120, %c0_121, %c0_122] : memref<8x8x8xf32, #tpu.memory_space<vmem>>, vector<1x8x8xf32>
    %362 = vector.shape_cast %361 : vector<1x8x8xf32> to vector<8x8xf32>
    %363 = vector.shape_cast %360 : vector<8x8xf32> to vector<1x8x8xf32>
    tpu.vector_store %arg8[%c7_120, %c0_121, %c0_122], %363 {strides = array<i32>} : memref<8x8x8xf32, #tpu.memory_space<vmem>>, vector<1x8x8xf32>,
    %c2_123 = arith.constant 2 : index
    %c0_124 = arith.constant 0 : index
    %c0_125 = arith.constant 0 : index
    %364 = vector.load %arg2[%c2_123, %c0_124, %c0_125] : memref<8x8x32xf32, #tpu.memory_space<vmem>>, vector<1x8x32xf32>
    %365 = vector.shape_cast %364 : vector<1x8x32xf32> to vector<8x32xf32>
    %c2_126 = arith.constant 2 : index
    %c0_127 = arith.constant 0 : index
    %c0_128 = arith.constant 0 : index
    %366 = vector.load %arg3[%c2_126, %c0_127, %c0_128] : memref<8x8x32xf32, #tpu.memory_space<vmem>>, vector<1x8x32xf32>
    %367 = vector.shape_cast %366 : vector<1x8x32xf32> to vector<8x32xf32>
    %c2_129 = arith.constant 2 : index
    %c0_130 = arith.constant 0 : index
    %c0_131 = arith.constant 0 : index
    %368 = vector.load %arg4[%c2_129, %c0_130, %c0_131] : memref<8x1x32xf32, #tpu.memory_space<vmem>>, vector<1x1x32xf32>
    %369 = vector.shape_cast %368 : vector<1x1x32xf32> to vector<1x32xf32>
    %c0_132 = arith.constant 0 : index
    %c0_133 = arith.constant 0 : index
    %c0_134 = arith.constant 0 : index
    %370 = vector.load %arg8[%c0_132, %c0_133, %c0_134] : memref<8x8x8xf32, #tpu.memory_space<vmem>>, vector<8x8x8xf32>
    %371 = vector.shape_cast %370 : vector<8x8x8xf32> to vector<64x8xf32>
    %cst_135 = arith.constant dense<0.000000e+00> : vector<64x32xf32>
    %372 = tpu.matmul %371, %365, %cst_135 {dimension_numbers = #tpu.dot_dimension_numbers<[1], [0], [0], [1], [0, 0, 1, 1], [], []>} : vector<64x8xf32>, vector<8x32xf32>, vector<64x32xf32> -> vector<64x32xf32>
    %373 = vector.broadcast %369 : vector<1x32xf32> to vector<64x32xf32>
    %374 = arith.addf %372, %373 : vector<64x32xf32>
    %cst_136 = arith.constant 0.000000e+00 : f32
    %375 = vector.broadcast %cst_136 : f32 to vector<8x8xf32>
    %cst_137 = arith.constant 0.000000e+00 : f32
    %376 = vector.broadcast %cst_137 : f32 to vector<8x8xf32>
    %377 = vector.extract_strided_slice %374 {offsets = [0, 0], sizes = [8, 32], strides = [1, 1]} : vector<64x32xf32> to vector<8x32xf32>
    %cst_138 = arith.constant dense<0.000000e+00> : vector<8x32xf32>
    %378 = tpu.matmul %375, %367, %cst_138 {dimension_numbers = #tpu.dot_dimension_numbers<[1], [0], [0], [1], [0, 0, 1, 1], [], []>} : vector<8x8xf32>, vector<8x32xf32>, vector<8x32xf32> -> vector<8x32xf32>
    %379 = arith.addf %377, %378 : vector<8x32xf32>
    %380 = math.tanh %379 : vector<8x32xf32>
    %381 = vector.extract_strided_slice %380 {offsets = [0, 0], sizes = [8, 24], strides = [1, 1]} : vector<8x32xf32> to vector<8x24xf32>
    %cst_139 = arith.constant 5.000000e-01 : f32
    %382 = vector.broadcast %cst_139 : f32 to vector<8x24xf32>
    %383 = arith.mulf %382, %381 : vector<8x24xf32>
    %cst_140 = arith.constant 5.000000e-01 : f32
    %384 = vector.broadcast %cst_140 : f32 to vector<8x24xf32>
    %385 = arith.addf %383, %384 : vector<8x24xf32>
    %386 = vector.extract_strided_slice %385 {offsets = [0, 0], sizes = [8, 8], strides = [1, 1]} : vector<8x24xf32> to vector<8x8xf32>
    %387 = vector.extract_strided_slice %385 {offsets = [0, 8], sizes = [8, 8], strides = [1, 1]} : vector<8x24xf32> to vector<8x8xf32>
    %388 = vector.extract_strided_slice %385 {offsets = [0, 16], sizes = [8, 8], strides = [1, 1]} : vector<8x24xf32> to vector<8x8xf32>
    %389 = vector.extract_strided_slice %380 {offsets = [0, 24], sizes = [8, 8], strides = [1, 1]} : vector<8x32xf32> to vector<8x8xf32>
    %390 = arith.mulf %387, %376 : vector<8x8xf32>
    %391 = arith.mulf %386, %389 : vector<8x8xf32>
    %392 = arith.addf %390, %391 : vector<8x8xf32>
    %393 = math.tanh %392 : vector<8x8xf32>
    %394 = arith.mulf %388, %393 : vector<8x8xf32>
    %c0_141 = arith.constant 0 : index
    %c0_142 = arith.constant 0 : index
    %c0_143 = arith.constant 0 : index
    %395 = vector.load %arg8[%c0_141, %c0_142, %c0_143] : memref<8x8x8xf32, #tpu.memory_space<vmem>>, vector<1x8x8xf32>
    %396 = vector.shape_cast %395 : vector<1x8x8xf32> to vector<8x8xf32>
    %397 = vector.shape_cast %394 : vector<8x8xf32> to vector<1x8x8xf32>
    tpu.vector_store %arg8[%c0_141, %c0_142, %c0_143], %397 {strides = array<i32>} : memref<8x8x8xf32, #tpu.memory_space<vmem>>, vector<1x8x8xf32>,
    %398 = vector.extract_strided_slice %374 {offsets = [8, 0], sizes = [8, 32], strides = [1, 1]} : vector<64x32xf32> to vector<8x32xf32>
    %cst_144 = arith.constant dense<0.000000e+00> : vector<8x32xf32>
    %399 = tpu.matmul %394, %367, %cst_144 {dimension_numbers = #tpu.dot_dimension_numbers<[1], [0], [0], [1], [0, 0, 1, 1], [], []>} : vector<8x8xf32>, vector<8x32xf32>, vector<8x32xf32> -> vector<8x32xf32>
    %400 = arith.addf %398, %399 : vector<8x32xf32>
    %401 = math.tanh %400 : vector<8x32xf32>
    %402 = vector.extract_strided_slice %401 {offsets = [0, 0], sizes = [8, 24], strides = [1, 1]} : vector<8x32xf32> to vector<8x24xf32>
    %cst_145 = arith.constant 5.000000e-01 : f32
    %403 = vector.broadcast %cst_145 : f32 to vector<8x24xf32>
    %404 = arith.mulf %403, %402 : vector<8x24xf32>
    %cst_146 = arith.constant 5.000000e-01 : f32
    %405 = vector.broadcast %cst_146 : f32 to vector<8x24xf32>
    %406 = arith.addf %404, %405 : vector<8x24xf32>
    %407 = vector.extract_strided_slice %406 {offsets = [0, 0], sizes = [8, 8], strides = [1, 1]} : vector<8x24xf32> to vector<8x8xf32>
    %408 = vector.extract_strided_slice %406 {offsets = [0, 8], sizes = [8, 8], strides = [1, 1]} : vector<8x24xf32> to vector<8x8xf32>
    %409 = vector.extract_strided_slice %406 {offsets = [0, 16], sizes = [8, 8], strides = [1, 1]} : vector<8x24xf32> to vector<8x8xf32>
    %410 = vector.extract_strided_slice %401 {offsets = [0, 24], sizes = [8, 8], strides = [1, 1]} : vector<8x32xf32> to vector<8x8xf32>
    %411 = arith.mulf %408, %392 : vector<8x8xf32>
    %412 = arith.mulf %407, %410 : vector<8x8xf32>
    %413 = arith.addf %411, %412 : vector<8x8xf32>
    %414 = math.tanh %413 : vector<8x8xf32>
    %415 = arith.mulf %409, %414 : vector<8x8xf32>
    %c1_147 = arith.constant 1 : index
    %c0_148 = arith.constant 0 : index
    %c0_149 = arith.constant 0 : index
    %416 = vector.load %arg8[%c1_147, %c0_148, %c0_149] : memref<8x8x8xf32, #tpu.memory_space<vmem>>, vector<1x8x8xf32>
    %417 = vector.shape_cast %416 : vector<1x8x8xf32> to vector<8x8xf32>
    %418 = vector.shape_cast %415 : vector<8x8xf32> to vector<1x8x8xf32>
    tpu.vector_store %arg8[%c1_147, %c0_148, %c0_149], %418 {strides = array<i32>} : memref<8x8x8xf32, #tpu.memory_space<vmem>>, vector<1x8x8xf32>,
    %419 = vector.extract_strided_slice %374 {offsets = [16, 0], sizes = [8, 32], strides = [1, 1]} : vector<64x32xf32> to vector<8x32xf32>
    %cst_150 = arith.constant dense<0.000000e+00> : vector<8x32xf32>
    %420 = tpu.matmul %415, %367, %cst_150 {dimension_numbers = #tpu.dot_dimension_numbers<[1], [0], [0], [1], [0, 0, 1, 1], [], []>} : vector<8x8xf32>, vector<8x32xf32>, vector<8x32xf32> -> vector<8x32xf32>
    %421 = arith.addf %419, %420 : vector<8x32xf32>
    %422 = math.tanh %421 : vector<8x32xf32>
    %423 = vector.extract_strided_slice %422 {offsets = [0, 0], sizes = [8, 24], strides = [1, 1]} : vector<8x32xf32> to vector<8x24xf32>
    %cst_151 = arith.constant 5.000000e-01 : f32
    %424 = vector.broadcast %cst_151 : f32 to vector<8x24xf32>
    %425 = arith.mulf %424, %423 : vector<8x24xf32>
    %cst_152 = arith.constant 5.000000e-01 : f32
    %426 = vector.broadcast %cst_152 : f32 to vector<8x24xf32>
    %427 = arith.addf %425, %426 : vector<8x24xf32>
    %428 = vector.extract_strided_slice %427 {offsets = [0, 0], sizes = [8, 8], strides = [1, 1]} : vector<8x24xf32> to vector<8x8xf32>
    %429 = vector.extract_strided_slice %427 {offsets = [0, 8], sizes = [8, 8], strides = [1, 1]} : vector<8x24xf32> to vector<8x8xf32>
    %430 = vector.extract_strided_slice %427 {offsets = [0, 16], sizes = [8, 8], strides = [1, 1]} : vector<8x24xf32> to vector<8x8xf32>
    %431 = vector.extract_strided_slice %422 {offsets = [0, 24], sizes = [8, 8], strides = [1, 1]} : vector<8x32xf32> to vector<8x8xf32>
    %432 = arith.mulf %429, %413 : vector<8x8xf32>
    %433 = arith.mulf %428, %431 : vector<8x8xf32>
    %434 = arith.addf %432, %433 : vector<8x8xf32>
    %435 = math.tanh %434 : vector<8x8xf32>
    %436 = arith.mulf %430, %435 : vector<8x8xf32>
    %c2_153 = arith.constant 2 : index
    %c0_154 = arith.constant 0 : index
    %c0_155 = arith.constant 0 : index
    %437 = vector.load %arg8[%c2_153, %c0_154, %c0_155] : memref<8x8x8xf32, #tpu.memory_space<vmem>>, vector<1x8x8xf32>
    %438 = vector.shape_cast %437 : vector<1x8x8xf32> to vector<8x8xf32>
    %439 = vector.shape_cast %436 : vector<8x8xf32> to vector<1x8x8xf32>
    tpu.vector_store %arg8[%c2_153, %c0_154, %c0_155], %439 {strides = array<i32>} : memref<8x8x8xf32, #tpu.memory_space<vmem>>, vector<1x8x8xf32>,
    %440 = vector.extract_strided_slice %374 {offsets = [24, 0], sizes = [8, 32], strides = [1, 1]} : vector<64x32xf32> to vector<8x32xf32>
    %cst_156 = arith.constant dense<0.000000e+00> : vector<8x32xf32>
    %441 = tpu.matmul %436, %367, %cst_156 {dimension_numbers = #tpu.dot_dimension_numbers<[1], [0], [0], [1], [0, 0, 1, 1], [], []>} : vector<8x8xf32>, vector<8x32xf32>, vector<8x32xf32> -> vector<8x32xf32>
    %442 = arith.addf %440, %441 : vector<8x32xf32>
    %443 = math.tanh %442 : vector<8x32xf32>
    %444 = vector.extract_strided_slice %443 {offsets = [0, 0], sizes = [8, 24], strides = [1, 1]} : vector<8x32xf32> to vector<8x24xf32>
    %cst_157 = arith.constant 5.000000e-01 : f32
    %445 = vector.broadcast %cst_157 : f32 to vector<8x24xf32>
    %446 = arith.mulf %445, %444 : vector<8x24xf32>
    %cst_158 = arith.constant 5.000000e-01 : f32
    %447 = vector.broadcast %cst_158 : f32 to vector<8x24xf32>
    %448 = arith.addf %446, %447 : vector<8x24xf32>
    %449 = vector.extract_strided_slice %448 {offsets = [0, 0], sizes = [8, 8], strides = [1, 1]} : vector<8x24xf32> to vector<8x8xf32>
    %450 = vector.extract_strided_slice %448 {offsets = [0, 8], sizes = [8, 8], strides = [1, 1]} : vector<8x24xf32> to vector<8x8xf32>
    %451 = vector.extract_strided_slice %448 {offsets = [0, 16], sizes = [8, 8], strides = [1, 1]} : vector<8x24xf32> to vector<8x8xf32>
    %452 = vector.extract_strided_slice %443 {offsets = [0, 24], sizes = [8, 8], strides = [1, 1]} : vector<8x32xf32> to vector<8x8xf32>
    %453 = arith.mulf %450, %434 : vector<8x8xf32>
    %454 = arith.mulf %449, %452 : vector<8x8xf32>
    %455 = arith.addf %453, %454 : vector<8x8xf32>
    %456 = math.tanh %455 : vector<8x8xf32>
    %457 = arith.mulf %451, %456 : vector<8x8xf32>
    %c3_159 = arith.constant 3 : index
    %c0_160 = arith.constant 0 : index
    %c0_161 = arith.constant 0 : index
    %458 = vector.load %arg8[%c3_159, %c0_160, %c0_161] : memref<8x8x8xf32, #tpu.memory_space<vmem>>, vector<1x8x8xf32>
    %459 = vector.shape_cast %458 : vector<1x8x8xf32> to vector<8x8xf32>
    %460 = vector.shape_cast %457 : vector<8x8xf32> to vector<1x8x8xf32>
    tpu.vector_store %arg8[%c3_159, %c0_160, %c0_161], %460 {strides = array<i32>} : memref<8x8x8xf32, #tpu.memory_space<vmem>>, vector<1x8x8xf32>,
    %461 = vector.extract_strided_slice %374 {offsets = [32, 0], sizes = [8, 32], strides = [1, 1]} : vector<64x32xf32> to vector<8x32xf32>
    %cst_162 = arith.constant dense<0.000000e+00> : vector<8x32xf32>
    %462 = tpu.matmul %457, %367, %cst_162 {dimension_numbers = #tpu.dot_dimension_numbers<[1], [0], [0], [1], [0, 0, 1, 1], [], []>} : vector<8x8xf32>, vector<8x32xf32>, vector<8x32xf32> -> vector<8x32xf32>
    %463 = arith.addf %461, %462 : vector<8x32xf32>
    %464 = math.tanh %463 : vector<8x32xf32>
    %465 = vector.extract_strided_slice %464 {offsets = [0, 0], sizes = [8, 24], strides = [1, 1]} : vector<8x32xf32> to vector<8x24xf32>
    %cst_163 = arith.constant 5.000000e-01 : f32
    %466 = vector.broadcast %cst_163 : f32 to vector<8x24xf32>
    %467 = arith.mulf %466, %465 : vector<8x24xf32>
    %cst_164 = arith.constant 5.000000e-01 : f32
    %468 = vector.broadcast %cst_164 : f32 to vector<8x24xf32>
    %469 = arith.addf %467, %468 : vector<8x24xf32>
    %470 = vector.extract_strided_slice %469 {offsets = [0, 0], sizes = [8, 8], strides = [1, 1]} : vector<8x24xf32> to vector<8x8xf32>
    %471 = vector.extract_strided_slice %469 {offsets = [0, 8], sizes = [8, 8], strides = [1, 1]} : vector<8x24xf32> to vector<8x8xf32>
    %472 = vector.extract_strided_slice %469 {offsets = [0, 16], sizes = [8, 8], strides = [1, 1]} : vector<8x24xf32> to vector<8x8xf32>
    %473 = vector.extract_strided_slice %464 {offsets = [0, 24], sizes = [8, 8], strides = [1, 1]} : vector<8x32xf32> to vector<8x8xf32>
    %474 = arith.mulf %471, %455 : vector<8x8xf32>
    %475 = arith.mulf %470, %473 : vector<8x8xf32>
    %476 = arith.addf %474, %475 : vector<8x8xf32>
    %477 = math.tanh %476 : vector<8x8xf32>
    %478 = arith.mulf %472, %477 : vector<8x8xf32>
    %c4_165 = arith.constant 4 : index
    %c0_166 = arith.constant 0 : index
    %c0_167 = arith.constant 0 : index
    %479 = vector.load %arg8[%c4_165, %c0_166, %c0_167] : memref<8x8x8xf32, #tpu.memory_space<vmem>>, vector<1x8x8xf32>
    %480 = vector.shape_cast %479 : vector<1x8x8xf32> to vector<8x8xf32>
    %481 = vector.shape_cast %478 : vector<8x8xf32> to vector<1x8x8xf32>
    tpu.vector_store %arg8[%c4_165, %c0_166, %c0_167], %481 {strides = array<i32>} : memref<8x8x8xf32, #tpu.memory_space<vmem>>, vector<1x8x8xf32>,
    %482 = vector.extract_strided_slice %374 {offsets = [40, 0], sizes = [8, 32], strides = [1, 1]} : vector<64x32xf32> to vector<8x32xf32>
    %cst_168 = arith.constant dense<0.000000e+00> : vector<8x32xf32>
    %483 = tpu.matmul %478, %367, %cst_168 {dimension_numbers = #tpu.dot_dimension_numbers<[1], [0], [0], [1], [0, 0, 1, 1], [], []>} : vector<8x8xf32>, vector<8x32xf32>, vector<8x32xf32> -> vector<8x32xf32>
    %484 = arith.addf %482, %483 : vector<8x32xf32>
    %485 = math.tanh %484 : vector<8x32xf32>
    %486 = vector.extract_strided_slice %485 {offsets = [0, 0], sizes = [8, 24], strides = [1, 1]} : vector<8x32xf32> to vector<8x24xf32>
    %cst_169 = arith.constant 5.000000e-01 : f32
    %487 = vector.broadcast %cst_169 : f32 to vector<8x24xf32>
    %488 = arith.mulf %487, %486 : vector<8x24xf32>
    %cst_170 = arith.constant 5.000000e-01 : f32
    %489 = vector.broadcast %cst_170 : f32 to vector<8x24xf32>
    %490 = arith.addf %488, %489 : vector<8x24xf32>
    %491 = vector.extract_strided_slice %490 {offsets = [0, 0], sizes = [8, 8], strides = [1, 1]} : vector<8x24xf32> to vector<8x8xf32>
    %492 = vector.extract_strided_slice %490 {offsets = [0, 8], sizes = [8, 8], strides = [1, 1]} : vector<8x24xf32> to vector<8x8xf32>
    %493 = vector.extract_strided_slice %490 {offsets = [0, 16], sizes = [8, 8], strides = [1, 1]} : vector<8x24xf32> to vector<8x8xf32>
    %494 = vector.extract_strided_slice %485 {offsets = [0, 24], sizes = [8, 8], strides = [1, 1]} : vector<8x32xf32> to vector<8x8xf32>
    %495 = arith.mulf %492, %476 : vector<8x8xf32>
    %496 = arith.mulf %491, %494 : vector<8x8xf32>
    %497 = arith.addf %495, %496 : vector<8x8xf32>
    %498 = math.tanh %497 : vector<8x8xf32>
    %499 = arith.mulf %493, %498 : vector<8x8xf32>
    %c5_171 = arith.constant 5 : index
    %c0_172 = arith.constant 0 : index
    %c0_173 = arith.constant 0 : index
    %500 = vector.load %arg8[%c5_171, %c0_172, %c0_173] : memref<8x8x8xf32, #tpu.memory_space<vmem>>, vector<1x8x8xf32>
    %501 = vector.shape_cast %500 : vector<1x8x8xf32> to vector<8x8xf32>
    %502 = vector.shape_cast %499 : vector<8x8xf32> to vector<1x8x8xf32>
    tpu.vector_store %arg8[%c5_171, %c0_172, %c0_173], %502 {strides = array<i32>} : memref<8x8x8xf32, #tpu.memory_space<vmem>>, vector<1x8x8xf32>,
    %503 = vector.extract_strided_slice %374 {offsets = [48, 0], sizes = [8, 32], strides = [1, 1]} : vector<64x32xf32> to vector<8x32xf32>
    %cst_174 = arith.constant dense<0.000000e+00> : vector<8x32xf32>
    %504 = tpu.matmul %499, %367, %cst_174 {dimension_numbers = #tpu.dot_dimension_numbers<[1], [0], [0], [1], [0, 0, 1, 1], [], []>} : vector<8x8xf32>, vector<8x32xf32>, vector<8x32xf32> -> vector<8x32xf32>
    %505 = arith.addf %503, %504 : vector<8x32xf32>
    %506 = math.tanh %505 : vector<8x32xf32>
    %507 = vector.extract_strided_slice %506 {offsets = [0, 0], sizes = [8, 24], strides = [1, 1]} : vector<8x32xf32> to vector<8x24xf32>
    %cst_175 = arith.constant 5.000000e-01 : f32
    %508 = vector.broadcast %cst_175 : f32 to vector<8x24xf32>
    %509 = arith.mulf %508, %507 : vector<8x24xf32>
    %cst_176 = arith.constant 5.000000e-01 : f32
    %510 = vector.broadcast %cst_176 : f32 to vector<8x24xf32>
    %511 = arith.addf %509, %510 : vector<8x24xf32>
    %512 = vector.extract_strided_slice %511 {offsets = [0, 0], sizes = [8, 8], strides = [1, 1]} : vector<8x24xf32> to vector<8x8xf32>
    %513 = vector.extract_strided_slice %511 {offsets = [0, 8], sizes = [8, 8], strides = [1, 1]} : vector<8x24xf32> to vector<8x8xf32>
    %514 = vector.extract_strided_slice %511 {offsets = [0, 16], sizes = [8, 8], strides = [1, 1]} : vector<8x24xf32> to vector<8x8xf32>
    %515 = vector.extract_strided_slice %506 {offsets = [0, 24], sizes = [8, 8], strides = [1, 1]} : vector<8x32xf32> to vector<8x8xf32>
    %516 = arith.mulf %513, %497 : vector<8x8xf32>
    %517 = arith.mulf %512, %515 : vector<8x8xf32>
    %518 = arith.addf %516, %517 : vector<8x8xf32>
    %519 = math.tanh %518 : vector<8x8xf32>
    %520 = arith.mulf %514, %519 : vector<8x8xf32>
    %c6_177 = arith.constant 6 : index
    %c0_178 = arith.constant 0 : index
    %c0_179 = arith.constant 0 : index
    %521 = vector.load %arg8[%c6_177, %c0_178, %c0_179] : memref<8x8x8xf32, #tpu.memory_space<vmem>>, vector<1x8x8xf32>
    %522 = vector.shape_cast %521 : vector<1x8x8xf32> to vector<8x8xf32>
    %523 = vector.shape_cast %520 : vector<8x8xf32> to vector<1x8x8xf32>
    tpu.vector_store %arg8[%c6_177, %c0_178, %c0_179], %523 {strides = array<i32>} : memref<8x8x8xf32, #tpu.memory_space<vmem>>, vector<1x8x8xf32>,
    %524 = vector.extract_strided_slice %374 {offsets = [56, 0], sizes = [8, 32], strides = [1, 1]} : vector<64x32xf32> to vector<8x32xf32>
    %cst_180 = arith.constant dense<0.000000e+00> : vector<8x32xf32>
    %525 = tpu.matmul %520, %367, %cst_180 {dimension_numbers = #tpu.dot_dimension_numbers<[1], [0], [0], [1], [0, 0, 1, 1], [], []>} : vector<8x8xf32>, vector<8x32xf32>, vector<8x32xf32> -> vector<8x32xf32>
    %526 = arith.addf %524, %525 : vector<8x32xf32>
    %527 = math.tanh %526 : vector<8x32xf32>
    %528 = vector.extract_strided_slice %527 {offsets = [0, 0], sizes = [8, 24], strides = [1, 1]} : vector<8x32xf32> to vector<8x24xf32>
    %cst_181 = arith.constant 5.000000e-01 : f32
    %529 = vector.broadcast %cst_181 : f32 to vector<8x24xf32>
    %530 = arith.mulf %529, %528 : vector<8x24xf32>
    %cst_182 = arith.constant 5.000000e-01 : f32
    %531 = vector.broadcast %cst_182 : f32 to vector<8x24xf32>
    %532 = arith.addf %530, %531 : vector<8x24xf32>
    %533 = vector.extract_strided_slice %532 {offsets = [0, 0], sizes = [8, 8], strides = [1, 1]} : vector<8x24xf32> to vector<8x8xf32>
    %534 = vector.extract_strided_slice %532 {offsets = [0, 8], sizes = [8, 8], strides = [1, 1]} : vector<8x24xf32> to vector<8x8xf32>
    %535 = vector.extract_strided_slice %532 {offsets = [0, 16], sizes = [8, 8], strides = [1, 1]} : vector<8x24xf32> to vector<8x8xf32>
    %536 = vector.extract_strided_slice %527 {offsets = [0, 24], sizes = [8, 8], strides = [1, 1]} : vector<8x32xf32> to vector<8x8xf32>
    %537 = arith.mulf %534, %518 : vector<8x8xf32>
    %538 = arith.mulf %533, %536 : vector<8x8xf32>
    %539 = arith.addf %537, %538 : vector<8x8xf32>
    %540 = math.tanh %539 : vector<8x8xf32>
    %541 = arith.mulf %535, %540 : vector<8x8xf32>
    %c7_183 = arith.constant 7 : index
    %c0_184 = arith.constant 0 : index
    %c0_185 = arith.constant 0 : index
    %542 = vector.load %arg8[%c7_183, %c0_184, %c0_185] : memref<8x8x8xf32, #tpu.memory_space<vmem>>, vector<1x8x8xf32>
    %543 = vector.shape_cast %542 : vector<1x8x8xf32> to vector<8x8xf32>
    %544 = vector.shape_cast %541 : vector<8x8xf32> to vector<1x8x8xf32>
    tpu.vector_store %arg8[%c7_183, %c0_184, %c0_185], %544 {strides = array<i32>} : memref<8x8x8xf32, #tpu.memory_space<vmem>>, vector<1x8x8xf32>,
    %c3_186 = arith.constant 3 : index
    %c0_187 = arith.constant 0 : index
    %c0_188 = arith.constant 0 : index
    %545 = vector.load %arg2[%c3_186, %c0_187, %c0_188] : memref<8x8x32xf32, #tpu.memory_space<vmem>>, vector<1x8x32xf32>
    %546 = vector.shape_cast %545 : vector<1x8x32xf32> to vector<8x32xf32>
    %c3_189 = arith.constant 3 : index
    %c0_190 = arith.constant 0 : index
    %c0_191 = arith.constant 0 : index
    %547 = vector.load %arg3[%c3_189, %c0_190, %c0_191] : memref<8x8x32xf32, #tpu.memory_space<vmem>>, vector<1x8x32xf32>
    %548 = vector.shape_cast %547 : vector<1x8x32xf32> to vector<8x32xf32>
    %c3_192 = arith.constant 3 : index
    %c0_193 = arith.constant 0 : index
    %c0_194 = arith.constant 0 : index
    %549 = vector.load %arg4[%c3_192, %c0_193, %c0_194] : memref<8x1x32xf32, #tpu.memory_space<vmem>>, vector<1x1x32xf32>
    %550 = vector.shape_cast %549 : vector<1x1x32xf32> to vector<1x32xf32>
    %c0_195 = arith.constant 0 : index
    %c0_196 = arith.constant 0 : index
    %c0_197 = arith.constant 0 : index
    %551 = vector.load %arg8[%c0_195, %c0_196, %c0_197] : memref<8x8x8xf32, #tpu.memory_space<vmem>>, vector<8x8x8xf32>
    %552 = vector.shape_cast %551 : vector<8x8x8xf32> to vector<64x8xf32>
    %cst_198 = arith.constant dense<0.000000e+00> : vector<64x32xf32>
    %553 = tpu.matmul %552, %546, %cst_198 {dimension_numbers = #tpu.dot_dimension_numbers<[1], [0], [0], [1], [0, 0, 1, 1], [], []>} : vector<64x8xf32>, vector<8x32xf32>, vector<64x32xf32> -> vector<64x32xf32>
    %554 = vector.broadcast %550 : vector<1x32xf32> to vector<64x32xf32>
    %555 = arith.addf %553, %554 : vector<64x32xf32>
    %cst_199 = arith.constant 0.000000e+00 : f32
    %556 = vector.broadcast %cst_199 : f32 to vector<8x8xf32>
    %cst_200 = arith.constant 0.000000e+00 : f32
    %557 = vector.broadcast %cst_200 : f32 to vector<8x8xf32>
    %558 = vector.extract_strided_slice %555 {offsets = [0, 0], sizes = [8, 32], strides = [1, 1]} : vector<64x32xf32> to vector<8x32xf32>
    %cst_201 = arith.constant dense<0.000000e+00> : vector<8x32xf32>
    %559 = tpu.matmul %556, %548, %cst_201 {dimension_numbers = #tpu.dot_dimension_numbers<[1], [0], [0], [1], [0, 0, 1, 1], [], []>} : vector<8x8xf32>, vector<8x32xf32>, vector<8x32xf32> -> vector<8x32xf32>
    %560 = arith.addf %558, %559 : vector<8x32xf32>
    %561 = math.tanh %560 : vector<8x32xf32>
    %562 = vector.extract_strided_slice %561 {offsets = [0, 0], sizes = [8, 24], strides = [1, 1]} : vector<8x32xf32> to vector<8x24xf32>
    %cst_202 = arith.constant 5.000000e-01 : f32
    %563 = vector.broadcast %cst_202 : f32 to vector<8x24xf32>
    %564 = arith.mulf %563, %562 : vector<8x24xf32>
    %cst_203 = arith.constant 5.000000e-01 : f32
    %565 = vector.broadcast %cst_203 : f32 to vector<8x24xf32>
    %566 = arith.addf %564, %565 : vector<8x24xf32>
    %567 = vector.extract_strided_slice %566 {offsets = [0, 0], sizes = [8, 8], strides = [1, 1]} : vector<8x24xf32> to vector<8x8xf32>
    %568 = vector.extract_strided_slice %566 {offsets = [0, 8], sizes = [8, 8], strides = [1, 1]} : vector<8x24xf32> to vector<8x8xf32>
    %569 = vector.extract_strided_slice %566 {offsets = [0, 16], sizes = [8, 8], strides = [1, 1]} : vector<8x24xf32> to vector<8x8xf32>
    %570 = vector.extract_strided_slice %561 {offsets = [0, 24], sizes = [8, 8], strides = [1, 1]} : vector<8x32xf32> to vector<8x8xf32>
    %571 = arith.mulf %568, %557 : vector<8x8xf32>
    %572 = arith.mulf %567, %570 : vector<8x8xf32>
    %573 = arith.addf %571, %572 : vector<8x8xf32>
    %574 = math.tanh %573 : vector<8x8xf32>
    %575 = arith.mulf %569, %574 : vector<8x8xf32>
    %c0_204 = arith.constant 0 : index
    %c0_205 = arith.constant 0 : index
    %c0_206 = arith.constant 0 : index
    %576 = vector.load %arg8[%c0_204, %c0_205, %c0_206] : memref<8x8x8xf32, #tpu.memory_space<vmem>>, vector<1x8x8xf32>
    %577 = vector.shape_cast %576 : vector<1x8x8xf32> to vector<8x8xf32>
    %578 = vector.shape_cast %575 : vector<8x8xf32> to vector<1x8x8xf32>
    tpu.vector_store %arg8[%c0_204, %c0_205, %c0_206], %578 {strides = array<i32>} : memref<8x8x8xf32, #tpu.memory_space<vmem>>, vector<1x8x8xf32>,
    %579 = vector.extract_strided_slice %555 {offsets = [8, 0], sizes = [8, 32], strides = [1, 1]} : vector<64x32xf32> to vector<8x32xf32>
    %cst_207 = arith.constant dense<0.000000e+00> : vector<8x32xf32>
    %580 = tpu.matmul %575, %548, %cst_207 {dimension_numbers = #tpu.dot_dimension_numbers<[1], [0], [0], [1], [0, 0, 1, 1], [], []>} : vector<8x8xf32>, vector<8x32xf32>, vector<8x32xf32> -> vector<8x32xf32>
    %581 = arith.addf %579, %580 : vector<8x32xf32>
    %582 = math.tanh %581 : vector<8x32xf32>
    %583 = vector.extract_strided_slice %582 {offsets = [0, 0], sizes = [8, 24], strides = [1, 1]} : vector<8x32xf32> to vector<8x24xf32>
    %cst_208 = arith.constant 5.000000e-01 : f32
    %584 = vector.broadcast %cst_208 : f32 to vector<8x24xf32>
    %585 = arith.mulf %584, %583 : vector<8x24xf32>
    %cst_209 = arith.constant 5.000000e-01 : f32
    %586 = vector.broadcast %cst_209 : f32 to vector<8x24xf32>
    %587 = arith.addf %585, %586 : vector<8x24xf32>
    %588 = vector.extract_strided_slice %587 {offsets = [0, 0], sizes = [8, 8], strides = [1, 1]} : vector<8x24xf32> to vector<8x8xf32>
    %589 = vector.extract_strided_slice %587 {offsets = [0, 8], sizes = [8, 8], strides = [1, 1]} : vector<8x24xf32> to vector<8x8xf32>
    %590 = vector.extract_strided_slice %587 {offsets = [0, 16], sizes = [8, 8], strides = [1, 1]} : vector<8x24xf32> to vector<8x8xf32>
    %591 = vector.extract_strided_slice %582 {offsets = [0, 24], sizes = [8, 8], strides = [1, 1]} : vector<8x32xf32> to vector<8x8xf32>
    %592 = arith.mulf %589, %573 : vector<8x8xf32>
    %593 = arith.mulf %588, %591 : vector<8x8xf32>
    %594 = arith.addf %592, %593 : vector<8x8xf32>
    %595 = math.tanh %594 : vector<8x8xf32>
    %596 = arith.mulf %590, %595 : vector<8x8xf32>
    %c1_210 = arith.constant 1 : index
    %c0_211 = arith.constant 0 : index
    %c0_212 = arith.constant 0 : index
    %597 = vector.load %arg8[%c1_210, %c0_211, %c0_212] : memref<8x8x8xf32, #tpu.memory_space<vmem>>, vector<1x8x8xf32>
    %598 = vector.shape_cast %597 : vector<1x8x8xf32> to vector<8x8xf32>
    %599 = vector.shape_cast %596 : vector<8x8xf32> to vector<1x8x8xf32>
    tpu.vector_store %arg8[%c1_210, %c0_211, %c0_212], %599 {strides = array<i32>} : memref<8x8x8xf32, #tpu.memory_space<vmem>>, vector<1x8x8xf32>,
    %600 = vector.extract_strided_slice %555 {offsets = [16, 0], sizes = [8, 32], strides = [1, 1]} : vector<64x32xf32> to vector<8x32xf32>
    %cst_213 = arith.constant dense<0.000000e+00> : vector<8x32xf32>
    %601 = tpu.matmul %596, %548, %cst_213 {dimension_numbers = #tpu.dot_dimension_numbers<[1], [0], [0], [1], [0, 0, 1, 1], [], []>} : vector<8x8xf32>, vector<8x32xf32>, vector<8x32xf32> -> vector<8x32xf32>
    %602 = arith.addf %600, %601 : vector<8x32xf32>
    %603 = math.tanh %602 : vector<8x32xf32>
    %604 = vector.extract_strided_slice %603 {offsets = [0, 0], sizes = [8, 24], strides = [1, 1]} : vector<8x32xf32> to vector<8x24xf32>
    %cst_214 = arith.constant 5.000000e-01 : f32
    %605 = vector.broadcast %cst_214 : f32 to vector<8x24xf32>
    %606 = arith.mulf %605, %604 : vector<8x24xf32>
    %cst_215 = arith.constant 5.000000e-01 : f32
    %607 = vector.broadcast %cst_215 : f32 to vector<8x24xf32>
    %608 = arith.addf %606, %607 : vector<8x24xf32>
    %609 = vector.extract_strided_slice %608 {offsets = [0, 0], sizes = [8, 8], strides = [1, 1]} : vector<8x24xf32> to vector<8x8xf32>
    %610 = vector.extract_strided_slice %608 {offsets = [0, 8], sizes = [8, 8], strides = [1, 1]} : vector<8x24xf32> to vector<8x8xf32>
    %611 = vector.extract_strided_slice %608 {offsets = [0, 16], sizes = [8, 8], strides = [1, 1]} : vector<8x24xf32> to vector<8x8xf32>
    %612 = vector.extract_strided_slice %603 {offsets = [0, 24], sizes = [8, 8], strides = [1, 1]} : vector<8x32xf32> to vector<8x8xf32>
    %613 = arith.mulf %610, %594 : vector<8x8xf32>
    %614 = arith.mulf %609, %612 : vector<8x8xf32>
    %615 = arith.addf %613, %614 : vector<8x8xf32>
    %616 = math.tanh %615 : vector<8x8xf32>
    %617 = arith.mulf %611, %616 : vector<8x8xf32>
    %c2_216 = arith.constant 2 : index
    %c0_217 = arith.constant 0 : index
    %c0_218 = arith.constant 0 : index
    %618 = vector.load %arg8[%c2_216, %c0_217, %c0_218] : memref<8x8x8xf32, #tpu.memory_space<vmem>>, vector<1x8x8xf32>
    %619 = vector.shape_cast %618 : vector<1x8x8xf32> to vector<8x8xf32>
    %620 = vector.shape_cast %617 : vector<8x8xf32> to vector<1x8x8xf32>
    tpu.vector_store %arg8[%c2_216, %c0_217, %c0_218], %620 {strides = array<i32>} : memref<8x8x8xf32, #tpu.memory_space<vmem>>, vector<1x8x8xf32>,
    %621 = vector.extract_strided_slice %555 {offsets = [24, 0], sizes = [8, 32], strides = [1, 1]} : vector<64x32xf32> to vector<8x32xf32>
    %cst_219 = arith.constant dense<0.000000e+00> : vector<8x32xf32>
    %622 = tpu.matmul %617, %548, %cst_219 {dimension_numbers = #tpu.dot_dimension_numbers<[1], [0], [0], [1], [0, 0, 1, 1], [], []>} : vector<8x8xf32>, vector<8x32xf32>, vector<8x32xf32> -> vector<8x32xf32>
    %623 = arith.addf %621, %622 : vector<8x32xf32>
    %624 = math.tanh %623 : vector<8x32xf32>
    %625 = vector.extract_strided_slice %624 {offsets = [0, 0], sizes = [8, 24], strides = [1, 1]} : vector<8x32xf32> to vector<8x24xf32>
    %cst_220 = arith.constant 5.000000e-01 : f32
    %626 = vector.broadcast %cst_220 : f32 to vector<8x24xf32>
    %627 = arith.mulf %626, %625 : vector<8x24xf32>
    %cst_221 = arith.constant 5.000000e-01 : f32
    %628 = vector.broadcast %cst_221 : f32 to vector<8x24xf32>
    %629 = arith.addf %627, %628 : vector<8x24xf32>
    %630 = vector.extract_strided_slice %629 {offsets = [0, 0], sizes = [8, 8], strides = [1, 1]} : vector<8x24xf32> to vector<8x8xf32>
    %631 = vector.extract_strided_slice %629 {offsets = [0, 8], sizes = [8, 8], strides = [1, 1]} : vector<8x24xf32> to vector<8x8xf32>
    %632 = vector.extract_strided_slice %629 {offsets = [0, 16], sizes = [8, 8], strides = [1, 1]} : vector<8x24xf32> to vector<8x8xf32>
    %633 = vector.extract_strided_slice %624 {offsets = [0, 24], sizes = [8, 8], strides = [1, 1]} : vector<8x32xf32> to vector<8x8xf32>
    %634 = arith.mulf %631, %615 : vector<8x8xf32>
    %635 = arith.mulf %630, %633 : vector<8x8xf32>
    %636 = arith.addf %634, %635 : vector<8x8xf32>
    %637 = math.tanh %636 : vector<8x8xf32>
    %638 = arith.mulf %632, %637 : vector<8x8xf32>
    %c3_222 = arith.constant 3 : index
    %c0_223 = arith.constant 0 : index
    %c0_224 = arith.constant 0 : index
    %639 = vector.load %arg8[%c3_222, %c0_223, %c0_224] : memref<8x8x8xf32, #tpu.memory_space<vmem>>, vector<1x8x8xf32>
    %640 = vector.shape_cast %639 : vector<1x8x8xf32> to vector<8x8xf32>
    %641 = vector.shape_cast %638 : vector<8x8xf32> to vector<1x8x8xf32>
    tpu.vector_store %arg8[%c3_222, %c0_223, %c0_224], %641 {strides = array<i32>} : memref<8x8x8xf32, #tpu.memory_space<vmem>>, vector<1x8x8xf32>,
    %642 = vector.extract_strided_slice %555 {offsets = [32, 0], sizes = [8, 32], strides = [1, 1]} : vector<64x32xf32> to vector<8x32xf32>
    %cst_225 = arith.constant dense<0.000000e+00> : vector<8x32xf32>
    %643 = tpu.matmul %638, %548, %cst_225 {dimension_numbers = #tpu.dot_dimension_numbers<[1], [0], [0], [1], [0, 0, 1, 1], [], []>} : vector<8x8xf32>, vector<8x32xf32>, vector<8x32xf32> -> vector<8x32xf32>
    %644 = arith.addf %642, %643 : vector<8x32xf32>
    %645 = math.tanh %644 : vector<8x32xf32>
    %646 = vector.extract_strided_slice %645 {offsets = [0, 0], sizes = [8, 24], strides = [1, 1]} : vector<8x32xf32> to vector<8x24xf32>
    %cst_226 = arith.constant 5.000000e-01 : f32
    %647 = vector.broadcast %cst_226 : f32 to vector<8x24xf32>
    %648 = arith.mulf %647, %646 : vector<8x24xf32>
    %cst_227 = arith.constant 5.000000e-01 : f32
    %649 = vector.broadcast %cst_227 : f32 to vector<8x24xf32>
    %650 = arith.addf %648, %649 : vector<8x24xf32>
    %651 = vector.extract_strided_slice %650 {offsets = [0, 0], sizes = [8, 8], strides = [1, 1]} : vector<8x24xf32> to vector<8x8xf32>
    %652 = vector.extract_strided_slice %650 {offsets = [0, 8], sizes = [8, 8], strides = [1, 1]} : vector<8x24xf32> to vector<8x8xf32>
    %653 = vector.extract_strided_slice %650 {offsets = [0, 16], sizes = [8, 8], strides = [1, 1]} : vector<8x24xf32> to vector<8x8xf32>
    %654 = vector.extract_strided_slice %645 {offsets = [0, 24], sizes = [8, 8], strides = [1, 1]} : vector<8x32xf32> to vector<8x8xf32>
    %655 = arith.mulf %652, %636 : vector<8x8xf32>
    %656 = arith.mulf %651, %654 : vector<8x8xf32>
    %657 = arith.addf %655, %656 : vector<8x8xf32>
    %658 = math.tanh %657 : vector<8x8xf32>
    %659 = arith.mulf %653, %658 : vector<8x8xf32>
    %c4_228 = arith.constant 4 : index
    %c0_229 = arith.constant 0 : index
    %c0_230 = arith.constant 0 : index
    %660 = vector.load %arg8[%c4_228, %c0_229, %c0_230] : memref<8x8x8xf32, #tpu.memory_space<vmem>>, vector<1x8x8xf32>
    %661 = vector.shape_cast %660 : vector<1x8x8xf32> to vector<8x8xf32>
    %662 = vector.shape_cast %659 : vector<8x8xf32> to vector<1x8x8xf32>
    tpu.vector_store %arg8[%c4_228, %c0_229, %c0_230], %662 {strides = array<i32>} : memref<8x8x8xf32, #tpu.memory_space<vmem>>, vector<1x8x8xf32>,
    %663 = vector.extract_strided_slice %555 {offsets = [40, 0], sizes = [8, 32], strides = [1, 1]} : vector<64x32xf32> to vector<8x32xf32>
    %cst_231 = arith.constant dense<0.000000e+00> : vector<8x32xf32>
    %664 = tpu.matmul %659, %548, %cst_231 {dimension_numbers = #tpu.dot_dimension_numbers<[1], [0], [0], [1], [0, 0, 1, 1], [], []>} : vector<8x8xf32>, vector<8x32xf32>, vector<8x32xf32> -> vector<8x32xf32>
    %665 = arith.addf %663, %664 : vector<8x32xf32>
    %666 = math.tanh %665 : vector<8x32xf32>
    %667 = vector.extract_strided_slice %666 {offsets = [0, 0], sizes = [8, 24], strides = [1, 1]} : vector<8x32xf32> to vector<8x24xf32>
    %cst_232 = arith.constant 5.000000e-01 : f32
    %668 = vector.broadcast %cst_232 : f32 to vector<8x24xf32>
    %669 = arith.mulf %668, %667 : vector<8x24xf32>
    %cst_233 = arith.constant 5.000000e-01 : f32
    %670 = vector.broadcast %cst_233 : f32 to vector<8x24xf32>
    %671 = arith.addf %669, %670 : vector<8x24xf32>
    %672 = vector.extract_strided_slice %671 {offsets = [0, 0], sizes = [8, 8], strides = [1, 1]} : vector<8x24xf32> to vector<8x8xf32>
    %673 = vector.extract_strided_slice %671 {offsets = [0, 8], sizes = [8, 8], strides = [1, 1]} : vector<8x24xf32> to vector<8x8xf32>
    %674 = vector.extract_strided_slice %671 {offsets = [0, 16], sizes = [8, 8], strides = [1, 1]} : vector<8x24xf32> to vector<8x8xf32>
    %675 = vector.extract_strided_slice %666 {offsets = [0, 24], sizes = [8, 8], strides = [1, 1]} : vector<8x32xf32> to vector<8x8xf32>
    %676 = arith.mulf %673, %657 : vector<8x8xf32>
    %677 = arith.mulf %672, %675 : vector<8x8xf32>
    %678 = arith.addf %676, %677 : vector<8x8xf32>
    %679 = math.tanh %678 : vector<8x8xf32>
    %680 = arith.mulf %674, %679 : vector<8x8xf32>
    %c5_234 = arith.constant 5 : index
    %c0_235 = arith.constant 0 : index
    %c0_236 = arith.constant 0 : index
    %681 = vector.load %arg8[%c5_234, %c0_235, %c0_236] : memref<8x8x8xf32, #tpu.memory_space<vmem>>, vector<1x8x8xf32>
    %682 = vector.shape_cast %681 : vector<1x8x8xf32> to vector<8x8xf32>
    %683 = vector.shape_cast %680 : vector<8x8xf32> to vector<1x8x8xf32>
    tpu.vector_store %arg8[%c5_234, %c0_235, %c0_236], %683 {strides = array<i32>} : memref<8x8x8xf32, #tpu.memory_space<vmem>>, vector<1x8x8xf32>,
    %684 = vector.extract_strided_slice %555 {offsets = [48, 0], sizes = [8, 32], strides = [1, 1]} : vector<64x32xf32> to vector<8x32xf32>
    %cst_237 = arith.constant dense<0.000000e+00> : vector<8x32xf32>
    %685 = tpu.matmul %680, %548, %cst_237 {dimension_numbers = #tpu.dot_dimension_numbers<[1], [0], [0], [1], [0, 0, 1, 1], [], []>} : vector<8x8xf32>, vector<8x32xf32>, vector<8x32xf32> -> vector<8x32xf32>
    %686 = arith.addf %684, %685 : vector<8x32xf32>
    %687 = math.tanh %686 : vector<8x32xf32>
    %688 = vector.extract_strided_slice %687 {offsets = [0, 0], sizes = [8, 24], strides = [1, 1]} : vector<8x32xf32> to vector<8x24xf32>
    %cst_238 = arith.constant 5.000000e-01 : f32
    %689 = vector.broadcast %cst_238 : f32 to vector<8x24xf32>
    %690 = arith.mulf %689, %688 : vector<8x24xf32>
    %cst_239 = arith.constant 5.000000e-01 : f32
    %691 = vector.broadcast %cst_239 : f32 to vector<8x24xf32>
    %692 = arith.addf %690, %691 : vector<8x24xf32>
    %693 = vector.extract_strided_slice %692 {offsets = [0, 0], sizes = [8, 8], strides = [1, 1]} : vector<8x24xf32> to vector<8x8xf32>
    %694 = vector.extract_strided_slice %692 {offsets = [0, 8], sizes = [8, 8], strides = [1, 1]} : vector<8x24xf32> to vector<8x8xf32>
    %695 = vector.extract_strided_slice %692 {offsets = [0, 16], sizes = [8, 8], strides = [1, 1]} : vector<8x24xf32> to vector<8x8xf32>
    %696 = vector.extract_strided_slice %687 {offsets = [0, 24], sizes = [8, 8], strides = [1, 1]} : vector<8x32xf32> to vector<8x8xf32>
    %697 = arith.mulf %694, %678 : vector<8x8xf32>
    %698 = arith.mulf %693, %696 : vector<8x8xf32>
    %699 = arith.addf %697, %698 : vector<8x8xf32>
    %700 = math.tanh %699 : vector<8x8xf32>
    %701 = arith.mulf %695, %700 : vector<8x8xf32>
    %c6_240 = arith.constant 6 : index
    %c0_241 = arith.constant 0 : index
    %c0_242 = arith.constant 0 : index
    %702 = vector.load %arg8[%c6_240, %c0_241, %c0_242] : memref<8x8x8xf32, #tpu.memory_space<vmem>>, vector<1x8x8xf32>
    %703 = vector.shape_cast %702 : vector<1x8x8xf32> to vector<8x8xf32>
    %704 = vector.shape_cast %701 : vector<8x8xf32> to vector<1x8x8xf32>
    tpu.vector_store %arg8[%c6_240, %c0_241, %c0_242], %704 {strides = array<i32>} : memref<8x8x8xf32, #tpu.memory_space<vmem>>, vector<1x8x8xf32>,
    %705 = vector.extract_strided_slice %555 {offsets = [56, 0], sizes = [8, 32], strides = [1, 1]} : vector<64x32xf32> to vector<8x32xf32>
    %cst_243 = arith.constant dense<0.000000e+00> : vector<8x32xf32>
    %706 = tpu.matmul %701, %548, %cst_243 {dimension_numbers = #tpu.dot_dimension_numbers<[1], [0], [0], [1], [0, 0, 1, 1], [], []>} : vector<8x8xf32>, vector<8x32xf32>, vector<8x32xf32> -> vector<8x32xf32>
    %707 = arith.addf %705, %706 : vector<8x32xf32>
    %708 = math.tanh %707 : vector<8x32xf32>
    %709 = vector.extract_strided_slice %708 {offsets = [0, 0], sizes = [8, 24], strides = [1, 1]} : vector<8x32xf32> to vector<8x24xf32>
    %cst_244 = arith.constant 5.000000e-01 : f32
    %710 = vector.broadcast %cst_244 : f32 to vector<8x24xf32>
    %711 = arith.mulf %710, %709 : vector<8x24xf32>
    %cst_245 = arith.constant 5.000000e-01 : f32
    %712 = vector.broadcast %cst_245 : f32 to vector<8x24xf32>
    %713 = arith.addf %711, %712 : vector<8x24xf32>
    %714 = vector.extract_strided_slice %713 {offsets = [0, 0], sizes = [8, 8], strides = [1, 1]} : vector<8x24xf32> to vector<8x8xf32>
    %715 = vector.extract_strided_slice %713 {offsets = [0, 8], sizes = [8, 8], strides = [1, 1]} : vector<8x24xf32> to vector<8x8xf32>
    %716 = vector.extract_strided_slice %713 {offsets = [0, 16], sizes = [8, 8], strides = [1, 1]} : vector<8x24xf32> to vector<8x8xf32>
    %717 = vector.extract_strided_slice %708 {offsets = [0, 24], sizes = [8, 8], strides = [1, 1]} : vector<8x32xf32> to vector<8x8xf32>
    %718 = arith.mulf %715, %699 : vector<8x8xf32>
    %719 = arith.mulf %714, %717 : vector<8x8xf32>
    %720 = arith.addf %718, %719 : vector<8x8xf32>
    %721 = math.tanh %720 : vector<8x8xf32>
    %722 = arith.mulf %716, %721 : vector<8x8xf32>
    %c7_246 = arith.constant 7 : index
    %c0_247 = arith.constant 0 : index
    %c0_248 = arith.constant 0 : index
    %723 = vector.load %arg8[%c7_246, %c0_247, %c0_248] : memref<8x8x8xf32, #tpu.memory_space<vmem>>, vector<1x8x8xf32>
    %724 = vector.shape_cast %723 : vector<1x8x8xf32> to vector<8x8xf32>
    %725 = vector.shape_cast %722 : vector<8x8xf32> to vector<1x8x8xf32>
    tpu.vector_store %arg8[%c7_246, %c0_247, %c0_248], %725 {strides = array<i32>} : memref<8x8x8xf32, #tpu.memory_space<vmem>>, vector<1x8x8xf32>,
    %c4_249 = arith.constant 4 : index
    %c0_250 = arith.constant 0 : index
    %c0_251 = arith.constant 0 : index
    %726 = vector.load %arg2[%c4_249, %c0_250, %c0_251] : memref<8x8x32xf32, #tpu.memory_space<vmem>>, vector<1x8x32xf32>
    %727 = vector.shape_cast %726 : vector<1x8x32xf32> to vector<8x32xf32>
    %c4_252 = arith.constant 4 : index
    %c0_253 = arith.constant 0 : index
    %c0_254 = arith.constant 0 : index
    %728 = vector.load %arg3[%c4_252, %c0_253, %c0_254] : memref<8x8x32xf32, #tpu.memory_space<vmem>>, vector<1x8x32xf32>
    %729 = vector.shape_cast %728 : vector<1x8x32xf32> to vector<8x32xf32>
    %c4_255 = arith.constant 4 : index
    %c0_256 = arith.constant 0 : index
    %c0_257 = arith.constant 0 : index
    %730 = vector.load %arg4[%c4_255, %c0_256, %c0_257] : memref<8x1x32xf32, #tpu.memory_space<vmem>>, vector<1x1x32xf32>
    %731 = vector.shape_cast %730 : vector<1x1x32xf32> to vector<1x32xf32>
    %c0_258 = arith.constant 0 : index
    %c0_259 = arith.constant 0 : index
    %c0_260 = arith.constant 0 : index
    %732 = vector.load %arg8[%c0_258, %c0_259, %c0_260] : memref<8x8x8xf32, #tpu.memory_space<vmem>>, vector<8x8x8xf32>
    %733 = vector.shape_cast %732 : vector<8x8x8xf32> to vector<64x8xf32>
    %cst_261 = arith.constant dense<0.000000e+00> : vector<64x32xf32>
    %734 = tpu.matmul %733, %727, %cst_261 {dimension_numbers = #tpu.dot_dimension_numbers<[1], [0], [0], [1], [0, 0, 1, 1], [], []>} : vector<64x8xf32>, vector<8x32xf32>, vector<64x32xf32> -> vector<64x32xf32>
    %735 = vector.broadcast %731 : vector<1x32xf32> to vector<64x32xf32>
    %736 = arith.addf %734, %735 : vector<64x32xf32>
    %cst_262 = arith.constant 0.000000e+00 : f32
    %737 = vector.broadcast %cst_262 : f32 to vector<8x8xf32>
    %cst_263 = arith.constant 0.000000e+00 : f32
    %738 = vector.broadcast %cst_263 : f32 to vector<8x8xf32>
    %739 = vector.extract_strided_slice %736 {offsets = [0, 0], sizes = [8, 32], strides = [1, 1]} : vector<64x32xf32> to vector<8x32xf32>
    %cst_264 = arith.constant dense<0.000000e+00> : vector<8x32xf32>
    %740 = tpu.matmul %737, %729, %cst_264 {dimension_numbers = #tpu.dot_dimension_numbers<[1], [0], [0], [1], [0, 0, 1, 1], [], []>} : vector<8x8xf32>, vector<8x32xf32>, vector<8x32xf32> -> vector<8x32xf32>
    %741 = arith.addf %739, %740 : vector<8x32xf32>
    %742 = math.tanh %741 : vector<8x32xf32>
    %743 = vector.extract_strided_slice %742 {offsets = [0, 0], sizes = [8, 24], strides = [1, 1]} : vector<8x32xf32> to vector<8x24xf32>
    %cst_265 = arith.constant 5.000000e-01 : f32
    %744 = vector.broadcast %cst_265 : f32 to vector<8x24xf32>
    %745 = arith.mulf %744, %743 : vector<8x24xf32>
    %cst_266 = arith.constant 5.000000e-01 : f32
    %746 = vector.broadcast %cst_266 : f32 to vector<8x24xf32>
    %747 = arith.addf %745, %746 : vector<8x24xf32>
    %748 = vector.extract_strided_slice %747 {offsets = [0, 0], sizes = [8, 8], strides = [1, 1]} : vector<8x24xf32> to vector<8x8xf32>
    %749 = vector.extract_strided_slice %747 {offsets = [0, 8], sizes = [8, 8], strides = [1, 1]} : vector<8x24xf32> to vector<8x8xf32>
    %750 = vector.extract_strided_slice %747 {offsets = [0, 16], sizes = [8, 8], strides = [1, 1]} : vector<8x24xf32> to vector<8x8xf32>
    %751 = vector.extract_strided_slice %742 {offsets = [0, 24], sizes = [8, 8], strides = [1, 1]} : vector<8x32xf32> to vector<8x8xf32>
    %752 = arith.mulf %749, %738 : vector<8x8xf32>
    %753 = arith.mulf %748, %751 : vector<8x8xf32>
    %754 = arith.addf %752, %753 : vector<8x8xf32>
    %755 = math.tanh %754 : vector<8x8xf32>
    %756 = arith.mulf %750, %755 : vector<8x8xf32>
    %c0_267 = arith.constant 0 : index
    %c0_268 = arith.constant 0 : index
    %c0_269 = arith.constant 0 : index
    %757 = vector.load %arg8[%c0_267, %c0_268, %c0_269] : memref<8x8x8xf32, #tpu.memory_space<vmem>>, vector<1x8x8xf32>
    %758 = vector.shape_cast %757 : vector<1x8x8xf32> to vector<8x8xf32>
    %759 = vector.shape_cast %756 : vector<8x8xf32> to vector<1x8x8xf32>
    tpu.vector_store %arg8[%c0_267, %c0_268, %c0_269], %759 {strides = array<i32>} : memref<8x8x8xf32, #tpu.memory_space<vmem>>, vector<1x8x8xf32>,
    %760 = vector.extract_strided_slice %736 {offsets = [8, 0], sizes = [8, 32], strides = [1, 1]} : vector<64x32xf32> to vector<8x32xf32>
    %cst_270 = arith.constant dense<0.000000e+00> : vector<8x32xf32>
    %761 = tpu.matmul %756, %729, %cst_270 {dimension_numbers = #tpu.dot_dimension_numbers<[1], [0], [0], [1], [0, 0, 1, 1], [], []>} : vector<8x8xf32>, vector<8x32xf32>, vector<8x32xf32> -> vector<8x32xf32>
    %762 = arith.addf %760, %761 : vector<8x32xf32>
    %763 = math.tanh %762 : vector<8x32xf32>
    %764 = vector.extract_strided_slice %763 {offsets = [0, 0], sizes = [8, 24], strides = [1, 1]} : vector<8x32xf32> to vector<8x24xf32>
    %cst_271 = arith.constant 5.000000e-01 : f32
    %765 = vector.broadcast %cst_271 : f32 to vector<8x24xf32>
    %766 = arith.mulf %765, %764 : vector<8x24xf32>
    %cst_272 = arith.constant 5.000000e-01 : f32
    %767 = vector.broadcast %cst_272 : f32 to vector<8x24xf32>
    %768 = arith.addf %766, %767 : vector<8x24xf32>
    %769 = vector.extract_strided_slice %768 {offsets = [0, 0], sizes = [8, 8], strides = [1, 1]} : vector<8x24xf32> to vector<8x8xf32>
    %770 = vector.extract_strided_slice %768 {offsets = [0, 8], sizes = [8, 8], strides = [1, 1]} : vector<8x24xf32> to vector<8x8xf32>
    %771 = vector.extract_strided_slice %768 {offsets = [0, 16], sizes = [8, 8], strides = [1, 1]} : vector<8x24xf32> to vector<8x8xf32>
    %772 = vector.extract_strided_slice %763 {offsets = [0, 24], sizes = [8, 8], strides = [1, 1]} : vector<8x32xf32> to vector<8x8xf32>
    %773 = arith.mulf %770, %754 : vector<8x8xf32>
    %774 = arith.mulf %769, %772 : vector<8x8xf32>
    %775 = arith.addf %773, %774 : vector<8x8xf32>
    %776 = math.tanh %775 : vector<8x8xf32>
    %777 = arith.mulf %771, %776 : vector<8x8xf32>
    %c1_273 = arith.constant 1 : index
    %c0_274 = arith.constant 0 : index
    %c0_275 = arith.constant 0 : index
    %778 = vector.load %arg8[%c1_273, %c0_274, %c0_275] : memref<8x8x8xf32, #tpu.memory_space<vmem>>, vector<1x8x8xf32>
    %779 = vector.shape_cast %778 : vector<1x8x8xf32> to vector<8x8xf32>
    %780 = vector.shape_cast %777 : vector<8x8xf32> to vector<1x8x8xf32>
    tpu.vector_store %arg8[%c1_273, %c0_274, %c0_275], %780 {strides = array<i32>} : memref<8x8x8xf32, #tpu.memory_space<vmem>>, vector<1x8x8xf32>,
    %781 = vector.extract_strided_slice %736 {offsets = [16, 0], sizes = [8, 32], strides = [1, 1]} : vector<64x32xf32> to vector<8x32xf32>
    %cst_276 = arith.constant dense<0.000000e+00> : vector<8x32xf32>
    %782 = tpu.matmul %777, %729, %cst_276 {dimension_numbers = #tpu.dot_dimension_numbers<[1], [0], [0], [1], [0, 0, 1, 1], [], []>} : vector<8x8xf32>, vector<8x32xf32>, vector<8x32xf32> -> vector<8x32xf32>
    %783 = arith.addf %781, %782 : vector<8x32xf32>
    %784 = math.tanh %783 : vector<8x32xf32>
    %785 = vector.extract_strided_slice %784 {offsets = [0, 0], sizes = [8, 24], strides = [1, 1]} : vector<8x32xf32> to vector<8x24xf32>
    %cst_277 = arith.constant 5.000000e-01 : f32
    %786 = vector.broadcast %cst_277 : f32 to vector<8x24xf32>
    %787 = arith.mulf %786, %785 : vector<8x24xf32>
    %cst_278 = arith.constant 5.000000e-01 : f32
    %788 = vector.broadcast %cst_278 : f32 to vector<8x24xf32>
    %789 = arith.addf %787, %788 : vector<8x24xf32>
    %790 = vector.extract_strided_slice %789 {offsets = [0, 0], sizes = [8, 8], strides = [1, 1]} : vector<8x24xf32> to vector<8x8xf32>
    %791 = vector.extract_strided_slice %789 {offsets = [0, 8], sizes = [8, 8], strides = [1, 1]} : vector<8x24xf32> to vector<8x8xf32>
    %792 = vector.extract_strided_slice %789 {offsets = [0, 16], sizes = [8, 8], strides = [1, 1]} : vector<8x24xf32> to vector<8x8xf32>
    %793 = vector.extract_strided_slice %784 {offsets = [0, 24], sizes = [8, 8], strides = [1, 1]} : vector<8x32xf32> to vector<8x8xf32>
    %794 = arith.mulf %791, %775 : vector<8x8xf32>
    %795 = arith.mulf %790, %793 : vector<8x8xf32>
    %796 = arith.addf %794, %795 : vector<8x8xf32>
    %797 = math.tanh %796 : vector<8x8xf32>
    %798 = arith.mulf %792, %797 : vector<8x8xf32>
    %c2_279 = arith.constant 2 : index
    %c0_280 = arith.constant 0 : index
    %c0_281 = arith.constant 0 : index
    %799 = vector.load %arg8[%c2_279, %c0_280, %c0_281] : memref<8x8x8xf32, #tpu.memory_space<vmem>>, vector<1x8x8xf32>
    %800 = vector.shape_cast %799 : vector<1x8x8xf32> to vector<8x8xf32>
    %801 = vector.shape_cast %798 : vector<8x8xf32> to vector<1x8x8xf32>
    tpu.vector_store %arg8[%c2_279, %c0_280, %c0_281], %801 {strides = array<i32>} : memref<8x8x8xf32, #tpu.memory_space<vmem>>, vector<1x8x8xf32>,
    %802 = vector.extract_strided_slice %736 {offsets = [24, 0], sizes = [8, 32], strides = [1, 1]} : vector<64x32xf32> to vector<8x32xf32>
    %cst_282 = arith.constant dense<0.000000e+00> : vector<8x32xf32>
    %803 = tpu.matmul %798, %729, %cst_282 {dimension_numbers = #tpu.dot_dimension_numbers<[1], [0], [0], [1], [0, 0, 1, 1], [], []>} : vector<8x8xf32>, vector<8x32xf32>, vector<8x32xf32> -> vector<8x32xf32>
    %804 = arith.addf %802, %803 : vector<8x32xf32>
    %805 = math.tanh %804 : vector<8x32xf32>
    %806 = vector.extract_strided_slice %805 {offsets = [0, 0], sizes = [8, 24], strides = [1, 1]} : vector<8x32xf32> to vector<8x24xf32>
    %cst_283 = arith.constant 5.000000e-01 : f32
    %807 = vector.broadcast %cst_283 : f32 to vector<8x24xf32>
    %808 = arith.mulf %807, %806 : vector<8x24xf32>
    %cst_284 = arith.constant 5.000000e-01 : f32
    %809 = vector.broadcast %cst_284 : f32 to vector<8x24xf32>
    %810 = arith.addf %808, %809 : vector<8x24xf32>
    %811 = vector.extract_strided_slice %810 {offsets = [0, 0], sizes = [8, 8], strides = [1, 1]} : vector<8x24xf32> to vector<8x8xf32>
    %812 = vector.extract_strided_slice %810 {offsets = [0, 8], sizes = [8, 8], strides = [1, 1]} : vector<8x24xf32> to vector<8x8xf32>
    %813 = vector.extract_strided_slice %810 {offsets = [0, 16], sizes = [8, 8], strides = [1, 1]} : vector<8x24xf32> to vector<8x8xf32>
    %814 = vector.extract_strided_slice %805 {offsets = [0, 24], sizes = [8, 8], strides = [1, 1]} : vector<8x32xf32> to vector<8x8xf32>
    %815 = arith.mulf %812, %796 : vector<8x8xf32>
    %816 = arith.mulf %811, %814 : vector<8x8xf32>
    %817 = arith.addf %815, %816 : vector<8x8xf32>
    %818 = math.tanh %817 : vector<8x8xf32>
    %819 = arith.mulf %813, %818 : vector<8x8xf32>
    %c3_285 = arith.constant 3 : index
    %c0_286 = arith.constant 0 : index
    %c0_287 = arith.constant 0 : index
    %820 = vector.load %arg8[%c3_285, %c0_286, %c0_287] : memref<8x8x8xf32, #tpu.memory_space<vmem>>, vector<1x8x8xf32>
    %821 = vector.shape_cast %820 : vector<1x8x8xf32> to vector<8x8xf32>
    %822 = vector.shape_cast %819 : vector<8x8xf32> to vector<1x8x8xf32>
    tpu.vector_store %arg8[%c3_285, %c0_286, %c0_287], %822 {strides = array<i32>} : memref<8x8x8xf32, #tpu.memory_space<vmem>>, vector<1x8x8xf32>,
    %823 = vector.extract_strided_slice %736 {offsets = [32, 0], sizes = [8, 32], strides = [1, 1]} : vector<64x32xf32> to vector<8x32xf32>
    %cst_288 = arith.constant dense<0.000000e+00> : vector<8x32xf32>
    %824 = tpu.matmul %819, %729, %cst_288 {dimension_numbers = #tpu.dot_dimension_numbers<[1], [0], [0], [1], [0, 0, 1, 1], [], []>} : vector<8x8xf32>, vector<8x32xf32>, vector<8x32xf32> -> vector<8x32xf32>
    %825 = arith.addf %823, %824 : vector<8x32xf32>
    %826 = math.tanh %825 : vector<8x32xf32>
    %827 = vector.extract_strided_slice %826 {offsets = [0, 0], sizes = [8, 24], strides = [1, 1]} : vector<8x32xf32> to vector<8x24xf32>
    %cst_289 = arith.constant 5.000000e-01 : f32
    %828 = vector.broadcast %cst_289 : f32 to vector<8x24xf32>
    %829 = arith.mulf %828, %827 : vector<8x24xf32>
    %cst_290 = arith.constant 5.000000e-01 : f32
    %830 = vector.broadcast %cst_290 : f32 to vector<8x24xf32>
    %831 = arith.addf %829, %830 : vector<8x24xf32>
    %832 = vector.extract_strided_slice %831 {offsets = [0, 0], sizes = [8, 8], strides = [1, 1]} : vector<8x24xf32> to vector<8x8xf32>
    %833 = vector.extract_strided_slice %831 {offsets = [0, 8], sizes = [8, 8], strides = [1, 1]} : vector<8x24xf32> to vector<8x8xf32>
    %834 = vector.extract_strided_slice %831 {offsets = [0, 16], sizes = [8, 8], strides = [1, 1]} : vector<8x24xf32> to vector<8x8xf32>
    %835 = vector.extract_strided_slice %826 {offsets = [0, 24], sizes = [8, 8], strides = [1, 1]} : vector<8x32xf32> to vector<8x8xf32>
    %836 = arith.mulf %833, %817 : vector<8x8xf32>
    %837 = arith.mulf %832, %835 : vector<8x8xf32>
    %838 = arith.addf %836, %837 : vector<8x8xf32>
    %839 = math.tanh %838 : vector<8x8xf32>
    %840 = arith.mulf %834, %839 : vector<8x8xf32>
    %c4_291 = arith.constant 4 : index
    %c0_292 = arith.constant 0 : index
    %c0_293 = arith.constant 0 : index
    %841 = vector.load %arg8[%c4_291, %c0_292, %c0_293] : memref<8x8x8xf32, #tpu.memory_space<vmem>>, vector<1x8x8xf32>
    %842 = vector.shape_cast %841 : vector<1x8x8xf32> to vector<8x8xf32>
    %843 = vector.shape_cast %840 : vector<8x8xf32> to vector<1x8x8xf32>
    tpu.vector_store %arg8[%c4_291, %c0_292, %c0_293], %843 {strides = array<i32>} : memref<8x8x8xf32, #tpu.memory_space<vmem>>, vector<1x8x8xf32>,
    %844 = vector.extract_strided_slice %736 {offsets = [40, 0], sizes = [8, 32], strides = [1, 1]} : vector<64x32xf32> to vector<8x32xf32>
    %cst_294 = arith.constant dense<0.000000e+00> : vector<8x32xf32>
    %845 = tpu.matmul %840, %729, %cst_294 {dimension_numbers = #tpu.dot_dimension_numbers<[1], [0], [0], [1], [0, 0, 1, 1], [], []>} : vector<8x8xf32>, vector<8x32xf32>, vector<8x32xf32> -> vector<8x32xf32>
    %846 = arith.addf %844, %845 : vector<8x32xf32>
    %847 = math.tanh %846 : vector<8x32xf32>
    %848 = vector.extract_strided_slice %847 {offsets = [0, 0], sizes = [8, 24], strides = [1, 1]} : vector<8x32xf32> to vector<8x24xf32>
    %cst_295 = arith.constant 5.000000e-01 : f32
    %849 = vector.broadcast %cst_295 : f32 to vector<8x24xf32>
    %850 = arith.mulf %849, %848 : vector<8x24xf32>
    %cst_296 = arith.constant 5.000000e-01 : f32
    %851 = vector.broadcast %cst_296 : f32 to vector<8x24xf32>
    %852 = arith.addf %850, %851 : vector<8x24xf32>
    %853 = vector.extract_strided_slice %852 {offsets = [0, 0], sizes = [8, 8], strides = [1, 1]} : vector<8x24xf32> to vector<8x8xf32>
    %854 = vector.extract_strided_slice %852 {offsets = [0, 8], sizes = [8, 8], strides = [1, 1]} : vector<8x24xf32> to vector<8x8xf32>
    %855 = vector.extract_strided_slice %852 {offsets = [0, 16], sizes = [8, 8], strides = [1, 1]} : vector<8x24xf32> to vector<8x8xf32>
    %856 = vector.extract_strided_slice %847 {offsets = [0, 24], sizes = [8, 8], strides = [1, 1]} : vector<8x32xf32> to vector<8x8xf32>
    %857 = arith.mulf %854, %838 : vector<8x8xf32>
    %858 = arith.mulf %853, %856 : vector<8x8xf32>
    %859 = arith.addf %857, %858 : vector<8x8xf32>
    %860 = math.tanh %859 : vector<8x8xf32>
    %861 = arith.mulf %855, %860 : vector<8x8xf32>
    %c5_297 = arith.constant 5 : index
    %c0_298 = arith.constant 0 : index
    %c0_299 = arith.constant 0 : index
    %862 = vector.load %arg8[%c5_297, %c0_298, %c0_299] : memref<8x8x8xf32, #tpu.memory_space<vmem>>, vector<1x8x8xf32>
    %863 = vector.shape_cast %862 : vector<1x8x8xf32> to vector<8x8xf32>
    %864 = vector.shape_cast %861 : vector<8x8xf32> to vector<1x8x8xf32>
    tpu.vector_store %arg8[%c5_297, %c0_298, %c0_299], %864 {strides = array<i32>} : memref<8x8x8xf32, #tpu.memory_space<vmem>>, vector<1x8x8xf32>,
    %865 = vector.extract_strided_slice %736 {offsets = [48, 0], sizes = [8, 32], strides = [1, 1]} : vector<64x32xf32> to vector<8x32xf32>
    %cst_300 = arith.constant dense<0.000000e+00> : vector<8x32xf32>
    %866 = tpu.matmul %861, %729, %cst_300 {dimension_numbers = #tpu.dot_dimension_numbers<[1], [0], [0], [1], [0, 0, 1, 1], [], []>} : vector<8x8xf32>, vector<8x32xf32>, vector<8x32xf32> -> vector<8x32xf32>
    %867 = arith.addf %865, %866 : vector<8x32xf32>
    %868 = math.tanh %867 : vector<8x32xf32>
    %869 = vector.extract_strided_slice %868 {offsets = [0, 0], sizes = [8, 24], strides = [1, 1]} : vector<8x32xf32> to vector<8x24xf32>
    %cst_301 = arith.constant 5.000000e-01 : f32
    %870 = vector.broadcast %cst_301 : f32 to vector<8x24xf32>
    %871 = arith.mulf %870, %869 : vector<8x24xf32>
    %cst_302 = arith.constant 5.000000e-01 : f32
    %872 = vector.broadcast %cst_302 : f32 to vector<8x24xf32>
    %873 = arith.addf %871, %872 : vector<8x24xf32>
    %874 = vector.extract_strided_slice %873 {offsets = [0, 0], sizes = [8, 8], strides = [1, 1]} : vector<8x24xf32> to vector<8x8xf32>
    %875 = vector.extract_strided_slice %873 {offsets = [0, 8], sizes = [8, 8], strides = [1, 1]} : vector<8x24xf32> to vector<8x8xf32>
    %876 = vector.extract_strided_slice %873 {offsets = [0, 16], sizes = [8, 8], strides = [1, 1]} : vector<8x24xf32> to vector<8x8xf32>
    %877 = vector.extract_strided_slice %868 {offsets = [0, 24], sizes = [8, 8], strides = [1, 1]} : vector<8x32xf32> to vector<8x8xf32>
    %878 = arith.mulf %875, %859 : vector<8x8xf32>
    %879 = arith.mulf %874, %877 : vector<8x8xf32>
    %880 = arith.addf %878, %879 : vector<8x8xf32>
    %881 = math.tanh %880 : vector<8x8xf32>
    %882 = arith.mulf %876, %881 : vector<8x8xf32>
    %c6_303 = arith.constant 6 : index
    %c0_304 = arith.constant 0 : index
    %c0_305 = arith.constant 0 : index
    %883 = vector.load %arg8[%c6_303, %c0_304, %c0_305] : memref<8x8x8xf32, #tpu.memory_space<vmem>>, vector<1x8x8xf32>
    %884 = vector.shape_cast %883 : vector<1x8x8xf32> to vector<8x8xf32>
    %885 = vector.shape_cast %882 : vector<8x8xf32> to vector<1x8x8xf32>
    tpu.vector_store %arg8[%c6_303, %c0_304, %c0_305], %885 {strides = array<i32>} : memref<8x8x8xf32, #tpu.memory_space<vmem>>, vector<1x8x8xf32>,
    %886 = vector.extract_strided_slice %736 {offsets = [56, 0], sizes = [8, 32], strides = [1, 1]} : vector<64x32xf32> to vector<8x32xf32>
    %cst_306 = arith.constant dense<0.000000e+00> : vector<8x32xf32>
    %887 = tpu.matmul %882, %729, %cst_306 {dimension_numbers = #tpu.dot_dimension_numbers<[1], [0], [0], [1], [0, 0, 1, 1], [], []>} : vector<8x8xf32>, vector<8x32xf32>, vector<8x32xf32> -> vector<8x32xf32>
    %888 = arith.addf %886, %887 : vector<8x32xf32>
    %889 = math.tanh %888 : vector<8x32xf32>
    %890 = vector.extract_strided_slice %889 {offsets = [0, 0], sizes = [8, 24], strides = [1, 1]} : vector<8x32xf32> to vector<8x24xf32>
    %cst_307 = arith.constant 5.000000e-01 : f32
    %891 = vector.broadcast %cst_307 : f32 to vector<8x24xf32>
    %892 = arith.mulf %891, %890 : vector<8x24xf32>
    %cst_308 = arith.constant 5.000000e-01 : f32
    %893 = vector.broadcast %cst_308 : f32 to vector<8x24xf32>
    %894 = arith.addf %892, %893 : vector<8x24xf32>
    %895 = vector.extract_strided_slice %894 {offsets = [0, 0], sizes = [8, 8], strides = [1, 1]} : vector<8x24xf32> to vector<8x8xf32>
    %896 = vector.extract_strided_slice %894 {offsets = [0, 8], sizes = [8, 8], strides = [1, 1]} : vector<8x24xf32> to vector<8x8xf32>
    %897 = vector.extract_strided_slice %894 {offsets = [0, 16], sizes = [8, 8], strides = [1, 1]} : vector<8x24xf32> to vector<8x8xf32>
    %898 = vector.extract_strided_slice %889 {offsets = [0, 24], sizes = [8, 8], strides = [1, 1]} : vector<8x32xf32> to vector<8x8xf32>
    %899 = arith.mulf %896, %880 : vector<8x8xf32>
    %900 = arith.mulf %895, %898 : vector<8x8xf32>
    %901 = arith.addf %899, %900 : vector<8x8xf32>
    %902 = math.tanh %901 : vector<8x8xf32>
    %903 = arith.mulf %897, %902 : vector<8x8xf32>
    %c7_309 = arith.constant 7 : index
    %c0_310 = arith.constant 0 : index
    %c0_311 = arith.constant 0 : index
    %904 = vector.load %arg8[%c7_309, %c0_310, %c0_311] : memref<8x8x8xf32, #tpu.memory_space<vmem>>, vector<1x8x8xf32>
    %905 = vector.shape_cast %904 : vector<1x8x8xf32> to vector<8x8xf32>
    %906 = vector.shape_cast %903 : vector<8x8xf32> to vector<1x8x8xf32>
    tpu.vector_store %arg8[%c7_309, %c0_310, %c0_311], %906 {strides = array<i32>} : memref<8x8x8xf32, #tpu.memory_space<vmem>>, vector<1x8x8xf32>,
    %c5_312 = arith.constant 5 : index
    %c0_313 = arith.constant 0 : index
    %c0_314 = arith.constant 0 : index
    %907 = vector.load %arg2[%c5_312, %c0_313, %c0_314] : memref<8x8x32xf32, #tpu.memory_space<vmem>>, vector<1x8x32xf32>
    %908 = vector.shape_cast %907 : vector<1x8x32xf32> to vector<8x32xf32>
    %c5_315 = arith.constant 5 : index
    %c0_316 = arith.constant 0 : index
    %c0_317 = arith.constant 0 : index
    %909 = vector.load %arg3[%c5_315, %c0_316, %c0_317] : memref<8x8x32xf32, #tpu.memory_space<vmem>>, vector<1x8x32xf32>
    %910 = vector.shape_cast %909 : vector<1x8x32xf32> to vector<8x32xf32>
    %c5_318 = arith.constant 5 : index
    %c0_319 = arith.constant 0 : index
    %c0_320 = arith.constant 0 : index
    %911 = vector.load %arg4[%c5_318, %c0_319, %c0_320] : memref<8x1x32xf32, #tpu.memory_space<vmem>>, vector<1x1x32xf32>
    %912 = vector.shape_cast %911 : vector<1x1x32xf32> to vector<1x32xf32>
    %c0_321 = arith.constant 0 : index
    %c0_322 = arith.constant 0 : index
    %c0_323 = arith.constant 0 : index
    %913 = vector.load %arg8[%c0_321, %c0_322, %c0_323] : memref<8x8x8xf32, #tpu.memory_space<vmem>>, vector<8x8x8xf32>
    %914 = vector.shape_cast %913 : vector<8x8x8xf32> to vector<64x8xf32>
    %cst_324 = arith.constant dense<0.000000e+00> : vector<64x32xf32>
    %915 = tpu.matmul %914, %908, %cst_324 {dimension_numbers = #tpu.dot_dimension_numbers<[1], [0], [0], [1], [0, 0, 1, 1], [], []>} : vector<64x8xf32>, vector<8x32xf32>, vector<64x32xf32> -> vector<64x32xf32>
    %916 = vector.broadcast %912 : vector<1x32xf32> to vector<64x32xf32>
    %917 = arith.addf %915, %916 : vector<64x32xf32>
    %cst_325 = arith.constant 0.000000e+00 : f32
    %918 = vector.broadcast %cst_325 : f32 to vector<8x8xf32>
    %cst_326 = arith.constant 0.000000e+00 : f32
    %919 = vector.broadcast %cst_326 : f32 to vector<8x8xf32>
    %920 = vector.extract_strided_slice %917 {offsets = [0, 0], sizes = [8, 32], strides = [1, 1]} : vector<64x32xf32> to vector<8x32xf32>
    %cst_327 = arith.constant dense<0.000000e+00> : vector<8x32xf32>
    %921 = tpu.matmul %918, %910, %cst_327 {dimension_numbers = #tpu.dot_dimension_numbers<[1], [0], [0], [1], [0, 0, 1, 1], [], []>} : vector<8x8xf32>, vector<8x32xf32>, vector<8x32xf32> -> vector<8x32xf32>
    %922 = arith.addf %920, %921 : vector<8x32xf32>
    %923 = math.tanh %922 : vector<8x32xf32>
    %924 = vector.extract_strided_slice %923 {offsets = [0, 0], sizes = [8, 24], strides = [1, 1]} : vector<8x32xf32> to vector<8x24xf32>
    %cst_328 = arith.constant 5.000000e-01 : f32
    %925 = vector.broadcast %cst_328 : f32 to vector<8x24xf32>
    %926 = arith.mulf %925, %924 : vector<8x24xf32>
    %cst_329 = arith.constant 5.000000e-01 : f32
    %927 = vector.broadcast %cst_329 : f32 to vector<8x24xf32>
    %928 = arith.addf %926, %927 : vector<8x24xf32>
    %929 = vector.extract_strided_slice %928 {offsets = [0, 0], sizes = [8, 8], strides = [1, 1]} : vector<8x24xf32> to vector<8x8xf32>
    %930 = vector.extract_strided_slice %928 {offsets = [0, 8], sizes = [8, 8], strides = [1, 1]} : vector<8x24xf32> to vector<8x8xf32>
    %931 = vector.extract_strided_slice %928 {offsets = [0, 16], sizes = [8, 8], strides = [1, 1]} : vector<8x24xf32> to vector<8x8xf32>
    %932 = vector.extract_strided_slice %923 {offsets = [0, 24], sizes = [8, 8], strides = [1, 1]} : vector<8x32xf32> to vector<8x8xf32>
    %933 = arith.mulf %930, %919 : vector<8x8xf32>
    %934 = arith.mulf %929, %932 : vector<8x8xf32>
    %935 = arith.addf %933, %934 : vector<8x8xf32>
    %936 = math.tanh %935 : vector<8x8xf32>
    %937 = arith.mulf %931, %936 : vector<8x8xf32>
    %c0_330 = arith.constant 0 : index
    %c0_331 = arith.constant 0 : index
    %c0_332 = arith.constant 0 : index
    %938 = vector.load %arg8[%c0_330, %c0_331, %c0_332] : memref<8x8x8xf32, #tpu.memory_space<vmem>>, vector<1x8x8xf32>
    %939 = vector.shape_cast %938 : vector<1x8x8xf32> to vector<8x8xf32>
    %940 = vector.shape_cast %937 : vector<8x8xf32> to vector<1x8x8xf32>
    tpu.vector_store %arg8[%c0_330, %c0_331, %c0_332], %940 {strides = array<i32>} : memref<8x8x8xf32, #tpu.memory_space<vmem>>, vector<1x8x8xf32>,
    %941 = vector.extract_strided_slice %917 {offsets = [8, 0], sizes = [8, 32], strides = [1, 1]} : vector<64x32xf32> to vector<8x32xf32>
    %cst_333 = arith.constant dense<0.000000e+00> : vector<8x32xf32>
    %942 = tpu.matmul %937, %910, %cst_333 {dimension_numbers = #tpu.dot_dimension_numbers<[1], [0], [0], [1], [0, 0, 1, 1], [], []>} : vector<8x8xf32>, vector<8x32xf32>, vector<8x32xf32> -> vector<8x32xf32>
    %943 = arith.addf %941, %942 : vector<8x32xf32>
    %944 = math.tanh %943 : vector<8x32xf32>
    %945 = vector.extract_strided_slice %944 {offsets = [0, 0], sizes = [8, 24], strides = [1, 1]} : vector<8x32xf32> to vector<8x24xf32>
    %cst_334 = arith.constant 5.000000e-01 : f32
    %946 = vector.broadcast %cst_334 : f32 to vector<8x24xf32>
    %947 = arith.mulf %946, %945 : vector<8x24xf32>
    %cst_335 = arith.constant 5.000000e-01 : f32
    %948 = vector.broadcast %cst_335 : f32 to vector<8x24xf32>
    %949 = arith.addf %947, %948 : vector<8x24xf32>
    %950 = vector.extract_strided_slice %949 {offsets = [0, 0], sizes = [8, 8], strides = [1, 1]} : vector<8x24xf32> to vector<8x8xf32>
    %951 = vector.extract_strided_slice %949 {offsets = [0, 8], sizes = [8, 8], strides = [1, 1]} : vector<8x24xf32> to vector<8x8xf32>
    %952 = vector.extract_strided_slice %949 {offsets = [0, 16], sizes = [8, 8], strides = [1, 1]} : vector<8x24xf32> to vector<8x8xf32>
    %953 = vector.extract_strided_slice %944 {offsets = [0, 24], sizes = [8, 8], strides = [1, 1]} : vector<8x32xf32> to vector<8x8xf32>
    %954 = arith.mulf %951, %935 : vector<8x8xf32>
    %955 = arith.mulf %950, %953 : vector<8x8xf32>
    %956 = arith.addf %954, %955 : vector<8x8xf32>
    %957 = math.tanh %956 : vector<8x8xf32>
    %958 = arith.mulf %952, %957 : vector<8x8xf32>
    %c1_336 = arith.constant 1 : index
    %c0_337 = arith.constant 0 : index
    %c0_338 = arith.constant 0 : index
    %959 = vector.load %arg8[%c1_336, %c0_337, %c0_338] : memref<8x8x8xf32, #tpu.memory_space<vmem>>, vector<1x8x8xf32>
    %960 = vector.shape_cast %959 : vector<1x8x8xf32> to vector<8x8xf32>
    %961 = vector.shape_cast %958 : vector<8x8xf32> to vector<1x8x8xf32>
    tpu.vector_store %arg8[%c1_336, %c0_337, %c0_338], %961 {strides = array<i32>} : memref<8x8x8xf32, #tpu.memory_space<vmem>>, vector<1x8x8xf32>,
    %962 = vector.extract_strided_slice %917 {offsets = [16, 0], sizes = [8, 32], strides = [1, 1]} : vector<64x32xf32> to vector<8x32xf32>
    %cst_339 = arith.constant dense<0.000000e+00> : vector<8x32xf32>
    %963 = tpu.matmul %958, %910, %cst_339 {dimension_numbers = #tpu.dot_dimension_numbers<[1], [0], [0], [1], [0, 0, 1, 1], [], []>} : vector<8x8xf32>, vector<8x32xf32>, vector<8x32xf32> -> vector<8x32xf32>
    %964 = arith.addf %962, %963 : vector<8x32xf32>
    %965 = math.tanh %964 : vector<8x32xf32>
    %966 = vector.extract_strided_slice %965 {offsets = [0, 0], sizes = [8, 24], strides = [1, 1]} : vector<8x32xf32> to vector<8x24xf32>
    %cst_340 = arith.constant 5.000000e-01 : f32
    %967 = vector.broadcast %cst_340 : f32 to vector<8x24xf32>
    %968 = arith.mulf %967, %966 : vector<8x24xf32>
    %cst_341 = arith.constant 5.000000e-01 : f32
    %969 = vector.broadcast %cst_341 : f32 to vector<8x24xf32>
    %970 = arith.addf %968, %969 : vector<8x24xf32>
    %971 = vector.extract_strided_slice %970 {offsets = [0, 0], sizes = [8, 8], strides = [1, 1]} : vector<8x24xf32> to vector<8x8xf32>
    %972 = vector.extract_strided_slice %970 {offsets = [0, 8], sizes = [8, 8], strides = [1, 1]} : vector<8x24xf32> to vector<8x8xf32>
    %973 = vector.extract_strided_slice %970 {offsets = [0, 16], sizes = [8, 8], strides = [1, 1]} : vector<8x24xf32> to vector<8x8xf32>
    %974 = vector.extract_strided_slice %965 {offsets = [0, 24], sizes = [8, 8], strides = [1, 1]} : vector<8x32xf32> to vector<8x8xf32>
    %975 = arith.mulf %972, %956 : vector<8x8xf32>
    %976 = arith.mulf %971, %974 : vector<8x8xf32>
    %977 = arith.addf %975, %976 : vector<8x8xf32>
    %978 = math.tanh %977 : vector<8x8xf32>
    %979 = arith.mulf %973, %978 : vector<8x8xf32>
    %c2_342 = arith.constant 2 : index
    %c0_343 = arith.constant 0 : index
    %c0_344 = arith.constant 0 : index
    %980 = vector.load %arg8[%c2_342, %c0_343, %c0_344] : memref<8x8x8xf32, #tpu.memory_space<vmem>>, vector<1x8x8xf32>
    %981 = vector.shape_cast %980 : vector<1x8x8xf32> to vector<8x8xf32>
    %982 = vector.shape_cast %979 : vector<8x8xf32> to vector<1x8x8xf32>
    tpu.vector_store %arg8[%c2_342, %c0_343, %c0_344], %982 {strides = array<i32>} : memref<8x8x8xf32, #tpu.memory_space<vmem>>, vector<1x8x8xf32>,
    %983 = vector.extract_strided_slice %917 {offsets = [24, 0], sizes = [8, 32], strides = [1, 1]} : vector<64x32xf32> to vector<8x32xf32>
    %cst_345 = arith.constant dense<0.000000e+00> : vector<8x32xf32>
    %984 = tpu.matmul %979, %910, %cst_345 {dimension_numbers = #tpu.dot_dimension_numbers<[1], [0], [0], [1], [0, 0, 1, 1], [], []>} : vector<8x8xf32>, vector<8x32xf32>, vector<8x32xf32> -> vector<8x32xf32>
    %985 = arith.addf %983, %984 : vector<8x32xf32>
    %986 = math.tanh %985 : vector<8x32xf32>
    %987 = vector.extract_strided_slice %986 {offsets = [0, 0], sizes = [8, 24], strides = [1, 1]} : vector<8x32xf32> to vector<8x24xf32>
    %cst_346 = arith.constant 5.000000e-01 : f32
    %988 = vector.broadcast %cst_346 : f32 to vector<8x24xf32>
    %989 = arith.mulf %988, %987 : vector<8x24xf32>
    %cst_347 = arith.constant 5.000000e-01 : f32
    %990 = vector.broadcast %cst_347 : f32 to vector<8x24xf32>
    %991 = arith.addf %989, %990 : vector<8x24xf32>
    %992 = vector.extract_strided_slice %991 {offsets = [0, 0], sizes = [8, 8], strides = [1, 1]} : vector<8x24xf32> to vector<8x8xf32>
    %993 = vector.extract_strided_slice %991 {offsets = [0, 8], sizes = [8, 8], strides = [1, 1]} : vector<8x24xf32> to vector<8x8xf32>
    %994 = vector.extract_strided_slice %991 {offsets = [0, 16], sizes = [8, 8], strides = [1, 1]} : vector<8x24xf32> to vector<8x8xf32>
    %995 = vector.extract_strided_slice %986 {offsets = [0, 24], sizes = [8, 8], strides = [1, 1]} : vector<8x32xf32> to vector<8x8xf32>
    %996 = arith.mulf %993, %977 : vector<8x8xf32>
    %997 = arith.mulf %992, %995 : vector<8x8xf32>
    %998 = arith.addf %996, %997 : vector<8x8xf32>
    %999 = math.tanh %998 : vector<8x8xf32>
    %1000 = arith.mulf %994, %999 : vector<8x8xf32>
    %c3_348 = arith.constant 3 : index
    %c0_349 = arith.constant 0 : index
    %c0_350 = arith.constant 0 : index
    %1001 = vector.load %arg8[%c3_348, %c0_349, %c0_350] : memref<8x8x8xf32, #tpu.memory_space<vmem>>, vector<1x8x8xf32>
    %1002 = vector.shape_cast %1001 : vector<1x8x8xf32> to vector<8x8xf32>
    %1003 = vector.shape_cast %1000 : vector<8x8xf32> to vector<1x8x8xf32>
    tpu.vector_store %arg8[%c3_348, %c0_349, %c0_350], %1003 {strides = array<i32>} : memref<8x8x8xf32, #tpu.memory_space<vmem>>, vector<1x8x8xf32>,
    %1004 = vector.extract_strided_slice %917 {offsets = [32, 0], sizes = [8, 32], strides = [1, 1]} : vector<64x32xf32> to vector<8x32xf32>
    %cst_351 = arith.constant dense<0.000000e+00> : vector<8x32xf32>
    %1005 = tpu.matmul %1000, %910, %cst_351 {dimension_numbers = #tpu.dot_dimension_numbers<[1], [0], [0], [1], [0, 0, 1, 1], [], []>} : vector<8x8xf32>, vector<8x32xf32>, vector<8x32xf32> -> vector<8x32xf32>
    %1006 = arith.addf %1004, %1005 : vector<8x32xf32>
    %1007 = math.tanh %1006 : vector<8x32xf32>
    %1008 = vector.extract_strided_slice %1007 {offsets = [0, 0], sizes = [8, 24], strides = [1, 1]} : vector<8x32xf32> to vector<8x24xf32>
    %cst_352 = arith.constant 5.000000e-01 : f32
    %1009 = vector.broadcast %cst_352 : f32 to vector<8x24xf32>
    %1010 = arith.mulf %1009, %1008 : vector<8x24xf32>
    %cst_353 = arith.constant 5.000000e-01 : f32
    %1011 = vector.broadcast %cst_353 : f32 to vector<8x24xf32>
    %1012 = arith.addf %1010, %1011 : vector<8x24xf32>
    %1013 = vector.extract_strided_slice %1012 {offsets = [0, 0], sizes = [8, 8], strides = [1, 1]} : vector<8x24xf32> to vector<8x8xf32>
    %1014 = vector.extract_strided_slice %1012 {offsets = [0, 8], sizes = [8, 8], strides = [1, 1]} : vector<8x24xf32> to vector<8x8xf32>
    %1015 = vector.extract_strided_slice %1012 {offsets = [0, 16], sizes = [8, 8], strides = [1, 1]} : vector<8x24xf32> to vector<8x8xf32>
    %1016 = vector.extract_strided_slice %1007 {offsets = [0, 24], sizes = [8, 8], strides = [1, 1]} : vector<8x32xf32> to vector<8x8xf32>
    %1017 = arith.mulf %1014, %998 : vector<8x8xf32>
    %1018 = arith.mulf %1013, %1016 : vector<8x8xf32>
    %1019 = arith.addf %1017, %1018 : vector<8x8xf32>
    %1020 = math.tanh %1019 : vector<8x8xf32>
    %1021 = arith.mulf %1015, %1020 : vector<8x8xf32>
    %c4_354 = arith.constant 4 : index
    %c0_355 = arith.constant 0 : index
    %c0_356 = arith.constant 0 : index
    %1022 = vector.load %arg8[%c4_354, %c0_355, %c0_356] : memref<8x8x8xf32, #tpu.memory_space<vmem>>, vector<1x8x8xf32>
    %1023 = vector.shape_cast %1022 : vector<1x8x8xf32> to vector<8x8xf32>
    %1024 = vector.shape_cast %1021 : vector<8x8xf32> to vector<1x8x8xf32>
    tpu.vector_store %arg8[%c4_354, %c0_355, %c0_356], %1024 {strides = array<i32>} : memref<8x8x8xf32, #tpu.memory_space<vmem>>, vector<1x8x8xf32>,
    %1025 = vector.extract_strided_slice %917 {offsets = [40, 0], sizes = [8, 32], strides = [1, 1]} : vector<64x32xf32> to vector<8x32xf32>
    %cst_357 = arith.constant dense<0.000000e+00> : vector<8x32xf32>
    %1026 = tpu.matmul %1021, %910, %cst_357 {dimension_numbers = #tpu.dot_dimension_numbers<[1], [0], [0], [1], [0, 0, 1, 1], [], []>} : vector<8x8xf32>, vector<8x32xf32>, vector<8x32xf32> -> vector<8x32xf32>
    %1027 = arith.addf %1025, %1026 : vector<8x32xf32>
    %1028 = math.tanh %1027 : vector<8x32xf32>
    %1029 = vector.extract_strided_slice %1028 {offsets = [0, 0], sizes = [8, 24], strides = [1, 1]} : vector<8x32xf32> to vector<8x24xf32>
    %cst_358 = arith.constant 5.000000e-01 : f32
    %1030 = vector.broadcast %cst_358 : f32 to vector<8x24xf32>
    %1031 = arith.mulf %1030, %1029 : vector<8x24xf32>
    %cst_359 = arith.constant 5.000000e-01 : f32
    %1032 = vector.broadcast %cst_359 : f32 to vector<8x24xf32>
    %1033 = arith.addf %1031, %1032 : vector<8x24xf32>
    %1034 = vector.extract_strided_slice %1033 {offsets = [0, 0], sizes = [8, 8], strides = [1, 1]} : vector<8x24xf32> to vector<8x8xf32>
    %1035 = vector.extract_strided_slice %1033 {offsets = [0, 8], sizes = [8, 8], strides = [1, 1]} : vector<8x24xf32> to vector<8x8xf32>
    %1036 = vector.extract_strided_slice %1033 {offsets = [0, 16], sizes = [8, 8], strides = [1, 1]} : vector<8x24xf32> to vector<8x8xf32>
    %1037 = vector.extract_strided_slice %1028 {offsets = [0, 24], sizes = [8, 8], strides = [1, 1]} : vector<8x32xf32> to vector<8x8xf32>
    %1038 = arith.mulf %1035, %1019 : vector<8x8xf32>
    %1039 = arith.mulf %1034, %1037 : vector<8x8xf32>
    %1040 = arith.addf %1038, %1039 : vector<8x8xf32>
    %1041 = math.tanh %1040 : vector<8x8xf32>
    %1042 = arith.mulf %1036, %1041 : vector<8x8xf32>
    %c5_360 = arith.constant 5 : index
    %c0_361 = arith.constant 0 : index
    %c0_362 = arith.constant 0 : index
    %1043 = vector.load %arg8[%c5_360, %c0_361, %c0_362] : memref<8x8x8xf32, #tpu.memory_space<vmem>>, vector<1x8x8xf32>
    %1044 = vector.shape_cast %1043 : vector<1x8x8xf32> to vector<8x8xf32>
    %1045 = vector.shape_cast %1042 : vector<8x8xf32> to vector<1x8x8xf32>
    tpu.vector_store %arg8[%c5_360, %c0_361, %c0_362], %1045 {strides = array<i32>} : memref<8x8x8xf32, #tpu.memory_space<vmem>>, vector<1x8x8xf32>,
    %1046 = vector.extract_strided_slice %917 {offsets = [48, 0], sizes = [8, 32], strides = [1, 1]} : vector<64x32xf32> to vector<8x32xf32>
    %cst_363 = arith.constant dense<0.000000e+00> : vector<8x32xf32>
    %1047 = tpu.matmul %1042, %910, %cst_363 {dimension_numbers = #tpu.dot_dimension_numbers<[1], [0], [0], [1], [0, 0, 1, 1], [], []>} : vector<8x8xf32>, vector<8x32xf32>, vector<8x32xf32> -> vector<8x32xf32>
    %1048 = arith.addf %1046, %1047 : vector<8x32xf32>
    %1049 = math.tanh %1048 : vector<8x32xf32>
    %1050 = vector.extract_strided_slice %1049 {offsets = [0, 0], sizes = [8, 24], strides = [1, 1]} : vector<8x32xf32> to vector<8x24xf32>
    %cst_364 = arith.constant 5.000000e-01 : f32
    %1051 = vector.broadcast %cst_364 : f32 to vector<8x24xf32>
    %1052 = arith.mulf %1051, %1050 : vector<8x24xf32>
    %cst_365 = arith.constant 5.000000e-01 : f32
    %1053 = vector.broadcast %cst_365 : f32 to vector<8x24xf32>
    %1054 = arith.addf %1052, %1053 : vector<8x24xf32>
    %1055 = vector.extract_strided_slice %1054 {offsets = [0, 0], sizes = [8, 8], strides = [1, 1]} : vector<8x24xf32> to vector<8x8xf32>
    %1056 = vector.extract_strided_slice %1054 {offsets = [0, 8], sizes = [8, 8], strides = [1, 1]} : vector<8x24xf32> to vector<8x8xf32>
    %1057 = vector.extract_strided_slice %1054 {offsets = [0, 16], sizes = [8, 8], strides = [1, 1]} : vector<8x24xf32> to vector<8x8xf32>
    %1058 = vector.extract_strided_slice %1049 {offsets = [0, 24], sizes = [8, 8], strides = [1, 1]} : vector<8x32xf32> to vector<8x8xf32>
    %1059 = arith.mulf %1056, %1040 : vector<8x8xf32>
    %1060 = arith.mulf %1055, %1058 : vector<8x8xf32>
    %1061 = arith.addf %1059, %1060 : vector<8x8xf32>
    %1062 = math.tanh %1061 : vector<8x8xf32>
    %1063 = arith.mulf %1057, %1062 : vector<8x8xf32>
    %c6_366 = arith.constant 6 : index
    %c0_367 = arith.constant 0 : index
    %c0_368 = arith.constant 0 : index
    %1064 = vector.load %arg8[%c6_366, %c0_367, %c0_368] : memref<8x8x8xf32, #tpu.memory_space<vmem>>, vector<1x8x8xf32>
    %1065 = vector.shape_cast %1064 : vector<1x8x8xf32> to vector<8x8xf32>
    %1066 = vector.shape_cast %1063 : vector<8x8xf32> to vector<1x8x8xf32>
    tpu.vector_store %arg8[%c6_366, %c0_367, %c0_368], %1066 {strides = array<i32>} : memref<8x8x8xf32, #tpu.memory_space<vmem>>, vector<1x8x8xf32>,
    %1067 = vector.extract_strided_slice %917 {offsets = [56, 0], sizes = [8, 32], strides = [1, 1]} : vector<64x32xf32> to vector<8x32xf32>
    %cst_369 = arith.constant dense<0.000000e+00> : vector<8x32xf32>
    %1068 = tpu.matmul %1063, %910, %cst_369 {dimension_numbers = #tpu.dot_dimension_numbers<[1], [0], [0], [1], [0, 0, 1, 1], [], []>} : vector<8x8xf32>, vector<8x32xf32>, vector<8x32xf32> -> vector<8x32xf32>
    %1069 = arith.addf %1067, %1068 : vector<8x32xf32>
    %1070 = math.tanh %1069 : vector<8x32xf32>
    %1071 = vector.extract_strided_slice %1070 {offsets = [0, 0], sizes = [8, 24], strides = [1, 1]} : vector<8x32xf32> to vector<8x24xf32>
    %cst_370 = arith.constant 5.000000e-01 : f32
    %1072 = vector.broadcast %cst_370 : f32 to vector<8x24xf32>
    %1073 = arith.mulf %1072, %1071 : vector<8x24xf32>
    %cst_371 = arith.constant 5.000000e-01 : f32
    %1074 = vector.broadcast %cst_371 : f32 to vector<8x24xf32>
    %1075 = arith.addf %1073, %1074 : vector<8x24xf32>
    %1076 = vector.extract_strided_slice %1075 {offsets = [0, 0], sizes = [8, 8], strides = [1, 1]} : vector<8x24xf32> to vector<8x8xf32>
    %1077 = vector.extract_strided_slice %1075 {offsets = [0, 8], sizes = [8, 8], strides = [1, 1]} : vector<8x24xf32> to vector<8x8xf32>
    %1078 = vector.extract_strided_slice %1075 {offsets = [0, 16], sizes = [8, 8], strides = [1, 1]} : vector<8x24xf32> to vector<8x8xf32>
    %1079 = vector.extract_strided_slice %1070 {offsets = [0, 24], sizes = [8, 8], strides = [1, 1]} : vector<8x32xf32> to vector<8x8xf32>
    %1080 = arith.mulf %1077, %1061 : vector<8x8xf32>
    %1081 = arith.mulf %1076, %1079 : vector<8x8xf32>
    %1082 = arith.addf %1080, %1081 : vector<8x8xf32>
    %1083 = math.tanh %1082 : vector<8x8xf32>
    %1084 = arith.mulf %1078, %1083 : vector<8x8xf32>
    %c7_372 = arith.constant 7 : index
    %c0_373 = arith.constant 0 : index
    %c0_374 = arith.constant 0 : index
    %1085 = vector.load %arg8[%c7_372, %c0_373, %c0_374] : memref<8x8x8xf32, #tpu.memory_space<vmem>>, vector<1x8x8xf32>
    %1086 = vector.shape_cast %1085 : vector<1x8x8xf32> to vector<8x8xf32>
    %1087 = vector.shape_cast %1084 : vector<8x8xf32> to vector<1x8x8xf32>
    tpu.vector_store %arg8[%c7_372, %c0_373, %c0_374], %1087 {strides = array<i32>} : memref<8x8x8xf32, #tpu.memory_space<vmem>>, vector<1x8x8xf32>,
    %c6_375 = arith.constant 6 : index
    %c0_376 = arith.constant 0 : index
    %c0_377 = arith.constant 0 : index
    %1088 = vector.load %arg2[%c6_375, %c0_376, %c0_377] : memref<8x8x32xf32, #tpu.memory_space<vmem>>, vector<1x8x32xf32>
    %1089 = vector.shape_cast %1088 : vector<1x8x32xf32> to vector<8x32xf32>
    %c6_378 = arith.constant 6 : index
    %c0_379 = arith.constant 0 : index
    %c0_380 = arith.constant 0 : index
    %1090 = vector.load %arg3[%c6_378, %c0_379, %c0_380] : memref<8x8x32xf32, #tpu.memory_space<vmem>>, vector<1x8x32xf32>
    %1091 = vector.shape_cast %1090 : vector<1x8x32xf32> to vector<8x32xf32>
    %c6_381 = arith.constant 6 : index
    %c0_382 = arith.constant 0 : index
    %c0_383 = arith.constant 0 : index
    %1092 = vector.load %arg4[%c6_381, %c0_382, %c0_383] : memref<8x1x32xf32, #tpu.memory_space<vmem>>, vector<1x1x32xf32>
    %1093 = vector.shape_cast %1092 : vector<1x1x32xf32> to vector<1x32xf32>
    %c0_384 = arith.constant 0 : index
    %c0_385 = arith.constant 0 : index
    %c0_386 = arith.constant 0 : index
    %1094 = vector.load %arg8[%c0_384, %c0_385, %c0_386] : memref<8x8x8xf32, #tpu.memory_space<vmem>>, vector<8x8x8xf32>
    %1095 = vector.shape_cast %1094 : vector<8x8x8xf32> to vector<64x8xf32>
    %cst_387 = arith.constant dense<0.000000e+00> : vector<64x32xf32>
    %1096 = tpu.matmul %1095, %1089, %cst_387 {dimension_numbers = #tpu.dot_dimension_numbers<[1], [0], [0], [1], [0, 0, 1, 1], [], []>} : vector<64x8xf32>, vector<8x32xf32>, vector<64x32xf32> -> vector<64x32xf32>
    %1097 = vector.broadcast %1093 : vector<1x32xf32> to vector<64x32xf32>
    %1098 = arith.addf %1096, %1097 : vector<64x32xf32>
    %cst_388 = arith.constant 0.000000e+00 : f32
    %1099 = vector.broadcast %cst_388 : f32 to vector<8x8xf32>
    %cst_389 = arith.constant 0.000000e+00 : f32
    %1100 = vector.broadcast %cst_389 : f32 to vector<8x8xf32>
    %1101 = vector.extract_strided_slice %1098 {offsets = [0, 0], sizes = [8, 32], strides = [1, 1]} : vector<64x32xf32> to vector<8x32xf32>
    %cst_390 = arith.constant dense<0.000000e+00> : vector<8x32xf32>
    %1102 = tpu.matmul %1099, %1091, %cst_390 {dimension_numbers = #tpu.dot_dimension_numbers<[1], [0], [0], [1], [0, 0, 1, 1], [], []>} : vector<8x8xf32>, vector<8x32xf32>, vector<8x32xf32> -> vector<8x32xf32>
    %1103 = arith.addf %1101, %1102 : vector<8x32xf32>
    %1104 = math.tanh %1103 : vector<8x32xf32>
    %1105 = vector.extract_strided_slice %1104 {offsets = [0, 0], sizes = [8, 24], strides = [1, 1]} : vector<8x32xf32> to vector<8x24xf32>
    %cst_391 = arith.constant 5.000000e-01 : f32
    %1106 = vector.broadcast %cst_391 : f32 to vector<8x24xf32>
    %1107 = arith.mulf %1106, %1105 : vector<8x24xf32>
    %cst_392 = arith.constant 5.000000e-01 : f32
    %1108 = vector.broadcast %cst_392 : f32 to vector<8x24xf32>
    %1109 = arith.addf %1107, %1108 : vector<8x24xf32>
    %1110 = vector.extract_strided_slice %1109 {offsets = [0, 0], sizes = [8, 8], strides = [1, 1]} : vector<8x24xf32> to vector<8x8xf32>
    %1111 = vector.extract_strided_slice %1109 {offsets = [0, 8], sizes = [8, 8], strides = [1, 1]} : vector<8x24xf32> to vector<8x8xf32>
    %1112 = vector.extract_strided_slice %1109 {offsets = [0, 16], sizes = [8, 8], strides = [1, 1]} : vector<8x24xf32> to vector<8x8xf32>
    %1113 = vector.extract_strided_slice %1104 {offsets = [0, 24], sizes = [8, 8], strides = [1, 1]} : vector<8x32xf32> to vector<8x8xf32>
    %1114 = arith.mulf %1111, %1100 : vector<8x8xf32>
    %1115 = arith.mulf %1110, %1113 : vector<8x8xf32>
    %1116 = arith.addf %1114, %1115 : vector<8x8xf32>
    %1117 = math.tanh %1116 : vector<8x8xf32>
    %1118 = arith.mulf %1112, %1117 : vector<8x8xf32>
    %c0_393 = arith.constant 0 : index
    %c0_394 = arith.constant 0 : index
    %c0_395 = arith.constant 0 : index
    %1119 = vector.load %arg8[%c0_393, %c0_394, %c0_395] : memref<8x8x8xf32, #tpu.memory_space<vmem>>, vector<1x8x8xf32>
    %1120 = vector.shape_cast %1119 : vector<1x8x8xf32> to vector<8x8xf32>
    %1121 = vector.shape_cast %1118 : vector<8x8xf32> to vector<1x8x8xf32>
    tpu.vector_store %arg8[%c0_393, %c0_394, %c0_395], %1121 {strides = array<i32>} : memref<8x8x8xf32, #tpu.memory_space<vmem>>, vector<1x8x8xf32>,
    %1122 = vector.extract_strided_slice %1098 {offsets = [8, 0], sizes = [8, 32], strides = [1, 1]} : vector<64x32xf32> to vector<8x32xf32>
    %cst_396 = arith.constant dense<0.000000e+00> : vector<8x32xf32>
    %1123 = tpu.matmul %1118, %1091, %cst_396 {dimension_numbers = #tpu.dot_dimension_numbers<[1], [0], [0], [1], [0, 0, 1, 1], [], []>} : vector<8x8xf32>, vector<8x32xf32>, vector<8x32xf32> -> vector<8x32xf32>
    %1124 = arith.addf %1122, %1123 : vector<8x32xf32>
    %1125 = math.tanh %1124 : vector<8x32xf32>
    %1126 = vector.extract_strided_slice %1125 {offsets = [0, 0], sizes = [8, 24], strides = [1, 1]} : vector<8x32xf32> to vector<8x24xf32>
    %cst_397 = arith.constant 5.000000e-01 : f32
    %1127 = vector.broadcast %cst_397 : f32 to vector<8x24xf32>
    %1128 = arith.mulf %1127, %1126 : vector<8x24xf32>
    %cst_398 = arith.constant 5.000000e-01 : f32
    %1129 = vector.broadcast %cst_398 : f32 to vector<8x24xf32>
    %1130 = arith.addf %1128, %1129 : vector<8x24xf32>
    %1131 = vector.extract_strided_slice %1130 {offsets = [0, 0], sizes = [8, 8], strides = [1, 1]} : vector<8x24xf32> to vector<8x8xf32>
    %1132 = vector.extract_strided_slice %1130 {offsets = [0, 8], sizes = [8, 8], strides = [1, 1]} : vector<8x24xf32> to vector<8x8xf32>
    %1133 = vector.extract_strided_slice %1130 {offsets = [0, 16], sizes = [8, 8], strides = [1, 1]} : vector<8x24xf32> to vector<8x8xf32>
    %1134 = vector.extract_strided_slice %1125 {offsets = [0, 24], sizes = [8, 8], strides = [1, 1]} : vector<8x32xf32> to vector<8x8xf32>
    %1135 = arith.mulf %1132, %1116 : vector<8x8xf32>
    %1136 = arith.mulf %1131, %1134 : vector<8x8xf32>
    %1137 = arith.addf %1135, %1136 : vector<8x8xf32>
    %1138 = math.tanh %1137 : vector<8x8xf32>
    %1139 = arith.mulf %1133, %1138 : vector<8x8xf32>
    %c1_399 = arith.constant 1 : index
    %c0_400 = arith.constant 0 : index
    %c0_401 = arith.constant 0 : index
    %1140 = vector.load %arg8[%c1_399, %c0_400, %c0_401] : memref<8x8x8xf32, #tpu.memory_space<vmem>>, vector<1x8x8xf32>
    %1141 = vector.shape_cast %1140 : vector<1x8x8xf32> to vector<8x8xf32>
    %1142 = vector.shape_cast %1139 : vector<8x8xf32> to vector<1x8x8xf32>
    tpu.vector_store %arg8[%c1_399, %c0_400, %c0_401], %1142 {strides = array<i32>} : memref<8x8x8xf32, #tpu.memory_space<vmem>>, vector<1x8x8xf32>,
    %1143 = vector.extract_strided_slice %1098 {offsets = [16, 0], sizes = [8, 32], strides = [1, 1]} : vector<64x32xf32> to vector<8x32xf32>
    %cst_402 = arith.constant dense<0.000000e+00> : vector<8x32xf32>
    %1144 = tpu.matmul %1139, %1091, %cst_402 {dimension_numbers = #tpu.dot_dimension_numbers<[1], [0], [0], [1], [0, 0, 1, 1], [], []>} : vector<8x8xf32>, vector<8x32xf32>, vector<8x32xf32> -> vector<8x32xf32>
    %1145 = arith.addf %1143, %1144 : vector<8x32xf32>
    %1146 = math.tanh %1145 : vector<8x32xf32>
    %1147 = vector.extract_strided_slice %1146 {offsets = [0, 0], sizes = [8, 24], strides = [1, 1]} : vector<8x32xf32> to vector<8x24xf32>
    %cst_403 = arith.constant 5.000000e-01 : f32
    %1148 = vector.broadcast %cst_403 : f32 to vector<8x24xf32>
    %1149 = arith.mulf %1148, %1147 : vector<8x24xf32>
    %cst_404 = arith.constant 5.000000e-01 : f32
    %1150 = vector.broadcast %cst_404 : f32 to vector<8x24xf32>
    %1151 = arith.addf %1149, %1150 : vector<8x24xf32>
    %1152 = vector.extract_strided_slice %1151 {offsets = [0, 0], sizes = [8, 8], strides = [1, 1]} : vector<8x24xf32> to vector<8x8xf32>
    %1153 = vector.extract_strided_slice %1151 {offsets = [0, 8], sizes = [8, 8], strides = [1, 1]} : vector<8x24xf32> to vector<8x8xf32>
    %1154 = vector.extract_strided_slice %1151 {offsets = [0, 16], sizes = [8, 8], strides = [1, 1]} : vector<8x24xf32> to vector<8x8xf32>
    %1155 = vector.extract_strided_slice %1146 {offsets = [0, 24], sizes = [8, 8], strides = [1, 1]} : vector<8x32xf32> to vector<8x8xf32>
    %1156 = arith.mulf %1153, %1137 : vector<8x8xf32>
    %1157 = arith.mulf %1152, %1155 : vector<8x8xf32>
    %1158 = arith.addf %1156, %1157 : vector<8x8xf32>
    %1159 = math.tanh %1158 : vector<8x8xf32>
    %1160 = arith.mulf %1154, %1159 : vector<8x8xf32>
    %c2_405 = arith.constant 2 : index
    %c0_406 = arith.constant 0 : index
    %c0_407 = arith.constant 0 : index
    %1161 = vector.load %arg8[%c2_405, %c0_406, %c0_407] : memref<8x8x8xf32, #tpu.memory_space<vmem>>, vector<1x8x8xf32>
    %1162 = vector.shape_cast %1161 : vector<1x8x8xf32> to vector<8x8xf32>
    %1163 = vector.shape_cast %1160 : vector<8x8xf32> to vector<1x8x8xf32>
    tpu.vector_store %arg8[%c2_405, %c0_406, %c0_407], %1163 {strides = array<i32>} : memref<8x8x8xf32, #tpu.memory_space<vmem>>, vector<1x8x8xf32>,
    %1164 = vector.extract_strided_slice %1098 {offsets = [24, 0], sizes = [8, 32], strides = [1, 1]} : vector<64x32xf32> to vector<8x32xf32>
    %cst_408 = arith.constant dense<0.000000e+00> : vector<8x32xf32>
    %1165 = tpu.matmul %1160, %1091, %cst_408 {dimension_numbers = #tpu.dot_dimension_numbers<[1], [0], [0], [1], [0, 0, 1, 1], [], []>} : vector<8x8xf32>, vector<8x32xf32>, vector<8x32xf32> -> vector<8x32xf32>
    %1166 = arith.addf %1164, %1165 : vector<8x32xf32>
    %1167 = math.tanh %1166 : vector<8x32xf32>
    %1168 = vector.extract_strided_slice %1167 {offsets = [0, 0], sizes = [8, 24], strides = [1, 1]} : vector<8x32xf32> to vector<8x24xf32>
    %cst_409 = arith.constant 5.000000e-01 : f32
    %1169 = vector.broadcast %cst_409 : f32 to vector<8x24xf32>
    %1170 = arith.mulf %1169, %1168 : vector<8x24xf32>
    %cst_410 = arith.constant 5.000000e-01 : f32
    %1171 = vector.broadcast %cst_410 : f32 to vector<8x24xf32>
    %1172 = arith.addf %1170, %1171 : vector<8x24xf32>
    %1173 = vector.extract_strided_slice %1172 {offsets = [0, 0], sizes = [8, 8], strides = [1, 1]} : vector<8x24xf32> to vector<8x8xf32>
    %1174 = vector.extract_strided_slice %1172 {offsets = [0, 8], sizes = [8, 8], strides = [1, 1]} : vector<8x24xf32> to vector<8x8xf32>
    %1175 = vector.extract_strided_slice %1172 {offsets = [0, 16], sizes = [8, 8], strides = [1, 1]} : vector<8x24xf32> to vector<8x8xf32>
    %1176 = vector.extract_strided_slice %1167 {offsets = [0, 24], sizes = [8, 8], strides = [1, 1]} : vector<8x32xf32> to vector<8x8xf32>
    %1177 = arith.mulf %1174, %1158 : vector<8x8xf32>
    %1178 = arith.mulf %1173, %1176 : vector<8x8xf32>
    %1179 = arith.addf %1177, %1178 : vector<8x8xf32>
    %1180 = math.tanh %1179 : vector<8x8xf32>
    %1181 = arith.mulf %1175, %1180 : vector<8x8xf32>
    %c3_411 = arith.constant 3 : index
    %c0_412 = arith.constant 0 : index
    %c0_413 = arith.constant 0 : index
    %1182 = vector.load %arg8[%c3_411, %c0_412, %c0_413] : memref<8x8x8xf32, #tpu.memory_space<vmem>>, vector<1x8x8xf32>
    %1183 = vector.shape_cast %1182 : vector<1x8x8xf32> to vector<8x8xf32>
    %1184 = vector.shape_cast %1181 : vector<8x8xf32> to vector<1x8x8xf32>
    tpu.vector_store %arg8[%c3_411, %c0_412, %c0_413], %1184 {strides = array<i32>} : memref<8x8x8xf32, #tpu.memory_space<vmem>>, vector<1x8x8xf32>,
    %1185 = vector.extract_strided_slice %1098 {offsets = [32, 0], sizes = [8, 32], strides = [1, 1]} : vector<64x32xf32> to vector<8x32xf32>
    %cst_414 = arith.constant dense<0.000000e+00> : vector<8x32xf32>
    %1186 = tpu.matmul %1181, %1091, %cst_414 {dimension_numbers = #tpu.dot_dimension_numbers<[1], [0], [0], [1], [0, 0, 1, 1], [], []>} : vector<8x8xf32>, vector<8x32xf32>, vector<8x32xf32> -> vector<8x32xf32>
    %1187 = arith.addf %1185, %1186 : vector<8x32xf32>
    %1188 = math.tanh %1187 : vector<8x32xf32>
    %1189 = vector.extract_strided_slice %1188 {offsets = [0, 0], sizes = [8, 24], strides = [1, 1]} : vector<8x32xf32> to vector<8x24xf32>
    %cst_415 = arith.constant 5.000000e-01 : f32
    %1190 = vector.broadcast %cst_415 : f32 to vector<8x24xf32>
    %1191 = arith.mulf %1190, %1189 : vector<8x24xf32>
    %cst_416 = arith.constant 5.000000e-01 : f32
    %1192 = vector.broadcast %cst_416 : f32 to vector<8x24xf32>
    %1193 = arith.addf %1191, %1192 : vector<8x24xf32>
    %1194 = vector.extract_strided_slice %1193 {offsets = [0, 0], sizes = [8, 8], strides = [1, 1]} : vector<8x24xf32> to vector<8x8xf32>
    %1195 = vector.extract_strided_slice %1193 {offsets = [0, 8], sizes = [8, 8], strides = [1, 1]} : vector<8x24xf32> to vector<8x8xf32>
    %1196 = vector.extract_strided_slice %1193 {offsets = [0, 16], sizes = [8, 8], strides = [1, 1]} : vector<8x24xf32> to vector<8x8xf32>
    %1197 = vector.extract_strided_slice %1188 {offsets = [0, 24], sizes = [8, 8], strides = [1, 1]} : vector<8x32xf32> to vector<8x8xf32>
    %1198 = arith.mulf %1195, %1179 : vector<8x8xf32>
    %1199 = arith.mulf %1194, %1197 : vector<8x8xf32>
    %1200 = arith.addf %1198, %1199 : vector<8x8xf32>
    %1201 = math.tanh %1200 : vector<8x8xf32>
    %1202 = arith.mulf %1196, %1201 : vector<8x8xf32>
    %c4_417 = arith.constant 4 : index
    %c0_418 = arith.constant 0 : index
    %c0_419 = arith.constant 0 : index
    %1203 = vector.load %arg8[%c4_417, %c0_418, %c0_419] : memref<8x8x8xf32, #tpu.memory_space<vmem>>, vector<1x8x8xf32>
    %1204 = vector.shape_cast %1203 : vector<1x8x8xf32> to vector<8x8xf32>
    %1205 = vector.shape_cast %1202 : vector<8x8xf32> to vector<1x8x8xf32>
    tpu.vector_store %arg8[%c4_417, %c0_418, %c0_419], %1205 {strides = array<i32>} : memref<8x8x8xf32, #tpu.memory_space<vmem>>, vector<1x8x8xf32>,
    %1206 = vector.extract_strided_slice %1098 {offsets = [40, 0], sizes = [8, 32], strides = [1, 1]} : vector<64x32xf32> to vector<8x32xf32>
    %cst_420 = arith.constant dense<0.000000e+00> : vector<8x32xf32>
    %1207 = tpu.matmul %1202, %1091, %cst_420 {dimension_numbers = #tpu.dot_dimension_numbers<[1], [0], [0], [1], [0, 0, 1, 1], [], []>} : vector<8x8xf32>, vector<8x32xf32>, vector<8x32xf32> -> vector<8x32xf32>
    %1208 = arith.addf %1206, %1207 : vector<8x32xf32>
    %1209 = math.tanh %1208 : vector<8x32xf32>
    %1210 = vector.extract_strided_slice %1209 {offsets = [0, 0], sizes = [8, 24], strides = [1, 1]} : vector<8x32xf32> to vector<8x24xf32>
    %cst_421 = arith.constant 5.000000e-01 : f32
    %1211 = vector.broadcast %cst_421 : f32 to vector<8x24xf32>
    %1212 = arith.mulf %1211, %1210 : vector<8x24xf32>
    %cst_422 = arith.constant 5.000000e-01 : f32
    %1213 = vector.broadcast %cst_422 : f32 to vector<8x24xf32>
    %1214 = arith.addf %1212, %1213 : vector<8x24xf32>
    %1215 = vector.extract_strided_slice %1214 {offsets = [0, 0], sizes = [8, 8], strides = [1, 1]} : vector<8x24xf32> to vector<8x8xf32>
    %1216 = vector.extract_strided_slice %1214 {offsets = [0, 8], sizes = [8, 8], strides = [1, 1]} : vector<8x24xf32> to vector<8x8xf32>
    %1217 = vector.extract_strided_slice %1214 {offsets = [0, 16], sizes = [8, 8], strides = [1, 1]} : vector<8x24xf32> to vector<8x8xf32>
    %1218 = vector.extract_strided_slice %1209 {offsets = [0, 24], sizes = [8, 8], strides = [1, 1]} : vector<8x32xf32> to vector<8x8xf32>
    %1219 = arith.mulf %1216, %1200 : vector<8x8xf32>
    %1220 = arith.mulf %1215, %1218 : vector<8x8xf32>
    %1221 = arith.addf %1219, %1220 : vector<8x8xf32>
    %1222 = math.tanh %1221 : vector<8x8xf32>
    %1223 = arith.mulf %1217, %1222 : vector<8x8xf32>
    %c5_423 = arith.constant 5 : index
    %c0_424 = arith.constant 0 : index
    %c0_425 = arith.constant 0 : index
    %1224 = vector.load %arg8[%c5_423, %c0_424, %c0_425] : memref<8x8x8xf32, #tpu.memory_space<vmem>>, vector<1x8x8xf32>
    %1225 = vector.shape_cast %1224 : vector<1x8x8xf32> to vector<8x8xf32>
    %1226 = vector.shape_cast %1223 : vector<8x8xf32> to vector<1x8x8xf32>
    tpu.vector_store %arg8[%c5_423, %c0_424, %c0_425], %1226 {strides = array<i32>} : memref<8x8x8xf32, #tpu.memory_space<vmem>>, vector<1x8x8xf32>,
    %1227 = vector.extract_strided_slice %1098 {offsets = [48, 0], sizes = [8, 32], strides = [1, 1]} : vector<64x32xf32> to vector<8x32xf32>
    %cst_426 = arith.constant dense<0.000000e+00> : vector<8x32xf32>
    %1228 = tpu.matmul %1223, %1091, %cst_426 {dimension_numbers = #tpu.dot_dimension_numbers<[1], [0], [0], [1], [0, 0, 1, 1], [], []>} : vector<8x8xf32>, vector<8x32xf32>, vector<8x32xf32> -> vector<8x32xf32>
    %1229 = arith.addf %1227, %1228 : vector<8x32xf32>
    %1230 = math.tanh %1229 : vector<8x32xf32>
    %1231 = vector.extract_strided_slice %1230 {offsets = [0, 0], sizes = [8, 24], strides = [1, 1]} : vector<8x32xf32> to vector<8x24xf32>
    %cst_427 = arith.constant 5.000000e-01 : f32
    %1232 = vector.broadcast %cst_427 : f32 to vector<8x24xf32>
    %1233 = arith.mulf %1232, %1231 : vector<8x24xf32>
    %cst_428 = arith.constant 5.000000e-01 : f32
    %1234 = vector.broadcast %cst_428 : f32 to vector<8x24xf32>
    %1235 = arith.addf %1233, %1234 : vector<8x24xf32>
    %1236 = vector.extract_strided_slice %1235 {offsets = [0, 0], sizes = [8, 8], strides = [1, 1]} : vector<8x24xf32> to vector<8x8xf32>
    %1237 = vector.extract_strided_slice %1235 {offsets = [0, 8], sizes = [8, 8], strides = [1, 1]} : vector<8x24xf32> to vector<8x8xf32>
    %1238 = vector.extract_strided_slice %1235 {offsets = [0, 16], sizes = [8, 8], strides = [1, 1]} : vector<8x24xf32> to vector<8x8xf32>
    %1239 = vector.extract_strided_slice %1230 {offsets = [0, 24], sizes = [8, 8], strides = [1, 1]} : vector<8x32xf32> to vector<8x8xf32>
    %1240 = arith.mulf %1237, %1221 : vector<8x8xf32>
    %1241 = arith.mulf %1236, %1239 : vector<8x8xf32>
    %1242 = arith.addf %1240, %1241 : vector<8x8xf32>
    %1243 = math.tanh %1242 : vector<8x8xf32>
    %1244 = arith.mulf %1238, %1243 : vector<8x8xf32>
    %c6_429 = arith.constant 6 : index
    %c0_430 = arith.constant 0 : index
    %c0_431 = arith.constant 0 : index
    %1245 = vector.load %arg8[%c6_429, %c0_430, %c0_431] : memref<8x8x8xf32, #tpu.memory_space<vmem>>, vector<1x8x8xf32>
    %1246 = vector.shape_cast %1245 : vector<1x8x8xf32> to vector<8x8xf32>
    %1247 = vector.shape_cast %1244 : vector<8x8xf32> to vector<1x8x8xf32>
    tpu.vector_store %arg8[%c6_429, %c0_430, %c0_431], %1247 {strides = array<i32>} : memref<8x8x8xf32, #tpu.memory_space<vmem>>, vector<1x8x8xf32>,
    %1248 = vector.extract_strided_slice %1098 {offsets = [56, 0], sizes = [8, 32], strides = [1, 1]} : vector<64x32xf32> to vector<8x32xf32>
    %cst_432 = arith.constant dense<0.000000e+00> : vector<8x32xf32>
    %1249 = tpu.matmul %1244, %1091, %cst_432 {dimension_numbers = #tpu.dot_dimension_numbers<[1], [0], [0], [1], [0, 0, 1, 1], [], []>} : vector<8x8xf32>, vector<8x32xf32>, vector<8x32xf32> -> vector<8x32xf32>
    %1250 = arith.addf %1248, %1249 : vector<8x32xf32>
    %1251 = math.tanh %1250 : vector<8x32xf32>
    %1252 = vector.extract_strided_slice %1251 {offsets = [0, 0], sizes = [8, 24], strides = [1, 1]} : vector<8x32xf32> to vector<8x24xf32>
    %cst_433 = arith.constant 5.000000e-01 : f32
    %1253 = vector.broadcast %cst_433 : f32 to vector<8x24xf32>
    %1254 = arith.mulf %1253, %1252 : vector<8x24xf32>
    %cst_434 = arith.constant 5.000000e-01 : f32
    %1255 = vector.broadcast %cst_434 : f32 to vector<8x24xf32>
    %1256 = arith.addf %1254, %1255 : vector<8x24xf32>
    %1257 = vector.extract_strided_slice %1256 {offsets = [0, 0], sizes = [8, 8], strides = [1, 1]} : vector<8x24xf32> to vector<8x8xf32>
    %1258 = vector.extract_strided_slice %1256 {offsets = [0, 8], sizes = [8, 8], strides = [1, 1]} : vector<8x24xf32> to vector<8x8xf32>
    %1259 = vector.extract_strided_slice %1256 {offsets = [0, 16], sizes = [8, 8], strides = [1, 1]} : vector<8x24xf32> to vector<8x8xf32>
    %1260 = vector.extract_strided_slice %1251 {offsets = [0, 24], sizes = [8, 8], strides = [1, 1]} : vector<8x32xf32> to vector<8x8xf32>
    %1261 = arith.mulf %1258, %1242 : vector<8x8xf32>
    %1262 = arith.mulf %1257, %1260 : vector<8x8xf32>
    %1263 = arith.addf %1261, %1262 : vector<8x8xf32>
    %1264 = math.tanh %1263 : vector<8x8xf32>
    %1265 = arith.mulf %1259, %1264 : vector<8x8xf32>
    %c7_435 = arith.constant 7 : index
    %c0_436 = arith.constant 0 : index
    %c0_437 = arith.constant 0 : index
    %1266 = vector.load %arg8[%c7_435, %c0_436, %c0_437] : memref<8x8x8xf32, #tpu.memory_space<vmem>>, vector<1x8x8xf32>
    %1267 = vector.shape_cast %1266 : vector<1x8x8xf32> to vector<8x8xf32>
    %1268 = vector.shape_cast %1265 : vector<8x8xf32> to vector<1x8x8xf32>
    tpu.vector_store %arg8[%c7_435, %c0_436, %c0_437], %1268 {strides = array<i32>} : memref<8x8x8xf32, #tpu.memory_space<vmem>>, vector<1x8x8xf32>,
    %c7_438 = arith.constant 7 : index
    %c0_439 = arith.constant 0 : index
    %c0_440 = arith.constant 0 : index
    %1269 = vector.load %arg2[%c7_438, %c0_439, %c0_440] : memref<8x8x32xf32, #tpu.memory_space<vmem>>, vector<1x8x32xf32>
    %1270 = vector.shape_cast %1269 : vector<1x8x32xf32> to vector<8x32xf32>
    %c7_441 = arith.constant 7 : index
    %c0_442 = arith.constant 0 : index
    %c0_443 = arith.constant 0 : index
    %1271 = vector.load %arg3[%c7_441, %c0_442, %c0_443] : memref<8x8x32xf32, #tpu.memory_space<vmem>>, vector<1x8x32xf32>
    %1272 = vector.shape_cast %1271 : vector<1x8x32xf32> to vector<8x32xf32>
    %c7_444 = arith.constant 7 : index
    %c0_445 = arith.constant 0 : index
    %c0_446 = arith.constant 0 : index
    %1273 = vector.load %arg4[%c7_444, %c0_445, %c0_446] : memref<8x1x32xf32, #tpu.memory_space<vmem>>, vector<1x1x32xf32>
    %1274 = vector.shape_cast %1273 : vector<1x1x32xf32> to vector<1x32xf32>
    %c0_447 = arith.constant 0 : index
    %c0_448 = arith.constant 0 : index
    %c0_449 = arith.constant 0 : index
    %1275 = vector.load %arg8[%c0_447, %c0_448, %c0_449] : memref<8x8x8xf32, #tpu.memory_space<vmem>>, vector<8x8x8xf32>
    %1276 = vector.shape_cast %1275 : vector<8x8x8xf32> to vector<64x8xf32>
    %cst_450 = arith.constant dense<0.000000e+00> : vector<64x32xf32>
    %1277 = tpu.matmul %1276, %1270, %cst_450 {dimension_numbers = #tpu.dot_dimension_numbers<[1], [0], [0], [1], [0, 0, 1, 1], [], []>} : vector<64x8xf32>, vector<8x32xf32>, vector<64x32xf32> -> vector<64x32xf32>
    %1278 = vector.broadcast %1274 : vector<1x32xf32> to vector<64x32xf32>
    %1279 = arith.addf %1277, %1278 : vector<64x32xf32>
    %cst_451 = arith.constant 0.000000e+00 : f32
    %1280 = vector.broadcast %cst_451 : f32 to vector<8x8xf32>
    %cst_452 = arith.constant 0.000000e+00 : f32
    %1281 = vector.broadcast %cst_452 : f32 to vector<8x8xf32>
    %1282 = vector.extract_strided_slice %1279 {offsets = [0, 0], sizes = [8, 32], strides = [1, 1]} : vector<64x32xf32> to vector<8x32xf32>
    %cst_453 = arith.constant dense<0.000000e+00> : vector<8x32xf32>
    %1283 = tpu.matmul %1280, %1272, %cst_453 {dimension_numbers = #tpu.dot_dimension_numbers<[1], [0], [0], [1], [0, 0, 1, 1], [], []>} : vector<8x8xf32>, vector<8x32xf32>, vector<8x32xf32> -> vector<8x32xf32>
    %1284 = arith.addf %1282, %1283 : vector<8x32xf32>
    %1285 = math.tanh %1284 : vector<8x32xf32>
    %1286 = vector.extract_strided_slice %1285 {offsets = [0, 0], sizes = [8, 24], strides = [1, 1]} : vector<8x32xf32> to vector<8x24xf32>
    %cst_454 = arith.constant 5.000000e-01 : f32
    %1287 = vector.broadcast %cst_454 : f32 to vector<8x24xf32>
    %1288 = arith.mulf %1287, %1286 : vector<8x24xf32>
    %cst_455 = arith.constant 5.000000e-01 : f32
    %1289 = vector.broadcast %cst_455 : f32 to vector<8x24xf32>
    %1290 = arith.addf %1288, %1289 : vector<8x24xf32>
    %1291 = vector.extract_strided_slice %1290 {offsets = [0, 0], sizes = [8, 8], strides = [1, 1]} : vector<8x24xf32> to vector<8x8xf32>
    %1292 = vector.extract_strided_slice %1290 {offsets = [0, 8], sizes = [8, 8], strides = [1, 1]} : vector<8x24xf32> to vector<8x8xf32>
    %1293 = vector.extract_strided_slice %1290 {offsets = [0, 16], sizes = [8, 8], strides = [1, 1]} : vector<8x24xf32> to vector<8x8xf32>
    %1294 = vector.extract_strided_slice %1285 {offsets = [0, 24], sizes = [8, 8], strides = [1, 1]} : vector<8x32xf32> to vector<8x8xf32>
    %1295 = arith.mulf %1292, %1281 : vector<8x8xf32>
    %1296 = arith.mulf %1291, %1294 : vector<8x8xf32>
    %1297 = arith.addf %1295, %1296 : vector<8x8xf32>
    %1298 = math.tanh %1297 : vector<8x8xf32>
    %1299 = arith.mulf %1293, %1298 : vector<8x8xf32>
    %c0_456 = arith.constant 0 : index
    %c0_457 = arith.constant 0 : index
    %c0_458 = arith.constant 0 : index
    %1300 = vector.load %arg8[%c0_456, %c0_457, %c0_458] : memref<8x8x8xf32, #tpu.memory_space<vmem>>, vector<1x8x8xf32>
    %1301 = vector.shape_cast %1300 : vector<1x8x8xf32> to vector<8x8xf32>
    %1302 = vector.shape_cast %1299 : vector<8x8xf32> to vector<1x8x8xf32>
    tpu.vector_store %arg8[%c0_456, %c0_457, %c0_458], %1302 {strides = array<i32>} : memref<8x8x8xf32, #tpu.memory_space<vmem>>, vector<1x8x8xf32>,
    %1303 = vector.extract_strided_slice %1279 {offsets = [8, 0], sizes = [8, 32], strides = [1, 1]} : vector<64x32xf32> to vector<8x32xf32>
    %cst_459 = arith.constant dense<0.000000e+00> : vector<8x32xf32>
    %1304 = tpu.matmul %1299, %1272, %cst_459 {dimension_numbers = #tpu.dot_dimension_numbers<[1], [0], [0], [1], [0, 0, 1, 1], [], []>} : vector<8x8xf32>, vector<8x32xf32>, vector<8x32xf32> -> vector<8x32xf32>
    %1305 = arith.addf %1303, %1304 : vector<8x32xf32>
    %1306 = math.tanh %1305 : vector<8x32xf32>
    %1307 = vector.extract_strided_slice %1306 {offsets = [0, 0], sizes = [8, 24], strides = [1, 1]} : vector<8x32xf32> to vector<8x24xf32>
    %cst_460 = arith.constant 5.000000e-01 : f32
    %1308 = vector.broadcast %cst_460 : f32 to vector<8x24xf32>
    %1309 = arith.mulf %1308, %1307 : vector<8x24xf32>
    %cst_461 = arith.constant 5.000000e-01 : f32
    %1310 = vector.broadcast %cst_461 : f32 to vector<8x24xf32>
    %1311 = arith.addf %1309, %1310 : vector<8x24xf32>
    %1312 = vector.extract_strided_slice %1311 {offsets = [0, 0], sizes = [8, 8], strides = [1, 1]} : vector<8x24xf32> to vector<8x8xf32>
    %1313 = vector.extract_strided_slice %1311 {offsets = [0, 8], sizes = [8, 8], strides = [1, 1]} : vector<8x24xf32> to vector<8x8xf32>
    %1314 = vector.extract_strided_slice %1311 {offsets = [0, 16], sizes = [8, 8], strides = [1, 1]} : vector<8x24xf32> to vector<8x8xf32>
    %1315 = vector.extract_strided_slice %1306 {offsets = [0, 24], sizes = [8, 8], strides = [1, 1]} : vector<8x32xf32> to vector<8x8xf32>
    %1316 = arith.mulf %1313, %1297 : vector<8x8xf32>
    %1317 = arith.mulf %1312, %1315 : vector<8x8xf32>
    %1318 = arith.addf %1316, %1317 : vector<8x8xf32>
    %1319 = math.tanh %1318 : vector<8x8xf32>
    %1320 = arith.mulf %1314, %1319 : vector<8x8xf32>
    %c1_462 = arith.constant 1 : index
    %c0_463 = arith.constant 0 : index
    %c0_464 = arith.constant 0 : index
    %1321 = vector.load %arg8[%c1_462, %c0_463, %c0_464] : memref<8x8x8xf32, #tpu.memory_space<vmem>>, vector<1x8x8xf32>
    %1322 = vector.shape_cast %1321 : vector<1x8x8xf32> to vector<8x8xf32>
    %1323 = vector.shape_cast %1320 : vector<8x8xf32> to vector<1x8x8xf32>
    tpu.vector_store %arg8[%c1_462, %c0_463, %c0_464], %1323 {strides = array<i32>} : memref<8x8x8xf32, #tpu.memory_space<vmem>>, vector<1x8x8xf32>,
    %1324 = vector.extract_strided_slice %1279 {offsets = [16, 0], sizes = [8, 32], strides = [1, 1]} : vector<64x32xf32> to vector<8x32xf32>
    %cst_465 = arith.constant dense<0.000000e+00> : vector<8x32xf32>
    %1325 = tpu.matmul %1320, %1272, %cst_465 {dimension_numbers = #tpu.dot_dimension_numbers<[1], [0], [0], [1], [0, 0, 1, 1], [], []>} : vector<8x8xf32>, vector<8x32xf32>, vector<8x32xf32> -> vector<8x32xf32>
    %1326 = arith.addf %1324, %1325 : vector<8x32xf32>
    %1327 = math.tanh %1326 : vector<8x32xf32>
    %1328 = vector.extract_strided_slice %1327 {offsets = [0, 0], sizes = [8, 24], strides = [1, 1]} : vector<8x32xf32> to vector<8x24xf32>
    %cst_466 = arith.constant 5.000000e-01 : f32
    %1329 = vector.broadcast %cst_466 : f32 to vector<8x24xf32>
    %1330 = arith.mulf %1329, %1328 : vector<8x24xf32>
    %cst_467 = arith.constant 5.000000e-01 : f32
    %1331 = vector.broadcast %cst_467 : f32 to vector<8x24xf32>
    %1332 = arith.addf %1330, %1331 : vector<8x24xf32>
    %1333 = vector.extract_strided_slice %1332 {offsets = [0, 0], sizes = [8, 8], strides = [1, 1]} : vector<8x24xf32> to vector<8x8xf32>
    %1334 = vector.extract_strided_slice %1332 {offsets = [0, 8], sizes = [8, 8], strides = [1, 1]} : vector<8x24xf32> to vector<8x8xf32>
    %1335 = vector.extract_strided_slice %1332 {offsets = [0, 16], sizes = [8, 8], strides = [1, 1]} : vector<8x24xf32> to vector<8x8xf32>
    %1336 = vector.extract_strided_slice %1327 {offsets = [0, 24], sizes = [8, 8], strides = [1, 1]} : vector<8x32xf32> to vector<8x8xf32>
    %1337 = arith.mulf %1334, %1318 : vector<8x8xf32>
    %1338 = arith.mulf %1333, %1336 : vector<8x8xf32>
    %1339 = arith.addf %1337, %1338 : vector<8x8xf32>
    %1340 = math.tanh %1339 : vector<8x8xf32>
    %1341 = arith.mulf %1335, %1340 : vector<8x8xf32>
    %c2_468 = arith.constant 2 : index
    %c0_469 = arith.constant 0 : index
    %c0_470 = arith.constant 0 : index
    %1342 = vector.load %arg8[%c2_468, %c0_469, %c0_470] : memref<8x8x8xf32, #tpu.memory_space<vmem>>, vector<1x8x8xf32>
    %1343 = vector.shape_cast %1342 : vector<1x8x8xf32> to vector<8x8xf32>
    %1344 = vector.shape_cast %1341 : vector<8x8xf32> to vector<1x8x8xf32>
    tpu.vector_store %arg8[%c2_468, %c0_469, %c0_470], %1344 {strides = array<i32>} : memref<8x8x8xf32, #tpu.memory_space<vmem>>, vector<1x8x8xf32>,
    %1345 = vector.extract_strided_slice %1279 {offsets = [24, 0], sizes = [8, 32], strides = [1, 1]} : vector<64x32xf32> to vector<8x32xf32>
    %cst_471 = arith.constant dense<0.000000e+00> : vector<8x32xf32>
    %1346 = tpu.matmul %1341, %1272, %cst_471 {dimension_numbers = #tpu.dot_dimension_numbers<[1], [0], [0], [1], [0, 0, 1, 1], [], []>} : vector<8x8xf32>, vector<8x32xf32>, vector<8x32xf32> -> vector<8x32xf32>
    %1347 = arith.addf %1345, %1346 : vector<8x32xf32>
    %1348 = math.tanh %1347 : vector<8x32xf32>
    %1349 = vector.extract_strided_slice %1348 {offsets = [0, 0], sizes = [8, 24], strides = [1, 1]} : vector<8x32xf32> to vector<8x24xf32>
    %cst_472 = arith.constant 5.000000e-01 : f32
    %1350 = vector.broadcast %cst_472 : f32 to vector<8x24xf32>
    %1351 = arith.mulf %1350, %1349 : vector<8x24xf32>
    %cst_473 = arith.constant 5.000000e-01 : f32
    %1352 = vector.broadcast %cst_473 : f32 to vector<8x24xf32>
    %1353 = arith.addf %1351, %1352 : vector<8x24xf32>
    %1354 = vector.extract_strided_slice %1353 {offsets = [0, 0], sizes = [8, 8], strides = [1, 1]} : vector<8x24xf32> to vector<8x8xf32>
    %1355 = vector.extract_strided_slice %1353 {offsets = [0, 8], sizes = [8, 8], strides = [1, 1]} : vector<8x24xf32> to vector<8x8xf32>
    %1356 = vector.extract_strided_slice %1353 {offsets = [0, 16], sizes = [8, 8], strides = [1, 1]} : vector<8x24xf32> to vector<8x8xf32>
    %1357 = vector.extract_strided_slice %1348 {offsets = [0, 24], sizes = [8, 8], strides = [1, 1]} : vector<8x32xf32> to vector<8x8xf32>
    %1358 = arith.mulf %1355, %1339 : vector<8x8xf32>
    %1359 = arith.mulf %1354, %1357 : vector<8x8xf32>
    %1360 = arith.addf %1358, %1359 : vector<8x8xf32>
    %1361 = math.tanh %1360 : vector<8x8xf32>
    %1362 = arith.mulf %1356, %1361 : vector<8x8xf32>
    %c3_474 = arith.constant 3 : index
    %c0_475 = arith.constant 0 : index
    %c0_476 = arith.constant 0 : index
    %1363 = vector.load %arg8[%c3_474, %c0_475, %c0_476] : memref<8x8x8xf32, #tpu.memory_space<vmem>>, vector<1x8x8xf32>
    %1364 = vector.shape_cast %1363 : vector<1x8x8xf32> to vector<8x8xf32>
    %1365 = vector.shape_cast %1362 : vector<8x8xf32> to vector<1x8x8xf32>
    tpu.vector_store %arg8[%c3_474, %c0_475, %c0_476], %1365 {strides = array<i32>} : memref<8x8x8xf32, #tpu.memory_space<vmem>>, vector<1x8x8xf32>,
    %1366 = vector.extract_strided_slice %1279 {offsets = [32, 0], sizes = [8, 32], strides = [1, 1]} : vector<64x32xf32> to vector<8x32xf32>
    %cst_477 = arith.constant dense<0.000000e+00> : vector<8x32xf32>
    %1367 = tpu.matmul %1362, %1272, %cst_477 {dimension_numbers = #tpu.dot_dimension_numbers<[1], [0], [0], [1], [0, 0, 1, 1], [], []>} : vector<8x8xf32>, vector<8x32xf32>, vector<8x32xf32> -> vector<8x32xf32>
    %1368 = arith.addf %1366, %1367 : vector<8x32xf32>
    %1369 = math.tanh %1368 : vector<8x32xf32>
    %1370 = vector.extract_strided_slice %1369 {offsets = [0, 0], sizes = [8, 24], strides = [1, 1]} : vector<8x32xf32> to vector<8x24xf32>
    %cst_478 = arith.constant 5.000000e-01 : f32
    %1371 = vector.broadcast %cst_478 : f32 to vector<8x24xf32>
    %1372 = arith.mulf %1371, %1370 : vector<8x24xf32>
    %cst_479 = arith.constant 5.000000e-01 : f32
    %1373 = vector.broadcast %cst_479 : f32 to vector<8x24xf32>
    %1374 = arith.addf %1372, %1373 : vector<8x24xf32>
    %1375 = vector.extract_strided_slice %1374 {offsets = [0, 0], sizes = [8, 8], strides = [1, 1]} : vector<8x24xf32> to vector<8x8xf32>
    %1376 = vector.extract_strided_slice %1374 {offsets = [0, 8], sizes = [8, 8], strides = [1, 1]} : vector<8x24xf32> to vector<8x8xf32>
    %1377 = vector.extract_strided_slice %1374 {offsets = [0, 16], sizes = [8, 8], strides = [1, 1]} : vector<8x24xf32> to vector<8x8xf32>
    %1378 = vector.extract_strided_slice %1369 {offsets = [0, 24], sizes = [8, 8], strides = [1, 1]} : vector<8x32xf32> to vector<8x8xf32>
    %1379 = arith.mulf %1376, %1360 : vector<8x8xf32>
    %1380 = arith.mulf %1375, %1378 : vector<8x8xf32>
    %1381 = arith.addf %1379, %1380 : vector<8x8xf32>
    %1382 = math.tanh %1381 : vector<8x8xf32>
    %1383 = arith.mulf %1377, %1382 : vector<8x8xf32>
    %c4_480 = arith.constant 4 : index
    %c0_481 = arith.constant 0 : index
    %c0_482 = arith.constant 0 : index
    %1384 = vector.load %arg8[%c4_480, %c0_481, %c0_482] : memref<8x8x8xf32, #tpu.memory_space<vmem>>, vector<1x8x8xf32>
    %1385 = vector.shape_cast %1384 : vector<1x8x8xf32> to vector<8x8xf32>
    %1386 = vector.shape_cast %1383 : vector<8x8xf32> to vector<1x8x8xf32>
    tpu.vector_store %arg8[%c4_480, %c0_481, %c0_482], %1386 {strides = array<i32>} : memref<8x8x8xf32, #tpu.memory_space<vmem>>, vector<1x8x8xf32>,
    %1387 = vector.extract_strided_slice %1279 {offsets = [40, 0], sizes = [8, 32], strides = [1, 1]} : vector<64x32xf32> to vector<8x32xf32>
    %cst_483 = arith.constant dense<0.000000e+00> : vector<8x32xf32>
    %1388 = tpu.matmul %1383, %1272, %cst_483 {dimension_numbers = #tpu.dot_dimension_numbers<[1], [0], [0], [1], [0, 0, 1, 1], [], []>} : vector<8x8xf32>, vector<8x32xf32>, vector<8x32xf32> -> vector<8x32xf32>
    %1389 = arith.addf %1387, %1388 : vector<8x32xf32>
    %1390 = math.tanh %1389 : vector<8x32xf32>
    %1391 = vector.extract_strided_slice %1390 {offsets = [0, 0], sizes = [8, 24], strides = [1, 1]} : vector<8x32xf32> to vector<8x24xf32>
    %cst_484 = arith.constant 5.000000e-01 : f32
    %1392 = vector.broadcast %cst_484 : f32 to vector<8x24xf32>
    %1393 = arith.mulf %1392, %1391 : vector<8x24xf32>
    %cst_485 = arith.constant 5.000000e-01 : f32
    %1394 = vector.broadcast %cst_485 : f32 to vector<8x24xf32>
    %1395 = arith.addf %1393, %1394 : vector<8x24xf32>
    %1396 = vector.extract_strided_slice %1395 {offsets = [0, 0], sizes = [8, 8], strides = [1, 1]} : vector<8x24xf32> to vector<8x8xf32>
    %1397 = vector.extract_strided_slice %1395 {offsets = [0, 8], sizes = [8, 8], strides = [1, 1]} : vector<8x24xf32> to vector<8x8xf32>
    %1398 = vector.extract_strided_slice %1395 {offsets = [0, 16], sizes = [8, 8], strides = [1, 1]} : vector<8x24xf32> to vector<8x8xf32>
    %1399 = vector.extract_strided_slice %1390 {offsets = [0, 24], sizes = [8, 8], strides = [1, 1]} : vector<8x32xf32> to vector<8x8xf32>
    %1400 = arith.mulf %1397, %1381 : vector<8x8xf32>
    %1401 = arith.mulf %1396, %1399 : vector<8x8xf32>
    %1402 = arith.addf %1400, %1401 : vector<8x8xf32>
    %1403 = math.tanh %1402 : vector<8x8xf32>
    %1404 = arith.mulf %1398, %1403 : vector<8x8xf32>
    %c5_486 = arith.constant 5 : index
    %c0_487 = arith.constant 0 : index
    %c0_488 = arith.constant 0 : index
    %1405 = vector.load %arg8[%c5_486, %c0_487, %c0_488] : memref<8x8x8xf32, #tpu.memory_space<vmem>>, vector<1x8x8xf32>
    %1406 = vector.shape_cast %1405 : vector<1x8x8xf32> to vector<8x8xf32>
    %1407 = vector.shape_cast %1404 : vector<8x8xf32> to vector<1x8x8xf32>
    tpu.vector_store %arg8[%c5_486, %c0_487, %c0_488], %1407 {strides = array<i32>} : memref<8x8x8xf32, #tpu.memory_space<vmem>>, vector<1x8x8xf32>,
    %1408 = vector.extract_strided_slice %1279 {offsets = [48, 0], sizes = [8, 32], strides = [1, 1]} : vector<64x32xf32> to vector<8x32xf32>
    %cst_489 = arith.constant dense<0.000000e+00> : vector<8x32xf32>
    %1409 = tpu.matmul %1404, %1272, %cst_489 {dimension_numbers = #tpu.dot_dimension_numbers<[1], [0], [0], [1], [0, 0, 1, 1], [], []>} : vector<8x8xf32>, vector<8x32xf32>, vector<8x32xf32> -> vector<8x32xf32>
    %1410 = arith.addf %1408, %1409 : vector<8x32xf32>
    %1411 = math.tanh %1410 : vector<8x32xf32>
    %1412 = vector.extract_strided_slice %1411 {offsets = [0, 0], sizes = [8, 24], strides = [1, 1]} : vector<8x32xf32> to vector<8x24xf32>
    %cst_490 = arith.constant 5.000000e-01 : f32
    %1413 = vector.broadcast %cst_490 : f32 to vector<8x24xf32>
    %1414 = arith.mulf %1413, %1412 : vector<8x24xf32>
    %cst_491 = arith.constant 5.000000e-01 : f32
    %1415 = vector.broadcast %cst_491 : f32 to vector<8x24xf32>
    %1416 = arith.addf %1414, %1415 : vector<8x24xf32>
    %1417 = vector.extract_strided_slice %1416 {offsets = [0, 0], sizes = [8, 8], strides = [1, 1]} : vector<8x24xf32> to vector<8x8xf32>
    %1418 = vector.extract_strided_slice %1416 {offsets = [0, 8], sizes = [8, 8], strides = [1, 1]} : vector<8x24xf32> to vector<8x8xf32>
    %1419 = vector.extract_strided_slice %1416 {offsets = [0, 16], sizes = [8, 8], strides = [1, 1]} : vector<8x24xf32> to vector<8x8xf32>
    %1420 = vector.extract_strided_slice %1411 {offsets = [0, 24], sizes = [8, 8], strides = [1, 1]} : vector<8x32xf32> to vector<8x8xf32>
    %1421 = arith.mulf %1418, %1402 : vector<8x8xf32>
    %1422 = arith.mulf %1417, %1420 : vector<8x8xf32>
    %1423 = arith.addf %1421, %1422 : vector<8x8xf32>
    %1424 = math.tanh %1423 : vector<8x8xf32>
    %1425 = arith.mulf %1419, %1424 : vector<8x8xf32>
    %c6_492 = arith.constant 6 : index
    %c0_493 = arith.constant 0 : index
    %c0_494 = arith.constant 0 : index
    %1426 = vector.load %arg8[%c6_492, %c0_493, %c0_494] : memref<8x8x8xf32, #tpu.memory_space<vmem>>, vector<1x8x8xf32>
    %1427 = vector.shape_cast %1426 : vector<1x8x8xf32> to vector<8x8xf32>
    %1428 = vector.shape_cast %1425 : vector<8x8xf32> to vector<1x8x8xf32>
    tpu.vector_store %arg8[%c6_492, %c0_493, %c0_494], %1428 {strides = array<i32>} : memref<8x8x8xf32, #tpu.memory_space<vmem>>, vector<1x8x8xf32>,
    %1429 = vector.extract_strided_slice %1279 {offsets = [56, 0], sizes = [8, 32], strides = [1, 1]} : vector<64x32xf32> to vector<8x32xf32>
    %cst_495 = arith.constant dense<0.000000e+00> : vector<8x32xf32>
    %1430 = tpu.matmul %1425, %1272, %cst_495 {dimension_numbers = #tpu.dot_dimension_numbers<[1], [0], [0], [1], [0, 0, 1, 1], [], []>} : vector<8x8xf32>, vector<8x32xf32>, vector<8x32xf32> -> vector<8x32xf32>
    %1431 = arith.addf %1429, %1430 : vector<8x32xf32>
    %1432 = math.tanh %1431 : vector<8x32xf32>
    %1433 = vector.extract_strided_slice %1432 {offsets = [0, 0], sizes = [8, 24], strides = [1, 1]} : vector<8x32xf32> to vector<8x24xf32>
    %cst_496 = arith.constant 5.000000e-01 : f32
    %1434 = vector.broadcast %cst_496 : f32 to vector<8x24xf32>
    %1435 = arith.mulf %1434, %1433 : vector<8x24xf32>
    %cst_497 = arith.constant 5.000000e-01 : f32
    %1436 = vector.broadcast %cst_497 : f32 to vector<8x24xf32>
    %1437 = arith.addf %1435, %1436 : vector<8x24xf32>
    %1438 = vector.extract_strided_slice %1437 {offsets = [0, 0], sizes = [8, 8], strides = [1, 1]} : vector<8x24xf32> to vector<8x8xf32>
    %1439 = vector.extract_strided_slice %1437 {offsets = [0, 8], sizes = [8, 8], strides = [1, 1]} : vector<8x24xf32> to vector<8x8xf32>
    %1440 = vector.extract_strided_slice %1437 {offsets = [0, 16], sizes = [8, 8], strides = [1, 1]} : vector<8x24xf32> to vector<8x8xf32>
    %1441 = vector.extract_strided_slice %1432 {offsets = [0, 24], sizes = [8, 8], strides = [1, 1]} : vector<8x32xf32> to vector<8x8xf32>
    %1442 = arith.mulf %1439, %1423 : vector<8x8xf32>
    %1443 = arith.mulf %1438, %1441 : vector<8x8xf32>
    %1444 = arith.addf %1442, %1443 : vector<8x8xf32>
    %1445 = math.tanh %1444 : vector<8x8xf32>
    %1446 = arith.mulf %1440, %1445 : vector<8x8xf32>
    %c7_498 = arith.constant 7 : index
    %c0_499 = arith.constant 0 : index
    %c0_500 = arith.constant 0 : index
    %1447 = vector.load %arg8[%c7_498, %c0_499, %c0_500] : memref<8x8x8xf32, #tpu.memory_space<vmem>>, vector<1x8x8xf32>
    %1448 = vector.shape_cast %1447 : vector<1x8x8xf32> to vector<8x8xf32>
    %1449 = vector.shape_cast %1446 : vector<8x8xf32> to vector<1x8x8xf32>
    tpu.vector_store %arg8[%c7_498, %c0_499, %c0_500], %1449 {strides = array<i32>} : memref<8x8x8xf32, #tpu.memory_space<vmem>>, vector<1x8x8xf32>,
    %c0_501 = arith.constant 0 : index
    %c0_502 = arith.constant 0 : index
    %1450 = vector.load %arg5[%c0_501, %c0_502] : memref<8x128xf32, #tpu.memory_space<vmem>>, vector<8x128xf32>
    %c0_503 = arith.constant 0 : index
    %c0_504 = arith.constant 0 : index
    %1451 = vector.load %arg6[%c0_503, %c0_504] : memref<1x128xf32, #tpu.memory_space<vmem>>, vector<1x128xf32>
    %cst_505 = arith.constant dense<0.000000e+00> : vector<8x128xf32>
    %1452 = tpu.matmul %1446, %1450, %cst_505 {dimension_numbers = #tpu.dot_dimension_numbers<[1], [0], [0], [1], [0, 0, 1, 1], [], []>} : vector<8x8xf32>, vector<8x128xf32>, vector<8x128xf32> -> vector<8x128xf32>
    %1453 = vector.broadcast %1451 : vector<1x128xf32> to vector<8x128xf32>
    %1454 = arith.addf %1452, %1453 : vector<8x128xf32>
    %cst_506 = arith.constant dense<0xFF800000> : vector<8xf32>
    %1455 = vector.multi_reduction <maximumf>, %1454, %cst_506 [1] : vector<8x128xf32> to vector<8xf32>
    %1456 = vector.shape_cast %1455 : vector<8xf32> to vector<8x1xf32>
    %1457 = vector.broadcast %1456 : vector<8x1xf32> to vector<8x128xf32>
    %1458 = arith.subf %1454, %1457 : vector<8x128xf32>
    %1459 = math.exp %1458 : vector<8x128xf32>
    %cst_507 = arith.constant dense<0.000000e+00> : vector<8xf32>
    %1460 = vector.multi_reduction <add>, %1459, %cst_507 [1] : vector<8x128xf32> to vector<8xf32>
    %1461 = vector.shape_cast %1460 : vector<8xf32> to vector<8x1xf32>
    %1462 = vector.broadcast %1461 : vector<8x1xf32> to vector<8x128xf32>
    %1463 = arith.divf %1459, %1462 : vector<8x128xf32>
    %c0_508 = arith.constant 0 : index
    %c0_509 = arith.constant 0 : index
    %1464 = vector.load %arg7[%c0_508, %c0_509] : memref<8x128xf32, #tpu.memory_space<vmem>>, vector<8x128xf32>
    tpu.vector_store %arg7[%c0_508, %c0_509], %1463 {strides = array<i32>} : memref<8x128xf32, #tpu.memory_space<vmem>>, vector<8x128xf32>,
    return
  }
  func.func @transform_0(%arg0: i32) -> (i32, i32, i32) {
    %c0_i32 = arith.constant 0 : i32
    %c0_i32_0 = arith.constant 0 : i32
    %c0_i32_1 = arith.constant 0 : i32
    return %c0_i32, %arg0, %c0_i32_0 : i32, i32, i32
  }
  func.func @transform_1(%arg0: i32) -> (i32, i32, i32) {
    %c0_i32 = arith.constant 0 : i32
    %c0_i32_0 = arith.constant 0 : i32
    %c0_i32_1 = arith.constant 0 : i32
    %c0_i32_2 = arith.constant 0 : i32
    return %c0_i32, %c0_i32_0, %c0_i32_1 : i32, i32, i32
  }
  func.func @transform_2(%arg0: i32) -> (i32, i32, i32) {
    %c0_i32 = arith.constant 0 : i32
    %c0_i32_0 = arith.constant 0 : i32
    %c0_i32_1 = arith.constant 0 : i32
    %c0_i32_2 = arith.constant 0 : i32
    return %c0_i32, %c0_i32_0, %c0_i32_1 : i32, i32, i32
  }
  func.func @transform_3(%arg0: i32) -> (i32, i32, i32) {
    %c0_i32 = arith.constant 0 : i32
    %c0_i32_0 = arith.constant 0 : i32
    %c0_i32_1 = arith.constant 0 : i32
    %c0_i32_2 = arith.constant 0 : i32
    return %c0_i32, %c0_i32_0, %c0_i32_1 : i32, i32, i32
  }
  func.func @transform_4(%arg0: i32) -> (i32, i32) {
    %c0_i32 = arith.constant 0 : i32
    %c0_i32_0 = arith.constant 0 : i32
    %c0_i32_1 = arith.constant 0 : i32
    return %c0_i32, %c0_i32_0 : i32, i32
  }
  func.func @transform_5(%arg0: i32) -> (i32, i32) {
    %c0_i32 = arith.constant 0 : i32
    %c0_i32_0 = arith.constant 0 : i32
    %c0_i32_1 = arith.constant 0 : i32
    return %c0_i32, %c0_i32_0 : i32, i32
  }
  func.func @transform_6(%arg0: i32) -> (i32, i32) {
    %c0_i32 = arith.constant 0 : i32
    %c0_i32_0 = arith.constant 0 : i32
    return %arg0, %c0_i32 : i32, i32
  }
}

</mosaic_0001>

<bundles_post_ra>
// kernel: tpu_custom_call.1
= control target key start
LH: loop header
LB: loop body
LE: loop exit
PB: predicated region body
PF: predicated region fallthrough
CT: control target
= control target key end

     0   :  { %11 = vsyncpa [#allocation4], 0  ;;  %s9981_s0 = inlined_call_operand.hbm [shape: f32[8,8,8], index: 0, kind: input, shape index: {}]   ;;  %s9982_s1 = inlined_call_operand.hbm [shape: f32[8,8,32], index: 1, kind: input, shape index: {}]   ;;  %s9983_s2 = inlined_call_operand.hbm [shape: f32[8,8,32], index: 2, kind: input, shape index: {}]   ;;  %s9984_s3 = inlined_call_operand.vmem [shape: f32[8,1,32], index: 3, kind: input, shape index: {}]   ;;  %s9985_s4 = inlined_call_operand.hbm [shape: f32[8,128], index: 4, kind: input, shape index: {}]   ;;  %s9986_s5 = inlined_call_operand.vmem [shape: f32[1,128], index: 5, kind: input, shape index: {}]   ;;  %s9987_s6 = inlined_call_operand.hbm [shape: f32[8,128], index: 6, kind: output, shape index: {}]  }
   0x1   :  { %12 = vsyncpa [#allocation7], 0 }
   0x2   :  { %13 = vsyncpa [#allocation10], 0 }
   0x3   :  { %14 = vsyncpa [#allocation5], 0  ;;  %s8821_s21 = smov [#allocation6]   ;;  %s8822_s23 = smov [#allocation3]  }
   0x4   :  { %s32_s22 = sshll.u32 %s8821_s21, 4  ;;  %s20_s24 = sshll.u32 %s8822_s23, 4  ;;  %s33_s22 = int_to_ptr.vmem [resolvable:$true] %s32_s22  ;;  %s8867_s24 = int_to_ptr.vmem [resolvable:$true] %s20_s24 }
   0x5   :  { %s8703_s27 = scalar_lea.hbm %s9982_s1, 1024 }
   0x6   :  { %p8704_p0 = scmp.ne.s32.totalorder %s9982_s1, %s8703_s27  ;;  %p8707_p1 = scmp.lt.u32.totalorder %s8703_s27, %s9982_s1 }
   0x8   :  { %p8709_p2 = pnand %p8707_p1, %p8704_p0 }
   0xa   :  { %8712 = shalt.err (!%p8709_p2)
}
   0xb   :  { %s8713_s8 = scalar_lea.vmem %s33_s22, 1024  ;;  %p8718_p4 = scmp.lt.s32.totalorder %s33_s22, %s33_s22 }
   0xc   :  { %p8714_p3 = scmp.ne.s32.totalorder %s33_s22, %s8713_s8  ;;  %p8719_p5 = scmp.lt.s32.totalorder %s8713_s8, %s8713_s8 }
   0xe   :  { %p8720_p6 = por %p8719_p5, %p8718_p4 }
  0x10   :  { %p8721_p7 = pnand %p8720_p6, %p8714_p3 }
  0x12   :  { %8724 = shalt.err (!%p8721_p7)
}
  0x13   :  { %s8823_s9 = smov 128   ;;  %s8824_s10 = smov 8  }
  0x14   :  { %38 = dma.hbm_to_vmem [thread:$0]  %s9982_s1, 1024, %s33_s22, [#allocation7], %s8823_s9, %s8823_s9, %s8824_s10  }
  0x15   :  { %s8725_s15 = scalar_lea.hbm %s9981_s0, 1024 }
  0x16   :  { %p8726_p8 = scmp.ne.s32.totalorder %s9981_s0, %s8725_s15  ;;  %p8729_p9 = scmp.lt.u32.totalorder %s8725_s15, %s9981_s0 }
  0x18   :  { %p8731_p10 = pnand %p8729_p9, %p8726_p8 }
  0x1a   :  { %8734 = shalt.err (!%p8731_p10)
}
  0x1b   :  { %s8735_s20 = scalar_lea.vmem %s8867_s24, 1024  ;;  %p8740_p12 = scmp.lt.s32.totalorder %s8867_s24, %s8867_s24 }
  0x1c   :  { %p8736_p11 = scmp.ne.s32.totalorder %s8867_s24, %s8735_s20  ;;  %p8741_p13 = scmp.lt.s32.totalorder %s8735_s20, %s8735_s20 }
  0x1e   :  { %p8742_p0 = por %p8741_p13, %p8740_p12 }
  0x20   :  { %p8743_p1 = pnand %p8742_p0, %p8736_p11 }
  0x22   :  { %8746 = shalt.err (!%p8743_p1)
}
  0x23   :  { %26 = dma.hbm_to_vmem [thread:$0]  %s9981_s0, 1024, %s8867_s24, [#allocation4], %s8823_s9, %s8823_s9, %s8824_s10  }
  0x24   :  { %s8825_s22 = smov [#allocation8]   ;;  %s8826_s25 = smov [#allocation9]  }
  0x25   :  { %s44_s23 = sshll.u32 %s8825_s22, 4  ;;  %s59_s26 = sshll.u32 %s8826_s25, 4  ;;  %s45_s23 = int_to_ptr.vmem [resolvable:$true] %s44_s23  ;;  %s60_s26 = int_to_ptr.vmem [resolvable:$true] %s59_s26 }
  0x26   :  { %s8747_s29 = scalar_lea.hbm %s9983_s2, 1024 }
  0x27   :  { %p8748_p2 = scmp.ne.s32.totalorder %s9983_s2, %s8747_s29  ;;  %p8751_p3 = scmp.lt.u32.totalorder %s8747_s29, %s9983_s2 }
  0x29   :  { %p8753_p4 = pnand %p8751_p3, %p8748_p2 }
  0x2b   :  { %8756 = shalt.err (!%p8753_p4)
}
  0x2c   :  { %s8757_s0 = scalar_lea.vmem %s45_s23, 1024  ;;  %p8762_p6 = scmp.lt.s32.totalorder %s45_s23, %s45_s23 }
  0x2d   :  { %p8758_p5 = scmp.ne.s32.totalorder %s45_s23, %s8757_s0  ;;  %p8763_p7 = scmp.lt.s32.totalorder %s8757_s0, %s8757_s0 }
  0x2f   :  { %p8764_p8 = por %p8763_p7, %p8762_p6 }
  0x31   :  { %p8765_p9 = pnand %p8764_p8, %p8758_p5 }
  0x33   :  { %8768 = shalt.err (!%p8765_p9)
}
  0x34   :  { %50 = dma.hbm_to_vmem [thread:$0]  %s9983_s2, 1024, %s45_s23, [#allocation7], %s8823_s9, %s8823_s9, %s8824_s10  }
  0x35   :  { %s8769_s15 = scalar_lea.hbm %s9985_s4, 128 }
  0x36   :  { %p8770_p10 = scmp.ne.s32.totalorder %s9985_s4, %s8769_s15  ;;  %p8773_p11 = scmp.lt.u32.totalorder %s8769_s15, %s9985_s4 }
  0x38   :  { %p8775_p12 = pnand %p8773_p11, %p8770_p10 }
  0x3a   :  { %8778 = shalt.err (!%p8775_p12)
}
  0x3b   :  { %s8779_s20 = scalar_lea.vmem %s60_s26, 128  ;;  %p8784_p0 = scmp.lt.s32.totalorder %s60_s26, %s60_s26 }
  0x3c   :  { %p8780_p13 = scmp.ne.s32.totalorder %s60_s26, %s8779_s20  ;;  %p8785_p1 = scmp.lt.s32.totalorder %s8779_s20, %s8779_s20 }
  0x3e   :  { %p8786_p2 = por %p8785_p1, %p8784_p0 }
  0x40   :  { %p8787_p3 = pnand %p8786_p2, %p8780_p13 }
  0x42   :  { %8790 = shalt.err (!%p8787_p3)
}
  0x43   :  { %62 = dma.hbm_to_vmem [thread:$0]  %s9985_s4, 128, %s60_s26, [#allocation10]  }
  0x44   :  { %8813 = dma.done.wait [#allocation4], 1024  }
  0x45   :  { %8814 = vsyncadd [#allocation4], 4294966272 }
  0x46   :  { %8815 = dma.done.wait [#allocation7], 2048  }
  0x47   :  { %8816 = vsyncadd [#allocation7], 4294965248 }
  0x48   :  { %8817 = dma.done.wait [#allocation10], 128  }
  0x49   :  { %8818 = vsyncadd [#allocation10], 4294967168  ;;  %v8827_v0 = vmov 0.0   ;;  %vm8828_vm0 = vmmov 0   ;;  %vm85_vm1 = vcmask 64512   ;;  %v94_v1 = vld [vmem:[#allocation6] sm:$0xff] }
  0x4a   :  { %8009 = vmatprep.subr.mxu1 %v8827_v0  ;;  %8011 = vmatprep.mubr.msk.f32.mxu1 %vm8828_vm0, %v8827_v0  ;;  %v77_v2 = vld [vmem:[#allocation3] sm:$0xff]  ;;  %v78_v3 = vld [vmem:[#allocation3 + $0x8] sm:$0xff]  ;;  %s8829_s21 = smov 104   ;;  %s8830_s22 = smov 112   ;;  %v79_v38 = vld [vmem:[#allocation3 + $0x10] sm:$0xff] }
  0x4b   :  { %7995 = vmatprep.subr.mxu0 %v94_v1  ;;  %86 = vst.msk [vmem:[#allocation2] sm:$0xff] %vm85_vm1, %v77_v2  ;;  %87 = vst.msk [vmem:[#allocation2 + $0x8] sm:$0xff] %vm85_vm1, %v78_v3  ;;  %v8936_v4 = vld [vmem:[#allocation8] sm:$0xff]  ;;  %v80_v39 = vld [vmem:[#allocation3 + $0x18] sm:$0xff] }
  0x4c   :  { %7996 = vmatpush3.msra.mxu0 %v94_v1  ;;  %8010 = vmatpush3.msra.mxu1 %v8936_v4  ;;  %v8953_v9 = vld [vmem:[%s9984_s3] ss:$0 sm:$0xff]  ;;  %88 = vst.msk [vmem:[#allocation2 + $0x10] sm:$0xff] %vm85_vm1, %v79_v38  ;;  %89 = vst.msk [vmem:[#allocation2 + $0x18] sm:$0xff] %vm85_vm1, %v80_v39 }
  0x4d   :  { %8012 = vmatmul.mubr.f32.vlgmr.msra.gmra.mrb[0].mxu1 %v8827_v0  ;;  %8014 = vmatprep.subr.mxu1 %v8827_v0 }
  0x4e   :  { %8015 = vmatpush3.msra.mxu1 %v8936_v4  ;;  %8016 = vmatprep.mubr.msk.f32.mxu1 %vm8828_vm0, %v8827_v0 }
  0x4f   :  { %8019 = vmatprep.subr.mxu1 %v8827_v0  ;;  %8029 = vmatprep.subr.mxu0 %v8827_v0 }
  0x52   :  { %v97_v5 = vld [vmem:[#allocation2] sm:$0xff]  ;;  %v98_v6 = vld [vmem:[#allocation2 + $0x8] sm:$0xff] }
  0x53   :  { %7997 = vmatprep.mubr.msk.f32.mxu0 %vm85_vm1, %v97_v5  ;;  %v99_v40 = vld [vmem:[#allocation2 + $0x10] sm:$0xff]  ;;  %v100_v41 = vld [vmem:[#allocation2 + $0x18] sm:$0xff] }
  0x54   :  { %7998 = vmatmul.mubr.msk.f32.vlgmr.msra.gmra.mrb[0].mxu0 %vm85_vm1, %v98_v6 }
  0x55   :  { %8030 = vmatpush3.msra.mxu0 %v8936_v4  ;;  %8000 = vmatprep.mubr.msk.f32.mxu0 %vm85_vm1, %v99_v40 }
  0x56   :  { %8039 = vmatprep.subr.mxu0 %v8827_v0 }
  0x58   :  { %8001 = vmatmul.mubr.msk.f32.gmra.mrb[2].mxu0 %vm85_vm1, %v100_v41 }
 0x120   :  { %v309_v7 = vpop.f32.mrb[0].mxu1 }
 0x121   :  { %v8013_v8 = vpop.f32.mrb[1].mxu1 }
 0x127   :  { %v7999_v10 = vpop.f32.mrb[0].mxu0 }
 0x128   :  { %v201_v11 = vpop.f32.mrb[1].mxu0  ;;  %v207_v26 = vadd.f32 %v7999_v10, %v8953_v9 }
 0x129   :  { %v202_v12 = vadd.f32 %v8953_v9, %v201_v11 }
 0x12b   :  { %v313_v13 = vadd.f32 %v309_v7, %v202_v12  ;;  %v8002_v45 = vpop.f32.mrb[2].mxu0 }
 0x12c   :  { %v211_v46 = vpop.f32.mrb[3].mxu0  ;;  %v217_v1 = vadd.f32 %v8002_v45, %v8953_v9 }
 0x12d   :  { %8443 = vtanh.f32 %v313_v13  ;;  %v212_v48 = vadd.f32 %v8953_v9, %v211_v46 }
 0x137   :  { %v8444_v14 = vpop.eup %8443 }
 0x138   :  { %319 = vrot.lane.b32.xlu0 %v8444_v14, %s8829_s21  ;;  %v315_v15 = vmul.f32 0.5, %v8444_v14 }
 0x13a   :  { %v316_v16 = vadd.f32 0.5, %v315_v15  ;;  %v81_v15 = vld [vmem:[#allocation3 + $0x20] sm:$0xff] }
 0x13b   :  { %90 = vst.msk [vmem:[#allocation2 + $0x20] sm:$0xff] %vm85_vm1, %v81_v15 }
 0x13c   :  { %v317_v19 = vmul.f32 0.0, %v316_v16 }
 0x1aa   :  { %v320_v17 = vpop.permute.xlu0 %319 }
 0x1ab   :  { %v322_v18 = vmul.f32 %v320_v17, %v316_v16  ;;  %v83_v17 = vld [vmem:[#allocation3 + $0x30] sm:$0xff] }
 0x1ac   :  { %92 = vst.msk [vmem:[#allocation2 + $0x30] sm:$0xff] %vm85_vm1, %v83_v17 }
 0x1ad   :  { %324 = vrot.lane.b32.xlu0 %v322_v18, %s8824_s10  ;;  %v84_v18 = vld [vmem:[#allocation3 + $0x38] sm:$0xff] }
 0x1ae   :  { %93 = vst.msk [vmem:[#allocation2 + $0x38] sm:$0xff] %vm85_vm1, %v84_v18 }
 0x21f   :  { %v325_v20 = vpop.permute.xlu0 %324 }
 0x220   :  { %v327_v21 = vadd.f32 %v325_v20, %v317_v19  ;;  %v101_v19 = vld [vmem:[#allocation2 + $0x20] sm:$0xff] }
 0x221   :  { %8003 = vmatprep.mubr.msk.f32.mxu0 %vm85_vm1, %v101_v19 }
 0x222   :  { %8445 = vtanh.f32 %v327_v21 }
 0x22c   :  { %v8446_v22 = vpop.eup %8445 }
 0x22d   :  { %330 = vrot.lane.b32.xlu1 %v8446_v22, %s8824_s10 }
 0x29f   :  { %v331_v23 = vpop.permute.xlu1 %330 }
 0x2a0   :  { %v333_v24 = vmul.f32 %v331_v23, %v316_v16  ;;  %v82_v16 = vld [vmem:[#allocation3 + $0x28] sm:$0xff]  ;;  %v104_v23 = vld [vmem:[#allocation2 + $0x38] sm:$0xff] }
 0x2a1   :  { %91 = vst.msk [vmem:[#allocation2 + $0x28] sm:$0xff] %vm85_vm1, %v82_v16 }
 0x2a2   :  { %335 = vrot.lane.b32.xlu1 %v333_v24, %s8830_s22 }
 0x2a8   :  { %v102_v20 = vld [vmem:[#allocation2 + $0x28] sm:$0xff] }
 0x2a9   :  { %8004 = vmatmul.mubr.msk.f32.gmra.mrb[4].mxu0 %vm85_vm1, %v102_v20 }
 0x314   :  { %v336_v25 = vpop.permute.xlu1 %335 }
 0x315   :  { %338 = vst.msk [vmem:[#allocation2] sm:$0xff] %vm85_vm1, %v336_v25  ;;  %8017 = vmatmul.mubr.msk.f32.vlgmr.msra.gmra.mrb[2].mxu1 %vm85_vm1, %v336_v25 }
 0x316   :  { %8020 = vmatpush3.msra.mxu1 %v8936_v4  ;;  %8021 = vmatprep.mubr.msk.f32.mxu1 %vm8828_vm0, %v8827_v0 }
 0x317   :  { %8024 = vmatprep.subr.mxu1 %v8827_v0 }
 0x3e8   :  { %v407_v27 = vpop.f32.mrb[2].mxu1 }
 0x3e9   :  { %v411_v28 = vadd.f32 %v407_v27, %v207_v26  ;;  %v8018_v29 = vpop.f32.mrb[3].mxu1  ;;  %v8005_v26 = vpop.f32.mrb[4].mxu0 }
 0x3ea   :  { %v221_v27 = vpop.f32.mrb[5].mxu0 }
 0x3eb   :  { %8447 = vtanh.f32 %v411_v28 }
 0x3f5   :  { %v8448_v30 = vpop.eup %8447 }
 0x3f6   :  { %417 = vrot.lane.b32.xlu0 %v8448_v30, %s8829_s21  ;;  %v413_v31 = vmul.f32 0.5, %v8448_v30 }
 0x3f8   :  { %v414_v32 = vadd.f32 0.5, %v413_v31  ;;  %v222_v31 = vadd.f32 %v8953_v9, %v221_v27  ;;  %v9059_v27 = vld [vmem:[#allocation8 + $0x8] sm:$0xff] }
 0x3fa   :  { %v415_v35 = vmul.f32 %v414_v32, %v327_v21  ;;  %v103_v21 = vld [vmem:[#allocation2 + $0x30] sm:$0xff] }
 0x3fb   :  { %8006 = vmatprep.mubr.msk.f32.mxu0 %vm85_vm1, %v103_v21 }
 0x3fc   :  { %8007 = vmatmul.mubr.msk.f32.gmra.mrb[6].mxu0 %vm85_vm1, %v104_v23 }
 0x3fd   :  { %8031 = vmatprep.mubr.msk.f32.mxu0 %vm8828_vm0, %v8827_v0 }
 0x468   :  { %v418_v33 = vpop.permute.xlu0 %417 }
 0x469   :  { %v420_v34 = vmul.f32 %v418_v33, %v414_v32 }
 0x46b   :  { %422 = vrot.lane.b32.xlu1 %v420_v34, %s8824_s10 }
 0x4cf   :  { %v9007_v28 = vpop.f32.mrb[6].mxu0 }
 0x4d0   :  { %v9009_v29 = vpop.f32.mrb[7].mxu0 }
 0x4dd   :  { %v423_v36 = vpop.permute.xlu1 %422 }
 0x4de   :  { %v425_v37 = vadd.f32 %v423_v36, %v415_v35 }
 0x4e0   :  { %8449 = vtanh.f32 %v425_v37 }
 0x4ea   :  { %v8450_v42 = vpop.eup %8449 }
 0x4eb   :  { %428 = vrot.lane.b32.xlu0 %v8450_v42, %s8824_s10 }
 0x55d   :  { %v429_v43 = vpop.permute.xlu0 %428 }
 0x55e   :  { %v431_v44 = vmul.f32 %v429_v43, %v414_v32 }
 0x560   :  { %433 = vrot.lane.b32.xlu1 %v431_v44, %s8830_s22 }
 0x5d2   :  { %v434_v47 = vpop.permute.xlu1 %433 }
 0x5d3   :  { %437 = vst.msk [vmem:[#allocation2 + $0x8] sm:$0xff] %vm85_vm1, %v434_v47  ;;  %8022 = vmatmul.mubr.msk.f32.vlgmr.msra.gmra.mrb[4].mxu1 %vm85_vm1, %v434_v47  ;;  %v227_v47 = vadd.f32 %v8005_v26, %v8953_v9 }
 0x5d4   :  { %8025 = vmatpush3.msra.mxu1 %v8936_v4  ;;  %8026 = vmatprep.mubr.msk.f32.mxu1 %vm8828_vm0, %v8827_v0 }
 0x5d5   :  { %8034 = vmatprep.subr.mxu1 %v8827_v0 }
 0x6a6   :  { %v506_v49 = vpop.f32.mrb[4].mxu1 }
 0x6a7   :  { %v510_v50 = vadd.f32 %v506_v49, %v212_v48  ;;  %v8023_v51 = vpop.f32.mrb[5].mxu1 }
 0x6a9   :  { %8451 = vtanh.f32 %v510_v50 }
 0x6b3   :  { %v8452_v52 = vpop.eup %8451 }
 0x6b4   :  { %516 = vrot.lane.b32.xlu0 %v8452_v52, %s8829_s21  ;;  %v512_v53 = vmul.f32 0.5, %v8452_v52 }
 0x6b6   :  { %v513_v54 = vadd.f32 0.5, %v512_v53 }
 0x6b8   :  { %v514_v57 = vmul.f32 %v513_v54, %v425_v37 }
 0x726   :  { %v517_v55 = vpop.permute.xlu0 %516 }
 0x727   :  { %v519_v56 = vmul.f32 %v517_v55, %v513_v54 }
 0x729   :  { %521 = vrot.lane.b32.xlu1 %v519_v56, %s8824_s10 }
 0x79b   :  { %v522_v58 = vpop.permute.xlu1 %521 }
 0x79c   :  { %v524_v59 = vadd.f32 %v522_v58, %v514_v57 }
 0x79e   :  { %8453 = vtanh.f32 %v524_v59 }
 0x7a8   :  { %v8454_v60 = vpop.eup %8453 }
 0x7a9   :  { %527 = vrot.lane.b32.xlu0 %v8454_v60, %s8824_s10 }
 0x81b   :  { %v528_v61 = vpop.permute.xlu0 %527 }
 0x81c   :  { %v530_v62 = vmul.f32 %v528_v61, %v513_v54 }
 0x81e   :  { %532 = vrot.lane.b32.xlu1 %v530_v62, %s8830_s22 }
 0x890   :  { %v533_v63 = vpop.permute.xlu1 %532 }
 0x891   :  { %536 = vst.msk [vmem:[#allocation2 + $0x10] sm:$0xff] %vm85_vm1, %v533_v63  ;;  %8027 = vmatmul.mubr.msk.f32.vlgmr.msra.gmra.mrb[6].mxu1 %vm85_vm1, %v533_v63  ;;  %v1038_v63 = vld [vmem:[#allocation2] sm:$0xff] }
 0x892   :  { %8035 = vmatpush3.msra.mxu1 %v8936_v4  ;;  %8036 = vmatprep.mubr.msk.f32.mxu1 %vm8828_vm0, %v8827_v0 }
 0x893   :  { %8044 = vmatprep.subr.mxu1 %v8827_v0 }
 0x964   :  { %v605_v2 = vpop.f32.mrb[6].mxu1 }
 0x965   :  { %v609_v3 = vadd.f32 %v605_v2, %v217_v1  ;;  %v8028_v5 = vpop.f32.mrb[7].mxu1  ;;  %v1039_v1 = vld [vmem:[#allocation2 + $0x8] sm:$0xff]  ;;  %v1040_v2 = vld [vmem:[#allocation2 + $0x10] sm:$0xff] }
 0x967   :  { %8455 = vtanh.f32 %v609_v3 }
 0x971   :  { %v8456_v6 = vpop.eup %8455 }
 0x972   :  { %615 = vrot.lane.b32.xlu0 %v8456_v6, %s8829_s21  ;;  %v611_v7 = vmul.f32 0.5, %v8456_v6 }
 0x974   :  { %v612_v8 = vadd.f32 0.5, %v611_v7  ;;  %v232_v7 = vadd.f32 %v8953_v9, %v9009_v29 }
 0x976   :  { %v613_v12 = vmul.f32 %v612_v8, %v524_v59  ;;  %v1033_v59 = vld [vmem:[#allocation6 + $0x8] sm:$0xff] }
 0x9e4   :  { %v616_v10 = vpop.permute.xlu0 %615 }
 0x9e5   :  { %v618_v11 = vmul.f32 %v616_v10, %v612_v8 }
 0x9e7   :  { %620 = vrot.lane.b32.xlu1 %v618_v11, %s8824_s10 }
 0xa59   :  { %v621_v13 = vpop.permute.xlu1 %620 }
 0xa5a   :  { %v623_v14 = vadd.f32 %v621_v13, %v613_v12 }
 0xa5c   :  { %8457 = vtanh.f32 %v623_v14 }
 0xa66   :  { %v8458_v22 = vpop.eup %8457 }
 0xa67   :  { %626 = vrot.lane.b32.xlu0 %v8458_v22, %s8824_s10 }
 0xad9   :  { %v627_v24 = vpop.permute.xlu0 %626 }
 0xada   :  { %v629_v25 = vmul.f32 %v627_v24, %v612_v8 }
 0xadc   :  { %631 = vrot.lane.b32.xlu1 %v629_v25, %s8830_s22 }
 0xb4e   :  { %v632_v30 = vpop.permute.xlu1 %631 }
 0xb4f   :  { %635 = vst.msk [vmem:[#allocation2 + $0x18] sm:$0xff] %vm85_vm1, %v632_v30  ;;  %8032 = vmatmul.mubr.msk.f32.vlgmr.msra.gmra.mrb[8].mxu0 %vm85_vm1, %v632_v30 }
 0xb50   :  { %8040 = vmatpush3.msra.mxu0 %v8936_v4  ;;  %8041 = vmatprep.mubr.msk.f32.mxu0 %vm8828_vm0, %v8827_v0 }
 0xb51   :  { %8049 = vmatprep.subr.mxu0 %v1033_v59 }
 0xb56   :  { %v1041_v3 = vld [vmem:[#allocation2 + $0x18] sm:$0xff] }
 0xc22   :  { %v704_v32 = vpop.f32.mrb[8].mxu0 }
 0xc23   :  { %v708_v33 = vadd.f32 %v704_v32, %v222_v31  ;;  %v8033_v34 = vpop.f32.mrb[9].mxu0 }
 0xc24   :  { %v9081_v34 = vld [vmem:[%s9984_s3 + $0x1] ss:$0 sm:$0xff] }
 0xc25   :  { %8459 = vtanh.f32 %v708_v33  ;;  %v237_v33 = vadd.f32 %v9007_v28, %v8953_v9 }
 0xc2f   :  { %v8460_v35 = vpop.eup %8459 }
 0xc30   :  { %714 = vrot.lane.b32.xlu0 %v8460_v35, %s8829_s21  ;;  %v710_v36 = vmul.f32 0.5, %v8460_v35 }
 0xc32   :  { %v711_v37 = vadd.f32 0.5, %v710_v36 }
 0xc34   :  { %v712_v40 = vmul.f32 %v711_v37, %v623_v14 }
 0xca2   :  { %v715_v38 = vpop.permute.xlu0 %714 }
 0xca3   :  { %v717_v39 = vmul.f32 %v715_v38, %v711_v37 }
 0xca5   :  { %719 = vrot.lane.b32.xlu1 %v717_v39, %s8824_s10 }
 0xd17   :  { %v720_v41 = vpop.permute.xlu1 %719 }
 0xd18   :  { %v722_v42 = vadd.f32 %v720_v41, %v712_v40 }
 0xd1a   :  { %8461 = vtanh.f32 %v722_v42 }
 0xd24   :  { %v8462_v43 = vpop.eup %8461 }
 0xd25   :  { %725 = vrot.lane.b32.xlu0 %v8462_v43, %s8824_s10 }
 0xd97   :  { %v726_v44 = vpop.permute.xlu0 %725 }
 0xd98   :  { %v728_v45 = vmul.f32 %v726_v44, %v711_v37 }
 0xd9a   :  { %730 = vrot.lane.b32.xlu1 %v728_v45, %s8830_s22 }
 0xe0c   :  { %v731_v46 = vpop.permute.xlu1 %730 }
 0xe0d   :  { %734 = vst.msk [vmem:[#allocation2 + $0x20] sm:$0xff] %vm85_vm1, %v731_v46  ;;  %8037 = vmatmul.mubr.msk.f32.vlgmr.msra.gmra.mrb[8].mxu1 %vm85_vm1, %v731_v46 }
 0xe0e   :  { %8045 = vmatpush3.msra.mxu1 %v8936_v4  ;;  %8046 = vmatprep.mubr.msk.f32.mxu1 %vm8828_vm0, %v8827_v0 }
 0xe0f   :  { %8063 = vmatprep.subr.mxu1 %v8827_v0 }
 0xe14   :  { %v1042_v5 = vld [vmem:[#allocation2 + $0x20] sm:$0xff] }
 0xee0   :  { %v803_v48 = vpop.f32.mrb[8].mxu1 }
 0xee1   :  { %v807_v49 = vadd.f32 %v803_v48, %v227_v47  ;;  %v8038_v50 = vpop.f32.mrb[9].mxu1 }
 0xee3   :  { %8463 = vtanh.f32 %v807_v49 }
 0xeed   :  { %v8464_v51 = vpop.eup %8463 }
 0xeee   :  { %813 = vrot.lane.b32.xlu0 %v8464_v51, %s8829_s21  ;;  %v809_v52 = vmul.f32 0.5, %v8464_v51 }
 0xef0   :  { %v810_v53 = vadd.f32 0.5, %v809_v52 }
 0xef2   :  { %v811_v4 = vmul.f32 %v810_v53, %v722_v42 }
 0xf60   :  { %v814_v54 = vpop.permute.xlu0 %813 }
 0xf61   :  { %v816_v55 = vmul.f32 %v814_v54, %v810_v53 }
 0xf63   :  { %818 = vrot.lane.b32.xlu1 %v816_v55, %s8824_s10 }
 0xfd5   :  { %v819_v56 = vpop.permute.xlu1 %818 }
 0xfd6   :  { %v821_v57 = vadd.f32 %v819_v56, %v811_v4 }
 0xfd8   :  { %8465 = vtanh.f32 %v821_v57 }
 0xfe2   :  { %v8466_v58 = vpop.eup %8465 }
 0xfe3   :  { %824 = vrot.lane.b32.xlu0 %v8466_v58, %s8824_s10 }
0x1055   :  { %v825_v60 = vpop.permute.xlu0 %824 }
0x1056   :  { %v827_v61 = vmul.f32 %v825_v60, %v810_v53 }
0x1058   :  { %829 = vrot.lane.b32.xlu1 %v827_v61, %s8830_s22 }
0x10ca   :  { %v830_v62 = vpop.permute.xlu1 %829 }
0x10cb   :  { %833 = vst.msk [vmem:[#allocation2 + $0x28] sm:$0xff] %vm85_vm1, %v830_v62  ;;  %8042 = vmatmul.mubr.msk.f32.vlgmr.msra.gmra.mrb[10].mxu0 %vm85_vm1, %v830_v62 }
0x10cc   :  { %8051 = vmatprep.mubr.msk.f32.mxu0 %vm85_vm1, %v1038_v63  ;;  %8050 = vmatpush3.msra.mxu0 %v1033_v59 }
0x10cd   :  { %8083 = vmatprep.subr.mxu0 %v8827_v0 }
0x10cf   :  { %8052 = vmatmul.mubr.msk.f32.vlgmr.msra.gmra.mrb[12].mxu0 %vm85_vm1, %v1039_v1 }
0x10d0   :  { %8054 = vmatprep.mubr.msk.f32.mxu0 %vm85_vm1, %v1040_v2  ;;  %8084 = vmatpush3.msra.mxu0 %v9059_v27 }
0x10d1   :  { %8093 = vmatprep.subr.mxu0 %v8827_v0 }
0x10d2   :  { %v1043_v6 = vld [vmem:[#allocation2 + $0x28] sm:$0xff] }
0x10d3   :  { %8055 = vmatmul.mubr.msk.f32.gmra.mrb[14].mxu0 %vm85_vm1, %v1041_v3 }
0x10d4   :  { %8057 = vmatprep.mubr.msk.f32.mxu0 %vm85_vm1, %v1042_v5 }
0x10d7   :  { %8058 = vmatmul.mubr.msk.f32.gmra.mrb[16].mxu0 %vm85_vm1, %v1043_v6 }
0x119e   :  { %v902_v8 = vpop.f32.mrb[10].mxu0 }
0x119f   :  { %v906_v10 = vadd.f32 %v902_v8, %v232_v7  ;;  %v8043_v11 = vpop.f32.mrb[11].mxu0 }
0x11a1   :  { %8467 = vtanh.f32 %v906_v10 }
0x11a2   :  { %v9043_v12 = vpop.f32.mrb[12].mxu0 }
0x11a3   :  { %v1142_v13 = vpop.f32.mrb[13].mxu0  ;;  %v1148_v52 = vadd.f32 %v9043_v12, %v9081_v34 }
0x11a4   :  { %v1143_v38 = vadd.f32 %v9081_v34, %v1142_v13 }
0x11a6   :  { %v9045_v14 = vpop.f32.mrb[14].mxu0 }
0x11a7   :  { %v9047_v15 = vpop.f32.mrb[15].mxu0 }
0x11a8   :  { %v1153_v5 = vadd.f32 %v9081_v34, %v9047_v15 }
0x11aa   :  { %v9049_v16 = vpop.f32.mrb[16].mxu0 }
0x11ab   :  { %v8468_v17 = vpop.eup %8467  ;;  %v9051_v18 = vpop.f32.mrb[17].mxu0 }
0x11ac   :  { %912 = vrot.lane.b32.xlu0 %v8468_v17, %s8829_s21  ;;  %v908_v19 = vmul.f32 0.5, %v8468_v17 }
0x11ae   :  { %v909_v20 = vadd.f32 0.5, %v908_v19 }
0x11b0   :  { %v910_v23 = vmul.f32 %v909_v20, %v821_v57 }
0x121e   :  { %v913_v21 = vpop.permute.xlu0 %912 }
0x121f   :  { %v915_v22 = vmul.f32 %v913_v21, %v909_v20 }
0x1221   :  { %917 = vrot.lane.b32.xlu1 %v915_v22, %s8824_s10 }
0x1293   :  { %v918_v24 = vpop.permute.xlu1 %917 }
0x1294   :  { %v9055_v25 = vadd.f32 %v918_v24, %v910_v23 }
0x1296   :  { %8469 = vtanh.f32 %v9055_v25 }
0x12a0   :  { %v8470_v26 = vpop.eup %8469 }
0x12a1   :  { %923 = vrot.lane.b32.xlu0 %v8470_v26, %s8824_s10 }
0x1313   :  { %v924_v29 = vpop.permute.xlu0 %923 }
0x1314   :  { %v926_v30 = vmul.f32 %v924_v29, %v909_v20 }
0x1316   :  { %928 = vrot.lane.b32.xlu1 %v926_v30, %s8830_s22 }
0x1388   :  { %v929_v31 = vpop.permute.xlu1 %928 }
0x1389   :  { %932 = vst.msk [vmem:[#allocation2 + $0x30] sm:$0xff] %vm85_vm1, %v929_v31  ;;  %8047 = vmatmul.mubr.msk.f32.vlgmr.msra.gmra.mrb[10].mxu1 %vm85_vm1, %v929_v31 }
0x138a   :  { %8064 = vmatpush3.msra.mxu1 %v9059_v27  ;;  %8065 = vmatprep.mubr.msk.f32.mxu1 %vm8828_vm0, %v8827_v0 }
0x138b   :  { %8068 = vmatprep.subr.mxu1 %v8827_v0 }
0x138d   :  { %8066 = vmatmul.mubr.f32.vlgmr.msra.gmra.mrb[12].mxu1 %v8827_v0 }
0x138e   :  { %8069 = vmatpush3.msra.mxu1 %v9059_v27  ;;  %8070 = vmatprep.mubr.msk.f32.mxu1 %vm8828_vm0, %v8827_v0 }
0x138f   :  { %8073 = vmatprep.subr.mxu1 %v8827_v0 }
0x1390   :  { %v1044_v32 = vld [vmem:[#allocation2 + $0x30] sm:$0xff] }
0x1391   :  { %8060 = vmatprep.mubr.msk.f32.mxu0 %vm85_vm1, %v1044_v32 }
0x145c   :  { %v1001_v35 = vpop.f32.mrb[10].mxu1 }
0x145d   :  { %v9083_v36 = vadd.f32 %v1001_v35, %v237_v33  ;;  %v8048_v37 = vpop.f32.mrb[11].mxu1 }
0x1460   :  { %v1247_v39 = vpop.f32.mrb[12].mxu1 }
0x1461   :  { %v1251_v40 = vadd.f32 %v1247_v39, %v1143_v38  ;;  %v8067_v41 = vpop.f32.mrb[13].mxu1 }
0x1463   :  { %8471 = vtanh.f32 %v1251_v40  ;;  %v1158_v40 = vadd.f32 %v9045_v14, %v9081_v34 }
0x146d   :  { %v8472_v42 = vpop.eup %8471 }
0x146e   :  { %1257 = vrot.lane.b32.xlu0 %v8472_v42, %s8829_s21  ;;  %v1253_v43 = vmul.f32 0.5, %v8472_v42 }
0x1470   :  { %v1254_v9 = vadd.f32 0.5, %v1253_v43 }
0x1472   :  { %v1255_v45 = vmul.f32 0.0, %v1254_v9 }
0x14e0   :  { %v1258_v28 = vpop.permute.xlu0 %1257 }
0x14e1   :  { %v1260_v44 = vmul.f32 %v1258_v28, %v1254_v9 }
0x14e3   :  { %1262 = vrot.lane.b32.xlu1 %v1260_v44, %s8824_s10 }
0x1555   :  { %v1263_v46 = vpop.permute.xlu1 %1262 }
0x1556   :  { %v1265_v47 = vadd.f32 %v1263_v46, %v1255_v45 }
0x1558   :  { %8473 = vtanh.f32 %v1265_v47 }
0x1562   :  { %v8474_v48 = vpop.eup %8473 }
0x1563   :  { %1268 = vrot.lane.b32.xlu0 %v8474_v48, %s8824_s10 }
0x15d5   :  { %v1269_v49 = vpop.permute.xlu0 %1268 }
0x15d6   :  { %v1271_v50 = vmul.f32 %v1269_v49, %v1254_v9 }
0x15d8   :  { %1273 = vrot.lane.b32.xlu1 %v1271_v50, %s8830_s22 }
0x164a   :  { %v1274_v51 = vpop.permute.xlu1 %1273 }
0x164b   :  { %1276 = vst.msk [vmem:[#allocation2] sm:$0xff] %vm85_vm1, %v1274_v51  ;;  %8071 = vmatmul.mubr.msk.f32.vlgmr.msra.gmra.mrb[14].mxu1 %vm85_vm1, %v1274_v51 }
0x164c   :  { %8074 = vmatpush3.msra.mxu1 %v9059_v27  ;;  %8075 = vmatprep.mubr.msk.f32.mxu1 %vm8828_vm0, %v8827_v0 }
0x164d   :  { %8078 = vmatprep.subr.mxu1 %v8827_v0 }
0x171e   :  { %v1345_v53 = vpop.f32.mrb[14].mxu1 }
0x171f   :  { %v1349_v54 = vadd.f32 %v1345_v53, %v1148_v52  ;;  %v8072_v55 = vpop.f32.mrb[15].mxu1 }
0x1721   :  { %8475 = vtanh.f32 %v1349_v54 }
0x172b   :  { %v8476_v4 = vpop.eup %8475 }
0x172c   :  { %1355 = vrot.lane.b32.xlu0 %v8476_v4, %s8829_s21  ;;  %v1351_v56 = vmul.f32 0.5, %v8476_v4  ;;  %v1163_v4 = vadd.f32 %v9081_v34, %v9051_v18 }
0x172e   :  { %v1352_v57 = vadd.f32 0.5, %v1351_v56 }
0x1730   :  { %v1353_v60 = vmul.f32 %v1352_v57, %v1265_v47 }
0x179e   :  { %v1356_v58 = vpop.permute.xlu0 %1355 }
0x179f   :  { %v1358_v59 = vmul.f32 %v1356_v58, %v1352_v57 }
0x17a1   :  { %1360 = vrot.lane.b32.xlu1 %v1358_v59, %s8824_s10 }
0x1813   :  { %v1361_v61 = vpop.permute.xlu1 %1360 }
0x1814   :  { %v1363_v62 = vadd.f32 %v1361_v61, %v1353_v60 }
0x1816   :  { %8477 = vtanh.f32 %v1363_v62 }
0x1820   :  { %v8478_v63 = vpop.eup %8477 }
0x1821   :  { %1366 = vrot.lane.b32.xlu0 %v8478_v63, %s8824_s10 }
0x1893   :  { %v1367_v1 = vpop.permute.xlu0 %1366 }
0x1894   :  { %v1369_v2 = vmul.f32 %v1367_v1, %v1352_v57 }
0x1896   :  { %1371 = vrot.lane.b32.xlu1 %v1369_v2, %s8830_s22 }
0x1908   :  { %v1372_v3 = vpop.permute.xlu1 %1371 }
0x1909   :  { %1374 = vst.msk [vmem:[#allocation2 + $0x8] sm:$0xff] %vm85_vm1, %v1372_v3  ;;  %8076 = vmatmul.mubr.msk.f32.vlgmr.msra.gmra.mrb[16].mxu1 %vm85_vm1, %v1372_v3 }
0x190a   :  { %8079 = vmatpush3.msra.mxu1 %v9059_v27  ;;  %8080 = vmatprep.mubr.msk.f32.mxu1 %vm8828_vm0, %v8827_v0 }
0x190b   :  { %8088 = vmatprep.subr.mxu1 %v8827_v0 }
0x19dc   :  { %v1443_v6 = vpop.f32.mrb[16].mxu1 }
0x19dd   :  { %v1447_v7 = vadd.f32 %v1443_v6, %v1153_v5  ;;  %v8077_v8 = vpop.f32.mrb[17].mxu1 }
0x19de   :  { %v1168_v8 = vadd.f32 %v9049_v16, %v9081_v34  ;;  %v1964_v16 = vld [vmem:[#allocation6 + $0x10] sm:$0xff] }
0x19df   :  { %8479 = vtanh.f32 %v1447_v7 }
0x19e9   :  { %v8480_v10 = vpop.eup %8479 }
0x19ea   :  { %1453 = vrot.lane.b32.xlu0 %v8480_v10, %s8829_s21  ;;  %v1449_v11 = vmul.f32 0.5, %v8480_v10 }
0x19ec   :  { %v1450_v12 = vadd.f32 0.5, %v1449_v11 }
0x19ee   :  { %v1451_v19 = vmul.f32 %v1450_v12, %v1363_v62 }
0x1a5c   :  { %v1454_v13 = vpop.permute.xlu0 %1453 }
0x1a5d   :  { %v1456_v17 = vmul.f32 %v1454_v13, %v1450_v12 }
0x1a5f   :  { %1458 = vrot.lane.b32.xlu1 %v1456_v17, %s8824_s10 }
0x1ad1   :  { %v1459_v20 = vpop.permute.xlu1 %1458 }
0x1ad2   :  { %v1461_v21 = vadd.f32 %v1459_v20, %v1451_v19 }
0x1ad4   :  { %8481 = vtanh.f32 %v1461_v21 }
0x1ad5   :  { %8483 = vtanh.f32 %v9083_v36 }
0x1ade   :  { %v8482_v15 = vpop.eup %8481 }
0x1adf   :  { %1464 = vrot.lane.b32.xlu0 %v8482_v15, %s8824_s10  ;;  %v8484_v22 = vpop.eup %8483 }
0x1ae0   :  { %v1007_v23 = vmul.f32 0.5, %v8484_v22 }
0x1ae2   :  { %v1008_v29 = vadd.f32 0.5, %v1007_v23 }
0x1ae3   :  { %1011 = vrot.lane.b32.xlu0 %v8484_v22, %s8829_s21 }
0x1ae4   :  { %v1009_v33 = vmul.f32 %v1008_v29, %v9055_v25 }
0x1b51   :  { %v1465_v24 = vpop.permute.xlu0 %1464 }
0x1b52   :  { %v1467_v26 = vmul.f32 %v1465_v24, %v1450_v12 }
0x1b54   :  { %1469 = vrot.lane.b32.xlu1 %v1467_v26, %s8830_s22 }
0x1b55   :  { %v1012_v30 = vpop.permute.xlu0 %1011 }
0x1b56   :  { %v1014_v31 = vmul.f32 %v1012_v30, %v1008_v29  ;;  %v1969_v30 = vld [vmem:[#allocation2] sm:$0xff] }
0x1b58   :  { %1016 = vrot.lane.b32.xlu0 %v1014_v31, %s8824_s10  ;;  %v1970_v31 = vld [vmem:[#allocation2 + $0x8] sm:$0xff] }
0x1bc6   :  { %v1470_v32 = vpop.permute.xlu1 %1469 }
0x1bc7   :  { %1472 = vst.msk [vmem:[#allocation2 + $0x10] sm:$0xff] %vm85_vm1, %v1470_v32  ;;  %8081 = vmatmul.mubr.msk.f32.vlgmr.msra.gmra.mrb[18].mxu1 %vm85_vm1, %v1470_v32 }
0x1bc8   :  { %8089 = vmatpush3.msra.mxu1 %v9059_v27  ;;  %8090 = vmatprep.mubr.msk.f32.mxu1 %vm8828_vm0, %v8827_v0 }
0x1bc9   :  { %8098 = vmatprep.subr.mxu1 %v8827_v0 }
0x1bca   :  { %v1017_v35 = vpop.permute.xlu0 %1016 }
0x1bcb   :  { %v1019_v36 = vadd.f32 %v1017_v35, %v1009_v33 }
0x1bcd   :  { %8485 = vtanh.f32 %v1019_v36 }
0x1bce   :  { %v1971_v32 = vld [vmem:[#allocation2 + $0x10] sm:$0xff] }
0x1bd7   :  { %v8486_v37 = vpop.eup %8485 }
0x1bd8   :  { %1022 = vrot.lane.b32.xlu0 %v8486_v37, %s8824_s10 }
0x1c4a   :  { %v1023_v38 = vpop.permute.xlu0 %1022 }
0x1c4b   :  { %v1025_v39 = vmul.f32 %v1023_v38, %v1008_v29 }
0x1c4d   :  { %1027 = vrot.lane.b32.xlu0 %v1025_v39, %s8830_s22 }
0x1c9a   :  { %v1541_v41 = vpop.f32.mrb[18].mxu1 }
0x1c9b   :  { %v1545_v42 = vadd.f32 %v1541_v41, %v1158_v40  ;;  %v8082_v43 = vpop.f32.mrb[19].mxu1 }
0x1c9d   :  { %8487 = vtanh.f32 %v1545_v42 }
0x1ca7   :  { %v8488_v25 = vpop.eup %8487 }
0x1ca8   :  { %1551 = vrot.lane.b32.xlu1 %v8488_v25, %s8829_s21  ;;  %v1547_v44 = vmul.f32 0.5, %v8488_v25 }
0x1caa   :  { %v1548_v45 = vadd.f32 0.5, %v1547_v44 }
0x1cac   :  { %v1549_v47 = vmul.f32 %v1548_v45, %v1461_v21 }
0x1cbf   :  { %v1028_v9 = vpop.permute.xlu0 %1027 }
0x1cc0   :  { %1031 = vst.msk [vmem:[#allocation2 + $0x38] sm:$0xff] %vm85_vm1, %v1028_v9 }
0x1cc7   :  { %v1045_v28 = vld [vmem:[#allocation2 + $0x38] sm:$0xff] }
0x1cc8   :  { %8061 = vmatmul.mubr.msk.f32.gmra.mrb[18].mxu0 %vm85_vm1, %v1045_v28 }
0x1cc9   :  { %8085 = vmatprep.mubr.msk.f32.mxu0 %vm8828_vm0, %v8827_v0 }
0x1d1a   :  { %v1552_v46 = vpop.permute.xlu1 %1551 }
0x1d1b   :  { %v1554_v14 = vmul.f32 %v1552_v46, %v1548_v45 }
0x1d1d   :  { %1556 = vrot.lane.b32.xlu1 %v1554_v14, %s8824_s10 }
0x1d8f   :  { %v1557_v48 = vpop.permute.xlu1 %1556 }
0x1d90   :  { %v1559_v49 = vadd.f32 %v1557_v48, %v1549_v47 }
0x1d92   :  { %8489 = vtanh.f32 %v1559_v49 }
0x1d9b   :  { %v9134_v50 = vpop.f32.mrb[18].mxu0 }
0x1d9c   :  { %v8490_v51 = vpop.eup %8489  ;;  %v9136_v52 = vpop.f32.mrb[19].mxu0 }
0x1d9d   :  { %1562 = vrot.lane.b32.xlu1 %v8490_v51, %s8824_s10  ;;  %v1173_v37 = vadd.f32 %v9081_v34, %v9136_v52 }
0x1e0f   :  { %v1563_v53 = vpop.permute.xlu1 %1562 }
0x1e10   :  { %v1565_v54 = vmul.f32 %v1563_v53, %v1548_v45  ;;  %v9190_v53 = vld [vmem:[#allocation8 + $0x10] sm:$0xff] }
0x1e12   :  { %1567 = vrot.lane.b32.xlu1 %v1565_v54, %s8830_s22 }
0x1e84   :  { %v1568_v55 = vpop.permute.xlu1 %1567 }
0x1e85   :  { %1570 = vst.msk [vmem:[#allocation2 + $0x18] sm:$0xff] %vm85_vm1, %v1568_v55  ;;  %8086 = vmatmul.mubr.msk.f32.vlgmr.msra.gmra.mrb[20].mxu0 %vm85_vm1, %v1568_v55 }
0x1e86   :  { %8094 = vmatpush3.msra.mxu0 %v9059_v27  ;;  %8095 = vmatprep.mubr.msk.f32.mxu0 %vm8828_vm0, %v8827_v0 }
0x1e87   :  { %8103 = vmatprep.subr.mxu0 %v1964_v16 }
0x1e8c   :  { %v1972_v33 = vld [vmem:[#allocation2 + $0x18] sm:$0xff] }
0x1f58   :  { %v1639_v56 = vpop.f32.mrb[20].mxu0 }
0x1f59   :  { %v1643_v57 = vadd.f32 %v1639_v56, %v1163_v4  ;;  %v8087_v58 = vpop.f32.mrb[21].mxu0 }
0x1f5a   :  { %v9212_v58 = vld [vmem:[%s9984_s3 + $0x2] ss:$0 sm:$0xff] }
0x1f5b   :  { %8491 = vtanh.f32 %v1643_v57  ;;  %v1178_v57 = vadd.f32 %v9134_v50, %v9081_v34 }
0x1f65   :  { %v8492_v59 = vpop.eup %8491 }
0x1f66   :  { %1649 = vrot.lane.b32.xlu0 %v8492_v59, %s8829_s21  ;;  %v1645_v60 = vmul.f32 0.5, %v8492_v59 }
0x1f68   :  { %v1646_v61 = vadd.f32 0.5, %v1645_v60 }
0x1f6a   :  { %v1647_v1 = vmul.f32 %v1646_v61, %v1559_v49 }
0x1fd8   :  { %v1650_v62 = vpop.permute.xlu0 %1649 }
0x1fd9   :  { %v1652_v63 = vmul.f32 %v1650_v62, %v1646_v61 }
0x1fdb   :  { %1654 = vrot.lane.b32.xlu1 %v1652_v63, %s8824_s10 }
0x204d   :  { %v1655_v2 = vpop.permute.xlu1 %1654 }
0x204e   :  { %v1657_v3 = vadd.f32 %v1655_v2, %v1647_v1 }
0x2050   :  { %8493 = vtanh.f32 %v1657_v3 }
0x205a   :  { %v8494_v5 = vpop.eup %8493 }
0x205b   :  { %1660 = vrot.lane.b32.xlu0 %v8494_v5, %s8824_s10 }
0x20cd   :  { %v1661_v18 = vpop.permute.xlu0 %1660 }
0x20ce   :  { %v1663_v6 = vmul.f32 %v1661_v18, %v1646_v61 }
0x20d0   :  { %1665 = vrot.lane.b32.xlu1 %v1663_v6, %s8830_s22 }
0x2142   :  { %v1666_v7 = vpop.permute.xlu1 %1665 }
0x2143   :  { %1668 = vst.msk [vmem:[#allocation2 + $0x20] sm:$0xff] %vm85_vm1, %v1666_v7  ;;  %8091 = vmatmul.mubr.msk.f32.vlgmr.msra.gmra.mrb[20].mxu1 %vm85_vm1, %v1666_v7 }
0x2144   :  { %8099 = vmatpush3.msra.mxu1 %v9059_v27  ;;  %8100 = vmatprep.mubr.msk.f32.mxu1 %vm8828_vm0, %v8827_v0 }
0x2145   :  { %8117 = vmatprep.subr.mxu1 %v8827_v0 }
0x214a   :  { %v1973_v35 = vld [vmem:[#allocation2 + $0x20] sm:$0xff] }
0x2216   :  { %v1737_v10 = vpop.f32.mrb[20].mxu1 }
0x2217   :  { %v1741_v11 = vadd.f32 %v1737_v10, %v1168_v8  ;;  %v8092_v12 = vpop.f32.mrb[21].mxu1 }
0x2219   :  { %8495 = vtanh.f32 %v1741_v11 }
0x2223   :  { %v8496_v13 = vpop.eup %8495 }
0x2224   :  { %1747 = vrot.lane.b32.xlu0 %v8496_v13, %s8829_s21  ;;  %v1743_v17 = vmul.f32 0.5, %v8496_v13 }
0x2226   :  { %v1744_v19 = vadd.f32 0.5, %v1743_v17 }
0x2228   :  { %v1745_v27 = vmul.f32 %v1744_v19, %v1657_v3 }
0x2296   :  { %v1748_v20 = vpop.permute.xlu0 %1747 }
0x2297   :  { %v1750_v21 = vmul.f32 %v1748_v20, %v1744_v19 }
0x2299   :  { %1752 = vrot.lane.b32.xlu1 %v1750_v21, %s8824_s10 }
0x230b   :  { %v1753_v15 = vpop.permute.xlu1 %1752 }
0x230c   :  { %v1755_v22 = vadd.f32 %v1753_v15, %v1745_v27 }
0x230e   :  { %8497 = vtanh.f32 %v1755_v22 }
0x2318   :  { %v8498_v23 = vpop.eup %8497 }
0x2319   :  { %1758 = vrot.lane.b32.xlu0 %v8498_v23, %s8824_s10 }
0x238b   :  { %v1759_v24 = vpop.permute.xlu0 %1758 }
0x238c   :  { %v1761_v26 = vmul.f32 %v1759_v24, %v1744_v19 }
0x238e   :  { %1763 = vrot.lane.b32.xlu1 %v1761_v26, %s8830_s22 }
0x2400   :  { %v1764_v29 = vpop.permute.xlu1 %1763 }
0x2401   :  { %1766 = vst.msk [vmem:[#allocation2 + $0x28] sm:$0xff] %vm85_vm1, %v1764_v29  ;;  %8096 = vmatmul.mubr.msk.f32.vlgmr.msra.gmra.mrb[22].mxu0 %vm85_vm1, %v1764_v29 }
0x2402   :  { %8105 = vmatprep.mubr.msk.f32.mxu0 %vm85_vm1, %v1969_v30  ;;  %8104 = vmatpush3.msra.mxu0 %v1964_v16 }
0x2403   :  { %8137 = vmatprep.subr.mxu0 %v8827_v0 }
0x2405   :  { %8106 = vmatmul.mubr.msk.f32.vlgmr.msra.gmra.mrb[24].mxu0 %vm85_vm1, %v1970_v31 }
0x2406   :  { %8108 = vmatprep.mubr.msk.f32.mxu0 %vm85_vm1, %v1971_v32  ;;  %8138 = vmatpush3.msra.mxu0 %v9190_v53 }
0x2407   :  { %8147 = vmatprep.subr.mxu0 %v8827_v0 }
0x2408   :  { %v1974_v36 = vld [vmem:[#allocation2 + $0x28] sm:$0xff] }
0x2409   :  { %8109 = vmatmul.mubr.msk.f32.gmra.mrb[26].mxu0 %vm85_vm1, %v1972_v33 }
0x240a   :  { %8111 = vmatprep.mubr.msk.f32.mxu0 %vm85_vm1, %v1973_v35 }
0x240d   :  { %8112 = vmatmul.mubr.msk.f32.gmra.mrb[28].mxu0 %vm85_vm1, %v1974_v36 }
0x24d4   :  { %v1835_v38 = vpop.f32.mrb[22].mxu0 }
0x24d5   :  { %v1839_v39 = vadd.f32 %v1835_v38, %v1173_v37  ;;  %v8097_v40 = vpop.f32.mrb[23].mxu0 }
0x24d7   :  { %8499 = vtanh.f32 %v1839_v39 }
0x24d8   :  { %v9174_v41 = vpop.f32.mrb[24].mxu0 }
0x24d9   :  { %v2073_v42 = vpop.f32.mrb[25].mxu0  ;;  %v2079_v17 = vadd.f32 %v9174_v41, %v9212_v58 }
0x24da   :  { %v2074_v62 = vadd.f32 %v9212_v58, %v2073_v42 }
0x24dc   :  { %v9176_v43 = vpop.f32.mrb[26].mxu0 }
0x24dd   :  { %v9178_v25 = vpop.f32.mrb[27].mxu0 }
0x24de   :  { %v2084_v35 = vadd.f32 %v9212_v58, %v9178_v25 }
0x24e0   :  { %v9180_v9 = vpop.f32.mrb[28].mxu0 }
0x24e1   :  { %v8500_v28 = vpop.eup %8499  ;;  %v9182_v44 = vpop.f32.mrb[29].mxu0 }
0x24e2   :  { %1845 = vrot.lane.b32.xlu0 %v8500_v28, %s8829_s21  ;;  %v1841_v45 = vmul.f32 0.5, %v8500_v28 }
0x24e4   :  { %v1842_v46 = vadd.f32 0.5, %v1841_v45 }
0x24e6   :  { %v1843_v48 = vmul.f32 %v1842_v46, %v1755_v22 }
0x2554   :  { %v1846_v14 = vpop.permute.xlu0 %1845 }
0x2555   :  { %v1848_v47 = vmul.f32 %v1846_v14, %v1842_v46 }
0x2557   :  { %1850 = vrot.lane.b32.xlu1 %v1848_v47, %s8824_s10 }
0x25c9   :  { %v1851_v49 = vpop.permute.xlu1 %1850 }
0x25ca   :  { %v9186_v51 = vadd.f32 %v1851_v49, %v1843_v48 }
0x25cc   :  { %8501 = vtanh.f32 %v9186_v51 }
0x25d6   :  { %v8502_v52 = vpop.eup %8501 }
0x25d7   :  { %1856 = vrot.lane.b32.xlu0 %v8502_v52, %s8824_s10 }
0x2649   :  { %v1857_v54 = vpop.permute.xlu0 %1856 }
0x264a   :  { %v1859_v55 = vmul.f32 %v1857_v54, %v1842_v46 }
0x264c   :  { %1861 = vrot.lane.b32.xlu1 %v1859_v55, %s8830_s22 }
0x26be   :  { %v1862_v4 = vpop.permute.xlu1 %1861 }
0x26bf   :  { %1864 = vst.msk [vmem:[#allocation2 + $0x30] sm:$0xff] %vm85_vm1, %v1862_v4  ;;  %8101 = vmatmul.mubr.msk.f32.vlgmr.msra.gmra.mrb[22].mxu1 %vm85_vm1, %v1862_v4 }
0x26c0   :  { %8118 = vmatpush3.msra.mxu1 %v9190_v53  ;;  %8119 = vmatprep.mubr.msk.f32.mxu1 %vm8828_vm0, %v8827_v0 }
0x26c1   :  { %8122 = vmatprep.subr.mxu1 %v8827_v0 }
0x26c3   :  { %8120 = vmatmul.mubr.f32.vlgmr.msra.gmra.mrb[24].mxu1 %v8827_v0 }
0x26c4   :  { %8123 = vmatpush3.msra.mxu1 %v9190_v53  ;;  %8124 = vmatprep.mubr.msk.f32.mxu1 %vm8828_vm0, %v8827_v0 }
0x26c5   :  { %8127 = vmatprep.subr.mxu1 %v8827_v0 }
0x26c6   :  { %v1975_v56 = vld [vmem:[#allocation2 + $0x30] sm:$0xff] }
0x26c7   :  { %8114 = vmatprep.mubr.msk.f32.mxu0 %vm85_vm1, %v1975_v56 }
0x2792   :  { %v1933_v59 = vpop.f32.mrb[22].mxu1 }
0x2793   :  { %v9214_v60 = vadd.f32 %v1933_v59, %v1178_v57  ;;  %v8102_v61 = vpop.f32.mrb[23].mxu1 }
0x2796   :  { %v2178_v63 = vpop.f32.mrb[24].mxu1 }
0x2797   :  { %v2182_v1 = vadd.f32 %v2178_v63, %v2074_v62  ;;  %v8121_v2 = vpop.f32.mrb[25].mxu1 }
0x2799   :  { %8503 = vtanh.f32 %v2182_v1  ;;  %v2089_v1 = vadd.f32 %v9176_v43, %v9212_v58 }
0x27a3   :  { %v8504_v3 = vpop.eup %8503 }
0x27a4   :  { %2188 = vrot.lane.b32.xlu0 %v8504_v3, %s8829_s21  ;;  %v2184_v5 = vmul.f32 0.5, %v8504_v3 }
0x27a6   :  { %v2185_v34 = vadd.f32 0.5, %v2184_v5 }
0x27a8   :  { %v2186_v6 = vmul.f32 0.0, %v2185_v34 }
0x2816   :  { %v2189_v50 = vpop.permute.xlu0 %2188 }
0x2817   :  { %v2191_v18 = vmul.f32 %v2189_v50, %v2185_v34 }
0x2819   :  { %2193 = vrot.lane.b32.xlu1 %v2191_v18, %s8824_s10 }
0x288b   :  { %v2194_v7 = vpop.permute.xlu1 %2193 }
0x288c   :  { %v2196_v8 = vadd.f32 %v2194_v7, %v2186_v6 }
0x288e   :  { %8505 = vtanh.f32 %v2196_v8 }
0x2898   :  { %v8506_v10 = vpop.eup %8505 }
0x2899   :  { %2199 = vrot.lane.b32.xlu0 %v8506_v10, %s8824_s10 }
0x290b   :  { %v2200_v11 = vpop.permute.xlu0 %2199 }
0x290c   :  { %v2202_v12 = vmul.f32 %v2200_v11, %v2185_v34 }
0x290e   :  { %2204 = vrot.lane.b32.xlu1 %v2202_v12, %s8830_s22 }
0x2980   :  { %v2205_v13 = vpop.permute.xlu1 %2204 }
0x2981   :  { %2207 = vst.msk [vmem:[#allocation2] sm:$0xff] %vm85_vm1, %v2205_v13  ;;  %8125 = vmatmul.mubr.msk.f32.vlgmr.msra.gmra.mrb[26].mxu1 %vm85_vm1, %v2205_v13 }
0x2982   :  { %8128 = vmatpush3.msra.mxu1 %v9190_v53  ;;  %8129 = vmatprep.mubr.msk.f32.mxu1 %vm8828_vm0, %v8827_v0 }
0x2983   :  { %8132 = vmatprep.subr.mxu1 %v8827_v0 }
0x2a54   :  { %v2276_v19 = vpop.f32.mrb[26].mxu1 }
0x2a55   :  { %v2280_v20 = vadd.f32 %v2276_v19, %v2079_v17  ;;  %v8126_v21 = vpop.f32.mrb[27].mxu1 }
0x2a57   :  { %8507 = vtanh.f32 %v2280_v20 }
0x2a61   :  { %v8508_v27 = vpop.eup %8507 }
0x2a62   :  { %2286 = vrot.lane.b32.xlu0 %v8508_v27, %s8829_s21  ;;  %v2282_v15 = vmul.f32 0.5, %v8508_v27  ;;  %v2094_v27 = vadd.f32 %v9212_v58, %v9182_v44 }
0x2a64   :  { %v2283_v22 = vadd.f32 0.5, %v2282_v15 }
0x2a66   :  { %v2284_v24 = vmul.f32 %v2283_v22, %v2196_v8 }
0x2ad4   :  { %v2287_v23 = vpop.permute.xlu0 %2286 }
0x2ad5   :  { %v2289_v16 = vmul.f32 %v2287_v23, %v2283_v22 }
0x2ad7   :  { %2291 = vrot.lane.b32.xlu1 %v2289_v16, %s8824_s10 }
0x2b49   :  { %v2292_v26 = vpop.permute.xlu1 %2291 }
0x2b4a   :  { %v2294_v29 = vadd.f32 %v2292_v26, %v2284_v24 }
0x2b4c   :  { %8509 = vtanh.f32 %v2294_v29 }
0x2b56   :  { %v8510_v30 = vpop.eup %8509 }
0x2b57   :  { %2297 = vrot.lane.b32.xlu0 %v8510_v30, %s8824_s10 }
0x2bc9   :  { %v2298_v31 = vpop.permute.xlu0 %2297 }
0x2bca   :  { %v2300_v32 = vmul.f32 %v2298_v31, %v2283_v22 }
0x2bcc   :  { %2302 = vrot.lane.b32.xlu1 %v2300_v32, %s8830_s22 }
0x2c3e   :  { %v2303_v33 = vpop.permute.xlu1 %2302 }
0x2c3f   :  { %2305 = vst.msk [vmem:[#allocation2 + $0x8] sm:$0xff] %vm85_vm1, %v2303_v33  ;;  %8130 = vmatmul.mubr.msk.f32.vlgmr.msra.gmra.mrb[28].mxu1 %vm85_vm1, %v2303_v33 }
0x2c40   :  { %8133 = vmatpush3.msra.mxu1 %v9190_v53  ;;  %8134 = vmatprep.mubr.msk.f32.mxu1 %vm8828_vm0, %v8827_v0 }
0x2c41   :  { %8142 = vmatprep.subr.mxu1 %v8827_v0 }
0x2d12   :  { %v2374_v36 = vpop.f32.mrb[28].mxu1 }
0x2d13   :  { %v2378_v37 = vadd.f32 %v2374_v36, %v2084_v35  ;;  %v8131_v38 = vpop.f32.mrb[29].mxu1 }
0x2d14   :  { %v2099_v38 = vadd.f32 %v9180_v9, %v9212_v58  ;;  %v2895_v9 = vld [vmem:[#allocation6 + $0x18] sm:$0xff] }
0x2d15   :  { %8511 = vtanh.f32 %v2378_v37 }
0x2d1f   :  { %v8512_v39 = vpop.eup %8511 }
0x2d20   :  { %2384 = vrot.lane.b32.xlu0 %v8512_v39, %s8829_s21  ;;  %v2380_v40 = vmul.f32 0.5, %v8512_v39 }
0x2d22   :  { %v2381_v41 = vadd.f32 0.5, %v2380_v40 }
0x2d24   :  { %v2382_v45 = vmul.f32 %v2381_v41, %v2294_v29 }
0x2d92   :  { %v2385_v42 = vpop.permute.xlu0 %2384 }
0x2d93   :  { %v2387_v28 = vmul.f32 %v2385_v42, %v2381_v41 }
0x2d95   :  { %2389 = vrot.lane.b32.xlu1 %v2387_v28, %s8824_s10 }
0x2e07   :  { %v2390_v46 = vpop.permute.xlu1 %2389 }
0x2e08   :  { %v2392_v14 = vadd.f32 %v2390_v46, %v2382_v45 }
0x2e0a   :  { %8513 = vtanh.f32 %v2392_v14 }
0x2e0b   :  { %8515 = vtanh.f32 %v9214_v60 }
0x2e14   :  { %v8514_v25 = vpop.eup %8513 }
0x2e15   :  { %2395 = vrot.lane.b32.xlu0 %v8514_v25, %s8824_s10  ;;  %v8516_v47 = vpop.eup %8515 }
0x2e16   :  { %v1939_v48 = vmul.f32 0.5, %v8516_v47 }
0x2e18   :  { %v1940_v54 = vadd.f32 0.5, %v1939_v48 }
0x2e19   :  { %1943 = vrot.lane.b32.xlu0 %v8516_v47, %s8829_s21 }
0x2e1a   :  { %v1941_v57 = vmul.f32 %v1940_v54, %v9186_v51 }
0x2e87   :  { %v2396_v49 = vpop.permute.xlu0 %2395 }
0x2e88   :  { %v2398_v52 = vmul.f32 %v2396_v49, %v2381_v41 }
0x2e8a   :  { %2400 = vrot.lane.b32.xlu1 %v2398_v52, %s8830_s22 }
0x2e8b   :  { %v1944_v55 = vpop.permute.xlu0 %1943 }
0x2e8c   :  { %v1946_v4 = vmul.f32 %v1944_v55, %v1940_v54  ;;  %v2900_v55 = vld [vmem:[#allocation2] sm:$0xff] }
0x2e8e   :  { %1948 = vrot.lane.b32.xlu0 %v1946_v4, %s8824_s10  ;;  %v2901_v4 = vld [vmem:[#allocation2 + $0x8] sm:$0xff] }
0x2efc   :  { %v2401_v56 = vpop.permute.xlu1 %2400 }
0x2efd   :  { %2403 = vst.msk [vmem:[#allocation2 + $0x10] sm:$0xff] %vm85_vm1, %v2401_v56  ;;  %8135 = vmatmul.mubr.msk.f32.vlgmr.msra.gmra.mrb[30].mxu1 %vm85_vm1, %v2401_v56 }
0x2efe   :  { %8143 = vmatpush3.msra.mxu1 %v9190_v53  ;;  %8144 = vmatprep.mubr.msk.f32.mxu1 %vm8828_vm0, %v8827_v0 }
0x2eff   :  { %8152 = vmatprep.subr.mxu1 %v8827_v0 }
0x2f00   :  { %v1949_v59 = vpop.permute.xlu0 %1948 }
0x2f01   :  { %v1951_v60 = vadd.f32 %v1949_v59, %v1941_v57 }
0x2f03   :  { %8517 = vtanh.f32 %v1951_v60 }
0x2f04   :  { %v2902_v56 = vld [vmem:[#allocation2 + $0x10] sm:$0xff] }
0x2f0d   :  { %v8518_v61 = vpop.eup %8517 }
0x2f0e   :  { %1954 = vrot.lane.b32.xlu0 %v8518_v61, %s8824_s10 }
0x2f80   :  { %v1955_v62 = vpop.permute.xlu0 %1954 }
0x2f81   :  { %v1957_v63 = vmul.f32 %v1955_v62, %v1940_v54 }
0x2f83   :  { %1959 = vrot.lane.b32.xlu0 %v1957_v63, %s8830_s22 }
0x2fd0   :  { %v2472_v2 = vpop.f32.mrb[30].mxu1 }
0x2fd1   :  { %v2476_v3 = vadd.f32 %v2472_v2, %v2089_v1  ;;  %v8136_v5 = vpop.f32.mrb[31].mxu1 }
0x2fd3   :  { %8519 = vtanh.f32 %v2476_v3 }
0x2fdd   :  { %v8520_v51 = vpop.eup %8519 }
0x2fde   :  { %2482 = vrot.lane.b32.xlu1 %v8520_v51, %s8829_s21  ;;  %v2478_v18 = vmul.f32 0.5, %v8520_v51 }
0x2fe0   :  { %v2479_v6 = vadd.f32 0.5, %v2478_v18 }
0x2fe2   :  { %v2480_v8 = vmul.f32 %v2479_v6, %v2392_v14 }
0x2ff5   :  { %v1960_v34 = vpop.permute.xlu0 %1959 }
0x2ff6   :  { %1962 = vst.msk [vmem:[#allocation2 + $0x38] sm:$0xff] %vm85_vm1, %v1960_v34 }
0x2ffd   :  { %v1976_v50 = vld [vmem:[#allocation2 + $0x38] sm:$0xff] }
0x2ffe   :  { %8115 = vmatmul.mubr.msk.f32.gmra.mrb[30].mxu0 %vm85_vm1, %v1976_v50 }
0x2fff   :  { %8139 = vmatprep.mubr.msk.f32.mxu0 %vm8828_vm0, %v8827_v0 }
0x3050   :  { %v2483_v7 = vpop.permute.xlu1 %2482 }
0x3051   :  { %v2485_v43 = vmul.f32 %v2483_v7, %v2479_v6 }
0x3053   :  { %2487 = vrot.lane.b32.xlu1 %v2485_v43, %s8824_s10 }
0x30c5   :  { %v2488_v10 = vpop.permute.xlu1 %2487 }
0x30c6   :  { %v2490_v11 = vadd.f32 %v2488_v10, %v2480_v8 }
0x30c8   :  { %8521 = vtanh.f32 %v2490_v11 }
0x30d1   :  { %v9265_v12 = vpop.f32.mrb[30].mxu0 }
0x30d2   :  { %v8522_v13 = vpop.eup %8521  ;;  %v9267_v17 = vpop.f32.mrb[31].mxu0 }
0x30d3   :  { %2493 = vrot.lane.b32.xlu1 %v8522_v13, %s8824_s10  ;;  %v2104_v61 = vadd.f32 %v9212_v58, %v9267_v17 }
0x3145   :  { %v2494_v19 = vpop.permute.xlu1 %2493 }
0x3146   :  { %v2496_v20 = vmul.f32 %v2494_v19, %v2479_v6  ;;  %v9321_v19 = vld [vmem:[#allocation8 + $0x18] sm:$0xff] }
0x3148   :  { %2498 = vrot.lane.b32.xlu1 %v2496_v20, %s8830_s22 }
0x31ba   :  { %v2499_v21 = vpop.permute.xlu1 %2498 }
0x31bb   :  { %2501 = vst.msk [vmem:[#allocation2 + $0x18] sm:$0xff] %vm85_vm1, %v2499_v21  ;;  %8140 = vmatmul.mubr.msk.f32.vlgmr.msra.gmra.mrb[32].mxu0 %vm85_vm1, %v2499_v21 }
0x31bc   :  { %8148 = vmatpush3.msra.mxu0 %v9190_v53  ;;  %8149 = vmatprep.mubr.msk.f32.mxu0 %vm8828_vm0, %v8827_v0 }
0x31bd   :  { %8157 = vmatprep.subr.mxu0 %v2895_v9 }
0x31c2   :  { %v2903_v57 = vld [vmem:[#allocation2 + $0x18] sm:$0xff] }
0x328e   :  { %v2570_v15 = vpop.f32.mrb[32].mxu0 }
0x328f   :  { %v2574_v22 = vadd.f32 %v2570_v15, %v2094_v27  ;;  %v8141_v23 = vpop.f32.mrb[33].mxu0 }
0x3290   :  { %v9343_v23 = vld [vmem:[%s9984_s3 + $0x3] ss:$0 sm:$0xff] }
0x3291   :  { %8523 = vtanh.f32 %v2574_v22  ;;  %v2109_v22 = vadd.f32 %v9265_v12, %v9212_v58 }
0x329b   :  { %v8524_v16 = vpop.eup %8523 }
0x329c   :  { %2580 = vrot.lane.b32.xlu0 %v8524_v16, %s8829_s21  ;;  %v2576_v24 = vmul.f32 0.5, %v8524_v16 }
0x329e   :  { %v2577_v26 = vadd.f32 0.5, %v2576_v24 }
0x32a0   :  { %v2578_v31 = vmul.f32 %v2577_v26, %v2490_v11 }
0x330e   :  { %v2581_v29 = vpop.permute.xlu0 %2580 }
0x330f   :  { %v2583_v30 = vmul.f32 %v2581_v29, %v2577_v26 }
0x3311   :  { %2585 = vrot.lane.b32.xlu1 %v2583_v30, %s8824_s10 }
0x3383   :  { %v2586_v32 = vpop.permute.xlu1 %2585 }
0x3384   :  { %v2588_v33 = vadd.f32 %v2586_v32, %v2578_v31 }
0x3386   :  { %8525 = vtanh.f32 %v2588_v33 }
0x3390   :  { %v8526_v35 = vpop.eup %8525 }
0x3391   :  { %2591 = vrot.lane.b32.xlu0 %v8526_v35, %s8824_s10 }
0x3403   :  { %v2592_v44 = vpop.permute.xlu0 %2591 }
0x3404   :  { %v2594_v36 = vmul.f32 %v2592_v44, %v2577_v26 }
0x3406   :  { %2596 = vrot.lane.b32.xlu1 %v2594_v36, %s8830_s22 }
0x3478   :  { %v2597_v37 = vpop.permute.xlu1 %2596 }
0x3479   :  { %2599 = vst.msk [vmem:[#allocation2 + $0x20] sm:$0xff] %vm85_vm1, %v2597_v37  ;;  %8145 = vmatmul.mubr.msk.f32.vlgmr.msra.gmra.mrb[32].mxu1 %vm85_vm1, %v2597_v37 }
0x347a   :  { %8153 = vmatpush3.msra.mxu1 %v9190_v53  ;;  %8154 = vmatprep.mubr.msk.f32.mxu1 %vm8828_vm0, %v8827_v0 }
0x347b   :  { %8171 = vmatprep.subr.mxu1 %v8827_v0 }
0x3480   :  { %v2904_v59 = vld [vmem:[#allocation2 + $0x20] sm:$0xff] }
0x354c   :  { %v2668_v39 = vpop.f32.mrb[32].mxu1 }
0x354d   :  { %v2672_v40 = vadd.f32 %v2668_v39, %v2099_v38  ;;  %v8146_v41 = vpop.f32.mrb[33].mxu1 }
0x354f   :  { %8527 = vtanh.f32 %v2672_v40 }
0x3559   :  { %v8528_v42 = vpop.eup %8527 }
0x355a   :  { %2678 = vrot.lane.b32.xlu0 %v8528_v42, %s8829_s21  ;;  %v2674_v28 = vmul.f32 0.5, %v8528_v42 }
0x355c   :  { %v2675_v45 = vadd.f32 0.5, %v2674_v28 }
0x355e   :  { %v2676_v53 = vmul.f32 %v2675_v45, %v2588_v33 }
0x35cc   :  { %v2679_v46 = vpop.permute.xlu0 %2678 }
0x35cd   :  { %v2681_v14 = vmul.f32 %v2679_v46, %v2675_v45 }
0x35cf   :  { %2683 = vrot.lane.b32.xlu1 %v2681_v14, %s8824_s10 }
0x3641   :  { %v2684_v25 = vpop.permute.xlu1 %2683 }
0x3642   :  { %v2686_v47 = vadd.f32 %v2684_v25, %v2676_v53 }
0x3644   :  { %8529 = vtanh.f32 %v2686_v47 }
0x364e   :  { %v8530_v48 = vpop.eup %8529 }
0x364f   :  { %2689 = vrot.lane.b32.xlu0 %v8530_v48, %s8824_s10 }
0x36c1   :  { %v2690_v49 = vpop.permute.xlu0 %2689 }
0x36c2   :  { %v2692_v52 = vmul.f32 %v2690_v49, %v2675_v45 }
0x36c4   :  { %2694 = vrot.lane.b32.xlu1 %v2692_v52, %s8830_s22 }
0x3736   :  { %v2695_v54 = vpop.permute.xlu1 %2694 }
0x3737   :  { %2697 = vst.msk [vmem:[#allocation2 + $0x28] sm:$0xff] %vm85_vm1, %v2695_v54  ;;  %8150 = vmatmul.mubr.msk.f32.vlgmr.msra.gmra.mrb[34].mxu0 %vm85_vm1, %v2695_v54 }
0x3738   :  { %8159 = vmatprep.mubr.msk.f32.mxu0 %vm85_vm1, %v2900_v55  ;;  %8158 = vmatpush3.msra.mxu0 %v2895_v9 }
0x3739   :  { %8191 = vmatprep.subr.mxu0 %v8827_v0 }
0x373b   :  { %8160 = vmatmul.mubr.msk.f32.vlgmr.msra.gmra.mrb[36].mxu0 %vm85_vm1, %v2901_v4 }
0x373c   :  { %8162 = vmatprep.mubr.msk.f32.mxu0 %vm85_vm1, %v2902_v56  ;;  %8192 = vmatpush3.msra.mxu0 %v9321_v19 }
0x373d   :  { %8201 = vmatprep.subr.mxu0 %v8827_v0 }
0x373e   :  { %v2905_v60 = vld [vmem:[#allocation2 + $0x28] sm:$0xff] }
0x373f   :  { %8163 = vmatmul.mubr.msk.f32.gmra.mrb[38].mxu0 %vm85_vm1, %v2903_v57 }
0x3740   :  { %8165 = vmatprep.mubr.msk.f32.mxu0 %vm85_vm1, %v2904_v59 }
0x3743   :  { %8166 = vmatmul.mubr.msk.f32.gmra.mrb[40].mxu0 %vm85_vm1, %v2905_v60 }
0x380a   :  { %v2766_v62 = vpop.f32.mrb[34].mxu0 }
0x380b   :  { %v2770_v63 = vadd.f32 %v2766_v62, %v2104_v61  ;;  %v8151_v1 = vpop.f32.mrb[35].mxu0 }
0x380d   :  { %8531 = vtanh.f32 %v2770_v63 }
0x380e   :  { %v9305_v2 = vpop.f32.mrb[36].mxu0 }
0x380f   :  { %v3004_v3 = vpop.f32.mrb[37].mxu0  ;;  %v3010_v28 = vadd.f32 %v9305_v2, %v9343_v23 }
0x3810   :  { %v3005_v29 = vadd.f32 %v9343_v23, %v3004_v3 }
0x3812   :  { %v9307_v5 = vpop.f32.mrb[38].mxu0 }
0x3813   :  { %v9309_v51 = vpop.f32.mrb[39].mxu0 }
0x3814   :  { %v3015_v59 = vadd.f32 %v9343_v23, %v9309_v51 }
0x3816   :  { %v9311_v34 = vpop.f32.mrb[40].mxu0 }
0x3817   :  { %v8532_v50 = vpop.eup %8531  ;;  %v9313_v18 = vpop.f32.mrb[41].mxu0 }
0x3818   :  { %2776 = vrot.lane.b32.xlu0 %v8532_v50, %s8829_s21  ;;  %v2772_v6 = vmul.f32 0.5, %v8532_v50 }
0x381a   :  { %v2773_v7 = vadd.f32 0.5, %v2772_v6 }
0x381c   :  { %v2774_v10 = vmul.f32 %v2773_v7, %v2686_v47 }
0x388a   :  { %v2777_v43 = vpop.permute.xlu0 %2776 }
0x388b   :  { %v2779_v8 = vmul.f32 %v2777_v43, %v2773_v7 }
0x388d   :  { %2781 = vrot.lane.b32.xlu1 %v2779_v8, %s8824_s10 }
0x38ff   :  { %v2782_v11 = vpop.permute.xlu1 %2781 }
0x3900   :  { %v9317_v13 = vadd.f32 %v2782_v11, %v2774_v10 }
0x3902   :  { %8533 = vtanh.f32 %v9317_v13 }
0x390c   :  { %v8534_v17 = vpop.eup %8533 }
0x390d   :  { %2787 = vrot.lane.b32.xlu0 %v8534_v17, %s8824_s10 }
0x397f   :  { %v2788_v20 = vpop.permute.xlu0 %2787 }
0x3980   :  { %v2790_v21 = vmul.f32 %v2788_v20, %v2773_v7 }
0x3982   :  { %2792 = vrot.lane.b32.xlu1 %v2790_v21, %s8830_s22 }
0x39f4   :  { %v2793_v27 = vpop.permute.xlu1 %2792 }
0x39f5   :  { %2795 = vst.msk [vmem:[#allocation2 + $0x30] sm:$0xff] %vm85_vm1, %v2793_v27  ;;  %8155 = vmatmul.mubr.msk.f32.vlgmr.msra.gmra.mrb[34].mxu1 %vm85_vm1, %v2793_v27 }
0x39f6   :  { %8172 = vmatpush3.msra.mxu1 %v9321_v19  ;;  %8173 = vmatprep.mubr.msk.f32.mxu1 %vm8828_vm0, %v8827_v0 }
0x39f7   :  { %8176 = vmatprep.subr.mxu1 %v8827_v0 }
0x39f9   :  { %8174 = vmatmul.mubr.f32.vlgmr.msra.gmra.mrb[36].mxu1 %v8827_v0 }
0x39fa   :  { %8177 = vmatpush3.msra.mxu1 %v9321_v19  ;;  %8178 = vmatprep.mubr.msk.f32.mxu1 %vm8828_vm0, %v8827_v0 }
0x39fb   :  { %8181 = vmatprep.subr.mxu1 %v8827_v0 }
0x39fc   :  { %v2906_v15 = vld [vmem:[#allocation2 + $0x30] sm:$0xff] }
0x39fd   :  { %8168 = vmatprep.mubr.msk.f32.mxu0 %vm85_vm1, %v2906_v15 }
0x3ac8   :  { %v2864_v16 = vpop.f32.mrb[34].mxu1 }
0x3ac9   :  { %v9345_v24 = vadd.f32 %v2864_v16, %v2109_v22  ;;  %v8156_v26 = vpop.f32.mrb[35].mxu1 }
0x3acc   :  { %v3109_v30 = vpop.f32.mrb[36].mxu1 }
0x3acd   :  { %v3113_v31 = vadd.f32 %v3109_v30, %v3005_v29  ;;  %v8175_v32 = vpop.f32.mrb[37].mxu1 }
0x3acf   :  { %8535 = vtanh.f32 %v3113_v31  ;;  %v3020_v31 = vadd.f32 %v9307_v5, %v9343_v23 }
0x3ad9   :  { %v8536_v33 = vpop.eup %8535 }
0x3ada   :  { %3119 = vrot.lane.b32.xlu0 %v8536_v33, %s8829_s21  ;;  %v3115_v35 = vmul.f32 0.5, %v8536_v33 }
0x3adc   :  { %v3116_v58 = vadd.f32 0.5, %v3115_v35 }
0x3ade   :  { %v3117_v36 = vmul.f32 0.0, %v3116_v58 }
0x3b4c   :  { %v3120_v12 = vpop.permute.xlu0 %3119 }
0x3b4d   :  { %v3122_v44 = vmul.f32 %v3120_v12, %v3116_v58 }
0x3b4f   :  { %3124 = vrot.lane.b32.xlu1 %v3122_v44, %s8824_s10 }
0x3bc1   :  { %v3125_v37 = vpop.permute.xlu1 %3124 }
0x3bc2   :  { %v3127_v38 = vadd.f32 %v3125_v37, %v3117_v36 }
0x3bc4   :  { %8537 = vtanh.f32 %v3127_v38 }
0x3bce   :  { %v8538_v39 = vpop.eup %8537 }
0x3bcf   :  { %3130 = vrot.lane.b32.xlu0 %v8538_v39, %s8824_s10 }
0x3c41   :  { %v3131_v40 = vpop.permute.xlu0 %3130 }
0x3c42   :  { %v3133_v41 = vmul.f32 %v3131_v40, %v3116_v58 }
0x3c44   :  { %3135 = vrot.lane.b32.xlu1 %v3133_v41, %s8830_s22 }
0x3cb6   :  { %v3136_v42 = vpop.permute.xlu1 %3135 }
0x3cb7   :  { %3138 = vst.msk [vmem:[#allocation2] sm:$0xff] %vm85_vm1, %v3136_v42  ;;  %8179 = vmatmul.mubr.msk.f32.vlgmr.msra.gmra.mrb[38].mxu1 %vm85_vm1, %v3136_v42 }
0x3cb8   :  { %8182 = vmatpush3.msra.mxu1 %v9321_v19  ;;  %8183 = vmatprep.mubr.msk.f32.mxu1 %vm8828_vm0, %v8827_v0 }
0x3cb9   :  { %8186 = vmatprep.subr.mxu1 %v8827_v0 }
0x3d8a   :  { %v3207_v45 = vpop.f32.mrb[38].mxu1 }
0x3d8b   :  { %v3211_v46 = vadd.f32 %v3207_v45, %v3010_v28  ;;  %v8180_v14 = vpop.f32.mrb[39].mxu1 }
0x3d8d   :  { %8539 = vtanh.f32 %v3211_v46 }
0x3d97   :  { %v8540_v53 = vpop.eup %8539 }
0x3d98   :  { %3217 = vrot.lane.b32.xlu0 %v8540_v53, %s8829_s21  ;;  %v3213_v25 = vmul.f32 0.5, %v8540_v53  ;;  %v3025_v53 = vadd.f32 %v9343_v23, %v9313_v18 }
0x3d9a   :  { %v3214_v47 = vadd.f32 0.5, %v3213_v25 }
0x3d9c   :  { %v3215_v49 = vmul.f32 %v3214_v47, %v3127_v38 }
0x3e0a   :  { %v3218_v48 = vpop.permute.xlu0 %3217 }
0x3e0b   :  { %v3220_v9 = vmul.f32 %v3218_v48, %v3214_v47 }
0x3e0d   :  { %3222 = vrot.lane.b32.xlu1 %v3220_v9, %s8824_s10 }
0x3e7f   :  { %v3223_v52 = vpop.permute.xlu1 %3222 }
0x3e80   :  { %v3225_v54 = vadd.f32 %v3223_v52, %v3215_v49 }
0x3e82   :  { %8541 = vtanh.f32 %v3225_v54 }
0x3e8c   :  { %v8542_v55 = vpop.eup %8541 }
0x3e8d   :  { %3228 = vrot.lane.b32.xlu0 %v8542_v55, %s8824_s10 }
0x3eff   :  { %v3229_v4 = vpop.permute.xlu0 %3228 }
0x3f00   :  { %v3231_v56 = vmul.f32 %v3229_v4, %v3214_v47 }
0x3f02   :  { %3233 = vrot.lane.b32.xlu1 %v3231_v56, %s8830_s22 }
0x3f74   :  { %v3234_v57 = vpop.permute.xlu1 %3233 }
0x3f75   :  { %3236 = vst.msk [vmem:[#allocation2 + $0x8] sm:$0xff] %vm85_vm1, %v3234_v57  ;;  %8184 = vmatmul.mubr.msk.f32.vlgmr.msra.gmra.mrb[40].mxu1 %vm85_vm1, %v3234_v57 }
0x3f76   :  { %8187 = vmatpush3.msra.mxu1 %v9321_v19  ;;  %8188 = vmatprep.mubr.msk.f32.mxu1 %vm8828_vm0, %v8827_v0 }
0x3f77   :  { %8196 = vmatprep.subr.mxu1 %v8827_v0 }
0x4048   :  { %v3305_v60 = vpop.f32.mrb[40].mxu1 }
0x4049   :  { %v3309_v61 = vadd.f32 %v3305_v60, %v3015_v59  ;;  %v8185_v62 = vpop.f32.mrb[41].mxu1 }
0x404a   :  { %v3030_v62 = vadd.f32 %v9311_v34, %v9343_v23  ;;  %v3826_v34 = vld [vmem:[#allocation6 + $0x20] sm:$0xff] }
0x404b   :  { %8543 = vtanh.f32 %v3309_v61 }
0x4055   :  { %v8544_v63 = vpop.eup %8543 }
0x4056   :  { %3315 = vrot.lane.b32.xlu0 %v8544_v63, %s8829_s21  ;;  %v3311_v1 = vmul.f32 0.5, %v8544_v63 }
0x4058   :  { %v3312_v2 = vadd.f32 0.5, %v3311_v1 }
0x405a   :  { %v3313_v6 = vmul.f32 %v3312_v2, %v3225_v54 }
0x40c8   :  { %v3316_v3 = vpop.permute.xlu0 %3315 }
0x40c9   :  { %v3318_v50 = vmul.f32 %v3316_v3, %v3312_v2 }
0x40cb   :  { %3320 = vrot.lane.b32.xlu1 %v3318_v50, %s8824_s10 }
0x413d   :  { %v3321_v7 = vpop.permute.xlu1 %3320 }
0x413e   :  { %v3323_v43 = vadd.f32 %v3321_v7, %v3313_v6 }
0x4140   :  { %8545 = vtanh.f32 %v3323_v43 }
0x4141   :  { %8547 = vtanh.f32 %v9345_v24 }
0x414a   :  { %v8546_v51 = vpop.eup %8545 }
0x414b   :  { %3326 = vrot.lane.b32.xlu0 %v8546_v51, %s8824_s10  ;;  %v8548_v8 = vpop.eup %8547 }
0x414c   :  { %v2870_v10 = vmul.f32 0.5, %v8548_v8 }
0x414e   :  { %v2871_v20 = vadd.f32 0.5, %v2870_v10 }
0x414f   :  { %2874 = vrot.lane.b32.xlu0 %v8548_v8, %s8829_s21 }
0x4150   :  { %v2872_v22 = vmul.f32 %v2871_v20, %v9317_v13 }
0x41bd   :  { %v3327_v11 = vpop.permute.xlu0 %3326 }
0x41be   :  { %v3329_v17 = vmul.f32 %v3327_v11, %v3312_v2 }
0x41c0   :  { %3331 = vrot.lane.b32.xlu1 %v3329_v17, %s8830_s22 }
0x41c1   :  { %v2875_v21 = vpop.permute.xlu0 %2874 }
0x41c2   :  { %v2877_v27 = vmul.f32 %v2875_v21, %v2871_v20  ;;  %v3831_v21 = vld [vmem:[#allocation2] sm:$0xff] }
0x41c4   :  { %2879 = vrot.lane.b32.xlu0 %v2877_v27, %s8824_s10  ;;  %v3832_v27 = vld [vmem:[#allocation2 + $0x8] sm:$0xff] }
0x4232   :  { %v3332_v15 = vpop.permute.xlu1 %3331 }
0x4233   :  { %3334 = vst.msk [vmem:[#allocation2 + $0x10] sm:$0xff] %vm85_vm1, %v3332_v15  ;;  %8189 = vmatmul.mubr.msk.f32.vlgmr.msra.gmra.mrb[42].mxu1 %vm85_vm1, %v3332_v15 }
0x4234   :  { %8197 = vmatpush3.msra.mxu1 %v9321_v19  ;;  %8198 = vmatprep.mubr.msk.f32.mxu1 %vm8828_vm0, %v8827_v0 }
0x4235   :  { %8206 = vmatprep.subr.mxu1 %v8827_v0 }
0x4236   :  { %v2880_v16 = vpop.permute.xlu0 %2879 }
0x4237   :  { %v2882_v24 = vadd.f32 %v2880_v16, %v2872_v22 }
0x4239   :  { %8549 = vtanh.f32 %v2882_v24 }
0x423a   :  { %v3833_v15 = vld [vmem:[#allocation2 + $0x10] sm:$0xff] }
0x4243   :  { %v8550_v26 = vpop.eup %8549 }
0x4244   :  { %2885 = vrot.lane.b32.xlu0 %v8550_v26, %s8824_s10 }
0x42b6   :  { %v2886_v29 = vpop.permute.xlu0 %2885 }
0x42b7   :  { %v2888_v30 = vmul.f32 %v2886_v29, %v2871_v20 }
0x42b9   :  { %2890 = vrot.lane.b32.xlu0 %v2888_v30, %s8830_s22 }
0x4306   :  { %v3403_v32 = vpop.f32.mrb[42].mxu1 }
0x4307   :  { %v3407_v33 = vadd.f32 %v3403_v32, %v3020_v31  ;;  %v8190_v35 = vpop.f32.mrb[43].mxu1 }
0x4309   :  { %8551 = vtanh.f32 %v3407_v33 }
0x4313   :  { %v8552_v13 = vpop.eup %8551 }
0x4314   :  { %3413 = vrot.lane.b32.xlu1 %v8552_v13, %s8829_s21  ;;  %v3409_v44 = vmul.f32 0.5, %v8552_v13 }
0x4316   :  { %v3410_v36 = vadd.f32 0.5, %v3409_v44 }
0x4318   :  { %v3411_v38 = vmul.f32 %v3410_v36, %v3323_v43 }
0x432b   :  { %v2891_v58 = vpop.permute.xlu0 %2890 }
0x432c   :  { %2893 = vst.msk [vmem:[#allocation2 + $0x38] sm:$0xff] %vm85_vm1, %v2891_v58 }
0x4333   :  { %v2907_v12 = vld [vmem:[#allocation2 + $0x38] sm:$0xff] }
0x4334   :  { %8169 = vmatmul.mubr.msk.f32.gmra.mrb[42].mxu0 %vm85_vm1, %v2907_v12 }
0x4335   :  { %8193 = vmatprep.mubr.msk.f32.mxu0 %vm8828_vm0, %v8827_v0 }
0x4386   :  { %v3414_v37 = vpop.permute.xlu1 %3413 }
0x4387   :  { %v3416_v5 = vmul.f32 %v3414_v37, %v3410_v36 }
0x4389   :  { %3418 = vrot.lane.b32.xlu1 %v3416_v5, %s8824_s10 }
0x43fb   :  { %v3419_v39 = vpop.permute.xlu1 %3418 }
0x43fc   :  { %v3421_v40 = vadd.f32 %v3419_v39, %v3411_v38 }
0x43fe   :  { %8553 = vtanh.f32 %v3421_v40 }
0x4407   :  { %v9396_v41 = vpop.f32.mrb[42].mxu0 }
0x4408   :  { %v8554_v42 = vpop.eup %8553  ;;  %v9398_v28 = vpop.f32.mrb[43].mxu0 }
0x4409   :  { %3424 = vrot.lane.b32.xlu1 %v8554_v42, %s8824_s10  ;;  %v3035_v26 = vadd.f32 %v9343_v23, %v9398_v28 }
0x447b   :  { %v3425_v45 = vpop.permute.xlu1 %3424 }
0x447c   :  { %v3427_v46 = vmul.f32 %v3425_v45, %v3410_v36  ;;  %v9452_v45 = vld [vmem:[#allocation8 + $0x20] sm:$0xff] }
0x447e   :  { %3429 = vrot.lane.b32.xlu1 %v3427_v46, %s8830_s22 }
0x44f0   :  { %v3430_v14 = vpop.permute.xlu1 %3429 }
0x44f1   :  { %3432 = vst.msk [vmem:[#allocation2 + $0x18] sm:$0xff] %vm85_vm1, %v3430_v14  ;;  %8194 = vmatmul.mubr.msk.f32.vlgmr.msra.gmra.mrb[44].mxu0 %vm85_vm1, %v3430_v14 }
0x44f2   :  { %8202 = vmatpush3.msra.mxu0 %v9321_v19  ;;  %8203 = vmatprep.mubr.msk.f32.mxu0 %vm8828_vm0, %v8827_v0 }
0x44f3   :  { %8211 = vmatprep.subr.mxu0 %v3826_v34 }
0x44f8   :  { %v3834_v22 = vld [vmem:[#allocation2 + $0x18] sm:$0xff] }
0x45c4   :  { %v3501_v25 = vpop.f32.mrb[44].mxu0 }
0x45c5   :  { %v3505_v47 = vadd.f32 %v3501_v25, %v3025_v53  ;;  %v8195_v48 = vpop.f32.mrb[45].mxu0 }
0x45c6   :  { %v9474_v48 = vld [vmem:[%s9984_s3 + $0x4] ss:$0 sm:$0xff] }
0x45c7   :  { %8555 = vtanh.f32 %v3505_v47  ;;  %v3040_v47 = vadd.f32 %v9396_v41, %v9343_v23 }
0x45d1   :  { %v8556_v9 = vpop.eup %8555 }
0x45d2   :  { %3511 = vrot.lane.b32.xlu0 %v8556_v9, %s8829_s21  ;;  %v3507_v49 = vmul.f32 0.5, %v8556_v9 }
0x45d4   :  { %v3508_v52 = vadd.f32 0.5, %v3507_v49 }
0x45d6   :  { %v3509_v4 = vmul.f32 %v3508_v52, %v3421_v40 }
0x4644   :  { %v3512_v54 = vpop.permute.xlu0 %3511 }
0x4645   :  { %v3514_v55 = vmul.f32 %v3512_v54, %v3508_v52 }
0x4647   :  { %3516 = vrot.lane.b32.xlu1 %v3514_v55, %s8824_s10 }
0x46b9   :  { %v3517_v56 = vpop.permute.xlu1 %3516 }
0x46ba   :  { %v3519_v57 = vadd.f32 %v3517_v56, %v3509_v4 }
0x46bc   :  { %8557 = vtanh.f32 %v3519_v57 }
0x46c6   :  { %v8558_v59 = vpop.eup %8557 }
0x46c7   :  { %3522 = vrot.lane.b32.xlu0 %v8558_v59, %s8824_s10 }
0x4739   :  { %v3523_v18 = vpop.permute.xlu0 %3522 }
0x473a   :  { %v3525_v60 = vmul.f32 %v3523_v18, %v3508_v52 }
0x473c   :  { %3527 = vrot.lane.b32.xlu1 %v3525_v60, %s8830_s22 }
0x47ae   :  { %v3528_v61 = vpop.permute.xlu1 %3527 }
0x47af   :  { %3530 = vst.msk [vmem:[#allocation2 + $0x20] sm:$0xff] %vm85_vm1, %v3528_v61  ;;  %8199 = vmatmul.mubr.msk.f32.vlgmr.msra.gmra.mrb[44].mxu1 %vm85_vm1, %v3528_v61 }
0x47b0   :  { %8207 = vmatpush3.msra.mxu1 %v9321_v19  ;;  %8208 = vmatprep.mubr.msk.f32.mxu1 %vm8828_vm0, %v8827_v0 }
0x47b1   :  { %8225 = vmatprep.subr.mxu1 %v8827_v0 }
0x47b6   :  { %v3835_v16 = vld [vmem:[#allocation2 + $0x20] sm:$0xff] }
0x4882   :  { %v3599_v63 = vpop.f32.mrb[44].mxu1 }
0x4883   :  { %v3603_v1 = vadd.f32 %v3599_v63, %v3030_v62  ;;  %v8200_v2 = vpop.f32.mrb[45].mxu1 }
0x4885   :  { %8559 = vtanh.f32 %v3603_v1 }
0x488f   :  { %v8560_v3 = vpop.eup %8559 }
0x4890   :  { %3609 = vrot.lane.b32.xlu0 %v8560_v3, %s8829_s21  ;;  %v3605_v50 = vmul.f32 0.5, %v8560_v3 }
0x4892   :  { %v3606_v6 = vadd.f32 0.5, %v3605_v50 }
0x4894   :  { %v3607_v19 = vmul.f32 %v3606_v6, %v3519_v57 }
0x4902   :  { %v3610_v7 = vpop.permute.xlu0 %3609 }
0x4903   :  { %v3612_v43 = vmul.f32 %v3610_v7, %v3606_v6 }
0x4905   :  { %3614 = vrot.lane.b32.xlu1 %v3612_v43, %s8824_s10 }
0x4977   :  { %v3615_v51 = vpop.permute.xlu1 %3614 }
0x4978   :  { %v3617_v8 = vadd.f32 %v3615_v51, %v3607_v19 }
0x497a   :  { %8561 = vtanh.f32 %v3617_v8 }
0x4984   :  { %v8562_v10 = vpop.eup %8561 }
0x4985   :  { %3620 = vrot.lane.b32.xlu0 %v8562_v10, %s8824_s10 }
0x49f7   :  { %v3621_v11 = vpop.permute.xlu0 %3620 }
0x49f8   :  { %v3623_v17 = vmul.f32 %v3621_v11, %v3606_v6 }
0x49fa   :  { %3625 = vrot.lane.b32.xlu1 %v3623_v17, %s8830_s22 }
0x4a6c   :  { %v3626_v20 = vpop.permute.xlu1 %3625 }
0x4a6d   :  { %3628 = vst.msk [vmem:[#allocation2 + $0x28] sm:$0xff] %vm85_vm1, %v3626_v20  ;;  %8204 = vmatmul.mubr.msk.f32.vlgmr.msra.gmra.mrb[46].mxu0 %vm85_vm1, %v3626_v20 }
0x4a6e   :  { %8213 = vmatprep.mubr.msk.f32.mxu0 %vm85_vm1, %v3831_v21  ;;  %8212 = vmatpush3.msra.mxu0 %v3826_v34 }
0x4a6f   :  { %8245 = vmatprep.subr.mxu0 %v8827_v0 }
0x4a71   :  { %8214 = vmatmul.mubr.msk.f32.vlgmr.msra.gmra.mrb[48].mxu0 %vm85_vm1, %v3832_v27 }
0x4a72   :  { %8216 = vmatprep.mubr.msk.f32.mxu0 %vm85_vm1, %v3833_v15  ;;  %8246 = vmatpush3.msra.mxu0 %v9452_v45 }
0x4a73   :  { %8255 = vmatprep.subr.mxu0 %v8827_v0 }
0x4a74   :  { %v3836_v24 = vld [vmem:[#allocation2 + $0x28] sm:$0xff] }
0x4a75   :  { %8217 = vmatmul.mubr.msk.f32.gmra.mrb[50].mxu0 %vm85_vm1, %v3834_v22 }
0x4a76   :  { %8219 = vmatprep.mubr.msk.f32.mxu0 %vm85_vm1, %v3835_v16 }
0x4a79   :  { %8220 = vmatmul.mubr.msk.f32.gmra.mrb[52].mxu0 %vm85_vm1, %v3836_v24 }
0x4b40   :  { %v3697_v29 = vpop.f32.mrb[46].mxu0 }
0x4b41   :  { %v3701_v30 = vadd.f32 %v3697_v29, %v3035_v26  ;;  %v8205_v31 = vpop.f32.mrb[47].mxu0 }
0x4b43   :  { %8563 = vtanh.f32 %v3701_v30 }
0x4b44   :  { %v9436_v32 = vpop.f32.mrb[48].mxu0 }
0x4b45   :  { %v3935_v33 = vpop.f32.mrb[49].mxu0  ;;  %v3941_v50 = vadd.f32 %v9436_v32, %v9474_v48 }
0x4b46   :  { %v3936_v54 = vadd.f32 %v9474_v48, %v3935_v33 }
0x4b48   :  { %v9438_v35 = vpop.f32.mrb[50].mxu0 }
0x4b49   :  { %v9440_v13 = vpop.f32.mrb[51].mxu0 }
0x4b4a   :  { %v3946_v16 = vadd.f32 %v9474_v48, %v9440_v13 }
0x4b4c   :  { %v9442_v58 = vpop.f32.mrb[52].mxu0 }
0x4b4d   :  { %v8564_v12 = vpop.eup %8563  ;;  %v9444_v44 = vpop.f32.mrb[53].mxu0 }
0x4b4e   :  { %3707 = vrot.lane.b32.xlu0 %v8564_v12, %s8829_s21  ;;  %v3703_v36 = vmul.f32 0.5, %v8564_v12 }
0x4b50   :  { %v3704_v37 = vadd.f32 0.5, %v3703_v36 }
0x4b52   :  { %v3705_v39 = vmul.f32 %v3704_v37, %v3617_v8 }
0x4bc0   :  { %v3708_v5 = vpop.permute.xlu0 %3707 }
0x4bc1   :  { %v3710_v38 = vmul.f32 %v3708_v5, %v3704_v37 }
0x4bc3   :  { %3712 = vrot.lane.b32.xlu1 %v3710_v38, %s8824_s10 }
0x4c35   :  { %v3713_v40 = vpop.permute.xlu1 %3712 }
0x4c36   :  { %v9448_v42 = vadd.f32 %v3713_v40, %v3705_v39 }
0x4c38   :  { %8565 = vtanh.f32 %v9448_v42 }
0x4c42   :  { %v8566_v28 = vpop.eup %8565 }
0x4c43   :  { %3718 = vrot.lane.b32.xlu0 %v8566_v28, %s8824_s10 }
0x4cb5   :  { %v3719_v46 = vpop.permute.xlu0 %3718 }
0x4cb6   :  { %v3721_v14 = vmul.f32 %v3719_v46, %v3704_v37 }
0x4cb8   :  { %3723 = vrot.lane.b32.xlu1 %v3721_v14, %s8830_s22 }
0x4d2a   :  { %v3724_v53 = vpop.permute.xlu1 %3723 }
0x4d2b   :  { %3726 = vst.msk [vmem:[#allocation2 + $0x30] sm:$0xff] %vm85_vm1, %v3724_v53  ;;  %8209 = vmatmul.mubr.msk.f32.vlgmr.msra.gmra.mrb[46].mxu1 %vm85_vm1, %v3724_v53 }
0x4d2c   :  { %8226 = vmatpush3.msra.mxu1 %v9452_v45  ;;  %8227 = vmatprep.mubr.msk.f32.mxu1 %vm8828_vm0, %v8827_v0 }
0x4d2d   :  { %8230 = vmatprep.subr.mxu1 %v8827_v0 }
0x4d2f   :  { %8228 = vmatmul.mubr.f32.vlgmr.msra.gmra.mrb[48].mxu1 %v8827_v0 }
0x4d30   :  { %8231 = vmatpush3.msra.mxu1 %v9452_v45  ;;  %8232 = vmatprep.mubr.msk.f32.mxu1 %vm8828_vm0, %v8827_v0 }
0x4d31   :  { %8235 = vmatprep.subr.mxu1 %v8827_v0 }
0x4d32   :  { %v3837_v25 = vld [vmem:[#allocation2 + $0x30] sm:$0xff] }
0x4d33   :  { %8222 = vmatprep.mubr.msk.f32.mxu0 %vm85_vm1, %v3837_v25 }
0x4dfe   :  { %v3795_v9 = vpop.f32.mrb[46].mxu1 }
0x4dff   :  { %v9476_v49 = vadd.f32 %v3795_v9, %v3040_v47  ;;  %v8210_v52 = vpop.f32.mrb[47].mxu1 }
0x4e02   :  { %v4040_v55 = vpop.f32.mrb[48].mxu1 }
0x4e03   :  { %v4044_v4 = vadd.f32 %v4040_v55, %v3936_v54  ;;  %v8229_v56 = vpop.f32.mrb[49].mxu1 }
0x4e05   :  { %8567 = vtanh.f32 %v4044_v4  ;;  %v3951_v4 = vadd.f32 %v9438_v35, %v9474_v48 }
0x4e0f   :  { %v8568_v57 = vpop.eup %8567 }
0x4e10   :  { %4050 = vrot.lane.b32.xlu0 %v8568_v57, %s8829_s21  ;;  %v4046_v59 = vmul.f32 0.5, %v8568_v57 }
0x4e12   :  { %v4047_v23 = vadd.f32 0.5, %v4046_v59 }
0x4e14   :  { %v4048_v60 = vmul.f32 0.0, %v4047_v23 }
0x4e82   :  { %v4051_v41 = vpop.permute.xlu0 %4050 }
0x4e83   :  { %v4053_v18 = vmul.f32 %v4051_v41, %v4047_v23 }
0x4e85   :  { %4055 = vrot.lane.b32.xlu1 %v4053_v18, %s8824_s10 }
0x4ef7   :  { %v4056_v61 = vpop.permute.xlu1 %4055 }
0x4ef8   :  { %v4058_v62 = vadd.f32 %v4056_v61, %v4048_v60 }
0x4efa   :  { %8569 = vtanh.f32 %v4058_v62 }
0x4f04   :  { %v8570_v63 = vpop.eup %8569 }
0x4f05   :  { %4061 = vrot.lane.b32.xlu0 %v8570_v63, %s8824_s10 }
0x4f77   :  { %v4062_v1 = vpop.permute.xlu0 %4061 }
0x4f78   :  { %v4064_v2 = vmul.f32 %v4062_v1, %v4047_v23 }
0x4f7a   :  { %4066 = vrot.lane.b32.xlu1 %v4064_v2, %s8830_s22 }
0x4fec   :  { %v4067_v3 = vpop.permute.xlu1 %4066 }
0x4fed   :  { %4069 = vst.msk [vmem:[#allocation2] sm:$0xff] %vm85_vm1, %v4067_v3  ;;  %8233 = vmatmul.mubr.msk.f32.vlgmr.msra.gmra.mrb[50].mxu1 %vm85_vm1, %v4067_v3 }
0x4fee   :  { %8236 = vmatpush3.msra.mxu1 %v9452_v45  ;;  %8237 = vmatprep.mubr.msk.f32.mxu1 %vm8828_vm0, %v8827_v0 }
0x4fef   :  { %8240 = vmatprep.subr.mxu1 %v8827_v0 }
0x50c0   :  { %v4138_v6 = vpop.f32.mrb[50].mxu1 }
0x50c1   :  { %v4142_v7 = vadd.f32 %v4138_v6, %v3941_v50  ;;  %v8234_v43 = vpop.f32.mrb[51].mxu1 }
0x50c3   :  { %8571 = vtanh.f32 %v4142_v7 }
0x50cd   :  { %v8572_v19 = vpop.eup %8571 }
0x50ce   :  { %4148 = vrot.lane.b32.xlu0 %v8572_v19, %s8829_s21  ;;  %v4144_v51 = vmul.f32 0.5, %v8572_v19  ;;  %v3956_v19 = vadd.f32 %v9474_v48, %v9444_v44 }
0x50d0   :  { %v4145_v8 = vadd.f32 0.5, %v4144_v51 }
0x50d2   :  { %v4146_v11 = vmul.f32 %v4145_v8, %v4058_v62 }
0x5140   :  { %v4149_v10 = vpop.permute.xlu0 %4148 }
0x5141   :  { %v4151_v34 = vmul.f32 %v4149_v10, %v4145_v8 }
0x5143   :  { %4153 = vrot.lane.b32.xlu1 %v4151_v34, %s8824_s10 }
0x51b5   :  { %v4154_v17 = vpop.permute.xlu1 %4153 }
0x51b6   :  { %v4156_v20 = vadd.f32 %v4154_v17, %v4146_v11 }
0x51b8   :  { %8573 = vtanh.f32 %v4156_v20 }
0x51c2   :  { %v8574_v21 = vpop.eup %8573 }
0x51c3   :  { %4159 = vrot.lane.b32.xlu0 %v8574_v21, %s8824_s10 }
0x5235   :  { %v4160_v27 = vpop.permute.xlu0 %4159 }
0x5236   :  { %v4162_v15 = vmul.f32 %v4160_v27, %v4145_v8 }
0x5238   :  { %4164 = vrot.lane.b32.xlu1 %v4162_v15, %s8830_s22 }
0x52aa   :  { %v4165_v22 = vpop.permute.xlu1 %4164 }
0x52ab   :  { %4167 = vst.msk [vmem:[#allocation2 + $0x8] sm:$0xff] %vm85_vm1, %v4165_v22  ;;  %8238 = vmatmul.mubr.msk.f32.vlgmr.msra.gmra.mrb[52].mxu1 %vm85_vm1, %v4165_v22 }
0x52ac   :  { %8241 = vmatpush3.msra.mxu1 %v9452_v45  ;;  %8242 = vmatprep.mubr.msk.f32.mxu1 %vm8828_vm0, %v8827_v0 }
0x52ad   :  { %8250 = vmatprep.subr.mxu1 %v8827_v0 }
0x537e   :  { %v4236_v24 = vpop.f32.mrb[52].mxu1 }
0x537f   :  { %v4240_v26 = vadd.f32 %v4236_v24, %v3946_v16  ;;  %v8239_v29 = vpop.f32.mrb[53].mxu1 }
0x5380   :  { %v3961_v29 = vadd.f32 %v9442_v58, %v9474_v48  ;;  %v4757_v58 = vld [vmem:[#allocation6 + $0x28] sm:$0xff] }
0x5381   :  { %8575 = vtanh.f32 %v4240_v26 }
0x538b   :  { %v8576_v30 = vpop.eup %8575 }
0x538c   :  { %4246 = vrot.lane.b32.xlu0 %v8576_v30, %s8829_s21  ;;  %v4242_v31 = vmul.f32 0.5, %v8576_v30 }
0x538e   :  { %v4243_v32 = vadd.f32 0.5, %v4242_v31 }
0x5390   :  { %v4244_v36 = vmul.f32 %v4243_v32, %v4156_v20 }
0x53fe   :  { %v4247_v33 = vpop.permute.xlu0 %4246 }
0x53ff   :  { %v4249_v12 = vmul.f32 %v4247_v33, %v4243_v32 }
0x5401   :  { %4251 = vrot.lane.b32.xlu1 %v4249_v12, %s8824_s10 }
0x5473   :  { %v4252_v37 = vpop.permute.xlu1 %4251 }
0x5474   :  { %v4254_v5 = vadd.f32 %v4252_v37, %v4244_v36 }
0x5476   :  { %8577 = vtanh.f32 %v4254_v5 }
0x5477   :  { %8579 = vtanh.f32 %v9476_v49 }
0x5480   :  { %v8578_v13 = vpop.eup %8577 }
0x5481   :  { %4257 = vrot.lane.b32.xlu0 %v8578_v13, %s8824_s10  ;;  %v8580_v38 = vpop.eup %8579 }
0x5482   :  { %v3801_v39 = vmul.f32 0.5, %v8580_v38 }
0x5484   :  { %v3802_v46 = vadd.f32 0.5, %v3801_v39 }
0x5485   :  { %3805 = vrot.lane.b32.xlu0 %v8580_v38, %s8829_s21 }
0x5486   :  { %v3803_v47 = vmul.f32 %v3802_v46, %v9448_v42 }
0x54f3   :  { %v4258_v40 = vpop.permute.xlu0 %4257 }
0x54f4   :  { %v4260_v28 = vmul.f32 %v4258_v40, %v4243_v32 }
0x54f6   :  { %4262 = vrot.lane.b32.xlu1 %v4260_v28, %s8830_s22 }
0x54f7   :  { %v3806_v14 = vpop.permute.xlu0 %3805 }
0x54f8   :  { %v3808_v53 = vmul.f32 %v3806_v14, %v3802_v46  ;;  %v4762_v14 = vld [vmem:[#allocation2] sm:$0xff] }
0x54fa   :  { %3810 = vrot.lane.b32.xlu0 %v3808_v53, %s8824_s10  ;;  %v4763_v53 = vld [vmem:[#allocation2 + $0x8] sm:$0xff] }
0x5568   :  { %v4263_v25 = vpop.permute.xlu1 %4262 }
0x5569   :  { %4265 = vst.msk [vmem:[#allocation2 + $0x10] sm:$0xff] %vm85_vm1, %v4263_v25  ;;  %8243 = vmatmul.mubr.msk.f32.vlgmr.msra.gmra.mrb[54].mxu1 %vm85_vm1, %v4263_v25 }
0x556a   :  { %8251 = vmatpush3.msra.mxu1 %v9452_v45  ;;  %8252 = vmatprep.mubr.msk.f32.mxu1 %vm8828_vm0, %v8827_v0 }
0x556b   :  { %8260 = vmatprep.subr.mxu1 %v8827_v0 }
0x556c   :  { %v3811_v9 = vpop.permute.xlu0 %3810 }
0x556d   :  { %v3813_v49 = vadd.f32 %v3811_v9, %v3803_v47 }
0x556f   :  { %8581 = vtanh.f32 %v3813_v49 }
0x5570   :  { %v4764_v25 = vld [vmem:[#allocation2 + $0x10] sm:$0xff] }
0x5579   :  { %v8582_v52 = vpop.eup %8581 }
0x557a   :  { %3816 = vrot.lane.b32.xlu0 %v8582_v52, %s8824_s10 }
0x55ec   :  { %v3817_v54 = vpop.permute.xlu0 %3816 }
0x55ed   :  { %v3819_v55 = vmul.f32 %v3817_v54, %v3802_v46 }
0x55ef   :  { %3821 = vrot.lane.b32.xlu0 %v3819_v55, %s8830_s22 }
0x563c   :  { %v4334_v56 = vpop.f32.mrb[54].mxu1 }
0x563d   :  { %v4338_v57 = vadd.f32 %v4334_v56, %v3951_v4  ;;  %v8244_v59 = vpop.f32.mrb[55].mxu1 }
0x563f   :  { %8583 = vtanh.f32 %v4338_v57 }
0x5649   :  { %v8584_v42 = vpop.eup %8583 }
0x564a   :  { %4344 = vrot.lane.b32.xlu1 %v8584_v42, %s8829_s21  ;;  %v4340_v18 = vmul.f32 0.5, %v8584_v42 }
0x564c   :  { %v4341_v60 = vadd.f32 0.5, %v4340_v18 }
0x564e   :  { %v4342_v62 = vmul.f32 %v4341_v60, %v4254_v5 }
0x5661   :  { %v3822_v23 = vpop.permute.xlu0 %3821 }
0x5662   :  { %3824 = vst.msk [vmem:[#allocation2 + $0x38] sm:$0xff] %vm85_vm1, %v3822_v23 }
0x5669   :  { %v3838_v41 = vld [vmem:[#allocation2 + $0x38] sm:$0xff] }
0x566a   :  { %8223 = vmatmul.mubr.msk.f32.gmra.mrb[54].mxu0 %vm85_vm1, %v3838_v41 }
0x566b   :  { %8247 = vmatprep.mubr.msk.f32.mxu0 %vm8828_vm0, %v8827_v0 }
0x56bc   :  { %v4345_v61 = vpop.permute.xlu1 %4344 }
0x56bd   :  { %v4347_v35 = vmul.f32 %v4345_v61, %v4341_v60 }
0x56bf   :  { %4349 = vrot.lane.b32.xlu1 %v4347_v35, %s8824_s10 }
0x5731   :  { %v4350_v63 = vpop.permute.xlu1 %4349 }
0x5732   :  { %v4352_v1 = vadd.f32 %v4350_v63, %v4342_v62 }
0x5734   :  { %8585 = vtanh.f32 %v4352_v1 }
0x573d   :  { %v9527_v2 = vpop.f32.mrb[54].mxu0 }
0x573e   :  { %v8586_v3 = vpop.eup %8585  ;;  %v9529_v50 = vpop.f32.mrb[55].mxu0 }
0x573f   :  { %4355 = vrot.lane.b32.xlu1 %v8586_v3, %s8824_s10  ;;  %v3966_v52 = vadd.f32 %v9474_v48, %v9529_v50 }
0x57b1   :  { %v4356_v6 = vpop.permute.xlu1 %4355 }
0x57b2   :  { %v4358_v7 = vmul.f32 %v4356_v6, %v4341_v60  ;;  %v9583_v6 = vld [vmem:[#allocation8 + $0x28] sm:$0xff] }
0x57b4   :  { %4360 = vrot.lane.b32.xlu1 %v4358_v7, %s8830_s22 }
0x5826   :  { %v4361_v43 = vpop.permute.xlu1 %4360 }
0x5827   :  { %4363 = vst.msk [vmem:[#allocation2 + $0x18] sm:$0xff] %vm85_vm1, %v4361_v43  ;;  %8248 = vmatmul.mubr.msk.f32.vlgmr.msra.gmra.mrb[56].mxu0 %vm85_vm1, %v4361_v43 }
0x5828   :  { %8256 = vmatpush3.msra.mxu0 %v9452_v45  ;;  %8257 = vmatprep.mubr.msk.f32.mxu0 %vm8828_vm0, %v8827_v0 }
0x5829   :  { %8265 = vmatprep.subr.mxu0 %v4757_v58 }
0x582e   :  { %v4765_v47 = vld [vmem:[#allocation2 + $0x18] sm:$0xff] }
0x58fa   :  { %v4432_v51 = vpop.f32.mrb[56].mxu0 }
0x58fb   :  { %v4436_v8 = vadd.f32 %v4432_v51, %v3956_v19  ;;  %v8249_v10 = vpop.f32.mrb[57].mxu0 }
0x58fc   :  { %v9605_v10 = vld [vmem:[%s9984_s3 + $0x5] ss:$0 sm:$0xff] }
0x58fd   :  { %8587 = vtanh.f32 %v4436_v8  ;;  %v3971_v8 = vadd.f32 %v9527_v2, %v9474_v48 }
0x5907   :  { %v8588_v34 = vpop.eup %8587 }
0x5908   :  { %4442 = vrot.lane.b32.xlu0 %v8588_v34, %s8829_s21  ;;  %v4438_v11 = vmul.f32 0.5, %v8588_v34 }
0x590a   :  { %v4439_v17 = vadd.f32 0.5, %v4438_v11 }
0x590c   :  { %v4440_v27 = vmul.f32 %v4439_v17, %v4352_v1 }
0x597a   :  { %v4443_v20 = vpop.permute.xlu0 %4442 }
0x597b   :  { %v4445_v21 = vmul.f32 %v4443_v20, %v4439_v17 }
0x597d   :  { %4447 = vrot.lane.b32.xlu1 %v4445_v21, %s8824_s10 }
0x59ef   :  { %v4448_v15 = vpop.permute.xlu1 %4447 }
0x59f0   :  { %v4450_v22 = vadd.f32 %v4448_v15, %v4440_v27 }
0x59f2   :  { %8589 = vtanh.f32 %v4450_v22 }
0x59fc   :  { %v8590_v16 = vpop.eup %8589 }
0x59fd   :  { %4453 = vrot.lane.b32.xlu0 %v8590_v16, %s8824_s10 }
0x5a6f   :  { %v4454_v44 = vpop.permute.xlu0 %4453 }
0x5a70   :  { %v4456_v24 = vmul.f32 %v4454_v44, %v4439_v17 }
0x5a72   :  { %4458 = vrot.lane.b32.xlu1 %v4456_v24, %s8830_s22 }
0x5ae4   :  { %v4459_v26 = vpop.permute.xlu1 %4458 }
0x5ae5   :  { %4461 = vst.msk [vmem:[#allocation2 + $0x20] sm:$0xff] %vm85_vm1, %v4459_v26  ;;  %8253 = vmatmul.mubr.msk.f32.vlgmr.msra.gmra.mrb[56].mxu1 %vm85_vm1, %v4459_v26 }
0x5ae6   :  { %8261 = vmatpush3.msra.mxu1 %v9452_v45  ;;  %8262 = vmatprep.mubr.msk.f32.mxu1 %vm8828_vm0, %v8827_v0 }
0x5ae7   :  { %8279 = vmatprep.subr.mxu1 %v8827_v0 }
0x5aec   :  { %v4766_v9 = vld [vmem:[#allocation2 + $0x20] sm:$0xff] }
0x5bb8   :  { %v4530_v30 = vpop.f32.mrb[56].mxu1 }
0x5bb9   :  { %v4534_v31 = vadd.f32 %v4530_v30, %v3961_v29  ;;  %v8254_v32 = vpop.f32.mrb[57].mxu1 }
0x5bbb   :  { %8591 = vtanh.f32 %v4534_v31 }
0x5bc5   :  { %v8592_v33 = vpop.eup %8591 }
0x5bc6   :  { %4540 = vrot.lane.b32.xlu0 %v8592_v33, %s8829_s21  ;;  %v4536_v12 = vmul.f32 0.5, %v8592_v33 }
0x5bc8   :  { %v4537_v36 = vadd.f32 0.5, %v4536_v12 }
0x5bca   :  { %v4538_v45 = vmul.f32 %v4537_v36, %v4450_v22 }
0x5c38   :  { %v4541_v37 = vpop.permute.xlu0 %4540 }
0x5c39   :  { %v4543_v5 = vmul.f32 %v4541_v37, %v4537_v36 }
0x5c3b   :  { %4545 = vrot.lane.b32.xlu1 %v4543_v5, %s8824_s10 }
0x5cad   :  { %v4546_v13 = vpop.permute.xlu1 %4545 }
0x5cae   :  { %v4548_v38 = vadd.f32 %v4546_v13, %v4538_v45 }
0x5cb0   :  { %8593 = vtanh.f32 %v4548_v38 }
0x5cba   :  { %v8594_v39 = vpop.eup %8593 }
0x5cbb   :  { %4551 = vrot.lane.b32.xlu0 %v8594_v39, %s8824_s10 }
0x5d2d   :  { %v4552_v40 = vpop.permute.xlu0 %4551 }
0x5d2e   :  { %v4554_v28 = vmul.f32 %v4552_v40, %v4537_v36 }
0x5d30   :  { %4556 = vrot.lane.b32.xlu1 %v4554_v28, %s8830_s22 }
0x5da2   :  { %v4557_v46 = vpop.permute.xlu1 %4556 }
0x5da3   :  { %4559 = vst.msk [vmem:[#allocation2 + $0x28] sm:$0xff] %vm85_vm1, %v4557_v46  ;;  %8258 = vmatmul.mubr.msk.f32.vlgmr.msra.gmra.mrb[58].mxu0 %vm85_vm1, %v4557_v46 }
0x5da4   :  { %8267 = vmatprep.mubr.msk.f32.mxu0 %vm85_vm1, %v4762_v14  ;;  %8266 = vmatpush3.msra.mxu0 %v4757_v58 }
0x5da5   :  { %8299 = vmatprep.subr.mxu0 %v8827_v0 }
0x5da7   :  { %8268 = vmatmul.mubr.msk.f32.vlgmr.msra.gmra.mrb[60].mxu0 %vm85_vm1, %v4763_v53 }
0x5da8   :  { %8270 = vmatprep.mubr.msk.f32.mxu0 %vm85_vm1, %v4764_v25  ;;  %8300 = vmatpush3.msra.mxu0 %v9583_v6 }
0x5da9   :  { %8309 = vmatprep.subr.mxu0 %v8827_v0 }
0x5daa   :  { %v4767_v49 = vld [vmem:[#allocation2 + $0x28] sm:$0xff] }
0x5dab   :  { %8271 = vmatmul.mubr.msk.f32.gmra.mrb[62].mxu0 %vm85_vm1, %v4765_v47 }
0x5dac   :  { %8273 = vmatprep.mubr.msk.f32.mxu0 %vm85_vm1, %v4766_v9 }
0x5daf   :  { %8274 = vmatmul.mubr.msk.f32.gmra.mrb[64].mxu0 %vm85_vm1, %v4767_v49 }
0x5e76   :  { %v4628_v54 = vpop.f32.mrb[58].mxu0 }
0x5e77   :  { %v4632_v55 = vadd.f32 %v4628_v54, %v3966_v52  ;;  %v8259_v4 = vpop.f32.mrb[59].mxu0 }
0x5e79   :  { %8595 = vtanh.f32 %v4632_v55 }
0x5e7a   :  { %v9567_v56 = vpop.f32.mrb[60].mxu0 }
0x5e7b   :  { %v4866_v57 = vpop.f32.mrb[61].mxu0  ;;  %v4872_v12 = vadd.f32 %v9567_v56, %v9605_v10 }
0x5e7c   :  { %v4867_v20 = vadd.f32 %v9605_v10, %v4866_v57 }
0x5e7e   :  { %v9569_v59 = vpop.f32.mrb[62].mxu0 }
0x5e7f   :  { %v9571_v42 = vpop.f32.mrb[63].mxu0 }
0x5e80   :  { %v4877_v9 = vadd.f32 %v9605_v10, %v9571_v42 }
0x5e82   :  { %v9573_v23 = vpop.f32.mrb[64].mxu0 }
0x5e83   :  { %v8596_v41 = vpop.eup %8595  ;;  %v9575_v18 = vpop.f32.mrb[65].mxu0 }
0x5e84   :  { %4638 = vrot.lane.b32.xlu0 %v8596_v41, %s8829_s21  ;;  %v4634_v60 = vmul.f32 0.5, %v8596_v41 }
0x5e86   :  { %v4635_v61 = vadd.f32 0.5, %v4634_v60 }
0x5e88   :  { %v4636_v63 = vmul.f32 %v4635_v61, %v4548_v38 }
0x5ef6   :  { %v4639_v35 = vpop.permute.xlu0 %4638 }
0x5ef7   :  { %v4641_v62 = vmul.f32 %v4639_v35, %v4635_v61 }
0x5ef9   :  { %4643 = vrot.lane.b32.xlu1 %v4641_v62, %s8824_s10 }
0x5f6b   :  { %v4644_v1 = vpop.permute.xlu1 %4643 }
0x5f6c   :  { %v9579_v3 = vadd.f32 %v4644_v1, %v4636_v63 }
0x5f6e   :  { %8597 = vtanh.f32 %v9579_v3 }
0x5f78   :  { %v8598_v50 = vpop.eup %8597 }
0x5f79   :  { %4649 = vrot.lane.b32.xlu0 %v8598_v50, %s8824_s10 }
0x5feb   :  { %v4650_v7 = vpop.permute.xlu0 %4649 }
0x5fec   :  { %v4652_v43 = vmul.f32 %v4650_v7, %v4635_v61 }
0x5fee   :  { %4654 = vrot.lane.b32.xlu1 %v4652_v43, %s8830_s22 }
0x6060   :  { %v4655_v19 = vpop.permute.xlu1 %4654 }
0x6061   :  { %4657 = vst.msk [vmem:[#allocation2 + $0x30] sm:$0xff] %vm85_vm1, %v4655_v19  ;;  %8263 = vmatmul.mubr.msk.f32.vlgmr.msra.gmra.mrb[58].mxu1 %vm85_vm1, %v4655_v19 }
0x6062   :  { %8280 = vmatpush3.msra.mxu1 %v9583_v6  ;;  %8281 = vmatprep.mubr.msk.f32.mxu1 %vm8828_vm0, %v8827_v0 }
0x6063   :  { %8284 = vmatprep.subr.mxu1 %v8827_v0 }
0x6065   :  { %8282 = vmatmul.mubr.f32.vlgmr.msra.gmra.mrb[60].mxu1 %v8827_v0 }
0x6066   :  { %8285 = vmatpush3.msra.mxu1 %v9583_v6  ;;  %8286 = vmatprep.mubr.msk.f32.mxu1 %vm8828_vm0, %v8827_v0 }
0x6067   :  { %8289 = vmatprep.subr.mxu1 %v8827_v0 }
0x6068   :  { %v4768_v51 = vld [vmem:[#allocation2 + $0x30] sm:$0xff] }
0x6069   :  { %8276 = vmatprep.mubr.msk.f32.mxu0 %vm85_vm1, %v4768_v51 }
0x6134   :  { %v4726_v34 = vpop.f32.mrb[58].mxu1 }
0x6135   :  { %v9607_v11 = vadd.f32 %v4726_v34, %v3971_v8  ;;  %v8264_v17 = vpop.f32.mrb[59].mxu1 }
0x6138   :  { %v4971_v21 = vpop.f32.mrb[60].mxu1 }
0x6139   :  { %v4975_v27 = vadd.f32 %v4971_v21, %v4867_v20  ;;  %v8283_v15 = vpop.f32.mrb[61].mxu1 }
0x613b   :  { %8599 = vtanh.f32 %v4975_v27  ;;  %v4882_v27 = vadd.f32 %v9569_v59, %v9605_v10 }
0x6145   :  { %v8600_v22 = vpop.eup %8599 }
0x6146   :  { %4981 = vrot.lane.b32.xlu0 %v8600_v22, %s8829_s21  ;;  %v4977_v16 = vmul.f32 0.5, %v8600_v22 }
0x6148   :  { %v4978_v48 = vadd.f32 0.5, %v4977_v16 }
0x614a   :  { %v4979_v24 = vmul.f32 0.0, %v4978_v48 }
0x61b8   :  { %v4982_v2 = vpop.permute.xlu0 %4981 }
0x61b9   :  { %v4984_v44 = vmul.f32 %v4982_v2, %v4978_v48 }
0x61bb   :  { %4986 = vrot.lane.b32.xlu1 %v4984_v44, %s8824_s10 }
0x622d   :  { %v4987_v26 = vpop.permute.xlu1 %4986 }
0x622e   :  { %v4989_v29 = vadd.f32 %v4987_v26, %v4979_v24 }
0x6230   :  { %8601 = vtanh.f32 %v4989_v29 }
0x623a   :  { %v8602_v30 = vpop.eup %8601 }
0x623b   :  { %4992 = vrot.lane.b32.xlu0 %v8602_v30, %s8824_s10 }
0x62ad   :  { %v4993_v31 = vpop.permute.xlu0 %4992 }
0x62ae   :  { %v4995_v32 = vmul.f32 %v4993_v31, %v4978_v48 }
0x62b0   :  { %4997 = vrot.lane.b32.xlu1 %v4995_v32, %s8830_s22 }
0x6322   :  { %v4998_v33 = vpop.permute.xlu1 %4997 }
0x6323   :  { %5000 = vst.msk [vmem:[#allocation2] sm:$0xff] %vm85_vm1, %v4998_v33  ;;  %8287 = vmatmul.mubr.msk.f32.vlgmr.msra.gmra.mrb[62].mxu1 %vm85_vm1, %v4998_v33 }
0x6324   :  { %8290 = vmatpush3.msra.mxu1 %v9583_v6  ;;  %8291 = vmatprep.mubr.msk.f32.mxu1 %vm8828_vm0, %v8827_v0 }
0x6325   :  { %8294 = vmatprep.subr.mxu1 %v8827_v0 }
0x63f6   :  { %v5069_v36 = vpop.f32.mrb[62].mxu1 }
0x63f7   :  { %v5073_v37 = vadd.f32 %v5069_v36, %v4872_v12  ;;  %v8288_v5 = vpop.f32.mrb[63].mxu1 }
0x63f9   :  { %8603 = vtanh.f32 %v5073_v37 }
0x6403   :  { %v8604_v45 = vpop.eup %8603 }
0x6404   :  { %5079 = vrot.lane.b32.xlu0 %v8604_v45, %s8829_s21  ;;  %v5075_v13 = vmul.f32 0.5, %v8604_v45  ;;  %v4887_v45 = vadd.f32 %v9605_v10, %v9575_v18 }
0x6406   :  { %v5076_v38 = vadd.f32 0.5, %v5075_v13 }
0x6408   :  { %v5077_v40 = vmul.f32 %v5076_v38, %v4989_v29 }
0x6476   :  { %v5080_v39 = vpop.permute.xlu0 %5079 }
0x6477   :  { %v5082_v58 = vmul.f32 %v5080_v39, %v5076_v38 }
0x6479   :  { %5084 = vrot.lane.b32.xlu1 %v5082_v58, %s8824_s10 }
0x64eb   :  { %v5085_v28 = vpop.permute.xlu1 %5084 }
0x64ec   :  { %v5087_v46 = vadd.f32 %v5085_v28, %v5077_v40 }
0x64ee   :  { %8605 = vtanh.f32 %v5087_v46 }
0x64f8   :  { %v8606_v14 = vpop.eup %8605 }
0x64f9   :  { %5090 = vrot.lane.b32.xlu0 %v8606_v14, %s8824_s10 }
0x656b   :  { %v5091_v53 = vpop.permute.xlu0 %5090 }
0x656c   :  { %v5093_v25 = vmul.f32 %v5091_v53, %v5076_v38 }
0x656e   :  { %5095 = vrot.lane.b32.xlu1 %v5093_v25, %s8830_s22 }
0x65e0   :  { %v5096_v47 = vpop.permute.xlu1 %5095 }
0x65e1   :  { %5098 = vst.msk [vmem:[#allocation2 + $0x8] sm:$0xff] %vm85_vm1, %v5096_v47  ;;  %8292 = vmatmul.mubr.msk.f32.vlgmr.msra.gmra.mrb[64].mxu1 %vm85_vm1, %v5096_v47 }
0x65e2   :  { %8295 = vmatpush3.msra.mxu1 %v9583_v6  ;;  %8296 = vmatprep.mubr.msk.f32.mxu1 %vm8828_vm0, %v8827_v0 }
0x65e3   :  { %8304 = vmatprep.subr.mxu1 %v8827_v0 }
0x66b4   :  { %v5167_v49 = vpop.f32.mrb[64].mxu1 }
0x66b5   :  { %v5171_v52 = vadd.f32 %v5167_v49, %v4877_v9  ;;  %v8293_v54 = vpop.f32.mrb[65].mxu1 }
0x66b6   :  { %v4892_v54 = vadd.f32 %v9573_v23, %v9605_v10  ;;  %v5688_v23 = vld [vmem:[#allocation6 + $0x30] sm:$0xff] }
0x66b7   :  { %8607 = vtanh.f32 %v5171_v52 }
0x66c1   :  { %v8608_v55 = vpop.eup %8607 }
0x66c2   :  { %5177 = vrot.lane.b32.xlu0 %v8608_v55, %s8829_s21  ;;  %v5173_v4 = vmul.f32 0.5, %v8608_v55 }
0x66c4   :  { %v5174_v56 = vadd.f32 0.5, %v5173_v4 }
0x66c6   :  { %v5175_v60 = vmul.f32 %v5174_v56, %v5087_v46 }
0x6734   :  { %v5178_v57 = vpop.permute.xlu0 %5177 }
0x6735   :  { %v5180_v41 = vmul.f32 %v5178_v57, %v5174_v56 }
0x6737   :  { %5182 = vrot.lane.b32.xlu1 %v5180_v41, %s8824_s10 }
0x67a9   :  { %v5183_v61 = vpop.permute.xlu1 %5182 }
0x67aa   :  { %v5185_v35 = vadd.f32 %v5183_v61, %v5175_v60 }
0x67ac   :  { %8609 = vtanh.f32 %v5185_v35 }
0x67ad   :  { %8611 = vtanh.f32 %v9607_v11 }
0x67b6   :  { %v8610_v42 = vpop.eup %8609 }
0x67b7   :  { %5188 = vrot.lane.b32.xlu0 %v8610_v42, %s8824_s10  ;;  %v8612_v62 = vpop.eup %8611 }
0x67b8   :  { %v4732_v63 = vmul.f32 0.5, %v8612_v62 }
0x67ba   :  { %v4733_v7 = vadd.f32 0.5, %v4732_v63 }
0x67bb   :  { %4736 = vrot.lane.b32.xlu0 %v8612_v62, %s8829_s21 }
0x67bc   :  { %v4734_v8 = vmul.f32 %v4733_v7, %v9579_v3 }
0x6829   :  { %v5189_v1 = vpop.permute.xlu0 %5188 }
0x682a   :  { %v5191_v50 = vmul.f32 %v5189_v1, %v5174_v56 }
0x682c   :  { %5193 = vrot.lane.b32.xlu1 %v5191_v50, %s8830_s22 }
0x682d   :  { %v4737_v43 = vpop.permute.xlu0 %4736 }
0x682e   :  { %v4739_v19 = vmul.f32 %v4737_v43, %v4733_v7  ;;  %v5693_v43 = vld [vmem:[#allocation2] sm:$0xff] }
0x6830   :  { %4741 = vrot.lane.b32.xlu0 %v4739_v19, %s8824_s10  ;;  %v5694_v19 = vld [vmem:[#allocation2 + $0x8] sm:$0xff] }
0x689e   :  { %v5194_v51 = vpop.permute.xlu1 %5193 }
0x689f   :  { %5196 = vst.msk [vmem:[#allocation2 + $0x10] sm:$0xff] %vm85_vm1, %v5194_v51  ;;  %8297 = vmatmul.mubr.msk.f32.vlgmr.msra.gmra.mrb[66].mxu1 %vm85_vm1, %v5194_v51 }
0x68a0   :  { %8305 = vmatpush3.msra.mxu1 %v9583_v6  ;;  %8306 = vmatprep.mubr.msk.f32.mxu1 %vm8828_vm0, %v8827_v0 }
0x68a1   :  { %8314 = vmatprep.subr.mxu1 %v8827_v0 }
0x68a2   :  { %v4742_v34 = vpop.permute.xlu0 %4741 }
0x68a3   :  { %v4744_v11 = vadd.f32 %v4742_v34, %v4734_v8 }
0x68a5   :  { %8613 = vtanh.f32 %v4744_v11 }
0x68a6   :  { %v5695_v51 = vld [vmem:[#allocation2 + $0x10] sm:$0xff] }
0x68af   :  { %v8614_v17 = vpop.eup %8613 }
0x68b0   :  { %4747 = vrot.lane.b32.xlu0 %v8614_v17, %s8824_s10 }
0x6922   :  { %v4748_v20 = vpop.permute.xlu0 %4747 }
0x6923   :  { %v4750_v21 = vmul.f32 %v4748_v20, %v4733_v7 }
0x6925   :  { %4752 = vrot.lane.b32.xlu0 %v4750_v21, %s8830_s22 }
0x6972   :  { %v5265_v15 = vpop.f32.mrb[66].mxu1 }
0x6973   :  { %v5269_v22 = vadd.f32 %v5265_v15, %v4882_v27  ;;  %v8298_v16 = vpop.f32.mrb[67].mxu1 }
0x6975   :  { %8615 = vtanh.f32 %v5269_v22 }
0x697f   :  { %v8616_v3 = vpop.eup %8615 }
0x6980   :  { %5275 = vrot.lane.b32.xlu1 %v8616_v3, %s8829_s21  ;;  %v5271_v44 = vmul.f32 0.5, %v8616_v3 }
0x6982   :  { %v5272_v24 = vadd.f32 0.5, %v5271_v44 }
0x6984   :  { %v5273_v29 = vmul.f32 %v5272_v24, %v5185_v35 }
0x6997   :  { %v4753_v48 = vpop.permute.xlu0 %4752 }
0x6998   :  { %4755 = vst.msk [vmem:[#allocation2 + $0x38] sm:$0xff] %vm85_vm1, %v4753_v48 }
0x699f   :  { %v4769_v2 = vld [vmem:[#allocation2 + $0x38] sm:$0xff] }
0x69a0   :  { %8277 = vmatmul.mubr.msk.f32.gmra.mrb[66].mxu0 %vm85_vm1, %v4769_v2 }
0x69a1   :  { %8301 = vmatprep.mubr.msk.f32.mxu0 %vm8828_vm0, %v8827_v0 }
0x69f2   :  { %v5276_v26 = vpop.permute.xlu1 %5275 }
0x69f3   :  { %v5278_v59 = vmul.f32 %v5276_v26, %v5272_v24 }
0x69f5   :  { %5280 = vrot.lane.b32.xlu1 %v5278_v59, %s8824_s10 }
0x6a67   :  { %v5281_v30 = vpop.permute.xlu1 %5280 }
0x6a68   :  { %v5283_v31 = vadd.f32 %v5281_v30, %v5273_v29 }
0x6a6a   :  { %8617 = vtanh.f32 %v5283_v31 }
0x6a73   :  { %v9658_v32 = vpop.f32.mrb[66].mxu0 }
0x6a74   :  { %v8618_v33 = vpop.eup %8617  ;;  %v9660_v12 = vpop.f32.mrb[67].mxu0 }
0x6a75   :  { %5286 = vrot.lane.b32.xlu1 %v8618_v33, %s8824_s10  ;;  %v4897_v17 = vadd.f32 %v9605_v10, %v9660_v12 }
0x6ae7   :  { %v5287_v36 = vpop.permute.xlu1 %5286 }
0x6ae8   :  { %v5289_v37 = vmul.f32 %v5287_v36, %v5272_v24  ;;  %v9714_v36 = vld [vmem:[#allocation8 + $0x30] sm:$0xff] }
0x6aea   :  { %5291 = vrot.lane.b32.xlu1 %v5289_v37, %s8830_s22 }
0x6b5c   :  { %v5292_v5 = vpop.permute.xlu1 %5291 }
0x6b5d   :  { %5294 = vst.msk [vmem:[#allocation2 + $0x18] sm:$0xff] %vm85_vm1, %v5292_v5  ;;  %8302 = vmatmul.mubr.msk.f32.vlgmr.msra.gmra.mrb[68].mxu0 %vm85_vm1, %v5292_v5 }
0x6b5e   :  { %8310 = vmatpush3.msra.mxu0 %v9583_v6  ;;  %8311 = vmatprep.mubr.msk.f32.mxu0 %vm8828_vm0, %v8827_v0 }
0x6b5f   :  { %8319 = vmatprep.subr.mxu0 %v5688_v23 }
0x6b64   :  { %v5696_v8 = vld [vmem:[#allocation2 + $0x18] sm:$0xff] }
0x6c30   :  { %v5363_v13 = vpop.f32.mrb[68].mxu0 }
0x6c31   :  { %v5367_v38 = vadd.f32 %v5363_v13, %v4887_v45  ;;  %v8303_v39 = vpop.f32.mrb[69].mxu0 }
0x6c32   :  { %v9736_v39 = vld [vmem:[%s9984_s3 + $0x6] ss:$0 sm:$0xff] }
0x6c33   :  { %8619 = vtanh.f32 %v5367_v38  ;;  %v4902_v38 = vadd.f32 %v9658_v32, %v9605_v10 }
0x6c3d   :  { %v8620_v58 = vpop.eup %8619 }
0x6c3e   :  { %5373 = vrot.lane.b32.xlu0 %v8620_v58, %s8829_s21  ;;  %v5369_v40 = vmul.f32 0.5, %v8620_v58 }
0x6c40   :  { %v5370_v28 = vadd.f32 0.5, %v5369_v40 }
0x6c42   :  { %v5371_v53 = vmul.f32 %v5370_v28, %v5283_v31 }
0x6cb0   :  { %v5374_v46 = vpop.permute.xlu0 %5373 }
0x6cb1   :  { %v5376_v14 = vmul.f32 %v5374_v46, %v5370_v28 }
0x6cb3   :  { %5378 = vrot.lane.b32.xlu1 %v5376_v14, %s8824_s10 }
0x6d25   :  { %v5379_v25 = vpop.permute.xlu1 %5378 }
0x6d26   :  { %v5381_v47 = vadd.f32 %v5379_v25, %v5371_v53 }
0x6d28   :  { %8621 = vtanh.f32 %v5381_v47 }
0x6d32   :  { %v8622_v9 = vpop.eup %8621 }
0x6d33   :  { %5384 = vrot.lane.b32.xlu0 %v8622_v9, %s8824_s10 }
0x6da5   :  { %v5385_v18 = vpop.permute.xlu0 %5384 }
0x6da6   :  { %v5387_v49 = vmul.f32 %v5385_v18, %v5370_v28 }
0x6da8   :  { %5389 = vrot.lane.b32.xlu1 %v5387_v49, %s8830_s22 }
0x6e1a   :  { %v5390_v52 = vpop.permute.xlu1 %5389 }
0x6e1b   :  { %5392 = vst.msk [vmem:[#allocation2 + $0x20] sm:$0xff] %vm85_vm1, %v5390_v52  ;;  %8307 = vmatmul.mubr.msk.f32.vlgmr.msra.gmra.mrb[68].mxu1 %vm85_vm1, %v5390_v52 }
0x6e1c   :  { %8315 = vmatpush3.msra.mxu1 %v9583_v6  ;;  %8316 = vmatprep.mubr.msk.f32.mxu1 %vm8828_vm0, %v8827_v0 }
0x6e1d   :  { %8333 = vmatprep.subr.mxu1 %v8827_v0 }
0x6e22   :  { %v5697_v34 = vld [vmem:[#allocation2 + $0x20] sm:$0xff] }
0x6eee   :  { %v5461_v55 = vpop.f32.mrb[68].mxu1 }
0x6eef   :  { %v5465_v4 = vadd.f32 %v5461_v55, %v4892_v54  ;;  %v8308_v56 = vpop.f32.mrb[69].mxu1 }
0x6ef1   :  { %8623 = vtanh.f32 %v5465_v4 }
0x6efb   :  { %v8624_v57 = vpop.eup %8623 }
0x6efc   :  { %5471 = vrot.lane.b32.xlu0 %v8624_v57, %s8829_s21  ;;  %v5467_v41 = vmul.f32 0.5, %v8624_v57 }
0x6efe   :  { %v5468_v60 = vadd.f32 0.5, %v5467_v41 }
0x6f00   :  { %v5469_v6 = vmul.f32 %v5468_v60, %v5381_v47 }
0x6f6e   :  { %v5472_v61 = vpop.permute.xlu0 %5471 }
0x6f6f   :  { %v5474_v35 = vmul.f32 %v5472_v61, %v5468_v60 }
0x6f71   :  { %5476 = vrot.lane.b32.xlu1 %v5474_v35, %s8824_s10 }
0x6fe3   :  { %v5477_v42 = vpop.permute.xlu1 %5476 }
0x6fe4   :  { %v5479_v62 = vadd.f32 %v5477_v42, %v5469_v6 }
0x6fe6   :  { %8625 = vtanh.f32 %v5479_v62 }
0x6ff0   :  { %v8626_v63 = vpop.eup %8625 }
0x6ff1   :  { %5482 = vrot.lane.b32.xlu0 %v8626_v63, %s8824_s10 }
0x7063   :  { %v5483_v1 = vpop.permute.xlu0 %5482 }
0x7064   :  { %v5485_v50 = vmul.f32 %v5483_v1, %v5468_v60 }
0x7066   :  { %5487 = vrot.lane.b32.xlu1 %v5485_v50, %s8830_s22 }
0x70d8   :  { %v5488_v7 = vpop.permute.xlu1 %5487 }
0x70d9   :  { %5490 = vst.msk [vmem:[#allocation2 + $0x28] sm:$0xff] %vm85_vm1, %v5488_v7  ;;  %8312 = vmatmul.mubr.msk.f32.vlgmr.msra.gmra.mrb[70].mxu0 %vm85_vm1, %v5488_v7 }
0x70da   :  { %8321 = vmatprep.mubr.msk.f32.mxu0 %vm85_vm1, %v5693_v43  ;;  %8320 = vmatpush3.msra.mxu0 %v5688_v23 }
0x70db   :  { %8353 = vmatprep.subr.mxu0 %v8827_v0 }
0x70dd   :  { %8322 = vmatmul.mubr.msk.f32.vlgmr.msra.gmra.mrb[72].mxu0 %vm85_vm1, %v5694_v19 }
0x70de   :  { %8324 = vmatprep.mubr.msk.f32.mxu0 %vm85_vm1, %v5695_v51  ;;  %8354 = vmatpush3.msra.mxu0 %v9714_v36 }
0x70df   :  { %8363 = vmatprep.subr.mxu0 %v8827_v0 }
0x70e0   :  { %v5698_v11 = vld [vmem:[#allocation2 + $0x28] sm:$0xff] }
0x70e1   :  { %8325 = vmatmul.mubr.msk.f32.gmra.mrb[74].mxu0 %vm85_vm1, %v5696_v8 }
0x70e2   :  { %8327 = vmatprep.mubr.msk.f32.mxu0 %vm85_vm1, %v5697_v34 }
0x70e5   :  { %8328 = vmatmul.mubr.msk.f32.gmra.mrb[76].mxu0 %vm85_vm1, %v5698_v11 }
0x71ac   :  { %v5559_v20 = vpop.f32.mrb[70].mxu0 }
0x71ad   :  { %v5563_v21 = vadd.f32 %v5559_v20, %v4897_v17  ;;  %v8313_v27 = vpop.f32.mrb[71].mxu0 }
0x71af   :  { %8627 = vtanh.f32 %v5563_v21 }
0x71b0   :  { %v9698_v15 = vpop.f32.mrb[72].mxu0 }
0x71b1   :  { %v5797_v22 = vpop.f32.mrb[73].mxu0  ;;  %v5803_v41 = vadd.f32 %v9698_v15, %v9736_v39 }
0x71b2   :  { %v5798_v46 = vadd.f32 %v9736_v39, %v5797_v22 }
0x71b4   :  { %v9700_v16 = vpop.f32.mrb[74].mxu0 }
0x71b5   :  { %v9702_v3 = vpop.f32.mrb[75].mxu0 }
0x71b6   :  { %v5808_v34 = vadd.f32 %v9736_v39, %v9702_v3 }
0x71b8   :  { %v9704_v48 = vpop.f32.mrb[76].mxu0 }
0x71b9   :  { %v8628_v2 = vpop.eup %8627  ;;  %v9706_v44 = vpop.f32.mrb[77].mxu0 }
0x71ba   :  { %5569 = vrot.lane.b32.xlu0 %v8628_v2, %s8829_s21  ;;  %v5565_v24 = vmul.f32 0.5, %v8628_v2 }
0x71bc   :  { %v5566_v26 = vadd.f32 0.5, %v5565_v24 }
0x71be   :  { %v5567_v30 = vmul.f32 %v5566_v26, %v5479_v62 }
0x722c   :  { %v5570_v59 = vpop.permute.xlu0 %5569 }
0x722d   :  { %v5572_v29 = vmul.f32 %v5570_v59, %v5566_v26 }
0x722f   :  { %5574 = vrot.lane.b32.xlu1 %v5572_v29, %s8824_s10 }
0x72a1   :  { %v5575_v31 = vpop.permute.xlu1 %5574 }
0x72a2   :  { %v9710_v33 = vadd.f32 %v5575_v31, %v5567_v30 }
0x72a4   :  { %8629 = vtanh.f32 %v9710_v33 }
0x72ae   :  { %v8630_v12 = vpop.eup %8629 }
0x72af   :  { %5580 = vrot.lane.b32.xlu0 %v8630_v12, %s8824_s10 }
0x7321   :  { %v5581_v37 = vpop.permute.xlu0 %5580 }
0x7322   :  { %v5583_v5 = vmul.f32 %v5581_v37, %v5566_v26 }
0x7324   :  { %5585 = vrot.lane.b32.xlu1 %v5583_v5, %s8830_s22 }
0x7396   :  { %v5586_v45 = vpop.permute.xlu1 %5585 }
0x7397   :  { %5588 = vst.msk [vmem:[#allocation2 + $0x30] sm:$0xff] %vm85_vm1, %v5586_v45  ;;  %8317 = vmatmul.mubr.msk.f32.vlgmr.msra.gmra.mrb[70].mxu1 %vm85_vm1, %v5586_v45 }
0x7398   :  { %8334 = vmatpush3.msra.mxu1 %v9714_v36  ;;  %8335 = vmatprep.mubr.msk.f32.mxu1 %vm8828_vm0, %v8827_v0 }
0x7399   :  { %8338 = vmatprep.subr.mxu1 %v8827_v0 }
0x739b   :  { %8336 = vmatmul.mubr.f32.vlgmr.msra.gmra.mrb[72].mxu1 %v8827_v0 }
0x739c   :  { %8339 = vmatpush3.msra.mxu1 %v9714_v36  ;;  %8340 = vmatprep.mubr.msk.f32.mxu1 %vm8828_vm0, %v8827_v0 }
0x739d   :  { %8343 = vmatprep.subr.mxu1 %v8827_v0 }
0x739e   :  { %v5699_v13 = vld [vmem:[#allocation2 + $0x30] sm:$0xff] }
0x739f   :  { %8330 = vmatprep.mubr.msk.f32.mxu0 %vm85_vm1, %v5699_v13 }
0x746a   :  { %v5657_v58 = vpop.f32.mrb[70].mxu1 }
0x746b   :  { %v9738_v40 = vadd.f32 %v5657_v58, %v4902_v38  ;;  %v8318_v28 = vpop.f32.mrb[71].mxu1 }
0x746e   :  { %v5902_v14 = vpop.f32.mrb[72].mxu1 }
0x746f   :  { %v5906_v53 = vadd.f32 %v5902_v14, %v5798_v46  ;;  %v8337_v25 = vpop.f32.mrb[73].mxu1 }
0x7471   :  { %8631 = vtanh.f32 %v5906_v53  ;;  %v5813_v53 = vadd.f32 %v9700_v16, %v9736_v39 }
0x747b   :  { %v8632_v47 = vpop.eup %8631 }
0x747c   :  { %5912 = vrot.lane.b32.xlu0 %v8632_v47, %s8829_s21  ;;  %v5908_v9 = vmul.f32 0.5, %v8632_v47 }
0x747e   :  { %v5909_v10 = vadd.f32 0.5, %v5908_v9 }
0x7480   :  { %v5910_v49 = vmul.f32 0.0, %v5909_v10 }
0x74ee   :  { %v5913_v32 = vpop.permute.xlu0 %5912 }
0x74ef   :  { %v5915_v18 = vmul.f32 %v5913_v32, %v5909_v10 }
0x74f1   :  { %5917 = vrot.lane.b32.xlu1 %v5915_v18, %s8824_s10 }
0x7563   :  { %v5918_v52 = vpop.permute.xlu1 %5917 }
0x7564   :  { %v5920_v54 = vadd.f32 %v5918_v52, %v5910_v49 }
0x7566   :  { %8633 = vtanh.f32 %v5920_v54 }
0x7570   :  { %v8634_v55 = vpop.eup %8633 }
0x7571   :  { %5923 = vrot.lane.b32.xlu0 %v8634_v55, %s8824_s10 }
0x75e3   :  { %v5924_v4 = vpop.permute.xlu0 %5923 }
0x75e4   :  { %v5926_v56 = vmul.f32 %v5924_v4, %v5909_v10 }
0x75e6   :  { %5928 = vrot.lane.b32.xlu1 %v5926_v56, %s8830_s22 }
0x7658   :  { %v5929_v57 = vpop.permute.xlu1 %5928 }
0x7659   :  { %5931 = vst.msk [vmem:[#allocation2] sm:$0xff] %vm85_vm1, %v5929_v57  ;;  %8341 = vmatmul.mubr.msk.f32.vlgmr.msra.gmra.mrb[74].mxu1 %vm85_vm1, %v5929_v57 }
0x765a   :  { %8344 = vmatpush3.msra.mxu1 %v9714_v36  ;;  %8345 = vmatprep.mubr.msk.f32.mxu1 %vm8828_vm0, %v8827_v0 }
0x765b   :  { %8348 = vmatprep.subr.mxu1 %v8827_v0 }
0x772c   :  { %v6000_v60 = vpop.f32.mrb[74].mxu1 }
0x772d   :  { %v6004_v61 = vadd.f32 %v6000_v60, %v5803_v41  ;;  %v8342_v35 = vpop.f32.mrb[75].mxu1 }
0x772f   :  { %8635 = vtanh.f32 %v6004_v61 }
0x7739   :  { %v8636_v6 = vpop.eup %8635 }
0x773a   :  { %6010 = vrot.lane.b32.xlu0 %v8636_v6, %s8829_s21  ;;  %v6006_v42 = vmul.f32 0.5, %v8636_v6  ;;  %v5818_v6 = vadd.f32 %v9736_v39, %v9706_v44 }
0x773c   :  { %v6007_v62 = vadd.f32 0.5, %v6006_v42 }
0x773e   :  { %v6008_v1 = vmul.f32 %v6007_v62, %v5920_v54 }
0x77ac   :  { %v6011_v63 = vpop.permute.xlu0 %6010 }
0x77ad   :  { %v6013_v23 = vmul.f32 %v6011_v63, %v6007_v62 }
0x77af   :  { %6015 = vrot.lane.b32.xlu1 %v6013_v23, %s8824_s10 }
0x7821   :  { %v6016_v50 = vpop.permute.xlu1 %6015 }
0x7822   :  { %v6018_v7 = vadd.f32 %v6016_v50, %v6008_v1 }
0x7824   :  { %8637 = vtanh.f32 %v6018_v7 }
0x782e   :  { %v8638_v43 = vpop.eup %8637 }
0x782f   :  { %6021 = vrot.lane.b32.xlu0 %v8638_v43, %s8824_s10 }
0x78a1   :  { %v6022_v19 = vpop.permute.xlu0 %6021 }
0x78a2   :  { %v6024_v51 = vmul.f32 %v6022_v19, %v6007_v62 }
0x78a4   :  { %6026 = vrot.lane.b32.xlu1 %v6024_v51, %s8830_s22 }
0x7916   :  { %v6027_v8 = vpop.permute.xlu1 %6026 }
0x7917   :  { %6029 = vst.msk [vmem:[#allocation2 + $0x8] sm:$0xff] %vm85_vm1, %v6027_v8  ;;  %8346 = vmatmul.mubr.msk.f32.vlgmr.msra.gmra.mrb[76].mxu1 %vm85_vm1, %v6027_v8 }
0x7918   :  { %8349 = vmatpush3.msra.mxu1 %v9714_v36  ;;  %8350 = vmatprep.mubr.msk.f32.mxu1 %vm8828_vm0, %v8827_v0 }
0x7919   :  { %8358 = vmatprep.subr.mxu1 %v8827_v0 }
0x79ea   :  { %v6098_v11 = vpop.f32.mrb[76].mxu1 }
0x79eb   :  { %v6102_v17 = vadd.f32 %v6098_v11, %v5808_v34  ;;  %v8347_v20 = vpop.f32.mrb[77].mxu1 }
0x79ec   :  { %v5823_v20 = vadd.f32 %v9704_v48, %v9736_v39  ;;  %v6619_v48 = vld [vmem:[#allocation6 + $0x38] sm:$0xff] }
0x79ed   :  { %8639 = vtanh.f32 %v6102_v17 }
0x79f7   :  { %v8640_v21 = vpop.eup %8639 }
0x79f8   :  { %6108 = vrot.lane.b32.xlu0 %v8640_v21, %s8829_s21  ;;  %v6104_v27 = vmul.f32 0.5, %v8640_v21 }
0x79fa   :  { %v6105_v15 = vadd.f32 0.5, %v6104_v27 }
0x79fc   :  { %v6106_v24 = vmul.f32 %v6105_v15, %v6018_v7 }
0x7a6a   :  { %v6109_v22 = vpop.permute.xlu0 %6108 }
0x7a6b   :  { %v6111_v2 = vmul.f32 %v6109_v22, %v6105_v15 }
0x7a6d   :  { %6113 = vrot.lane.b32.xlu1 %v6111_v2, %s8824_s10 }
0x7adf   :  { %v6114_v26 = vpop.permute.xlu1 %6113 }
0x7ae0   :  { %v6116_v59 = vadd.f32 %v6114_v26, %v6106_v24 }
0x7ae2   :  { %8641 = vtanh.f32 %v6116_v59 }
0x7ae3   :  { %8643 = vtanh.f32 %v9738_v40 }
0x7aec   :  { %v8642_v3 = vpop.eup %8641 }
0x7aed   :  { %6119 = vrot.lane.b32.xlu0 %v8642_v3, %s8824_s10  ;;  %v8644_v29 = vpop.eup %8643 }
0x7aee   :  { %v5663_v30 = vmul.f32 0.5, %v8644_v29 }
0x7af0   :  { %v5664_v37 = vadd.f32 0.5, %v5663_v30 }
0x7af1   :  { %5667 = vrot.lane.b32.xlu0 %v8644_v29, %s8829_s21 }
0x7af2   :  { %v5665_v38 = vmul.f32 %v5664_v37, %v9710_v33 }
0x7b5f   :  { %v6120_v31 = vpop.permute.xlu0 %6119 }
0x7b60   :  { %v6122_v12 = vmul.f32 %v6120_v31, %v6105_v15 }
0x7b62   :  { %6124 = vrot.lane.b32.xlu1 %v6122_v12, %s8830_s22 }
0x7b63   :  { %v5668_v5 = vpop.permute.xlu0 %5667 }
0x7b64   :  { %v5670_v45 = vmul.f32 %v5668_v5, %v5664_v37  ;;  %v6624_v5 = vld [vmem:[#allocation2] sm:$0xff] }
0x7b66   :  { %5672 = vrot.lane.b32.xlu0 %v5670_v45, %s8824_s10  ;;  %v6625_v45 = vld [vmem:[#allocation2 + $0x8] sm:$0xff] }
0x7bd4   :  { %v6125_v13 = vpop.permute.xlu1 %6124 }
0x7bd5   :  { %6127 = vst.msk [vmem:[#allocation2 + $0x10] sm:$0xff] %vm85_vm1, %v6125_v13  ;;  %8351 = vmatmul.mubr.msk.f32.vlgmr.msra.gmra.mrb[78].mxu1 %vm85_vm1, %v6125_v13 }
0x7bd6   :  { %8359 = vmatpush3.msra.mxu1 %v9714_v36  ;;  %8360 = vmatprep.mubr.msk.f32.mxu1 %vm8828_vm0, %v8827_v0 }
0x7bd7   :  { %8368 = vmatprep.subr.mxu1 %v8827_v0 }
0x7bd8   :  { %v5673_v58 = vpop.permute.xlu0 %5672 }
0x7bd9   :  { %v5675_v40 = vadd.f32 %v5673_v58, %v5665_v38 }
0x7bdb   :  { %8645 = vtanh.f32 %v5675_v40 }
0x7bdc   :  { %v6626_v13 = vld [vmem:[#allocation2 + $0x10] sm:$0xff] }
0x7be5   :  { %v8646_v28 = vpop.eup %8645 }
0x7be6   :  { %5678 = vrot.lane.b32.xlu0 %v8646_v28, %s8824_s10 }
0x7c58   :  { %v5679_v46 = vpop.permute.xlu0 %5678 }
0x7c59   :  { %v5681_v14 = vmul.f32 %v5679_v46, %v5664_v37 }
0x7c5b   :  { %5683 = vrot.lane.b32.xlu0 %v5681_v14, %s8830_s22 }
0x7ca8   :  { %v6196_v25 = vpop.f32.mrb[78].mxu1 }
0x7ca9   :  { %v6200_v47 = vadd.f32 %v6196_v25, %v5813_v53  ;;  %v8352_v9 = vpop.f32.mrb[79].mxu1 }
0x7cab   :  { %8647 = vtanh.f32 %v6200_v47 }
0x7cb5   :  { %v8648_v33 = vpop.eup %8647 }
0x7cb6   :  { %6206 = vrot.lane.b32.xlu1 %v8648_v33, %s8829_s21  ;;  %v6202_v18 = vmul.f32 0.5, %v8648_v33 }
0x7cb8   :  { %v6203_v49 = vadd.f32 0.5, %v6202_v18 }
0x7cba   :  { %v6204_v54 = vmul.f32 %v6203_v49, %v6116_v59 }
0x7ccd   :  { %v5684_v10 = vpop.permute.xlu0 %5683 }
0x7cce   :  { %5686 = vst.msk [vmem:[#allocation2 + $0x38] sm:$0xff] %vm85_vm1, %v5684_v10 }
0x7cd5   :  { %v5700_v32 = vld [vmem:[#allocation2 + $0x38] sm:$0xff] }
0x7cd6   :  { %8331 = vmatmul.mubr.msk.f32.gmra.mrb[78].mxu0 %vm85_vm1, %v5700_v32 }
0x7cd7   :  { %8355 = vmatprep.mubr.msk.f32.mxu0 %vm8828_vm0, %v8827_v0 }
0x7d28   :  { %v6207_v52 = vpop.permute.xlu1 %6206 }
0x7d29   :  { %v6209_v16 = vmul.f32 %v6207_v52, %v6203_v49 }
0x7d2b   :  { %6211 = vrot.lane.b32.xlu1 %v6209_v16, %s8824_s10 }
0x7d9d   :  { %v6212_v55 = vpop.permute.xlu1 %6211 }
0x7d9e   :  { %v6214_v4 = vadd.f32 %v6212_v55, %v6204_v54 }
0x7da0   :  { %8649 = vtanh.f32 %v6214_v4 }
0x7da9   :  { %v9789_v56 = vpop.f32.mrb[78].mxu0 }
0x7daa   :  { %v8650_v57 = vpop.eup %8649  ;;  %v9791_v41 = vpop.f32.mrb[79].mxu0 }
0x7dab   :  { %6217 = vrot.lane.b32.xlu1 %v8650_v57, %s8824_s10  ;;  %v5828_v28 = vadd.f32 %v9736_v39, %v9791_v41 }
0x7e1d   :  { %v6218_v60 = vpop.permute.xlu1 %6217 }
0x7e1e   :  { %v6220_v61 = vmul.f32 %v6218_v60, %v6203_v49  ;;  %v9845_v60 = vld [vmem:[#allocation8 + $0x38] sm:$0xff] }
0x7e20   :  { %6222 = vrot.lane.b32.xlu1 %v6220_v61, %s8830_s22 }
0x7e92   :  { %v6223_v35 = vpop.permute.xlu1 %6222 }
0x7e93   :  { %6225 = vst.msk [vmem:[#allocation2 + $0x18] sm:$0xff] %vm85_vm1, %v6223_v35  ;;  %8356 = vmatmul.mubr.msk.f32.vlgmr.msra.gmra.mrb[80].mxu0 %vm85_vm1, %v6223_v35 }
0x7e94   :  { %8364 = vmatpush3.msra.mxu0 %v9714_v36  ;;  %8365 = vmatprep.mubr.msk.f32.mxu0 %vm8828_vm0, %v8827_v0 }
0x7e95   :  { %8373 = vmatprep.subr.mxu0 %v6619_v48 }
0x7e9a   :  { %v6627_v38 = vld [vmem:[#allocation2 + $0x18] sm:$0xff] }
0x7f66   :  { %v6294_v42 = vpop.f32.mrb[80].mxu0 }
0x7f67   :  { %v6298_v62 = vadd.f32 %v6294_v42, %v5818_v6  ;;  %v8357_v63 = vpop.f32.mrb[81].mxu0 }
0x7f68   :  { %v9867_v63 = vld [vmem:[%s9984_s3 + $0x7] ss:$0 sm:$0xff] }
0x7f69   :  { %8651 = vtanh.f32 %v6298_v62  ;;  %v5833_v62 = vadd.f32 %v9789_v56, %v9736_v39 }
0x7f73   :  { %v8652_v23 = vpop.eup %8651 }
0x7f74   :  { %6304 = vrot.lane.b32.xlu0 %v8652_v23, %s8829_s21  ;;  %v6300_v1 = vmul.f32 0.5, %v8652_v23 }
0x7f76   :  { %v6301_v50 = vadd.f32 0.5, %v6300_v1 }
0x7f78   :  { %v6302_v19 = vmul.f32 %v6301_v50, %v6214_v4 }
0x7fe6   :  { %v6305_v7 = vpop.permute.xlu0 %6304 }
0x7fe7   :  { %v6307_v43 = vmul.f32 %v6305_v7, %v6301_v50 }
0x7fe9   :  { %6309 = vrot.lane.b32.xlu1 %v6307_v43, %s8824_s10 }
0x805b   :  { %v6310_v51 = vpop.permute.xlu1 %6309 }
0x805c   :  { %v6312_v8 = vadd.f32 %v6310_v51, %v6302_v19 }
0x805e   :  { %8653 = vtanh.f32 %v6312_v8 }
0x8068   :  { %v8654_v34 = vpop.eup %8653 }
0x8069   :  { %6315 = vrot.lane.b32.xlu0 %v8654_v34, %s8824_s10 }
0x80db   :  { %v6316_v44 = vpop.permute.xlu0 %6315 }
0x80dc   :  { %v6318_v11 = vmul.f32 %v6316_v44, %v6301_v50 }
0x80de   :  { %6320 = vrot.lane.b32.xlu1 %v6318_v11, %s8830_s22 }
0x8150   :  { %v6321_v17 = vpop.permute.xlu1 %6320 }
0x8151   :  { %6323 = vst.msk [vmem:[#allocation2 + $0x20] sm:$0xff] %vm85_vm1, %v6321_v17  ;;  %8361 = vmatmul.mubr.msk.f32.vlgmr.msra.gmra.mrb[80].mxu1 %vm85_vm1, %v6321_v17 }
0x8152   :  { %8369 = vmatpush3.msra.mxu1 %v9714_v36  ;;  %8370 = vmatprep.mubr.msk.f32.mxu1 %vm8828_vm0, %v8827_v0 }
0x8153   :  { %8387 = vmatprep.subr.mxu1 %v8827_v0 }
0x8158   :  { %v6628_v58 = vld [vmem:[#allocation2 + $0x20] sm:$0xff] }
0x8224   :  { %v6392_v21 = vpop.f32.mrb[80].mxu1 }
0x8225   :  { %v6396_v27 = vadd.f32 %v6392_v21, %v5823_v20  ;;  %v8362_v15 = vpop.f32.mrb[81].mxu1 }
0x8227   :  { %8655 = vtanh.f32 %v6396_v27 }
0x8231   :  { %v8656_v22 = vpop.eup %8655 }
0x8232   :  { %6402 = vrot.lane.b32.xlu0 %v8656_v22, %s8829_s21  ;;  %v6398_v2 = vmul.f32 0.5, %v8656_v22 }
0x8234   :  { %v6399_v24 = vadd.f32 0.5, %v6398_v2 }
0x8236   :  { %v6400_v36 = vmul.f32 %v6399_v24, %v6312_v8 }
0x82a4   :  { %v6403_v26 = vpop.permute.xlu0 %6402 }
0x82a5   :  { %v6405_v59 = vmul.f32 %v6403_v26, %v6399_v24 }
0x82a7   :  { %6407 = vrot.lane.b32.xlu1 %v6405_v59, %s8824_s10 }
0x8319   :  { %v6408_v3 = vpop.permute.xlu1 %6407 }
0x831a   :  { %v6410_v29 = vadd.f32 %v6408_v3, %v6400_v36 }
0x831c   :  { %8657 = vtanh.f32 %v6410_v29 }
0x8326   :  { %v8658_v30 = vpop.eup %8657 }
0x8327   :  { %6413 = vrot.lane.b32.xlu0 %v8658_v30, %s8824_s10 }
0x8399   :  { %v6414_v31 = vpop.permute.xlu0 %6413 }
0x839a   :  { %v6416_v12 = vmul.f32 %v6414_v31, %v6399_v24 }
0x839c   :  { %6418 = vrot.lane.b32.xlu1 %v6416_v12, %s8830_s22 }
0x840e   :  { %v6419_v37 = vpop.permute.xlu1 %6418 }
0x840f   :  { %6421 = vst.msk [vmem:[#allocation2 + $0x28] sm:$0xff] %vm85_vm1, %v6419_v37  ;;  %8366 = vmatmul.mubr.msk.f32.vlgmr.msra.gmra.mrb[82].mxu0 %vm85_vm1, %v6419_v37 }
0x8410   :  { %8375 = vmatprep.mubr.msk.f32.mxu0 %vm85_vm1, %v6624_v5  ;;  %8374 = vmatpush3.msra.mxu0 %v6619_v48 }
0x8411   :  { %8407 = vmatprep.subr.mxu0 %v8827_v0 }
0x8413   :  { %8376 = vmatmul.mubr.msk.f32.vlgmr.msra.gmra.mrb[84].mxu0 %vm85_vm1, %v6625_v45 }
0x8414   :  { %8378 = vmatprep.mubr.msk.f32.mxu0 %vm85_vm1, %v6626_v13  ;;  %8408 = vmatpush3.msra.mxu0 %v9845_v60 }
0x8415   :  { %8417 = vmatprep.subr.mxu0 %v8827_v0 }
0x8416   :  { %v6629_v40 = vld [vmem:[#allocation2 + $0x28] sm:$0xff] }
0x8417   :  { %8379 = vmatmul.mubr.msk.f32.gmra.mrb[86].mxu0 %vm85_vm1, %v6627_v38 }
0x8418   :  { %8381 = vmatprep.mubr.msk.f32.mxu0 %vm85_vm1, %v6628_v58 }
0x841b   :  { %8382 = vmatmul.mubr.msk.f32.gmra.mrb[88].mxu0 %vm85_vm1, %v6629_v40 }
0x84e2   :  { %v6490_v46 = vpop.f32.mrb[82].mxu0 }
0x84e3   :  { %v6494_v14 = vadd.f32 %v6490_v46, %v5828_v28  ;;  %v8367_v53 = vpop.f32.mrb[83].mxu0 }
0x84e5   :  { %8659 = vtanh.f32 %v6494_v14 }
0x84e6   :  { %v9829_v25 = vpop.f32.mrb[84].mxu0 }
0x84e7   :  { %v6728_v47 = vpop.f32.mrb[85].mxu0  ;;  %v6734_v2 = vadd.f32 %v9829_v25, %v9867_v63 }
0x84e8   :  { %v6729_v7 = vadd.f32 %v9867_v63, %v6728_v47 }
0x84ea   :  { %v9831_v9 = vpop.f32.mrb[86].mxu0 }
0x84eb   :  { %v9833_v33 = vpop.f32.mrb[87].mxu0 }
0x84ec   :  { %v6739_v58 = vadd.f32 %v9867_v63, %v9833_v33 }
0x84ee   :  { %v9835_v10 = vpop.f32.mrb[88].mxu0 }
0x84ef   :  { %v8660_v32 = vpop.eup %8659  ;;  %v9837_v18 = vpop.f32.mrb[89].mxu0 }
0x84f0   :  { %6500 = vrot.lane.b32.xlu0 %v8660_v32, %s8829_s21  ;;  %v6496_v49 = vmul.f32 0.5, %v8660_v32 }
0x84f2   :  { %v6497_v52 = vadd.f32 0.5, %v6496_v49 }
0x84f4   :  { %v6498_v55 = vmul.f32 %v6497_v52, %v6410_v29 }
0x8562   :  { %v6501_v16 = vpop.permute.xlu0 %6500 }
0x8563   :  { %v6503_v54 = vmul.f32 %v6501_v16, %v6497_v52 }
0x8565   :  { %6505 = vrot.lane.b32.xlu1 %v6503_v54, %s8824_s10 }
0x85d7   :  { %v6506_v4 = vpop.permute.xlu1 %6505 }
0x85d8   :  { %v9841_v57 = vadd.f32 %v6506_v4, %v6498_v55 }
0x85da   :  { %8661 = vtanh.f32 %v9841_v57 }
0x85e4   :  { %v8662_v41 = vpop.eup %8661 }
0x85e5   :  { %6511 = vrot.lane.b32.xlu0 %v8662_v41, %s8824_s10 }
0x8657   :  { %v6512_v61 = vpop.permute.xlu0 %6511 }
0x8658   :  { %v6514_v35 = vmul.f32 %v6512_v61, %v6497_v52 }
0x865a   :  { %6516 = vrot.lane.b32.xlu1 %v6514_v35, %s8830_s22 }
0x86cc   :  { %v6517_v6 = vpop.permute.xlu1 %6516 }
0x86cd   :  { %6519 = vst.msk [vmem:[#allocation2 + $0x30] sm:$0xff] %vm85_vm1, %v6517_v6  ;;  %8371 = vmatmul.mubr.msk.f32.vlgmr.msra.gmra.mrb[82].mxu1 %vm85_vm1, %v6517_v6 }
0x86ce   :  { %8388 = vmatpush3.msra.mxu1 %v9845_v60  ;;  %8389 = vmatprep.mubr.msk.f32.mxu1 %vm8828_vm0, %v8827_v0 }
0x86cf   :  { %8392 = vmatprep.subr.mxu1 %v8827_v0 }
0x86d1   :  { %8390 = vmatmul.mubr.f32.vlgmr.msra.gmra.mrb[84].mxu1 %v8827_v0 }
0x86d2   :  { %8393 = vmatpush3.msra.mxu1 %v9845_v60  ;;  %8394 = vmatprep.mubr.msk.f32.mxu1 %vm8828_vm0, %v8827_v0 }
0x86d3   :  { %8397 = vmatprep.subr.mxu1 %v8827_v0 }
0x86d4   :  { %v6630_v42 = vld [vmem:[#allocation2 + $0x30] sm:$0xff] }
0x86d5   :  { %8384 = vmatprep.mubr.msk.f32.mxu0 %vm85_vm1, %v6630_v42 }
0x87a0   :  { %v6588_v23 = vpop.f32.mrb[82].mxu1 }
0x87a1   :  { %v9869_v1 = vadd.f32 %v6588_v23, %v5833_v62  ;;  %v8372_v50 = vpop.f32.mrb[83].mxu1 }
0x87a4   :  { %v6833_v43 = vpop.f32.mrb[84].mxu1 }
0x87a5   :  { %v6837_v19 = vadd.f32 %v6833_v43, %v6729_v7  ;;  %v8391_v51 = vpop.f32.mrb[85].mxu1 }
0x87a7   :  { %8663 = vtanh.f32 %v6837_v19  ;;  %v6744_v19 = vadd.f32 %v9831_v9, %v9867_v63 }
0x87b1   :  { %v8664_v8 = vpop.eup %8663 }
0x87b2   :  { %6843 = vrot.lane.b32.xlu0 %v8664_v8, %s8829_s21  ;;  %v6839_v34 = vmul.f32 0.5, %v8664_v8 }
0x87b4   :  { %v6840_v39 = vadd.f32 0.5, %v6839_v34 }
0x87b6   :  { %v6841_v11 = vmul.f32 0.0, %v6840_v39 }
0x8824   :  { %v6844_v56 = vpop.permute.xlu0 %6843 }
0x8825   :  { %v6846_v44 = vmul.f32 %v6844_v56, %v6840_v39 }
0x8827   :  { %6848 = vrot.lane.b32.xlu1 %v6846_v44, %s8824_s10 }
0x8899   :  { %v6849_v17 = vpop.permute.xlu1 %6848 }
0x889a   :  { %v6851_v20 = vadd.f32 %v6849_v17, %v6841_v11 }
0x889c   :  { %8665 = vtanh.f32 %v6851_v20 }
0x88a6   :  { %v8666_v21 = vpop.eup %8665 }
0x88a7   :  { %6854 = vrot.lane.b32.xlu0 %v8666_v21, %s8824_s10 }
0x8919   :  { %v6855_v27 = vpop.permute.xlu0 %6854 }
0x891a   :  { %v6857_v15 = vmul.f32 %v6855_v27, %v6840_v39 }
0x891c   :  { %6859 = vrot.lane.b32.xlu1 %v6857_v15, %s8830_s22 }
0x898e   :  { %v6860_v22 = vpop.permute.xlu1 %6859 }
0x898f   :  { %6862 = vst.msk [vmem:[#allocation2] sm:$0xff] %vm85_vm1, %v6860_v22  ;;  %8395 = vmatmul.mubr.msk.f32.vlgmr.msra.gmra.mrb[86].mxu1 %vm85_vm1, %v6860_v22 }
0x8990   :  { %8398 = vmatpush3.msra.mxu1 %v9845_v60  ;;  %8399 = vmatprep.mubr.msk.f32.mxu1 %vm8828_vm0, %v8827_v0 }
0x8991   :  { %8402 = vmatprep.subr.mxu1 %v8827_v0 }
0x8a62   :  { %v6931_v24 = vpop.f32.mrb[86].mxu1 }
0x8a63   :  { %v6935_v26 = vadd.f32 %v6931_v24, %v6734_v2  ;;  %v8396_v59 = vpop.f32.mrb[87].mxu1 }
0x8a65   :  { %8667 = vtanh.f32 %v6935_v26 }
0x8a6f   :  { %v8668_v36 = vpop.eup %8667 }
0x8a70   :  { %6941 = vrot.lane.b32.xlu0 %v8668_v36, %s8829_s21  ;;  %v6937_v3 = vmul.f32 0.5, %v8668_v36  ;;  %v6749_v36 = vadd.f32 %v9867_v63, %v9837_v18 }
0x8a72   :  { %v6938_v29 = vadd.f32 0.5, %v6937_v3 }
0x8a74   :  { %v6939_v31 = vmul.f32 %v6938_v29, %v6851_v20 }
0x8ae2   :  { %v6942_v30 = vpop.permute.xlu0 %6941 }
0x8ae3   :  { %v6944_v48 = vmul.f32 %v6942_v30, %v6938_v29 }
0x8ae5   :  { %6946 = vrot.lane.b32.xlu1 %v6944_v48, %s8824_s10 }
0x8b57   :  { %v6947_v12 = vpop.permute.xlu1 %6946 }
0x8b58   :  { %v6949_v37 = vadd.f32 %v6947_v12, %v6939_v31 }
0x8b5a   :  { %8669 = vtanh.f32 %v6949_v37 }
0x8b64   :  { %v8670_v5 = vpop.eup %8669 }
0x8b65   :  { %6952 = vrot.lane.b32.xlu0 %v8670_v5, %s8824_s10 }
0x8bd7   :  { %v6953_v45 = vpop.permute.xlu0 %6952 }
0x8bd8   :  { %v6955_v13 = vmul.f32 %v6953_v45, %v6938_v29 }
0x8bda   :  { %6957 = vrot.lane.b32.xlu1 %v6955_v13, %s8830_s22 }
0x8c4c   :  { %v6958_v38 = vpop.permute.xlu1 %6957 }
0x8c4d   :  { %6960 = vst.msk [vmem:[#allocation2 + $0x8] sm:$0xff] %vm85_vm1, %v6958_v38  ;;  %8400 = vmatmul.mubr.msk.f32.vlgmr.msra.gmra.mrb[88].mxu1 %vm85_vm1, %v6958_v38 }
0x8c4e   :  { %8403 = vmatpush3.msra.mxu1 %v9845_v60  ;;  %8404 = vmatprep.mubr.msk.f32.mxu1 %vm8828_vm0, %v8827_v0 }
0x8c4f   :  { %8412 = vmatprep.subr.mxu1 %v8827_v0 }
0x8d20   :  { %v7029_v40 = vpop.f32.mrb[88].mxu1 }
0x8d21   :  { %v7033_v28 = vadd.f32 %v7029_v40, %v6739_v58  ;;  %v8401_v46 = vpop.f32.mrb[89].mxu1 }
0x8d22   :  { %v6754_v46 = vadd.f32 %v9835_v10, %v9867_v63 }
0x8d23   :  { %8671 = vtanh.f32 %v7033_v28 }
0x8d2d   :  { %v8672_v14 = vpop.eup %8671 }
0x8d2e   :  { %7039 = vrot.lane.b32.xlu0 %v8672_v14, %s8829_s21  ;;  %v7035_v53 = vmul.f32 0.5, %v8672_v14 }
0x8d30   :  { %v7036_v25 = vadd.f32 0.5, %v7035_v53 }
0x8d32   :  { %v7037_v49 = vmul.f32 %v7036_v25, %v6949_v37 }
0x8da0   :  { %v7040_v47 = vpop.permute.xlu0 %7039 }
0x8da1   :  { %v7042_v32 = vmul.f32 %v7040_v47, %v7036_v25 }
0x8da3   :  { %7044 = vrot.lane.b32.xlu1 %v7042_v32, %s8824_s10 }
0x8e15   :  { %v7045_v52 = vpop.permute.xlu1 %7044 }
0x8e16   :  { %v7047_v16 = vadd.f32 %v7045_v52, %v7037_v49 }
0x8e18   :  { %8673 = vtanh.f32 %v7047_v16 }
0x8e19   :  { %8675 = vtanh.f32 %v9869_v1 }
0x8e22   :  { %v8674_v33 = vpop.eup %8673 }
0x8e23   :  { %7050 = vrot.lane.b32.xlu0 %v8674_v33, %s8824_s10  ;;  %v8676_v54 = vpop.eup %8675 }
0x8e24   :  { %v6594_v55 = vmul.f32 0.5, %v8676_v54 }
0x8e26   :  { %v6595_v61 = vadd.f32 0.5, %v6594_v55 }
0x8e27   :  { %6598 = vrot.lane.b32.xlu0 %v8676_v54, %s8829_s21 }
0x8e28   :  { %v6596_v62 = vmul.f32 %v6595_v61, %v9841_v57 }
0x8e95   :  { %v7051_v4 = vpop.permute.xlu0 %7050 }
0x8e96   :  { %v7053_v41 = vmul.f32 %v7051_v4, %v7036_v25 }
0x8e98   :  { %7055 = vrot.lane.b32.xlu1 %v7053_v41, %s8830_s22 }
0x8e99   :  { %v6599_v35 = vpop.permute.xlu0 %6598 }
0x8e9a   :  { %v6601_v6 = vmul.f32 %v6599_v35, %v6595_v61 }
0x8e9c   :  { %6603 = vrot.lane.b32.xlu0 %v6601_v6, %s8824_s10 }
0x8f0a   :  { %v7056_v42 = vpop.permute.xlu1 %7055 }
0x8f0b   :  { %7058 = vst.msk [vmem:[#allocation2 + $0x10] sm:$0xff] %vm85_vm1, %v7056_v42  ;;  %8405 = vmatmul.mubr.msk.f32.vlgmr.msra.gmra.mrb[90].mxu1 %vm85_vm1, %v7056_v42 }
0x8f0c   :  { %8413 = vmatpush3.msra.mxu1 %v9845_v60  ;;  %8414 = vmatprep.mubr.msk.f32.mxu1 %vm8828_vm0, %v8827_v0 }
0x8f0d   :  { %8422 = vmatprep.subr.mxu1 %v8827_v0 }
0x8f0e   :  { %v6604_v23 = vpop.permute.xlu0 %6603 }
0x8f0f   :  { %v6606_v1 = vadd.f32 %v6604_v23, %v6596_v62 }
0x8f11   :  { %8677 = vtanh.f32 %v6606_v1 }
0x8f1b   :  { %v8678_v50 = vpop.eup %8677 }
0x8f1c   :  { %6609 = vrot.lane.b32.xlu0 %v8678_v50, %s8824_s10 }
0x8f8e   :  { %v6610_v7 = vpop.permute.xlu0 %6609 }
0x8f8f   :  { %v6612_v43 = vmul.f32 %v6610_v7, %v6595_v61 }
0x8f91   :  { %6614 = vrot.lane.b32.xlu0 %v6612_v43, %s8830_s22 }
0x8fde   :  { %v7127_v51 = vpop.f32.mrb[90].mxu1 }
0x8fdf   :  { %v7131_v8 = vadd.f32 %v7127_v51, %v6744_v19  ;;  %v8406_v34 = vpop.f32.mrb[91].mxu1 }
0x8fe1   :  { %8679 = vtanh.f32 %v7131_v8 }
0x8feb   :  { %v8680_v57 = vpop.eup %8679 }
0x8fec   :  { %7137 = vrot.lane.b32.xlu1 %v8680_v57, %s8829_s21  ;;  %v7133_v44 = vmul.f32 0.5, %v8680_v57 }
0x8fee   :  { %v7134_v11 = vadd.f32 0.5, %v7133_v44 }
0x8ff0   :  { %v7135_v20 = vmul.f32 %v7134_v11, %v7047_v16 }
0x9003   :  { %v6615_v39 = vpop.permute.xlu0 %6614 }
0x9004   :  { %6617 = vst.msk [vmem:[#allocation2 + $0x38] sm:$0xff] %vm85_vm1, %v6615_v39 }
0x900b   :  { %v6631_v56 = vld [vmem:[#allocation2 + $0x38] sm:$0xff] }
0x900c   :  { %8385 = vmatmul.mubr.msk.f32.gmra.mrb[90].mxu0 %vm85_vm1, %v6631_v56 }
0x900d   :  { %8409 = vmatprep.mubr.msk.f32.mxu0 %vm8828_vm0, %v8827_v0 }
0x905e   :  { %v7138_v17 = vpop.permute.xlu1 %7137 }
0x905f   :  { %v7140_v9 = vmul.f32 %v7138_v17, %v7134_v11 }
0x9061   :  { %7142 = vrot.lane.b32.xlu1 %v7140_v9, %s8824_s10 }
0x90d3   :  { %v7143_v21 = vpop.permute.xlu1 %7142 }
0x90d4   :  { %v7145_v27 = vadd.f32 %v7143_v21, %v7135_v20 }
0x90d6   :  { %8681 = vtanh.f32 %v7145_v27 }
0x90df   :  { %v9920_v15 = vpop.f32.mrb[90].mxu0 }
0x90e0   :  { %v8682_v22 = vpop.eup %8681  ;;  %v6758_v2 = vpop.f32.mrb[91].mxu0  ;;  %v6764_v39 = vadd.f32 %v9920_v15, %v9867_v63 }
0x90e1   :  { %7148 = vrot.lane.b32.xlu1 %v8682_v22, %s8824_s10  ;;  %v6759_v61 = vadd.f32 %v9867_v63, %v6758_v2 }
0x9153   :  { %v7149_v24 = vpop.permute.xlu1 %7148 }
0x9154   :  { %v7151_v26 = vmul.f32 %v7149_v24, %v7134_v11 }
0x9156   :  { %7153 = vrot.lane.b32.xlu1 %v7151_v26, %s8830_s22  ;;  %v7549_v26 = vld [vmem:[#allocation9] sm:$0xff] }
0x91c8   :  { %v7154_v59 = vpop.permute.xlu1 %7153 }
0x91c9   :  { %7156 = vst.msk [vmem:[#allocation2 + $0x18] sm:$0xff] %vm85_vm1, %v7154_v59  ;;  %8410 = vmatmul.mubr.msk.f32.vlgmr.msra.gmra.mrb[92].mxu0 %vm85_vm1, %v7154_v59 }
0x91ca   :  { %8418 = vmatpush3.msra.mxu0 %v9845_v60  ;;  %8419 = vmatprep.mubr.msk.f32.mxu0 %vm8828_vm0, %v8827_v0 }
0x91cb   :  { %8427 = vmatprep.subr.mxu0 %v8827_v0 }
0x929c   :  { %v7225_v3 = vpop.f32.mrb[92].mxu0 }
0x929d   :  { %v7229_v29 = vadd.f32 %v7225_v3, %v6749_v36  ;;  %v8411_v30 = vpop.f32.mrb[93].mxu0  ;;  %v7791_v3 = vld [vmem:[%s9986_s5] ss:$0 sm:$0xff] }
0x929f   :  { %8683 = vtanh.f32 %v7229_v29 }
0x92a9   :  { %v8684_v48 = vpop.eup %8683 }
0x92aa   :  { %7235 = vrot.lane.b32.xlu0 %v8684_v48, %s8829_s21  ;;  %v7231_v31 = vmul.f32 0.5, %v8684_v48 }
0x92ac   :  { %v7232_v12 = vadd.f32 0.5, %v7231_v31 }
0x92ae   :  { %v7233_v45 = vmul.f32 %v7232_v12, %v7145_v27 }
0x931c   :  { %v7236_v37 = vpop.permute.xlu0 %7235 }
0x931d   :  { %v7238_v5 = vmul.f32 %v7236_v37, %v7232_v12 }
0x931f   :  { %7240 = vrot.lane.b32.xlu1 %v7238_v5, %s8824_s10 }
0x9391   :  { %v7241_v13 = vpop.permute.xlu1 %7240 }
0x9392   :  { %v7243_v38 = vadd.f32 %v7241_v13, %v7233_v45 }
0x9394   :  { %8685 = vtanh.f32 %v7243_v38 }
0x939e   :  { %v8686_v58 = vpop.eup %8685 }
0x939f   :  { %7246 = vrot.lane.b32.xlu0 %v8686_v58, %s8824_s10 }
0x9411   :  { %v7247_v18 = vpop.permute.xlu0 %7246 }
0x9412   :  { %v7249_v40 = vmul.f32 %v7247_v18, %v7232_v12 }
0x9414   :  { %7251 = vrot.lane.b32.xlu1 %v7249_v40, %s8830_s22 }
0x9486   :  { %v7252_v28 = vpop.permute.xlu1 %7251 }
0x9487   :  { %7254 = vst.msk [vmem:[#allocation2 + $0x20] sm:$0xff] %vm85_vm1, %v7252_v28  ;;  %8415 = vmatmul.mubr.msk.f32.vlgmr.msra.gmra.mrb[92].mxu1 %vm85_vm1, %v7252_v28 }
0x9488   :  { %8423 = vmatpush3.msra.mxu1 %v9845_v60  ;;  %8424 = vmatprep.mubr.msk.f32.mxu1 %vm8828_vm0, %v8827_v0 }
0x955a   :  { %v7323_v14 = vpop.f32.mrb[92].mxu1 }
0x955b   :  { %v7327_v53 = vadd.f32 %v7323_v14, %v6754_v46  ;;  %v8416_v25 = vpop.f32.mrb[93].mxu1 }
0x955d   :  { %8687 = vtanh.f32 %v7327_v53 }
0x9567   :  { %v8688_v47 = vpop.eup %8687 }
0x9568   :  { %7333 = vrot.lane.b32.xlu0 %v8688_v47, %s8829_s21  ;;  %v7329_v32 = vmul.f32 0.5, %v8688_v47 }
0x956a   :  { %v7330_v49 = vadd.f32 0.5, %v7329_v32 }
0x956c   :  { %v7331_v60 = vmul.f32 %v7330_v49, %v7243_v38 }
0x95da   :  { %v7334_v52 = vpop.permute.xlu0 %7333 }
0x95db   :  { %v7336_v16 = vmul.f32 %v7334_v52, %v7330_v49 }
0x95dd   :  { %7338 = vrot.lane.b32.xlu1 %v7336_v16, %s8824_s10 }
0x964f   :  { %v7339_v33 = vpop.permute.xlu1 %7338 }
0x9650   :  { %v7341_v54 = vadd.f32 %v7339_v33, %v7331_v60 }
0x9652   :  { %8689 = vtanh.f32 %v7341_v54 }
0x965c   :  { %v8690_v55 = vpop.eup %8689 }
0x965d   :  { %7344 = vrot.lane.b32.xlu0 %v8690_v55, %s8824_s10 }
0x96cf   :  { %v7345_v10 = vpop.permute.xlu0 %7344 }
0x96d0   :  { %v7347_v4 = vmul.f32 %v7345_v10, %v7330_v49 }
0x96d2   :  { %7349 = vrot.lane.b32.xlu1 %v7347_v4, %s8830_s22 }
0x9744   :  { %v7350_v41 = vpop.permute.xlu1 %7349 }
0x9745   :  { %7352 = vst.msk [vmem:[#allocation2 + $0x28] sm:$0xff] %vm85_vm1, %v7350_v41  ;;  %8420 = vmatmul.mubr.msk.f32.vlgmr.msra.gmra.mrb[94].mxu0 %vm85_vm1, %v7350_v41 }
0x9746   :  { %8429 = vmatprep.mubr.msk.f32.mxu0 %vm8828_vm0, %v8827_v0  ;;  %8428 = vmatpush3.msra.mxu0 %v7549_v26 }
0x9818   :  { %v7421_v35 = vpop.f32.mrb[94].mxu0 }
0x9819   :  { %v7425_v6 = vadd.f32 %v7421_v35, %v6759_v61  ;;  %v8421_v42 = vpop.f32.mrb[95].mxu0 }
0x981b   :  { %8691 = vtanh.f32 %v7425_v6 }
0x9825   :  { %v8692_v62 = vpop.eup %8691 }
0x9826   :  { %7431 = vrot.lane.b32.xlu0 %v8692_v62, %s8829_s21  ;;  %v7427_v23 = vmul.f32 0.5, %v8692_v62 }
0x9828   :  { %v7428_v1 = vadd.f32 0.5, %v7427_v23 }
0x982a   :  { %v7429_v43 = vmul.f32 %v7428_v1, %v7341_v54 }
0x9898   :  { %v7432_v50 = vpop.permute.xlu0 %7431 }
0x9899   :  { %v7434_v7 = vmul.f32 %v7432_v50, %v7428_v1 }
0x989b   :  { %7436 = vrot.lane.b32.xlu1 %v7434_v7, %s8824_s10 }
0x990d   :  { %v7437_v19 = vpop.permute.xlu1 %7436 }
0x990e   :  { %v7439_v51 = vadd.f32 %v7437_v19, %v7429_v43 }
0x9910   :  { %8693 = vtanh.f32 %v7439_v51 }
0x991a   :  { %v8694_v0 = vpop.eup %8693 }
0x991b   :  { %7442 = vrot.lane.b32.xlu0 %v8694_v0, %s8824_s10 }
0x998d   :  { %v7443_v8 = vpop.permute.xlu0 %7442 }
0x998e   :  { %v7445_v34 = vmul.f32 %v7443_v8, %v7428_v1 }
0x9990   :  { %7447 = vrot.lane.b32.xlu1 %v7445_v34, %s8830_s22 }
0x9a02   :  { %v7448_v57 = vpop.permute.xlu1 %7447 }
0x9a03   :  { %7450 = vst.msk [vmem:[#allocation2 + $0x30] sm:$0xff] %vm85_vm1, %v7448_v57  ;;  %8425 = vmatmul.mubr.msk.f32.vlgmr.msra.gmra.mrb[94].mxu1 %vm85_vm1, %v7448_v57 }
0x9ad6   :  { %v7519_v56 = vpop.f32.mrb[94].mxu1 }
0x9ad7   :  { %v7523_v44 = vadd.f32 %v7519_v56, %v6764_v39  ;;  %v8426_v11 = vpop.f32.mrb[95].mxu1 }
0x9ad9   :  { %8695 = vtanh.f32 %v7523_v44 }
0x9ae3   :  { %v8696_v17 = vpop.eup %8695 }
0x9ae4   :  { %7529 = vrot.lane.b32.xlu0 %v8696_v17, %s8829_s21  ;;  %v7525_v9 = vmul.f32 0.5, %v8696_v17 }
0x9ae6   :  { %v7526_v20 = vadd.f32 0.5, %v7525_v9 }
0x9ae8   :  { %v7527_v22 = vmul.f32 %v7526_v20, %v7439_v51 }
0x9b56   :  { %v7530_v21 = vpop.permute.xlu0 %7529 }
0x9b57   :  { %v7532_v27 = vmul.f32 %v7530_v21, %v7526_v20 }
0x9b59   :  { %7534 = vrot.lane.b32.xlu1 %v7532_v27, %s8824_s10 }
0x9bcb   :  { %v7535_v2 = vpop.permute.xlu1 %7534 }
0x9bcc   :  { %v7537_v24 = vadd.f32 %v7535_v2, %v7527_v22 }
0x9bce   :  { %8697 = vtanh.f32 %v7537_v24 }
0x9bd8   :  { %v8698_v63 = vpop.eup %8697 }
0x9bd9   :  { %7540 = vrot.lane.b32.xlu0 %v8698_v63, %s8824_s10  ;;  %s8831_s10 = smov [#allocation11]  }
0x9bda   :  { %s7645_s15 = sshll.u32 %s8831_s10, 4  ;;  %s7646_s15 = int_to_ptr.vmem [resolvable:$true] %s7645_s15 }
0x9bdb   :  { %s8791_s16 = scalar_lea.vmem %s7646_s15, 128  ;;  %p8796_p5 = scmp.lt.s32.totalorder %s7646_s15, %s7646_s15 }
0x9bdc   :  { %p8792_p4 = scmp.ne.s32.totalorder %s7646_s15, %s8791_s16  ;;  %p8797_p6 = scmp.lt.s32.totalorder %s8791_s16, %s8791_s16 }
0x9bde   :  { %p8798_p7 = por %p8797_p6, %p8796_p5 }
0x9be0   :  { %p8799_p8 = pnand %p8798_p7, %p8792_p4 }
0x9c4b   :  { %v7541_v15 = vpop.permute.xlu0 %7540 }
0x9c4c   :  { %v7543_v59 = vmul.f32 %v7541_v15, %v7526_v20 }
0x9c4e   :  { %7545 = vrot.lane.b32.xlu1 %v7543_v59, %s8830_s22 }
0x9cc0   :  { %v7546_v36 = vpop.permute.xlu1 %7545 }
0x9cc1   :  { %7548 = vst.msk [vmem:[#allocation2 + $0x38] sm:$0xff] %vm85_vm1, %v7546_v36  ;;  %8430 = vmatmul.mubr.msk.f32.vlgmr.msra.gmra.mrb[96].mxu0 %vm85_vm1, %v7546_v36 }
0x9d94   :  { %v7625_v29 = vpop.f32.mrb[96].mxu0 }
0x9d95   :  { %v7626_v30 = vadd.f32 %v7791_v3, %v7625_v29  ;;  %v8431_v48 = vpop.f32.mrb[97].mxu0 }
0x9d97   :  { %7629 = vmax.xlane.f32.xlu0 %v7626_v30 }
0x9e24   :  { %v7630_v31 = vpop.xlane.xlu0 %7629 }
0x9e25   :  { %v7631_v12 = vsub.f32 %v7626_v30, %v7630_v31 }
0x9e27   :  { %v7632_v37 = vmul.f32 1.442695, %v7631_v12 }
0x9e29   :  { %8699 = vpow2.f32 %v7632_v37 }
0x9e33   :  { %v8700_v5 = vpop.eup %8699 }
0x9e34   :  { %7634 = vadd.xlane.f32.xlu1 %v8700_v5 }
0x9ec1   :  { %v7635_v45 = vpop.xlane.xlu1 %7634 }
0x9ec2   :  { %8701 = vrcp.f32 %v7635_v45 }
0x9ecc   :  { %v8702_v13 = vpop.eup %8701 }
0x9ecd   :  { %v7637_v38 = vmul.f32 %v8702_v13, %v8700_v5 }
0x9ecf   :  { %7638 = vst [vmem:[#allocation11] sm:$0xff] %v7637_v38 }
0x9ed0   :  { %8802 = shalt.err (!%p8799_p8)
}
0x9ed1   :  { %s8803_s18 = scalar_lea.hbm %s9987_s6, 128 }
0x9ed2   :  { %p8804_p9 = scmp.ne.s32.totalorder %s9987_s6, %s8803_s18  ;;  %p8807_p10 = scmp.lt.u32.totalorder %s8803_s18, %s9987_s6 }
0x9ed4   :  { %p8809_p11 = pnand %p8807_p10, %p8804_p9 }
0x9ed6   :  { %8812 = shalt.err (!%p8809_p11)
}
0x9ed7   :  { %7648 = dma.vmem_to_hbm [thread:$0]  %s7646_s15, 128, %s9987_s6, [#allocation5]  }
0x9ed8   :  { %8819 = dma.done.wait [#allocation5], 128  }
0x9ed9   :  { %8820 = vsyncadd [#allocation5], 4294967168 }
0x9eda   :  { %7652 = vsyncpa [#allocation4], 1 }
0x9edb   :  { %7653 = vsyncpa [#allocation7], 1 }
0x9edc   :  { %7654 = vsyncpa [#allocation10], 1 }
0x9edd   :  { %7655 = vsyncpa [#allocation5], 1 }

</bundles_post_ra>
